<compile_context>
chip_gen: v7x
topology: tpu7x:2x2x1
jax: 0.10.0
libtpu: 0.0.40
codegen_flags: <defaults>
</compile_context>

<pallas_src>
import functools

import jax
import jax.numpy as jnp
from jax import lax
from jax.experimental import pallas as pl
from jax.experimental.pallas import tpu as pltpu


# ---------------------------------------------------------------------------- #
# Pallas kernels
# ---------------------------------------------------------------------------- #
def _phase_gemm_bn_relu_kernel(w_ref, p_ref, g_ref, b_ref, o_ref, *,
                               n_phase, shared_patch, eps, inv_count):
    """Fused per-phase GEMM + BatchNorm(batch stats) + ReLU.

    w_ref: (P, Cout, K)   bf16   sub-filter matrices
    p_ref: (Pp, K, M)     bf16   per-phase patch matrices (Pp == 1 if shared)
    g_ref, b_ref: (Cout,1) f32   BN gamma / beta
    o_ref: (P, Cout, M)   f32    normalized + ReLU'd output (lane-dense in M)
    """
    accs = []
    for ph in range(n_phase):
        rhs = p_ref[0] if shared_patch else p_ref[ph]
        accs.append(jnp.dot(w_ref[ph], rhs, preferred_element_type=jnp.float32))

    # Per-channel batch statistics over all phases & positions (XLU lane reduce).
    s = accs[0].sum(axis=-1, keepdims=True)
    for a in accs[1:]:
        s = s + a.sum(axis=-1, keepdims=True)
    mean = s * inv_count
    ssq = None
    for a in accs:
        d = a - mean
        part = (d * d).sum(axis=-1, keepdims=True)
        ssq = part if ssq is None else ssq + part
    var = ssq * inv_count                       # biased variance (PyTorch train mode)
    inv = lax.rsqrt(var + eps)
    scale = inv * g_ref[...]
    shift = b_ref[...] - mean * scale
    for ph, a in enumerate(accs):
        o_ref[ph] = jnp.maximum(a * scale + shift, 0.0)


def _phase_gemm_tanh_kernel(w_ref, p_ref, o_ref, *, n_phase):
    """Per-phase GEMM with fused tanh (final layer, no BN)."""
    for ph in range(n_phase):
        acc = jnp.dot(w_ref[ph], p_ref[ph], preferred_element_type=jnp.float32)
        o_ref[ph] = jnp.tanh(acc)


# ---------------------------------------------------------------------------- #
# pallas_call wrappers
# ---------------------------------------------------------------------------- #
def phase_gemm_bn_relu(Wt, Pt, gamma, beta, *, shared_patch, eps=1e-5):
    """Wt: (P, Cout, K) bf16; Pt: (Pp, K, M) bf16 -> (P, Cout, M) f32."""
    P, Cout, K = Wt.shape
    Pp, K2, M = Pt.shape
    assert K2 == K and (Pp == P or (shared_patch and Pp == 1))
    g = gamma.reshape(Cout, 1).astype(jnp.float32)
    b = beta.reshape(Cout, 1).astype(jnp.float32)
    kernel = functools.partial(
        _phase_gemm_bn_relu_kernel, n_phase=P, shared_patch=shared_patch,
        eps=eps, inv_count=1.0 / float(P * M))
    return pl.pallas_call(
        kernel,
        out_shape=jax.ShapeDtypeStruct((P, Cout, M), jnp.float32),
        in_specs=[
            pl.BlockSpec((P, Cout, K), lambda: (0, 0, 0)),
            pl.BlockSpec((Pp, K, M), lambda: (0, 0, 0)),
            pl.BlockSpec((Cout, 1), lambda: (0, 0)),
            pl.BlockSpec((Cout, 1), lambda: (0, 0)),
        ],
        out_specs=pl.BlockSpec((P, Cout, M), lambda: (0, 0, 0)),
    )(Wt, Pt, g, b)


def phase_gemm_tanh(Wt, Pt):
    """Wt: (P, Cout, K) bf16; Pt: (P, K, M) bf16 -> (P, Cout, M) f32, tanh fused."""
    P, Cout, K = Wt.shape
    _, K2, M = Pt.shape
    assert K2 == K
    tm = 1024 if (M % 1024 == 0 and M > 1024) else M     # >=2 lane-dense tiles when possible
    return pl.pallas_call(
        functools.partial(_phase_gemm_tanh_kernel, n_phase=P),
        out_shape=jax.ShapeDtypeStruct((P, Cout, M), jnp.float32),
        grid=(M // tm,),
        in_specs=[
            pl.BlockSpec((P, Cout, K), lambda i: (0, 0, 0)),
            pl.BlockSpec((P, K, tm), lambda i: (0, 0, i)),
        ],
        out_specs=pl.BlockSpec((P, Cout, tm), lambda i: (0, 0, i)),
        compiler_params=pltpu.CompilerParams(dimension_semantics=("parallel",)),
    )(Wt, Pt)


# ---------------------------------------------------------------------------- #
# ConvTranspose2d layers via phase decomposition
# ---------------------------------------------------------------------------- #
# For output parity p: list of (kernel tap index, offset into the 1-padded input).
_TAPS = {0: ((1, 1), (3, 0)),
         1: ((0, 2), (2, 1))}


def conv_transpose_4x4_s2_p1(x, w, gamma=None, beta=None, *, activation, eps=1e-5):
    """nn.ConvTranspose2d(Cin, Cout, 4, stride=2, padding=1, bias=False) + fused epilogue.

    x: (N, Cin, H, W) -> (N, Cout, 2H, 2W);  w: (Cin, Cout, 4, 4) (PyTorch layout).
    """
    N, Cin, H, W = x.shape
    Cin2, Cout, k, k2 = w.shape
    assert Cin2 == Cin and k == 4 and k2 == 4
    M = N * H * W
    xp = jnp.pad(x, ((0, 0), (0, 0), (1, 1), (1, 1)))

    p_list, w_list = [], []
    for ph in (0, 1):
        for pw in (0, 1):
            kh_list = [t[0] for t in _TAPS[ph]]
            ro_list = [t[1] for t in _TAPS[ph]]
            kw_list = [t[0] for t in _TAPS[pw]]
            co_list = [t[1] for t in _TAPS[pw]]
            # 4 taps of the (un-dilated) padded input -> (4, Cin, N*H*W) patch matrix
            taps = [xp[:, :, ro:ro + H, co:co + W]
                    for ro in ro_list for co in co_list]        # 4 x (N, Cin, H, W)
            t = jnp.stack(taps, axis=0)                         # (4, N, Cin, H, W)
            t = jnp.transpose(t, (0, 2, 1, 3, 4)).reshape(4 * Cin, M)
            p_list.append(t)
            # matching 2x2 sub-filter, flattened in (tap, cin) order
            ws = w[:, :, kh_list, :][:, :, :, kw_list]          # (Cin, Cout, 2, 2)
            ws = jnp.transpose(ws, (1, 2, 3, 0)).reshape(Cout, 4 * Cin)
            w_list.append(ws)

    Pt = jnp.stack(p_list, axis=0).astype(jnp.bfloat16)         # (4, 4*Cin, M)
    Wt = jnp.stack(w_list, axis=0).astype(jnp.bfloat16)         # (4, Cout, 4*Cin)

    if activation == "bn_relu":
        R = phase_gemm_bn_relu(Wt, Pt, gamma, beta, shared_patch=False, eps=eps)
    elif activation == "tanh":
        R = phase_gemm_tanh(Wt, Pt)
    else:
        raise ValueError(activation)

    # Interleave the 4 phase sub-grids back into NCHW.
    R = R.reshape(2, 2, Cout, N, H, W)                          # (ph, pw, c, n, i, j)
    return jnp.transpose(R, (3, 2, 4, 0, 5, 1)).reshape(N, Cout, 2 * H, 2 * W)


def conv_transpose_4x4_s1_p0_from1x1(z, w, gamma, beta, *, eps=1e-5):
    """nn.ConvTranspose2d(nz, Cout, 4, stride=1, padding=0) on a 1x1 input + BN + ReLU.

    Each of the 16 kernel taps is a 'phase' sharing the single (Cin, N) patch matrix.
    """
    N, Cin = z.shape[0], z.shape[1]
    Cin2, Cout, k, _ = w.shape
    assert Cin2 == Cin and k == 4
    Pt = z.reshape(N, Cin).T[None].astype(jnp.bfloat16)         # (1, Cin, N), shared
    Wt = jnp.transpose(w, (2, 3, 1, 0)).reshape(k * k, Cout, Cin).astype(jnp.bfloat16)
    R = phase_gemm_bn_relu(Wt, Pt, gamma, beta, shared_patch=True, eps=eps)  # (16,Cout,N)
    return jnp.transpose(R.reshape(k, k, Cout, N), (3, 2, 0, 1))  # (N, Cout, 4, 4)


# ---------------------------------------------------------------------------- #
# Generator (64x64): parameters + forward
# ---------------------------------------------------------------------------- #
def init_generator_params(key, nz, ngf, nc):
    """Synthetic init (normal * 0.02 conv weights; BN gamma=1, beta=0)."""
    specs = [
        (nz,       ngf * 8),
        (ngf * 8,  ngf * 4),
        (ngf * 4,  ngf * 2),
        (ngf * 2,  ngf),
        (ngf,      nc),
    ]
    params = []
    keys = jax.random.split(key, len(specs))
    for (cin, cout), k in zip(specs, keys):
        w = 0.02 * jax.random.normal(k, (cin, cout, 4, 4), dtype=jnp.float32)
        params.append({"w": w,
                       "gamma": jnp.ones((cout,), jnp.float32),
                       "beta": jnp.zeros((cout,), jnp.float32)})
    return params


def generator_forward(params, z):
    """z: (N, nz, 1, 1) -> (N, nc, 64, 64), matching the PyTorch 64x64 generator."""
    p = params
    x = z.astype(jnp.float32)
    # layer 1: ConvT(nz, ngf*8, 4, 1, 0) + BN + ReLU        -> 4x4
    x = conv_transpose_4x4_s1_p0_from1x1(x, p[0]["w"], p[0]["gamma"], p[0]["beta"])
    # layer 2: ConvT(ngf*8, ngf*4, 4, 2, 1) + BN + ReLU     -> 8x8
    x = conv_transpose_4x4_s2_p1(x, p[1]["w"], p[1]["gamma"], p[1]["beta"],
                                 activation="bn_relu")
    # layer 3: ConvT(ngf*4, ngf*2, 4, 2, 1) + BN + ReLU     -> 16x16
    x = conv_transpose_4x4_s2_p1(x, p[2]["w"], p[2]["gamma"], p[2]["beta"],
                                 activation="bn_relu")
    # layer 4: ConvT(ngf*2, ngf, 4, 2, 1) + BN + ReLU       -> 32x32
    x = conv_transpose_4x4_s2_p1(x, p[3]["w"], p[3]["gamma"], p[3]["beta"],
                                 activation="bn_relu")
    # layer 5: ConvT(ngf, nc, 4, 2, 1) + Tanh (fused)       -> 64x64
    x = conv_transpose_4x4_s2_p1(x, p[4]["w"], activation="tanh")
    return x


if __name__ == "__main__":
    # small shapes consistent with the module: batch=2, nz=32, ngf=8, nc=3, image_size=64
    nz, ngf, nc, batch = 32, 8, 3, 2

    key = jax.random.PRNGKey(0)
    k_params, k_z = jax.random.split(key)
    params = init_generator_params(k_params, nz, ngf, nc)
    z = jax.random.normal(k_z, (batch, nz, 1, 1), dtype=jnp.float32)

    out = jax.jit(generator_forward)(params, z)
    out = jax.block_until_ready(out)

    assert out.shape == (batch, nc, 64, 64), out.shape
    assert bool(jnp.all(jnp.isfinite(out)))
    assert bool(jnp.all(jnp.abs(out) <= 1.0 + 1e-6))   # tanh range
    print("KERNEL_OK")
</pallas_src>

<mosaic_0001>
module attributes {stable_mosaic.version = 11 : i64} {
  func.func @_phase_gemm_bn_relu_kernel(%arg0: memref<16x64x32xbf16, #tpu.memory_space<vmem>>, %arg1: memref<1x32x2xbf16, #tpu.memory_space<vmem>>, %arg2: memref<64x1xf32, #tpu.memory_space<vmem>>, %arg3: memref<64x1xf32, #tpu.memory_space<vmem>>, %arg4: memref<16x64x2xf32, #tpu.memory_space<vmem>>) attributes {dimension_semantics = [], scalar_prefetch = 0 : i64, scratch_operands = 0 : i64, tpu.core_type = #tpu.core_type<tc>} {
    %c0 = arith.constant 0 : index
    %c0_0 = arith.constant 0 : index
    %c0_1 = arith.constant 0 : index
    %0 = vector.load %arg1[%c0, %c0_0, %c0_1] : memref<1x32x2xbf16, #tpu.memory_space<vmem>>, vector<1x32x2xbf16>
    %1 = vector.shape_cast %0 : vector<1x32x2xbf16> to vector<32x2xbf16>
    %c0_2 = arith.constant 0 : index
    %c0_3 = arith.constant 0 : index
    %c0_4 = arith.constant 0 : index
    %2 = vector.load %arg0[%c0_2, %c0_3, %c0_4] : memref<16x64x32xbf16, #tpu.memory_space<vmem>>, vector<1x64x32xbf16>
    %3 = vector.shape_cast %2 : vector<1x64x32xbf16> to vector<64x32xbf16>
    %cst = arith.constant dense<0.000000e+00> : vector<64x2xf32>
    %4 = tpu.matmul %3, %1, %cst {dimension_numbers = #tpu.dot_dimension_numbers<[1], [0], [0], [1], [0, 0, 1, 1], [], []>} : vector<64x32xbf16>, vector<32x2xbf16>, vector<64x2xf32> -> vector<64x2xf32>
    %c0_5 = arith.constant 0 : index
    %c0_6 = arith.constant 0 : index
    %c0_7 = arith.constant 0 : index
    %5 = vector.load %arg1[%c0_5, %c0_6, %c0_7] : memref<1x32x2xbf16, #tpu.memory_space<vmem>>, vector<1x32x2xbf16>
    %6 = vector.shape_cast %5 : vector<1x32x2xbf16> to vector<32x2xbf16>
    %c1 = arith.constant 1 : index
    %c0_8 = arith.constant 0 : index
    %c0_9 = arith.constant 0 : index
    %7 = vector.load %arg0[%c1, %c0_8, %c0_9] : memref<16x64x32xbf16, #tpu.memory_space<vmem>>, vector<1x64x32xbf16>
    %8 = vector.shape_cast %7 : vector<1x64x32xbf16> to vector<64x32xbf16>
    %cst_10 = arith.constant dense<0.000000e+00> : vector<64x2xf32>
    %9 = tpu.matmul %8, %6, %cst_10 {dimension_numbers = #tpu.dot_dimension_numbers<[1], [0], [0], [1], [0, 0, 1, 1], [], []>} : vector<64x32xbf16>, vector<32x2xbf16>, vector<64x2xf32> -> vector<64x2xf32>
    %c0_11 = arith.constant 0 : index
    %c0_12 = arith.constant 0 : index
    %c0_13 = arith.constant 0 : index
    %10 = vector.load %arg1[%c0_11, %c0_12, %c0_13] : memref<1x32x2xbf16, #tpu.memory_space<vmem>>, vector<1x32x2xbf16>
    %11 = vector.shape_cast %10 : vector<1x32x2xbf16> to vector<32x2xbf16>
    %c2 = arith.constant 2 : index
    %c0_14 = arith.constant 0 : index
    %c0_15 = arith.constant 0 : index
    %12 = vector.load %arg0[%c2, %c0_14, %c0_15] : memref<16x64x32xbf16, #tpu.memory_space<vmem>>, vector<1x64x32xbf16>
    %13 = vector.shape_cast %12 : vector<1x64x32xbf16> to vector<64x32xbf16>
    %cst_16 = arith.constant dense<0.000000e+00> : vector<64x2xf32>
    %14 = tpu.matmul %13, %11, %cst_16 {dimension_numbers = #tpu.dot_dimension_numbers<[1], [0], [0], [1], [0, 0, 1, 1], [], []>} : vector<64x32xbf16>, vector<32x2xbf16>, vector<64x2xf32> -> vector<64x2xf32>
    %c0_17 = arith.constant 0 : index
    %c0_18 = arith.constant 0 : index
    %c0_19 = arith.constant 0 : index
    %15 = vector.load %arg1[%c0_17, %c0_18, %c0_19] : memref<1x32x2xbf16, #tpu.memory_space<vmem>>, vector<1x32x2xbf16>
    %16 = vector.shape_cast %15 : vector<1x32x2xbf16> to vector<32x2xbf16>
    %c3 = arith.constant 3 : index
    %c0_20 = arith.constant 0 : index
    %c0_21 = arith.constant 0 : index
    %17 = vector.load %arg0[%c3, %c0_20, %c0_21] : memref<16x64x32xbf16, #tpu.memory_space<vmem>>, vector<1x64x32xbf16>
    %18 = vector.shape_cast %17 : vector<1x64x32xbf16> to vector<64x32xbf16>
    %cst_22 = arith.constant dense<0.000000e+00> : vector<64x2xf32>
    %19 = tpu.matmul %18, %16, %cst_22 {dimension_numbers = #tpu.dot_dimension_numbers<[1], [0], [0], [1], [0, 0, 1, 1], [], []>} : vector<64x32xbf16>, vector<32x2xbf16>, vector<64x2xf32> -> vector<64x2xf32>
    %c0_23 = arith.constant 0 : index
    %c0_24 = arith.constant 0 : index
    %c0_25 = arith.constant 0 : index
    %20 = vector.load %arg1[%c0_23, %c0_24, %c0_25] : memref<1x32x2xbf16, #tpu.memory_space<vmem>>, vector<1x32x2xbf16>
    %21 = vector.shape_cast %20 : vector<1x32x2xbf16> to vector<32x2xbf16>
    %c4 = arith.constant 4 : index
    %c0_26 = arith.constant 0 : index
    %c0_27 = arith.constant 0 : index
    %22 = vector.load %arg0[%c4, %c0_26, %c0_27] : memref<16x64x32xbf16, #tpu.memory_space<vmem>>, vector<1x64x32xbf16>
    %23 = vector.shape_cast %22 : vector<1x64x32xbf16> to vector<64x32xbf16>
    %cst_28 = arith.constant dense<0.000000e+00> : vector<64x2xf32>
    %24 = tpu.matmul %23, %21, %cst_28 {dimension_numbers = #tpu.dot_dimension_numbers<[1], [0], [0], [1], [0, 0, 1, 1], [], []>} : vector<64x32xbf16>, vector<32x2xbf16>, vector<64x2xf32> -> vector<64x2xf32>
    %c0_29 = arith.constant 0 : index
    %c0_30 = arith.constant 0 : index
    %c0_31 = arith.constant 0 : index
    %25 = vector.load %arg1[%c0_29, %c0_30, %c0_31] : memref<1x32x2xbf16, #tpu.memory_space<vmem>>, vector<1x32x2xbf16>
    %26 = vector.shape_cast %25 : vector<1x32x2xbf16> to vector<32x2xbf16>
    %c5 = arith.constant 5 : index
    %c0_32 = arith.constant 0 : index
    %c0_33 = arith.constant 0 : index
    %27 = vector.load %arg0[%c5, %c0_32, %c0_33] : memref<16x64x32xbf16, #tpu.memory_space<vmem>>, vector<1x64x32xbf16>
    %28 = vector.shape_cast %27 : vector<1x64x32xbf16> to vector<64x32xbf16>
    %cst_34 = arith.constant dense<0.000000e+00> : vector<64x2xf32>
    %29 = tpu.matmul %28, %26, %cst_34 {dimension_numbers = #tpu.dot_dimension_numbers<[1], [0], [0], [1], [0, 0, 1, 1], [], []>} : vector<64x32xbf16>, vector<32x2xbf16>, vector<64x2xf32> -> vector<64x2xf32>
    %c0_35 = arith.constant 0 : index
    %c0_36 = arith.constant 0 : index
    %c0_37 = arith.constant 0 : index
    %30 = vector.load %arg1[%c0_35, %c0_36, %c0_37] : memref<1x32x2xbf16, #tpu.memory_space<vmem>>, vector<1x32x2xbf16>
    %31 = vector.shape_cast %30 : vector<1x32x2xbf16> to vector<32x2xbf16>
    %c6 = arith.constant 6 : index
    %c0_38 = arith.constant 0 : index
    %c0_39 = arith.constant 0 : index
    %32 = vector.load %arg0[%c6, %c0_38, %c0_39] : memref<16x64x32xbf16, #tpu.memory_space<vmem>>, vector<1x64x32xbf16>
    %33 = vector.shape_cast %32 : vector<1x64x32xbf16> to vector<64x32xbf16>
    %cst_40 = arith.constant dense<0.000000e+00> : vector<64x2xf32>
    %34 = tpu.matmul %33, %31, %cst_40 {dimension_numbers = #tpu.dot_dimension_numbers<[1], [0], [0], [1], [0, 0, 1, 1], [], []>} : vector<64x32xbf16>, vector<32x2xbf16>, vector<64x2xf32> -> vector<64x2xf32>
    %c0_41 = arith.constant 0 : index
    %c0_42 = arith.constant 0 : index
    %c0_43 = arith.constant 0 : index
    %35 = vector.load %arg1[%c0_41, %c0_42, %c0_43] : memref<1x32x2xbf16, #tpu.memory_space<vmem>>, vector<1x32x2xbf16>
    %36 = vector.shape_cast %35 : vector<1x32x2xbf16> to vector<32x2xbf16>
    %c7 = arith.constant 7 : index
    %c0_44 = arith.constant 0 : index
    %c0_45 = arith.constant 0 : index
    %37 = vector.load %arg0[%c7, %c0_44, %c0_45] : memref<16x64x32xbf16, #tpu.memory_space<vmem>>, vector<1x64x32xbf16>
    %38 = vector.shape_cast %37 : vector<1x64x32xbf16> to vector<64x32xbf16>
    %cst_46 = arith.constant dense<0.000000e+00> : vector<64x2xf32>
    %39 = tpu.matmul %38, %36, %cst_46 {dimension_numbers = #tpu.dot_dimension_numbers<[1], [0], [0], [1], [0, 0, 1, 1], [], []>} : vector<64x32xbf16>, vector<32x2xbf16>, vector<64x2xf32> -> vector<64x2xf32>
    %c0_47 = arith.constant 0 : index
    %c0_48 = arith.constant 0 : index
    %c0_49 = arith.constant 0 : index
    %40 = vector.load %arg1[%c0_47, %c0_48, %c0_49] : memref<1x32x2xbf16, #tpu.memory_space<vmem>>, vector<1x32x2xbf16>
    %41 = vector.shape_cast %40 : vector<1x32x2xbf16> to vector<32x2xbf16>
    %c8 = arith.constant 8 : index
    %c0_50 = arith.constant 0 : index
    %c0_51 = arith.constant 0 : index
    %42 = vector.load %arg0[%c8, %c0_50, %c0_51] : memref<16x64x32xbf16, #tpu.memory_space<vmem>>, vector<1x64x32xbf16>
    %43 = vector.shape_cast %42 : vector<1x64x32xbf16> to vector<64x32xbf16>
    %cst_52 = arith.constant dense<0.000000e+00> : vector<64x2xf32>
    %44 = tpu.matmul %43, %41, %cst_52 {dimension_numbers = #tpu.dot_dimension_numbers<[1], [0], [0], [1], [0, 0, 1, 1], [], []>} : vector<64x32xbf16>, vector<32x2xbf16>, vector<64x2xf32> -> vector<64x2xf32>
    %c0_53 = arith.constant 0 : index
    %c0_54 = arith.constant 0 : index
    %c0_55 = arith.constant 0 : index
    %45 = vector.load %arg1[%c0_53, %c0_54, %c0_55] : memref<1x32x2xbf16, #tpu.memory_space<vmem>>, vector<1x32x2xbf16>
    %46 = vector.shape_cast %45 : vector<1x32x2xbf16> to vector<32x2xbf16>
    %c9 = arith.constant 9 : index
    %c0_56 = arith.constant 0 : index
    %c0_57 = arith.constant 0 : index
    %47 = vector.load %arg0[%c9, %c0_56, %c0_57] : memref<16x64x32xbf16, #tpu.memory_space<vmem>>, vector<1x64x32xbf16>
    %48 = vector.shape_cast %47 : vector<1x64x32xbf16> to vector<64x32xbf16>
    %cst_58 = arith.constant dense<0.000000e+00> : vector<64x2xf32>
    %49 = tpu.matmul %48, %46, %cst_58 {dimension_numbers = #tpu.dot_dimension_numbers<[1], [0], [0], [1], [0, 0, 1, 1], [], []>} : vector<64x32xbf16>, vector<32x2xbf16>, vector<64x2xf32> -> vector<64x2xf32>
    %c0_59 = arith.constant 0 : index
    %c0_60 = arith.constant 0 : index
    %c0_61 = arith.constant 0 : index
    %50 = vector.load %arg1[%c0_59, %c0_60, %c0_61] : memref<1x32x2xbf16, #tpu.memory_space<vmem>>, vector<1x32x2xbf16>
    %51 = vector.shape_cast %50 : vector<1x32x2xbf16> to vector<32x2xbf16>
    %c10 = arith.constant 10 : index
    %c0_62 = arith.constant 0 : index
    %c0_63 = arith.constant 0 : index
    %52 = vector.load %arg0[%c10, %c0_62, %c0_63] : memref<16x64x32xbf16, #tpu.memory_space<vmem>>, vector<1x64x32xbf16>
    %53 = vector.shape_cast %52 : vector<1x64x32xbf16> to vector<64x32xbf16>
    %cst_64 = arith.constant dense<0.000000e+00> : vector<64x2xf32>
    %54 = tpu.matmul %53, %51, %cst_64 {dimension_numbers = #tpu.dot_dimension_numbers<[1], [0], [0], [1], [0, 0, 1, 1], [], []>} : vector<64x32xbf16>, vector<32x2xbf16>, vector<64x2xf32> -> vector<64x2xf32>
    %c0_65 = arith.constant 0 : index
    %c0_66 = arith.constant 0 : index
    %c0_67 = arith.constant 0 : index
    %55 = vector.load %arg1[%c0_65, %c0_66, %c0_67] : memref<1x32x2xbf16, #tpu.memory_space<vmem>>, vector<1x32x2xbf16>
    %56 = vector.shape_cast %55 : vector<1x32x2xbf16> to vector<32x2xbf16>
    %c11 = arith.constant 11 : index
    %c0_68 = arith.constant 0 : index
    %c0_69 = arith.constant 0 : index
    %57 = vector.load %arg0[%c11, %c0_68, %c0_69] : memref<16x64x32xbf16, #tpu.memory_space<vmem>>, vector<1x64x32xbf16>
    %58 = vector.shape_cast %57 : vector<1x64x32xbf16> to vector<64x32xbf16>
    %cst_70 = arith.constant dense<0.000000e+00> : vector<64x2xf32>
    %59 = tpu.matmul %58, %56, %cst_70 {dimension_numbers = #tpu.dot_dimension_numbers<[1], [0], [0], [1], [0, 0, 1, 1], [], []>} : vector<64x32xbf16>, vector<32x2xbf16>, vector<64x2xf32> -> vector<64x2xf32>
    %c0_71 = arith.constant 0 : index
    %c0_72 = arith.constant 0 : index
    %c0_73 = arith.constant 0 : index
    %60 = vector.load %arg1[%c0_71, %c0_72, %c0_73] : memref<1x32x2xbf16, #tpu.memory_space<vmem>>, vector<1x32x2xbf16>
    %61 = vector.shape_cast %60 : vector<1x32x2xbf16> to vector<32x2xbf16>
    %c12 = arith.constant 12 : index
    %c0_74 = arith.constant 0 : index
    %c0_75 = arith.constant 0 : index
    %62 = vector.load %arg0[%c12, %c0_74, %c0_75] : memref<16x64x32xbf16, #tpu.memory_space<vmem>>, vector<1x64x32xbf16>
    %63 = vector.shape_cast %62 : vector<1x64x32xbf16> to vector<64x32xbf16>
    %cst_76 = arith.constant dense<0.000000e+00> : vector<64x2xf32>
    %64 = tpu.matmul %63, %61, %cst_76 {dimension_numbers = #tpu.dot_dimension_numbers<[1], [0], [0], [1], [0, 0, 1, 1], [], []>} : vector<64x32xbf16>, vector<32x2xbf16>, vector<64x2xf32> -> vector<64x2xf32>
    %c0_77 = arith.constant 0 : index
    %c0_78 = arith.constant 0 : index
    %c0_79 = arith.constant 0 : index
    %65 = vector.load %arg1[%c0_77, %c0_78, %c0_79] : memref<1x32x2xbf16, #tpu.memory_space<vmem>>, vector<1x32x2xbf16>
    %66 = vector.shape_cast %65 : vector<1x32x2xbf16> to vector<32x2xbf16>
    %c13 = arith.constant 13 : index
    %c0_80 = arith.constant 0 : index
    %c0_81 = arith.constant 0 : index
    %67 = vector.load %arg0[%c13, %c0_80, %c0_81] : memref<16x64x32xbf16, #tpu.memory_space<vmem>>, vector<1x64x32xbf16>
    %68 = vector.shape_cast %67 : vector<1x64x32xbf16> to vector<64x32xbf16>
    %cst_82 = arith.constant dense<0.000000e+00> : vector<64x2xf32>
    %69 = tpu.matmul %68, %66, %cst_82 {dimension_numbers = #tpu.dot_dimension_numbers<[1], [0], [0], [1], [0, 0, 1, 1], [], []>} : vector<64x32xbf16>, vector<32x2xbf16>, vector<64x2xf32> -> vector<64x2xf32>
    %c0_83 = arith.constant 0 : index
    %c0_84 = arith.constant 0 : index
    %c0_85 = arith.constant 0 : index
    %70 = vector.load %arg1[%c0_83, %c0_84, %c0_85] : memref<1x32x2xbf16, #tpu.memory_space<vmem>>, vector<1x32x2xbf16>
    %71 = vector.shape_cast %70 : vector<1x32x2xbf16> to vector<32x2xbf16>
    %c14 = arith.constant 14 : index
    %c0_86 = arith.constant 0 : index
    %c0_87 = arith.constant 0 : index
    %72 = vector.load %arg0[%c14, %c0_86, %c0_87] : memref<16x64x32xbf16, #tpu.memory_space<vmem>>, vector<1x64x32xbf16>
    %73 = vector.shape_cast %72 : vector<1x64x32xbf16> to vector<64x32xbf16>
    %cst_88 = arith.constant dense<0.000000e+00> : vector<64x2xf32>
    %74 = tpu.matmul %73, %71, %cst_88 {dimension_numbers = #tpu.dot_dimension_numbers<[1], [0], [0], [1], [0, 0, 1, 1], [], []>} : vector<64x32xbf16>, vector<32x2xbf16>, vector<64x2xf32> -> vector<64x2xf32>
    %c0_89 = arith.constant 0 : index
    %c0_90 = arith.constant 0 : index
    %c0_91 = arith.constant 0 : index
    %75 = vector.load %arg1[%c0_89, %c0_90, %c0_91] : memref<1x32x2xbf16, #tpu.memory_space<vmem>>, vector<1x32x2xbf16>
    %76 = vector.shape_cast %75 : vector<1x32x2xbf16> to vector<32x2xbf16>
    %c15 = arith.constant 15 : index
    %c0_92 = arith.constant 0 : index
    %c0_93 = arith.constant 0 : index
    %77 = vector.load %arg0[%c15, %c0_92, %c0_93] : memref<16x64x32xbf16, #tpu.memory_space<vmem>>, vector<1x64x32xbf16>
    %78 = vector.shape_cast %77 : vector<1x64x32xbf16> to vector<64x32xbf16>
    %cst_94 = arith.constant dense<0.000000e+00> : vector<64x2xf32>
    %79 = tpu.matmul %78, %76, %cst_94 {dimension_numbers = #tpu.dot_dimension_numbers<[1], [0], [0], [1], [0, 0, 1, 1], [], []>} : vector<64x32xbf16>, vector<32x2xbf16>, vector<64x2xf32> -> vector<64x2xf32>
    %cst_95 = arith.constant dense<0.000000e+00> : vector<64xf32>
    %80 = vector.multi_reduction <add>, %4, %cst_95 [1] : vector<64x2xf32> to vector<64xf32>
    %81 = vector.shape_cast %80 : vector<64xf32> to vector<64x1xf32>
    %cst_96 = arith.constant dense<0.000000e+00> : vector<64xf32>
    %82 = vector.multi_reduction <add>, %9, %cst_96 [1] : vector<64x2xf32> to vector<64xf32>
    %83 = vector.shape_cast %82 : vector<64xf32> to vector<64x1xf32>
    %84 = arith.addf %81, %83 : vector<64x1xf32>
    %cst_97 = arith.constant dense<0.000000e+00> : vector<64xf32>
    %85 = vector.multi_reduction <add>, %14, %cst_97 [1] : vector<64x2xf32> to vector<64xf32>
    %86 = vector.shape_cast %85 : vector<64xf32> to vector<64x1xf32>
    %87 = arith.addf %84, %86 : vector<64x1xf32>
    %cst_98 = arith.constant dense<0.000000e+00> : vector<64xf32>
    %88 = vector.multi_reduction <add>, %19, %cst_98 [1] : vector<64x2xf32> to vector<64xf32>
    %89 = vector.shape_cast %88 : vector<64xf32> to vector<64x1xf32>
    %90 = arith.addf %87, %89 : vector<64x1xf32>
    %cst_99 = arith.constant dense<0.000000e+00> : vector<64xf32>
    %91 = vector.multi_reduction <add>, %24, %cst_99 [1] : vector<64x2xf32> to vector<64xf32>
    %92 = vector.shape_cast %91 : vector<64xf32> to vector<64x1xf32>
    %93 = arith.addf %90, %92 : vector<64x1xf32>
    %cst_100 = arith.constant dense<0.000000e+00> : vector<64xf32>
    %94 = vector.multi_reduction <add>, %29, %cst_100 [1] : vector<64x2xf32> to vector<64xf32>
    %95 = vector.shape_cast %94 : vector<64xf32> to vector<64x1xf32>
    %96 = arith.addf %93, %95 : vector<64x1xf32>
    %cst_101 = arith.constant dense<0.000000e+00> : vector<64xf32>
    %97 = vector.multi_reduction <add>, %34, %cst_101 [1] : vector<64x2xf32> to vector<64xf32>
    %98 = vector.shape_cast %97 : vector<64xf32> to vector<64x1xf32>
    %99 = arith.addf %96, %98 : vector<64x1xf32>
    %cst_102 = arith.constant dense<0.000000e+00> : vector<64xf32>
    %100 = vector.multi_reduction <add>, %39, %cst_102 [1] : vector<64x2xf32> to vector<64xf32>
    %101 = vector.shape_cast %100 : vector<64xf32> to vector<64x1xf32>
    %102 = arith.addf %99, %101 : vector<64x1xf32>
    %cst_103 = arith.constant dense<0.000000e+00> : vector<64xf32>
    %103 = vector.multi_reduction <add>, %44, %cst_103 [1] : vector<64x2xf32> to vector<64xf32>
    %104 = vector.shape_cast %103 : vector<64xf32> to vector<64x1xf32>
    %105 = arith.addf %102, %104 : vector<64x1xf32>
    %cst_104 = arith.constant dense<0.000000e+00> : vector<64xf32>
    %106 = vector.multi_reduction <add>, %49, %cst_104 [1] : vector<64x2xf32> to vector<64xf32>
    %107 = vector.shape_cast %106 : vector<64xf32> to vector<64x1xf32>
    %108 = arith.addf %105, %107 : vector<64x1xf32>
    %cst_105 = arith.constant dense<0.000000e+00> : vector<64xf32>
    %109 = vector.multi_reduction <add>, %54, %cst_105 [1] : vector<64x2xf32> to vector<64xf32>
    %110 = vector.shape_cast %109 : vector<64xf32> to vector<64x1xf32>
    %111 = arith.addf %108, %110 : vector<64x1xf32>
    %cst_106 = arith.constant dense<0.000000e+00> : vector<64xf32>
    %112 = vector.multi_reduction <add>, %59, %cst_106 [1] : vector<64x2xf32> to vector<64xf32>
    %113 = vector.shape_cast %112 : vector<64xf32> to vector<64x1xf32>
    %114 = arith.addf %111, %113 : vector<64x1xf32>
    %cst_107 = arith.constant dense<0.000000e+00> : vector<64xf32>
    %115 = vector.multi_reduction <add>, %64, %cst_107 [1] : vector<64x2xf32> to vector<64xf32>
    %116 = vector.shape_cast %115 : vector<64xf32> to vector<64x1xf32>
    %117 = arith.addf %114, %116 : vector<64x1xf32>
    %cst_108 = arith.constant dense<0.000000e+00> : vector<64xf32>
    %118 = vector.multi_reduction <add>, %69, %cst_108 [1] : vector<64x2xf32> to vector<64xf32>
    %119 = vector.shape_cast %118 : vector<64xf32> to vector<64x1xf32>
    %120 = arith.addf %117, %119 : vector<64x1xf32>
    %cst_109 = arith.constant dense<0.000000e+00> : vector<64xf32>
    %121 = vector.multi_reduction <add>, %74, %cst_109 [1] : vector<64x2xf32> to vector<64xf32>
    %122 = vector.shape_cast %121 : vector<64xf32> to vector<64x1xf32>
    %123 = arith.addf %120, %122 : vector<64x1xf32>
    %cst_110 = arith.constant dense<0.000000e+00> : vector<64xf32>
    %124 = vector.multi_reduction <add>, %79, %cst_110 [1] : vector<64x2xf32> to vector<64xf32>
    %125 = vector.shape_cast %124 : vector<64xf32> to vector<64x1xf32>
    %126 = arith.addf %123, %125 : vector<64x1xf32>
    %cst_111 = arith.constant 3.125000e-02 : f32
    %127 = vector.broadcast %cst_111 : f32 to vector<64x1xf32>
    %128 = arith.mulf %126, %127 : vector<64x1xf32>
    %129 = vector.broadcast %128 : vector<64x1xf32> to vector<64x2xf32>
    %130 = arith.subf %4, %129 : vector<64x2xf32>
    %131 = arith.mulf %130, %130 : vector<64x2xf32>
    %cst_112 = arith.constant dense<0.000000e+00> : vector<64xf32>
    %132 = vector.multi_reduction <add>, %131, %cst_112 [1] : vector<64x2xf32> to vector<64xf32>
    %133 = vector.shape_cast %132 : vector<64xf32> to vector<64x1xf32>
    %134 = vector.broadcast %128 : vector<64x1xf32> to vector<64x2xf32>
    %135 = arith.subf %9, %134 : vector<64x2xf32>
    %136 = arith.mulf %135, %135 : vector<64x2xf32>
    %cst_113 = arith.constant dense<0.000000e+00> : vector<64xf32>
    %137 = vector.multi_reduction <add>, %136, %cst_113 [1] : vector<64x2xf32> to vector<64xf32>
    %138 = vector.shape_cast %137 : vector<64xf32> to vector<64x1xf32>
    %139 = arith.addf %133, %138 : vector<64x1xf32>
    %140 = vector.broadcast %128 : vector<64x1xf32> to vector<64x2xf32>
    %141 = arith.subf %14, %140 : vector<64x2xf32>
    %142 = arith.mulf %141, %141 : vector<64x2xf32>
    %cst_114 = arith.constant dense<0.000000e+00> : vector<64xf32>
    %143 = vector.multi_reduction <add>, %142, %cst_114 [1] : vector<64x2xf32> to vector<64xf32>
    %144 = vector.shape_cast %143 : vector<64xf32> to vector<64x1xf32>
    %145 = arith.addf %139, %144 : vector<64x1xf32>
    %146 = vector.broadcast %128 : vector<64x1xf32> to vector<64x2xf32>
    %147 = arith.subf %19, %146 : vector<64x2xf32>
    %148 = arith.mulf %147, %147 : vector<64x2xf32>
    %cst_115 = arith.constant dense<0.000000e+00> : vector<64xf32>
    %149 = vector.multi_reduction <add>, %148, %cst_115 [1] : vector<64x2xf32> to vector<64xf32>
    %150 = vector.shape_cast %149 : vector<64xf32> to vector<64x1xf32>
    %151 = arith.addf %145, %150 : vector<64x1xf32>
    %152 = vector.broadcast %128 : vector<64x1xf32> to vector<64x2xf32>
    %153 = arith.subf %24, %152 : vector<64x2xf32>
    %154 = arith.mulf %153, %153 : vector<64x2xf32>
    %cst_116 = arith.constant dense<0.000000e+00> : vector<64xf32>
    %155 = vector.multi_reduction <add>, %154, %cst_116 [1] : vector<64x2xf32> to vector<64xf32>
    %156 = vector.shape_cast %155 : vector<64xf32> to vector<64x1xf32>
    %157 = arith.addf %151, %156 : vector<64x1xf32>
    %158 = vector.broadcast %128 : vector<64x1xf32> to vector<64x2xf32>
    %159 = arith.subf %29, %158 : vector<64x2xf32>
    %160 = arith.mulf %159, %159 : vector<64x2xf32>
    %cst_117 = arith.constant dense<0.000000e+00> : vector<64xf32>
    %161 = vector.multi_reduction <add>, %160, %cst_117 [1] : vector<64x2xf32> to vector<64xf32>
    %162 = vector.shape_cast %161 : vector<64xf32> to vector<64x1xf32>
    %163 = arith.addf %157, %162 : vector<64x1xf32>
    %164 = vector.broadcast %128 : vector<64x1xf32> to vector<64x2xf32>
    %165 = arith.subf %34, %164 : vector<64x2xf32>
    %166 = arith.mulf %165, %165 : vector<64x2xf32>
    %cst_118 = arith.constant dense<0.000000e+00> : vector<64xf32>
    %167 = vector.multi_reduction <add>, %166, %cst_118 [1] : vector<64x2xf32> to vector<64xf32>
    %168 = vector.shape_cast %167 : vector<64xf32> to vector<64x1xf32>
    %169 = arith.addf %163, %168 : vector<64x1xf32>
    %170 = vector.broadcast %128 : vector<64x1xf32> to vector<64x2xf32>
    %171 = arith.subf %39, %170 : vector<64x2xf32>
    %172 = arith.mulf %171, %171 : vector<64x2xf32>
    %cst_119 = arith.constant dense<0.000000e+00> : vector<64xf32>
    %173 = vector.multi_reduction <add>, %172, %cst_119 [1] : vector<64x2xf32> to vector<64xf32>
    %174 = vector.shape_cast %173 : vector<64xf32> to vector<64x1xf32>
    %175 = arith.addf %169, %174 : vector<64x1xf32>
    %176 = vector.broadcast %128 : vector<64x1xf32> to vector<64x2xf32>
    %177 = arith.subf %44, %176 : vector<64x2xf32>
    %178 = arith.mulf %177, %177 : vector<64x2xf32>
    %cst_120 = arith.constant dense<0.000000e+00> : vector<64xf32>
    %179 = vector.multi_reduction <add>, %178, %cst_120 [1] : vector<64x2xf32> to vector<64xf32>
    %180 = vector.shape_cast %179 : vector<64xf32> to vector<64x1xf32>
    %181 = arith.addf %175, %180 : vector<64x1xf32>
    %182 = vector.broadcast %128 : vector<64x1xf32> to vector<64x2xf32>
    %183 = arith.subf %49, %182 : vector<64x2xf32>
    %184 = arith.mulf %183, %183 : vector<64x2xf32>
    %cst_121 = arith.constant dense<0.000000e+00> : vector<64xf32>
    %185 = vector.multi_reduction <add>, %184, %cst_121 [1] : vector<64x2xf32> to vector<64xf32>
    %186 = vector.shape_cast %185 : vector<64xf32> to vector<64x1xf32>
    %187 = arith.addf %181, %186 : vector<64x1xf32>
    %188 = vector.broadcast %128 : vector<64x1xf32> to vector<64x2xf32>
    %189 = arith.subf %54, %188 : vector<64x2xf32>
    %190 = arith.mulf %189, %189 : vector<64x2xf32>
    %cst_122 = arith.constant dense<0.000000e+00> : vector<64xf32>
    %191 = vector.multi_reduction <add>, %190, %cst_122 [1] : vector<64x2xf32> to vector<64xf32>
    %192 = vector.shape_cast %191 : vector<64xf32> to vector<64x1xf32>
    %193 = arith.addf %187, %192 : vector<64x1xf32>
    %194 = vector.broadcast %128 : vector<64x1xf32> to vector<64x2xf32>
    %195 = arith.subf %59, %194 : vector<64x2xf32>
    %196 = arith.mulf %195, %195 : vector<64x2xf32>
    %cst_123 = arith.constant dense<0.000000e+00> : vector<64xf32>
    %197 = vector.multi_reduction <add>, %196, %cst_123 [1] : vector<64x2xf32> to vector<64xf32>
    %198 = vector.shape_cast %197 : vector<64xf32> to vector<64x1xf32>
    %199 = arith.addf %193, %198 : vector<64x1xf32>
    %200 = vector.broadcast %128 : vector<64x1xf32> to vector<64x2xf32>
    %201 = arith.subf %64, %200 : vector<64x2xf32>
    %202 = arith.mulf %201, %201 : vector<64x2xf32>
    %cst_124 = arith.constant dense<0.000000e+00> : vector<64xf32>
    %203 = vector.multi_reduction <add>, %202, %cst_124 [1] : vector<64x2xf32> to vector<64xf32>
    %204 = vector.shape_cast %203 : vector<64xf32> to vector<64x1xf32>
    %205 = arith.addf %199, %204 : vector<64x1xf32>
    %206 = vector.broadcast %128 : vector<64x1xf32> to vector<64x2xf32>
    %207 = arith.subf %69, %206 : vector<64x2xf32>
    %208 = arith.mulf %207, %207 : vector<64x2xf32>
    %cst_125 = arith.constant dense<0.000000e+00> : vector<64xf32>
    %209 = vector.multi_reduction <add>, %208, %cst_125 [1] : vector<64x2xf32> to vector<64xf32>
    %210 = vector.shape_cast %209 : vector<64xf32> to vector<64x1xf32>
    %211 = arith.addf %205, %210 : vector<64x1xf32>
    %212 = vector.broadcast %128 : vector<64x1xf32> to vector<64x2xf32>
    %213 = arith.subf %74, %212 : vector<64x2xf32>
    %214 = arith.mulf %213, %213 : vector<64x2xf32>
    %cst_126 = arith.constant dense<0.000000e+00> : vector<64xf32>
    %215 = vector.multi_reduction <add>, %214, %cst_126 [1] : vector<64x2xf32> to vector<64xf32>
    %216 = vector.shape_cast %215 : vector<64xf32> to vector<64x1xf32>
    %217 = arith.addf %211, %216 : vector<64x1xf32>
    %218 = vector.broadcast %128 : vector<64x1xf32> to vector<64x2xf32>
    %219 = arith.subf %79, %218 : vector<64x2xf32>
    %220 = arith.mulf %219, %219 : vector<64x2xf32>
    %cst_127 = arith.constant dense<0.000000e+00> : vector<64xf32>
    %221 = vector.multi_reduction <add>, %220, %cst_127 [1] : vector<64x2xf32> to vector<64xf32>
    %222 = vector.shape_cast %221 : vector<64xf32> to vector<64x1xf32>
    %223 = arith.addf %217, %222 : vector<64x1xf32>
    %cst_128 = arith.constant 3.125000e-02 : f32
    %224 = vector.broadcast %cst_128 : f32 to vector<64x1xf32>
    %225 = arith.mulf %223, %224 : vector<64x1xf32>
    %cst_129 = arith.constant 9.99999974E-6 : f32
    %226 = vector.broadcast %cst_129 : f32 to vector<64x1xf32>
    %227 = arith.addf %225, %226 : vector<64x1xf32>
    %228 = math.rsqrt %227 : vector<64x1xf32>
    %c0_130 = arith.constant 0 : index
    %c0_131 = arith.constant 0 : index
    %229 = vector.load %arg2[%c0_130, %c0_131] : memref<64x1xf32, #tpu.memory_space<vmem>>, vector<64x1xf32>
    %230 = arith.mulf %228, %229 : vector<64x1xf32>
    %c0_132 = arith.constant 0 : index
    %c0_133 = arith.constant 0 : index
    %231 = vector.load %arg3[%c0_132, %c0_133] : memref<64x1xf32, #tpu.memory_space<vmem>>, vector<64x1xf32>
    %232 = arith.mulf %128, %230 : vector<64x1xf32>
    %233 = arith.subf %231, %232 : vector<64x1xf32>
    %234 = vector.broadcast %230 : vector<64x1xf32> to vector<64x2xf32>
    %235 = arith.mulf %4, %234 : vector<64x2xf32>
    %236 = vector.broadcast %233 : vector<64x1xf32> to vector<64x2xf32>
    %237 = arith.addf %235, %236 : vector<64x2xf32>
    %cst_134 = arith.constant 0.000000e+00 : f32
    %238 = vector.broadcast %cst_134 : f32 to vector<64x2xf32>
    %239 = arith.maximumf %237, %238 : vector<64x2xf32>
    %c0_135 = arith.constant 0 : index
    %c0_136 = arith.constant 0 : index
    %c0_137 = arith.constant 0 : index
    %240 = vector.load %arg4[%c0_135, %c0_136, %c0_137] : memref<16x64x2xf32, #tpu.memory_space<vmem>>, vector<1x64x2xf32>
    %241 = vector.shape_cast %240 : vector<1x64x2xf32> to vector<64x2xf32>
    %242 = vector.shape_cast %239 : vector<64x2xf32> to vector<1x64x2xf32>
    tpu.vector_store %arg4[%c0_135, %c0_136, %c0_137], %242 {strides = array<i32>} : memref<16x64x2xf32, #tpu.memory_space<vmem>>, vector<1x64x2xf32>,
    %243 = vector.broadcast %230 : vector<64x1xf32> to vector<64x2xf32>
    %244 = arith.mulf %9, %243 : vector<64x2xf32>
    %245 = vector.broadcast %233 : vector<64x1xf32> to vector<64x2xf32>
    %246 = arith.addf %244, %245 : vector<64x2xf32>
    %cst_138 = arith.constant 0.000000e+00 : f32
    %247 = vector.broadcast %cst_138 : f32 to vector<64x2xf32>
    %248 = arith.maximumf %246, %247 : vector<64x2xf32>
    %c1_139 = arith.constant 1 : index
    %c0_140 = arith.constant 0 : index
    %c0_141 = arith.constant 0 : index
    %249 = vector.load %arg4[%c1_139, %c0_140, %c0_141] : memref<16x64x2xf32, #tpu.memory_space<vmem>>, vector<1x64x2xf32>
    %250 = vector.shape_cast %249 : vector<1x64x2xf32> to vector<64x2xf32>
    %251 = vector.shape_cast %248 : vector<64x2xf32> to vector<1x64x2xf32>
    tpu.vector_store %arg4[%c1_139, %c0_140, %c0_141], %251 {strides = array<i32>} : memref<16x64x2xf32, #tpu.memory_space<vmem>>, vector<1x64x2xf32>,
    %252 = vector.broadcast %230 : vector<64x1xf32> to vector<64x2xf32>
    %253 = arith.mulf %14, %252 : vector<64x2xf32>
    %254 = vector.broadcast %233 : vector<64x1xf32> to vector<64x2xf32>
    %255 = arith.addf %253, %254 : vector<64x2xf32>
    %cst_142 = arith.constant 0.000000e+00 : f32
    %256 = vector.broadcast %cst_142 : f32 to vector<64x2xf32>
    %257 = arith.maximumf %255, %256 : vector<64x2xf32>
    %c2_143 = arith.constant 2 : index
    %c0_144 = arith.constant 0 : index
    %c0_145 = arith.constant 0 : index
    %258 = vector.load %arg4[%c2_143, %c0_144, %c0_145] : memref<16x64x2xf32, #tpu.memory_space<vmem>>, vector<1x64x2xf32>
    %259 = vector.shape_cast %258 : vector<1x64x2xf32> to vector<64x2xf32>
    %260 = vector.shape_cast %257 : vector<64x2xf32> to vector<1x64x2xf32>
    tpu.vector_store %arg4[%c2_143, %c0_144, %c0_145], %260 {strides = array<i32>} : memref<16x64x2xf32, #tpu.memory_space<vmem>>, vector<1x64x2xf32>,
    %261 = vector.broadcast %230 : vector<64x1xf32> to vector<64x2xf32>
    %262 = arith.mulf %19, %261 : vector<64x2xf32>
    %263 = vector.broadcast %233 : vector<64x1xf32> to vector<64x2xf32>
    %264 = arith.addf %262, %263 : vector<64x2xf32>
    %cst_146 = arith.constant 0.000000e+00 : f32
    %265 = vector.broadcast %cst_146 : f32 to vector<64x2xf32>
    %266 = arith.maximumf %264, %265 : vector<64x2xf32>
    %c3_147 = arith.constant 3 : index
    %c0_148 = arith.constant 0 : index
    %c0_149 = arith.constant 0 : index
    %267 = vector.load %arg4[%c3_147, %c0_148, %c0_149] : memref<16x64x2xf32, #tpu.memory_space<vmem>>, vector<1x64x2xf32>
    %268 = vector.shape_cast %267 : vector<1x64x2xf32> to vector<64x2xf32>
    %269 = vector.shape_cast %266 : vector<64x2xf32> to vector<1x64x2xf32>
    tpu.vector_store %arg4[%c3_147, %c0_148, %c0_149], %269 {strides = array<i32>} : memref<16x64x2xf32, #tpu.memory_space<vmem>>, vector<1x64x2xf32>,
    %270 = vector.broadcast %230 : vector<64x1xf32> to vector<64x2xf32>
    %271 = arith.mulf %24, %270 : vector<64x2xf32>
    %272 = vector.broadcast %233 : vector<64x1xf32> to vector<64x2xf32>
    %273 = arith.addf %271, %272 : vector<64x2xf32>
    %cst_150 = arith.constant 0.000000e+00 : f32
    %274 = vector.broadcast %cst_150 : f32 to vector<64x2xf32>
    %275 = arith.maximumf %273, %274 : vector<64x2xf32>
    %c4_151 = arith.constant 4 : index
    %c0_152 = arith.constant 0 : index
    %c0_153 = arith.constant 0 : index
    %276 = vector.load %arg4[%c4_151, %c0_152, %c0_153] : memref<16x64x2xf32, #tpu.memory_space<vmem>>, vector<1x64x2xf32>
    %277 = vector.shape_cast %276 : vector<1x64x2xf32> to vector<64x2xf32>
    %278 = vector.shape_cast %275 : vector<64x2xf32> to vector<1x64x2xf32>
    tpu.vector_store %arg4[%c4_151, %c0_152, %c0_153], %278 {strides = array<i32>} : memref<16x64x2xf32, #tpu.memory_space<vmem>>, vector<1x64x2xf32>,
    %279 = vector.broadcast %230 : vector<64x1xf32> to vector<64x2xf32>
    %280 = arith.mulf %29, %279 : vector<64x2xf32>
    %281 = vector.broadcast %233 : vector<64x1xf32> to vector<64x2xf32>
    %282 = arith.addf %280, %281 : vector<64x2xf32>
    %cst_154 = arith.constant 0.000000e+00 : f32
    %283 = vector.broadcast %cst_154 : f32 to vector<64x2xf32>
    %284 = arith.maximumf %282, %283 : vector<64x2xf32>
    %c5_155 = arith.constant 5 : index
    %c0_156 = arith.constant 0 : index
    %c0_157 = arith.constant 0 : index
    %285 = vector.load %arg4[%c5_155, %c0_156, %c0_157] : memref<16x64x2xf32, #tpu.memory_space<vmem>>, vector<1x64x2xf32>
    %286 = vector.shape_cast %285 : vector<1x64x2xf32> to vector<64x2xf32>
    %287 = vector.shape_cast %284 : vector<64x2xf32> to vector<1x64x2xf32>
    tpu.vector_store %arg4[%c5_155, %c0_156, %c0_157], %287 {strides = array<i32>} : memref<16x64x2xf32, #tpu.memory_space<vmem>>, vector<1x64x2xf32>,
    %288 = vector.broadcast %230 : vector<64x1xf32> to vector<64x2xf32>
    %289 = arith.mulf %34, %288 : vector<64x2xf32>
    %290 = vector.broadcast %233 : vector<64x1xf32> to vector<64x2xf32>
    %291 = arith.addf %289, %290 : vector<64x2xf32>
    %cst_158 = arith.constant 0.000000e+00 : f32
    %292 = vector.broadcast %cst_158 : f32 to vector<64x2xf32>
    %293 = arith.maximumf %291, %292 : vector<64x2xf32>
    %c6_159 = arith.constant 6 : index
    %c0_160 = arith.constant 0 : index
    %c0_161 = arith.constant 0 : index
    %294 = vector.load %arg4[%c6_159, %c0_160, %c0_161] : memref<16x64x2xf32, #tpu.memory_space<vmem>>, vector<1x64x2xf32>
    %295 = vector.shape_cast %294 : vector<1x64x2xf32> to vector<64x2xf32>
    %296 = vector.shape_cast %293 : vector<64x2xf32> to vector<1x64x2xf32>
    tpu.vector_store %arg4[%c6_159, %c0_160, %c0_161], %296 {strides = array<i32>} : memref<16x64x2xf32, #tpu.memory_space<vmem>>, vector<1x64x2xf32>,
    %297 = vector.broadcast %230 : vector<64x1xf32> to vector<64x2xf32>
    %298 = arith.mulf %39, %297 : vector<64x2xf32>
    %299 = vector.broadcast %233 : vector<64x1xf32> to vector<64x2xf32>
    %300 = arith.addf %298, %299 : vector<64x2xf32>
    %cst_162 = arith.constant 0.000000e+00 : f32
    %301 = vector.broadcast %cst_162 : f32 to vector<64x2xf32>
    %302 = arith.maximumf %300, %301 : vector<64x2xf32>
    %c7_163 = arith.constant 7 : index
    %c0_164 = arith.constant 0 : index
    %c0_165 = arith.constant 0 : index
    %303 = vector.load %arg4[%c7_163, %c0_164, %c0_165] : memref<16x64x2xf32, #tpu.memory_space<vmem>>, vector<1x64x2xf32>
    %304 = vector.shape_cast %303 : vector<1x64x2xf32> to vector<64x2xf32>
    %305 = vector.shape_cast %302 : vector<64x2xf32> to vector<1x64x2xf32>
    tpu.vector_store %arg4[%c7_163, %c0_164, %c0_165], %305 {strides = array<i32>} : memref<16x64x2xf32, #tpu.memory_space<vmem>>, vector<1x64x2xf32>,
    %306 = vector.broadcast %230 : vector<64x1xf32> to vector<64x2xf32>
    %307 = arith.mulf %44, %306 : vector<64x2xf32>
    %308 = vector.broadcast %233 : vector<64x1xf32> to vector<64x2xf32>
    %309 = arith.addf %307, %308 : vector<64x2xf32>
    %cst_166 = arith.constant 0.000000e+00 : f32
    %310 = vector.broadcast %cst_166 : f32 to vector<64x2xf32>
    %311 = arith.maximumf %309, %310 : vector<64x2xf32>
    %c8_167 = arith.constant 8 : index
    %c0_168 = arith.constant 0 : index
    %c0_169 = arith.constant 0 : index
    %312 = vector.load %arg4[%c8_167, %c0_168, %c0_169] : memref<16x64x2xf32, #tpu.memory_space<vmem>>, vector<1x64x2xf32>
    %313 = vector.shape_cast %312 : vector<1x64x2xf32> to vector<64x2xf32>
    %314 = vector.shape_cast %311 : vector<64x2xf32> to vector<1x64x2xf32>
    tpu.vector_store %arg4[%c8_167, %c0_168, %c0_169], %314 {strides = array<i32>} : memref<16x64x2xf32, #tpu.memory_space<vmem>>, vector<1x64x2xf32>,
    %315 = vector.broadcast %230 : vector<64x1xf32> to vector<64x2xf32>
    %316 = arith.mulf %49, %315 : vector<64x2xf32>
    %317 = vector.broadcast %233 : vector<64x1xf32> to vector<64x2xf32>
    %318 = arith.addf %316, %317 : vector<64x2xf32>
    %cst_170 = arith.constant 0.000000e+00 : f32
    %319 = vector.broadcast %cst_170 : f32 to vector<64x2xf32>
    %320 = arith.maximumf %318, %319 : vector<64x2xf32>
    %c9_171 = arith.constant 9 : index
    %c0_172 = arith.constant 0 : index
    %c0_173 = arith.constant 0 : index
    %321 = vector.load %arg4[%c9_171, %c0_172, %c0_173] : memref<16x64x2xf32, #tpu.memory_space<vmem>>, vector<1x64x2xf32>
    %322 = vector.shape_cast %321 : vector<1x64x2xf32> to vector<64x2xf32>
    %323 = vector.shape_cast %320 : vector<64x2xf32> to vector<1x64x2xf32>
    tpu.vector_store %arg4[%c9_171, %c0_172, %c0_173], %323 {strides = array<i32>} : memref<16x64x2xf32, #tpu.memory_space<vmem>>, vector<1x64x2xf32>,
    %324 = vector.broadcast %230 : vector<64x1xf32> to vector<64x2xf32>
    %325 = arith.mulf %54, %324 : vector<64x2xf32>
    %326 = vector.broadcast %233 : vector<64x1xf32> to vector<64x2xf32>
    %327 = arith.addf %325, %326 : vector<64x2xf32>
    %cst_174 = arith.constant 0.000000e+00 : f32
    %328 = vector.broadcast %cst_174 : f32 to vector<64x2xf32>
    %329 = arith.maximumf %327, %328 : vector<64x2xf32>
    %c10_175 = arith.constant 10 : index
    %c0_176 = arith.constant 0 : index
    %c0_177 = arith.constant 0 : index
    %330 = vector.load %arg4[%c10_175, %c0_176, %c0_177] : memref<16x64x2xf32, #tpu.memory_space<vmem>>, vector<1x64x2xf32>
    %331 = vector.shape_cast %330 : vector<1x64x2xf32> to vector<64x2xf32>
    %332 = vector.shape_cast %329 : vector<64x2xf32> to vector<1x64x2xf32>
    tpu.vector_store %arg4[%c10_175, %c0_176, %c0_177], %332 {strides = array<i32>} : memref<16x64x2xf32, #tpu.memory_space<vmem>>, vector<1x64x2xf32>,
    %333 = vector.broadcast %230 : vector<64x1xf32> to vector<64x2xf32>
    %334 = arith.mulf %59, %333 : vector<64x2xf32>
    %335 = vector.broadcast %233 : vector<64x1xf32> to vector<64x2xf32>
    %336 = arith.addf %334, %335 : vector<64x2xf32>
    %cst_178 = arith.constant 0.000000e+00 : f32
    %337 = vector.broadcast %cst_178 : f32 to vector<64x2xf32>
    %338 = arith.maximumf %336, %337 : vector<64x2xf32>
    %c11_179 = arith.constant 11 : index
    %c0_180 = arith.constant 0 : index
    %c0_181 = arith.constant 0 : index
    %339 = vector.load %arg4[%c11_179, %c0_180, %c0_181] : memref<16x64x2xf32, #tpu.memory_space<vmem>>, vector<1x64x2xf32>
    %340 = vector.shape_cast %339 : vector<1x64x2xf32> to vector<64x2xf32>
    %341 = vector.shape_cast %338 : vector<64x2xf32> to vector<1x64x2xf32>
    tpu.vector_store %arg4[%c11_179, %c0_180, %c0_181], %341 {strides = array<i32>} : memref<16x64x2xf32, #tpu.memory_space<vmem>>, vector<1x64x2xf32>,
    %342 = vector.broadcast %230 : vector<64x1xf32> to vector<64x2xf32>
    %343 = arith.mulf %64, %342 : vector<64x2xf32>
    %344 = vector.broadcast %233 : vector<64x1xf32> to vector<64x2xf32>
    %345 = arith.addf %343, %344 : vector<64x2xf32>
    %cst_182 = arith.constant 0.000000e+00 : f32
    %346 = vector.broadcast %cst_182 : f32 to vector<64x2xf32>
    %347 = arith.maximumf %345, %346 : vector<64x2xf32>
    %c12_183 = arith.constant 12 : index
    %c0_184 = arith.constant 0 : index
    %c0_185 = arith.constant 0 : index
    %348 = vector.load %arg4[%c12_183, %c0_184, %c0_185] : memref<16x64x2xf32, #tpu.memory_space<vmem>>, vector<1x64x2xf32>
    %349 = vector.shape_cast %348 : vector<1x64x2xf32> to vector<64x2xf32>
    %350 = vector.shape_cast %347 : vector<64x2xf32> to vector<1x64x2xf32>
    tpu.vector_store %arg4[%c12_183, %c0_184, %c0_185], %350 {strides = array<i32>} : memref<16x64x2xf32, #tpu.memory_space<vmem>>, vector<1x64x2xf32>,
    %351 = vector.broadcast %230 : vector<64x1xf32> to vector<64x2xf32>
    %352 = arith.mulf %69, %351 : vector<64x2xf32>
    %353 = vector.broadcast %233 : vector<64x1xf32> to vector<64x2xf32>
    %354 = arith.addf %352, %353 : vector<64x2xf32>
    %cst_186 = arith.constant 0.000000e+00 : f32
    %355 = vector.broadcast %cst_186 : f32 to vector<64x2xf32>
    %356 = arith.maximumf %354, %355 : vector<64x2xf32>
    %c13_187 = arith.constant 13 : index
    %c0_188 = arith.constant 0 : index
    %c0_189 = arith.constant 0 : index
    %357 = vector.load %arg4[%c13_187, %c0_188, %c0_189] : memref<16x64x2xf32, #tpu.memory_space<vmem>>, vector<1x64x2xf32>
    %358 = vector.shape_cast %357 : vector<1x64x2xf32> to vector<64x2xf32>
    %359 = vector.shape_cast %356 : vector<64x2xf32> to vector<1x64x2xf32>
    tpu.vector_store %arg4[%c13_187, %c0_188, %c0_189], %359 {strides = array<i32>} : memref<16x64x2xf32, #tpu.memory_space<vmem>>, vector<1x64x2xf32>,
    %360 = vector.broadcast %230 : vector<64x1xf32> to vector<64x2xf32>
    %361 = arith.mulf %74, %360 : vector<64x2xf32>
    %362 = vector.broadcast %233 : vector<64x1xf32> to vector<64x2xf32>
    %363 = arith.addf %361, %362 : vector<64x2xf32>
    %cst_190 = arith.constant 0.000000e+00 : f32
    %364 = vector.broadcast %cst_190 : f32 to vector<64x2xf32>
    %365 = arith.maximumf %363, %364 : vector<64x2xf32>
    %c14_191 = arith.constant 14 : index
    %c0_192 = arith.constant 0 : index
    %c0_193 = arith.constant 0 : index
    %366 = vector.load %arg4[%c14_191, %c0_192, %c0_193] : memref<16x64x2xf32, #tpu.memory_space<vmem>>, vector<1x64x2xf32>
    %367 = vector.shape_cast %366 : vector<1x64x2xf32> to vector<64x2xf32>
    %368 = vector.shape_cast %365 : vector<64x2xf32> to vector<1x64x2xf32>
    tpu.vector_store %arg4[%c14_191, %c0_192, %c0_193], %368 {strides = array<i32>} : memref<16x64x2xf32, #tpu.memory_space<vmem>>, vector<1x64x2xf32>,
    %369 = vector.broadcast %230 : vector<64x1xf32> to vector<64x2xf32>
    %370 = arith.mulf %79, %369 : vector<64x2xf32>
    %371 = vector.broadcast %233 : vector<64x1xf32> to vector<64x2xf32>
    %372 = arith.addf %370, %371 : vector<64x2xf32>
    %cst_194 = arith.constant 0.000000e+00 : f32
    %373 = vector.broadcast %cst_194 : f32 to vector<64x2xf32>
    %374 = arith.maximumf %372, %373 : vector<64x2xf32>
    %c15_195 = arith.constant 15 : index
    %c0_196 = arith.constant 0 : index
    %c0_197 = arith.constant 0 : index
    %375 = vector.load %arg4[%c15_195, %c0_196, %c0_197] : memref<16x64x2xf32, #tpu.memory_space<vmem>>, vector<1x64x2xf32>
    %376 = vector.shape_cast %375 : vector<1x64x2xf32> to vector<64x2xf32>
    %377 = vector.shape_cast %374 : vector<64x2xf32> to vector<1x64x2xf32>
    tpu.vector_store %arg4[%c15_195, %c0_196, %c0_197], %377 {strides = array<i32>} : memref<16x64x2xf32, #tpu.memory_space<vmem>>, vector<1x64x2xf32>,
    return
  }
}

module attributes {stable_mosaic.version = 11 : i64} {
  func.func @_phase_gemm_bn_relu_kernel(%arg0: memref<4x32x256xbf16, #tpu.memory_space<vmem>>, %arg1: memref<4x256x32xbf16, #tpu.memory_space<vmem>>, %arg2: memref<32x1xf32, #tpu.memory_space<vmem>>, %arg3: memref<32x1xf32, #tpu.memory_space<vmem>>, %arg4: memref<4x32x32xf32, #tpu.memory_space<vmem>>) attributes {dimension_semantics = [], scalar_prefetch = 0 : i64, scratch_operands = 0 : i64, tpu.core_type = #tpu.core_type<tc>} {
    %c0 = arith.constant 0 : index
    %c0_0 = arith.constant 0 : index
    %c0_1 = arith.constant 0 : index
    %0 = vector.load %arg1[%c0, %c0_0, %c0_1] : memref<4x256x32xbf16, #tpu.memory_space<vmem>>, vector<1x256x32xbf16>
    %1 = vector.shape_cast %0 : vector<1x256x32xbf16> to vector<256x32xbf16>
    %c0_2 = arith.constant 0 : index
    %c0_3 = arith.constant 0 : index
    %c0_4 = arith.constant 0 : index
    %2 = vector.load %arg0[%c0_2, %c0_3, %c0_4] : memref<4x32x256xbf16, #tpu.memory_space<vmem>>, vector<1x32x256xbf16>
    %3 = vector.shape_cast %2 : vector<1x32x256xbf16> to vector<32x256xbf16>
    %cst = arith.constant dense<0.000000e+00> : vector<32x32xf32>
    %4 = tpu.matmul %3, %1, %cst {dimension_numbers = #tpu.dot_dimension_numbers<[1], [0], [0], [1], [0, 0, 1, 1], [], []>} : vector<32x256xbf16>, vector<256x32xbf16>, vector<32x32xf32> -> vector<32x32xf32>
    %c1 = arith.constant 1 : index
    %c0_5 = arith.constant 0 : index
    %c0_6 = arith.constant 0 : index
    %5 = vector.load %arg1[%c1, %c0_5, %c0_6] : memref<4x256x32xbf16, #tpu.memory_space<vmem>>, vector<1x256x32xbf16>
    %6 = vector.shape_cast %5 : vector<1x256x32xbf16> to vector<256x32xbf16>
    %c1_7 = arith.constant 1 : index
    %c0_8 = arith.constant 0 : index
    %c0_9 = arith.constant 0 : index
    %7 = vector.load %arg0[%c1_7, %c0_8, %c0_9] : memref<4x32x256xbf16, #tpu.memory_space<vmem>>, vector<1x32x256xbf16>
    %8 = vector.shape_cast %7 : vector<1x32x256xbf16> to vector<32x256xbf16>
    %cst_10 = arith.constant dense<0.000000e+00> : vector<32x32xf32>
    %9 = tpu.matmul %8, %6, %cst_10 {dimension_numbers = #tpu.dot_dimension_numbers<[1], [0], [0], [1], [0, 0, 1, 1], [], []>} : vector<32x256xbf16>, vector<256x32xbf16>, vector<32x32xf32> -> vector<32x32xf32>
    %c2 = arith.constant 2 : index
    %c0_11 = arith.constant 0 : index
    %c0_12 = arith.constant 0 : index
    %10 = vector.load %arg1[%c2, %c0_11, %c0_12] : memref<4x256x32xbf16, #tpu.memory_space<vmem>>, vector<1x256x32xbf16>
    %11 = vector.shape_cast %10 : vector<1x256x32xbf16> to vector<256x32xbf16>
    %c2_13 = arith.constant 2 : index
    %c0_14 = arith.constant 0 : index
    %c0_15 = arith.constant 0 : index
    %12 = vector.load %arg0[%c2_13, %c0_14, %c0_15] : memref<4x32x256xbf16, #tpu.memory_space<vmem>>, vector<1x32x256xbf16>
    %13 = vector.shape_cast %12 : vector<1x32x256xbf16> to vector<32x256xbf16>
    %cst_16 = arith.constant dense<0.000000e+00> : vector<32x32xf32>
    %14 = tpu.matmul %13, %11, %cst_16 {dimension_numbers = #tpu.dot_dimension_numbers<[1], [0], [0], [1], [0, 0, 1, 1], [], []>} : vector<32x256xbf16>, vector<256x32xbf16>, vector<32x32xf32> -> vector<32x32xf32>
    %c3 = arith.constant 3 : index
    %c0_17 = arith.constant 0 : index
    %c0_18 = arith.constant 0 : index
    %15 = vector.load %arg1[%c3, %c0_17, %c0_18] : memref<4x256x32xbf16, #tpu.memory_space<vmem>>, vector<1x256x32xbf16>
    %16 = vector.shape_cast %15 : vector<1x256x32xbf16> to vector<256x32xbf16>
    %c3_19 = arith.constant 3 : index
    %c0_20 = arith.constant 0 : index
    %c0_21 = arith.constant 0 : index
    %17 = vector.load %arg0[%c3_19, %c0_20, %c0_21] : memref<4x32x256xbf16, #tpu.memory_space<vmem>>, vector<1x32x256xbf16>
    %18 = vector.shape_cast %17 : vector<1x32x256xbf16> to vector<32x256xbf16>
    %cst_22 = arith.constant dense<0.000000e+00> : vector<32x32xf32>
    %19 = tpu.matmul %18, %16, %cst_22 {dimension_numbers = #tpu.dot_dimension_numbers<[1], [0], [0], [1], [0, 0, 1, 1], [], []>} : vector<32x256xbf16>, vector<256x32xbf16>, vector<32x32xf32> -> vector<32x32xf32>
    %cst_23 = arith.constant dense<0.000000e+00> : vector<32xf32>
    %20 = vector.multi_reduction <add>, %4, %cst_23 [1] : vector<32x32xf32> to vector<32xf32>
    %21 = vector.shape_cast %20 : vector<32xf32> to vector<32x1xf32>
    %cst_24 = arith.constant dense<0.000000e+00> : vector<32xf32>
    %22 = vector.multi_reduction <add>, %9, %cst_24 [1] : vector<32x32xf32> to vector<32xf32>
    %23 = vector.shape_cast %22 : vector<32xf32> to vector<32x1xf32>
    %24 = arith.addf %21, %23 : vector<32x1xf32>
    %cst_25 = arith.constant dense<0.000000e+00> : vector<32xf32>
    %25 = vector.multi_reduction <add>, %14, %cst_25 [1] : vector<32x32xf32> to vector<32xf32>
    %26 = vector.shape_cast %25 : vector<32xf32> to vector<32x1xf32>
    %27 = arith.addf %24, %26 : vector<32x1xf32>
    %cst_26 = arith.constant dense<0.000000e+00> : vector<32xf32>
    %28 = vector.multi_reduction <add>, %19, %cst_26 [1] : vector<32x32xf32> to vector<32xf32>
    %29 = vector.shape_cast %28 : vector<32xf32> to vector<32x1xf32>
    %30 = arith.addf %27, %29 : vector<32x1xf32>
    %cst_27 = arith.constant 7.812500e-03 : f32
    %31 = vector.broadcast %cst_27 : f32 to vector<32x1xf32>
    %32 = arith.mulf %30, %31 : vector<32x1xf32>
    %33 = vector.broadcast %32 : vector<32x1xf32> to vector<32x32xf32>
    %34 = arith.subf %4, %33 : vector<32x32xf32>
    %35 = arith.mulf %34, %34 : vector<32x32xf32>
    %cst_28 = arith.constant dense<0.000000e+00> : vector<32xf32>
    %36 = vector.multi_reduction <add>, %35, %cst_28 [1] : vector<32x32xf32> to vector<32xf32>
    %37 = vector.shape_cast %36 : vector<32xf32> to vector<32x1xf32>
    %38 = vector.broadcast %32 : vector<32x1xf32> to vector<32x32xf32>
    %39 = arith.subf %9, %38 : vector<32x32xf32>
    %40 = arith.mulf %39, %39 : vector<32x32xf32>
    %cst_29 = arith.constant dense<0.000000e+00> : vector<32xf32>
    %41 = vector.multi_reduction <add>, %40, %cst_29 [1] : vector<32x32xf32> to vector<32xf32>
    %42 = vector.shape_cast %41 : vector<32xf32> to vector<32x1xf32>
    %43 = arith.addf %37, %42 : vector<32x1xf32>
    %44 = vector.broadcast %32 : vector<32x1xf32> to vector<32x32xf32>
    %45 = arith.subf %14, %44 : vector<32x32xf32>
    %46 = arith.mulf %45, %45 : vector<32x32xf32>
    %cst_30 = arith.constant dense<0.000000e+00> : vector<32xf32>
    %47 = vector.multi_reduction <add>, %46, %cst_30 [1] : vector<32x32xf32> to vector<32xf32>
    %48 = vector.shape_cast %47 : vector<32xf32> to vector<32x1xf32>
    %49 = arith.addf %43, %48 : vector<32x1xf32>
    %50 = vector.broadcast %32 : vector<32x1xf32> to vector<32x32xf32>
    %51 = arith.subf %19, %50 : vector<32x32xf32>
    %52 = arith.mulf %51, %51 : vector<32x32xf32>
    %cst_31 = arith.constant dense<0.000000e+00> : vector<32xf32>
    %53 = vector.multi_reduction <add>, %52, %cst_31 [1] : vector<32x32xf32> to vector<32xf32>
    %54 = vector.shape_cast %53 : vector<32xf32> to vector<32x1xf32>
    %55 = arith.addf %49, %54 : vector<32x1xf32>
    %cst_32 = arith.constant 7.812500e-03 : f32
    %56 = vector.broadcast %cst_32 : f32 to vector<32x1xf32>
    %57 = arith.mulf %55, %56 : vector<32x1xf32>
    %cst_33 = arith.constant 9.99999974E-6 : f32
    %58 = vector.broadcast %cst_33 : f32 to vector<32x1xf32>
    %59 = arith.addf %57, %58 : vector<32x1xf32>
    %60 = math.rsqrt %59 : vector<32x1xf32>
    %c0_34 = arith.constant 0 : index
    %c0_35 = arith.constant 0 : index
    %61 = vector.load %arg2[%c0_34, %c0_35] : memref<32x1xf32, #tpu.memory_space<vmem>>, vector<32x1xf32>
    %62 = arith.mulf %60, %61 : vector<32x1xf32>
    %c0_36 = arith.constant 0 : index
    %c0_37 = arith.constant 0 : index
    %63 = vector.load %arg3[%c0_36, %c0_37] : memref<32x1xf32, #tpu.memory_space<vmem>>, vector<32x1xf32>
    %64 = arith.mulf %32, %62 : vector<32x1xf32>
    %65 = arith.subf %63, %64 : vector<32x1xf32>
    %66 = vector.broadcast %62 : vector<32x1xf32> to vector<32x32xf32>
    %67 = arith.mulf %4, %66 : vector<32x32xf32>
    %68 = vector.broadcast %65 : vector<32x1xf32> to vector<32x32xf32>
    %69 = arith.addf %67, %68 : vector<32x32xf32>
    %cst_38 = arith.constant 0.000000e+00 : f32
    %70 = vector.broadcast %cst_38 : f32 to vector<32x32xf32>
    %71 = arith.maximumf %69, %70 : vector<32x32xf32>
    %c0_39 = arith.constant 0 : index
    %c0_40 = arith.constant 0 : index
    %c0_41 = arith.constant 0 : index
    %72 = vector.load %arg4[%c0_39, %c0_40, %c0_41] : memref<4x32x32xf32, #tpu.memory_space<vmem>>, vector<1x32x32xf32>
    %73 = vector.shape_cast %72 : vector<1x32x32xf32> to vector<32x32xf32>
    %74 = vector.shape_cast %71 : vector<32x32xf32> to vector<1x32x32xf32>
    tpu.vector_store %arg4[%c0_39, %c0_40, %c0_41], %74 {strides = array<i32>} : memref<4x32x32xf32, #tpu.memory_space<vmem>>, vector<1x32x32xf32>,
    %75 = vector.broadcast %62 : vector<32x1xf32> to vector<32x32xf32>
    %76 = arith.mulf %9, %75 : vector<32x32xf32>
    %77 = vector.broadcast %65 : vector<32x1xf32> to vector<32x32xf32>
    %78 = arith.addf %76, %77 : vector<32x32xf32>
    %cst_42 = arith.constant 0.000000e+00 : f32
    %79 = vector.broadcast %cst_42 : f32 to vector<32x32xf32>
    %80 = arith.maximumf %78, %79 : vector<32x32xf32>
    %c1_43 = arith.constant 1 : index
    %c0_44 = arith.constant 0 : index
    %c0_45 = arith.constant 0 : index
    %81 = vector.load %arg4[%c1_43, %c0_44, %c0_45] : memref<4x32x32xf32, #tpu.memory_space<vmem>>, vector<1x32x32xf32>
    %82 = vector.shape_cast %81 : vector<1x32x32xf32> to vector<32x32xf32>
    %83 = vector.shape_cast %80 : vector<32x32xf32> to vector<1x32x32xf32>
    tpu.vector_store %arg4[%c1_43, %c0_44, %c0_45], %83 {strides = array<i32>} : memref<4x32x32xf32, #tpu.memory_space<vmem>>, vector<1x32x32xf32>,
    %84 = vector.broadcast %62 : vector<32x1xf32> to vector<32x32xf32>
    %85 = arith.mulf %14, %84 : vector<32x32xf32>
    %86 = vector.broadcast %65 : vector<32x1xf32> to vector<32x32xf32>
    %87 = arith.addf %85, %86 : vector<32x32xf32>
    %cst_46 = arith.constant 0.000000e+00 : f32
    %88 = vector.broadcast %cst_46 : f32 to vector<32x32xf32>
    %89 = arith.maximumf %87, %88 : vector<32x32xf32>
    %c2_47 = arith.constant 2 : index
    %c0_48 = arith.constant 0 : index
    %c0_49 = arith.constant 0 : index
    %90 = vector.load %arg4[%c2_47, %c0_48, %c0_49] : memref<4x32x32xf32, #tpu.memory_space<vmem>>, vector<1x32x32xf32>
    %91 = vector.shape_cast %90 : vector<1x32x32xf32> to vector<32x32xf32>
    %92 = vector.shape_cast %89 : vector<32x32xf32> to vector<1x32x32xf32>
    tpu.vector_store %arg4[%c2_47, %c0_48, %c0_49], %92 {strides = array<i32>} : memref<4x32x32xf32, #tpu.memory_space<vmem>>, vector<1x32x32xf32>,
    %93 = vector.broadcast %62 : vector<32x1xf32> to vector<32x32xf32>
    %94 = arith.mulf %19, %93 : vector<32x32xf32>
    %95 = vector.broadcast %65 : vector<32x1xf32> to vector<32x32xf32>
    %96 = arith.addf %94, %95 : vector<32x32xf32>
    %cst_50 = arith.constant 0.000000e+00 : f32
    %97 = vector.broadcast %cst_50 : f32 to vector<32x32xf32>
    %98 = arith.maximumf %96, %97 : vector<32x32xf32>
    %c3_51 = arith.constant 3 : index
    %c0_52 = arith.constant 0 : index
    %c0_53 = arith.constant 0 : index
    %99 = vector.load %arg4[%c3_51, %c0_52, %c0_53] : memref<4x32x32xf32, #tpu.memory_space<vmem>>, vector<1x32x32xf32>
    %100 = vector.shape_cast %99 : vector<1x32x32xf32> to vector<32x32xf32>
    %101 = vector.shape_cast %98 : vector<32x32xf32> to vector<1x32x32xf32>
    tpu.vector_store %arg4[%c3_51, %c0_52, %c0_53], %101 {strides = array<i32>} : memref<4x32x32xf32, #tpu.memory_space<vmem>>, vector<1x32x32xf32>,
    return
  }
}

module attributes {stable_mosaic.version = 11 : i64} {
  func.func @_phase_gemm_bn_relu_kernel(%arg0: memref<4x16x128xbf16, #tpu.memory_space<vmem>>, %arg1: memref<4x128x128xbf16, #tpu.memory_space<vmem>>, %arg2: memref<16x1xf32, #tpu.memory_space<vmem>>, %arg3: memref<16x1xf32, #tpu.memory_space<vmem>>, %arg4: memref<4x16x128xf32, #tpu.memory_space<vmem>>) attributes {dimension_semantics = [], scalar_prefetch = 0 : i64, scratch_operands = 0 : i64, tpu.core_type = #tpu.core_type<tc>} {
    %c0 = arith.constant 0 : index
    %c0_0 = arith.constant 0 : index
    %c0_1 = arith.constant 0 : index
    %0 = vector.load %arg1[%c0, %c0_0, %c0_1] : memref<4x128x128xbf16, #tpu.memory_space<vmem>>, vector<1x128x128xbf16>
    %1 = vector.shape_cast %0 : vector<1x128x128xbf16> to vector<128x128xbf16>
    %c0_2 = arith.constant 0 : index
    %c0_3 = arith.constant 0 : index
    %c0_4 = arith.constant 0 : index
    %2 = vector.load %arg0[%c0_2, %c0_3, %c0_4] : memref<4x16x128xbf16, #tpu.memory_space<vmem>>, vector<1x16x128xbf16>
    %3 = vector.shape_cast %2 : vector<1x16x128xbf16> to vector<16x128xbf16>
    %cst = arith.constant dense<0.000000e+00> : vector<16x128xf32>
    %4 = tpu.matmul %3, %1, %cst {dimension_numbers = #tpu.dot_dimension_numbers<[1], [0], [0], [1], [0, 0, 1, 1], [], []>} : vector<16x128xbf16>, vector<128x128xbf16>, vector<16x128xf32> -> vector<16x128xf32>
    %c1 = arith.constant 1 : index
    %c0_5 = arith.constant 0 : index
    %c0_6 = arith.constant 0 : index
    %5 = vector.load %arg1[%c1, %c0_5, %c0_6] : memref<4x128x128xbf16, #tpu.memory_space<vmem>>, vector<1x128x128xbf16>
    %6 = vector.shape_cast %5 : vector<1x128x128xbf16> to vector<128x128xbf16>
    %c1_7 = arith.constant 1 : index
    %c0_8 = arith.constant 0 : index
    %c0_9 = arith.constant 0 : index
    %7 = vector.load %arg0[%c1_7, %c0_8, %c0_9] : memref<4x16x128xbf16, #tpu.memory_space<vmem>>, vector<1x16x128xbf16>
    %8 = vector.shape_cast %7 : vector<1x16x128xbf16> to vector<16x128xbf16>
    %cst_10 = arith.constant dense<0.000000e+00> : vector<16x128xf32>
    %9 = tpu.matmul %8, %6, %cst_10 {dimension_numbers = #tpu.dot_dimension_numbers<[1], [0], [0], [1], [0, 0, 1, 1], [], []>} : vector<16x128xbf16>, vector<128x128xbf16>, vector<16x128xf32> -> vector<16x128xf32>
    %c2 = arith.constant 2 : index
    %c0_11 = arith.constant 0 : index
    %c0_12 = arith.constant 0 : index
    %10 = vector.load %arg1[%c2, %c0_11, %c0_12] : memref<4x128x128xbf16, #tpu.memory_space<vmem>>, vector<1x128x128xbf16>
    %11 = vector.shape_cast %10 : vector<1x128x128xbf16> to vector<128x128xbf16>
    %c2_13 = arith.constant 2 : index
    %c0_14 = arith.constant 0 : index
    %c0_15 = arith.constant 0 : index
    %12 = vector.load %arg0[%c2_13, %c0_14, %c0_15] : memref<4x16x128xbf16, #tpu.memory_space<vmem>>, vector<1x16x128xbf16>
    %13 = vector.shape_cast %12 : vector<1x16x128xbf16> to vector<16x128xbf16>
    %cst_16 = arith.constant dense<0.000000e+00> : vector<16x128xf32>
    %14 = tpu.matmul %13, %11, %cst_16 {dimension_numbers = #tpu.dot_dimension_numbers<[1], [0], [0], [1], [0, 0, 1, 1], [], []>} : vector<16x128xbf16>, vector<128x128xbf16>, vector<16x128xf32> -> vector<16x128xf32>
    %c3 = arith.constant 3 : index
    %c0_17 = arith.constant 0 : index
    %c0_18 = arith.constant 0 : index
    %15 = vector.load %arg1[%c3, %c0_17, %c0_18] : memref<4x128x128xbf16, #tpu.memory_space<vmem>>, vector<1x128x128xbf16>
    %16 = vector.shape_cast %15 : vector<1x128x128xbf16> to vector<128x128xbf16>
    %c3_19 = arith.constant 3 : index
    %c0_20 = arith.constant 0 : index
    %c0_21 = arith.constant 0 : index
    %17 = vector.load %arg0[%c3_19, %c0_20, %c0_21] : memref<4x16x128xbf16, #tpu.memory_space<vmem>>, vector<1x16x128xbf16>
    %18 = vector.shape_cast %17 : vector<1x16x128xbf16> to vector<16x128xbf16>
    %cst_22 = arith.constant dense<0.000000e+00> : vector<16x128xf32>
    %19 = tpu.matmul %18, %16, %cst_22 {dimension_numbers = #tpu.dot_dimension_numbers<[1], [0], [0], [1], [0, 0, 1, 1], [], []>} : vector<16x128xbf16>, vector<128x128xbf16>, vector<16x128xf32> -> vector<16x128xf32>
    %cst_23 = arith.constant dense<0.000000e+00> : vector<16xf32>
    %20 = vector.multi_reduction <add>, %4, %cst_23 [1] : vector<16x128xf32> to vector<16xf32>
    %21 = vector.shape_cast %20 : vector<16xf32> to vector<16x1xf32>
    %cst_24 = arith.constant dense<0.000000e+00> : vector<16xf32>
    %22 = vector.multi_reduction <add>, %9, %cst_24 [1] : vector<16x128xf32> to vector<16xf32>
    %23 = vector.shape_cast %22 : vector<16xf32> to vector<16x1xf32>
    %24 = arith.addf %21, %23 : vector<16x1xf32>
    %cst_25 = arith.constant dense<0.000000e+00> : vector<16xf32>
    %25 = vector.multi_reduction <add>, %14, %cst_25 [1] : vector<16x128xf32> to vector<16xf32>
    %26 = vector.shape_cast %25 : vector<16xf32> to vector<16x1xf32>
    %27 = arith.addf %24, %26 : vector<16x1xf32>
    %cst_26 = arith.constant dense<0.000000e+00> : vector<16xf32>
    %28 = vector.multi_reduction <add>, %19, %cst_26 [1] : vector<16x128xf32> to vector<16xf32>
    %29 = vector.shape_cast %28 : vector<16xf32> to vector<16x1xf32>
    %30 = arith.addf %27, %29 : vector<16x1xf32>
    %cst_27 = arith.constant 0.001953125 : f32
    %31 = vector.broadcast %cst_27 : f32 to vector<16x1xf32>
    %32 = arith.mulf %30, %31 : vector<16x1xf32>
    %33 = vector.broadcast %32 : vector<16x1xf32> to vector<16x128xf32>
    %34 = arith.subf %4, %33 : vector<16x128xf32>
    %35 = arith.mulf %34, %34 : vector<16x128xf32>
    %cst_28 = arith.constant dense<0.000000e+00> : vector<16xf32>
    %36 = vector.multi_reduction <add>, %35, %cst_28 [1] : vector<16x128xf32> to vector<16xf32>
    %37 = vector.shape_cast %36 : vector<16xf32> to vector<16x1xf32>
    %38 = vector.broadcast %32 : vector<16x1xf32> to vector<16x128xf32>
    %39 = arith.subf %9, %38 : vector<16x128xf32>
    %40 = arith.mulf %39, %39 : vector<16x128xf32>
    %cst_29 = arith.constant dense<0.000000e+00> : vector<16xf32>
    %41 = vector.multi_reduction <add>, %40, %cst_29 [1] : vector<16x128xf32> to vector<16xf32>
    %42 = vector.shape_cast %41 : vector<16xf32> to vector<16x1xf32>
    %43 = arith.addf %37, %42 : vector<16x1xf32>
    %44 = vector.broadcast %32 : vector<16x1xf32> to vector<16x128xf32>
    %45 = arith.subf %14, %44 : vector<16x128xf32>
    %46 = arith.mulf %45, %45 : vector<16x128xf32>
    %cst_30 = arith.constant dense<0.000000e+00> : vector<16xf32>
    %47 = vector.multi_reduction <add>, %46, %cst_30 [1] : vector<16x128xf32> to vector<16xf32>
    %48 = vector.shape_cast %47 : vector<16xf32> to vector<16x1xf32>
    %49 = arith.addf %43, %48 : vector<16x1xf32>
    %50 = vector.broadcast %32 : vector<16x1xf32> to vector<16x128xf32>
    %51 = arith.subf %19, %50 : vector<16x128xf32>
    %52 = arith.mulf %51, %51 : vector<16x128xf32>
    %cst_31 = arith.constant dense<0.000000e+00> : vector<16xf32>
    %53 = vector.multi_reduction <add>, %52, %cst_31 [1] : vector<16x128xf32> to vector<16xf32>
    %54 = vector.shape_cast %53 : vector<16xf32> to vector<16x1xf32>
    %55 = arith.addf %49, %54 : vector<16x1xf32>
    %cst_32 = arith.constant 0.001953125 : f32
    %56 = vector.broadcast %cst_32 : f32 to vector<16x1xf32>
    %57 = arith.mulf %55, %56 : vector<16x1xf32>
    %cst_33 = arith.constant 9.99999974E-6 : f32
    %58 = vector.broadcast %cst_33 : f32 to vector<16x1xf32>
    %59 = arith.addf %57, %58 : vector<16x1xf32>
    %60 = math.rsqrt %59 : vector<16x1xf32>
    %c0_34 = arith.constant 0 : index
    %c0_35 = arith.constant 0 : index
    %61 = vector.load %arg2[%c0_34, %c0_35] : memref<16x1xf32, #tpu.memory_space<vmem>>, vector<16x1xf32>
    %62 = arith.mulf %60, %61 : vector<16x1xf32>
    %c0_36 = arith.constant 0 : index
    %c0_37 = arith.constant 0 : index
    %63 = vector.load %arg3[%c0_36, %c0_37] : memref<16x1xf32, #tpu.memory_space<vmem>>, vector<16x1xf32>
    %64 = arith.mulf %32, %62 : vector<16x1xf32>
    %65 = arith.subf %63, %64 : vector<16x1xf32>
    %66 = vector.broadcast %62 : vector<16x1xf32> to vector<16x128xf32>
    %67 = arith.mulf %4, %66 : vector<16x128xf32>
    %68 = vector.broadcast %65 : vector<16x1xf32> to vector<16x128xf32>
    %69 = arith.addf %67, %68 : vector<16x128xf32>
    %cst_38 = arith.constant 0.000000e+00 : f32
    %70 = vector.broadcast %cst_38 : f32 to vector<16x128xf32>
    %71 = arith.maximumf %69, %70 : vector<16x128xf32>
    %c0_39 = arith.constant 0 : index
    %c0_40 = arith.constant 0 : index
    %c0_41 = arith.constant 0 : index
    %72 = vector.load %arg4[%c0_39, %c0_40, %c0_41] : memref<4x16x128xf32, #tpu.memory_space<vmem>>, vector<1x16x128xf32>
    %73 = vector.shape_cast %72 : vector<1x16x128xf32> to vector<16x128xf32>
    %74 = vector.shape_cast %71 : vector<16x128xf32> to vector<1x16x128xf32>
    tpu.vector_store %arg4[%c0_39, %c0_40, %c0_41], %74 {strides = array<i32>} : memref<4x16x128xf32, #tpu.memory_space<vmem>>, vector<1x16x128xf32>,
    %75 = vector.broadcast %62 : vector<16x1xf32> to vector<16x128xf32>
    %76 = arith.mulf %9, %75 : vector<16x128xf32>
    %77 = vector.broadcast %65 : vector<16x1xf32> to vector<16x128xf32>
    %78 = arith.addf %76, %77 : vector<16x128xf32>
    %cst_42 = arith.constant 0.000000e+00 : f32
    %79 = vector.broadcast %cst_42 : f32 to vector<16x128xf32>
    %80 = arith.maximumf %78, %79 : vector<16x128xf32>
    %c1_43 = arith.constant 1 : index
    %c0_44 = arith.constant 0 : index
    %c0_45 = arith.constant 0 : index
    %81 = vector.load %arg4[%c1_43, %c0_44, %c0_45] : memref<4x16x128xf32, #tpu.memory_space<vmem>>, vector<1x16x128xf32>
    %82 = vector.shape_cast %81 : vector<1x16x128xf32> to vector<16x128xf32>
    %83 = vector.shape_cast %80 : vector<16x128xf32> to vector<1x16x128xf32>
    tpu.vector_store %arg4[%c1_43, %c0_44, %c0_45], %83 {strides = array<i32>} : memref<4x16x128xf32, #tpu.memory_space<vmem>>, vector<1x16x128xf32>,
    %84 = vector.broadcast %62 : vector<16x1xf32> to vector<16x128xf32>
    %85 = arith.mulf %14, %84 : vector<16x128xf32>
    %86 = vector.broadcast %65 : vector<16x1xf32> to vector<16x128xf32>
    %87 = arith.addf %85, %86 : vector<16x128xf32>
    %cst_46 = arith.constant 0.000000e+00 : f32
    %88 = vector.broadcast %cst_46 : f32 to vector<16x128xf32>
    %89 = arith.maximumf %87, %88 : vector<16x128xf32>
    %c2_47 = arith.constant 2 : index
    %c0_48 = arith.constant 0 : index
    %c0_49 = arith.constant 0 : index
    %90 = vector.load %arg4[%c2_47, %c0_48, %c0_49] : memref<4x16x128xf32, #tpu.memory_space<vmem>>, vector<1x16x128xf32>
    %91 = vector.shape_cast %90 : vector<1x16x128xf32> to vector<16x128xf32>
    %92 = vector.shape_cast %89 : vector<16x128xf32> to vector<1x16x128xf32>
    tpu.vector_store %arg4[%c2_47, %c0_48, %c0_49], %92 {strides = array<i32>} : memref<4x16x128xf32, #tpu.memory_space<vmem>>, vector<1x16x128xf32>,
    %93 = vector.broadcast %62 : vector<16x1xf32> to vector<16x128xf32>
    %94 = arith.mulf %19, %93 : vector<16x128xf32>
    %95 = vector.broadcast %65 : vector<16x1xf32> to vector<16x128xf32>
    %96 = arith.addf %94, %95 : vector<16x128xf32>
    %cst_50 = arith.constant 0.000000e+00 : f32
    %97 = vector.broadcast %cst_50 : f32 to vector<16x128xf32>
    %98 = arith.maximumf %96, %97 : vector<16x128xf32>
    %c3_51 = arith.constant 3 : index
    %c0_52 = arith.constant 0 : index
    %c0_53 = arith.constant 0 : index
    %99 = vector.load %arg4[%c3_51, %c0_52, %c0_53] : memref<4x16x128xf32, #tpu.memory_space<vmem>>, vector<1x16x128xf32>
    %100 = vector.shape_cast %99 : vector<1x16x128xf32> to vector<16x128xf32>
    %101 = vector.shape_cast %98 : vector<16x128xf32> to vector<1x16x128xf32>
    tpu.vector_store %arg4[%c3_51, %c0_52, %c0_53], %101 {strides = array<i32>} : memref<4x16x128xf32, #tpu.memory_space<vmem>>, vector<1x16x128xf32>,
    return
  }
}

module attributes {stable_mosaic.version = 11 : i64} {
  func.func @_phase_gemm_bn_relu_kernel(%arg0: memref<4x8x64xbf16, #tpu.memory_space<vmem>>, %arg1: memref<4x64x512xbf16, #tpu.memory_space<vmem>>, %arg2: memref<8x1xf32, #tpu.memory_space<vmem>>, %arg3: memref<8x1xf32, #tpu.memory_space<vmem>>, %arg4: memref<4x8x512xf32, #tpu.memory_space<vmem>>) attributes {dimension_semantics = [], scalar_prefetch = 0 : i64, scratch_operands = 0 : i64, tpu.core_type = #tpu.core_type<tc>} {
    %c0 = arith.constant 0 : index
    %c0_0 = arith.constant 0 : index
    %c0_1 = arith.constant 0 : index
    %0 = vector.load %arg1[%c0, %c0_0, %c0_1] : memref<4x64x512xbf16, #tpu.memory_space<vmem>>, vector<1x64x512xbf16>
    %1 = vector.shape_cast %0 : vector<1x64x512xbf16> to vector<64x512xbf16>
    %c0_2 = arith.constant 0 : index
    %c0_3 = arith.constant 0 : index
    %c0_4 = arith.constant 0 : index
    %2 = vector.load %arg0[%c0_2, %c0_3, %c0_4] : memref<4x8x64xbf16, #tpu.memory_space<vmem>>, vector<1x8x64xbf16>
    %3 = vector.shape_cast %2 : vector<1x8x64xbf16> to vector<8x64xbf16>
    %cst = arith.constant dense<0.000000e+00> : vector<8x512xf32>
    %4 = tpu.matmul %3, %1, %cst {dimension_numbers = #tpu.dot_dimension_numbers<[1], [0], [0], [1], [0, 0, 1, 1], [], []>} : vector<8x64xbf16>, vector<64x512xbf16>, vector<8x512xf32> -> vector<8x512xf32>
    %c1 = arith.constant 1 : index
    %c0_5 = arith.constant 0 : index
    %c0_6 = arith.constant 0 : index
    %5 = vector.load %arg1[%c1, %c0_5, %c0_6] : memref<4x64x512xbf16, #tpu.memory_space<vmem>>, vector<1x64x512xbf16>
    %6 = vector.shape_cast %5 : vector<1x64x512xbf16> to vector<64x512xbf16>
    %c1_7 = arith.constant 1 : index
    %c0_8 = arith.constant 0 : index
    %c0_9 = arith.constant 0 : index
    %7 = vector.load %arg0[%c1_7, %c0_8, %c0_9] : memref<4x8x64xbf16, #tpu.memory_space<vmem>>, vector<1x8x64xbf16>
    %8 = vector.shape_cast %7 : vector<1x8x64xbf16> to vector<8x64xbf16>
    %cst_10 = arith.constant dense<0.000000e+00> : vector<8x512xf32>
    %9 = tpu.matmul %8, %6, %cst_10 {dimension_numbers = #tpu.dot_dimension_numbers<[1], [0], [0], [1], [0, 0, 1, 1], [], []>} : vector<8x64xbf16>, vector<64x512xbf16>, vector<8x512xf32> -> vector<8x512xf32>
    %c2 = arith.constant 2 : index
    %c0_11 = arith.constant 0 : index
    %c0_12 = arith.constant 0 : index
    %10 = vector.load %arg1[%c2, %c0_11, %c0_12] : memref<4x64x512xbf16, #tpu.memory_space<vmem>>, vector<1x64x512xbf16>
    %11 = vector.shape_cast %10 : vector<1x64x512xbf16> to vector<64x512xbf16>
    %c2_13 = arith.constant 2 : index
    %c0_14 = arith.constant 0 : index
    %c0_15 = arith.constant 0 : index
    %12 = vector.load %arg0[%c2_13, %c0_14, %c0_15] : memref<4x8x64xbf16, #tpu.memory_space<vmem>>, vector<1x8x64xbf16>
    %13 = vector.shape_cast %12 : vector<1x8x64xbf16> to vector<8x64xbf16>
    %cst_16 = arith.constant dense<0.000000e+00> : vector<8x512xf32>
    %14 = tpu.matmul %13, %11, %cst_16 {dimension_numbers = #tpu.dot_dimension_numbers<[1], [0], [0], [1], [0, 0, 1, 1], [], []>} : vector<8x64xbf16>, vector<64x512xbf16>, vector<8x512xf32> -> vector<8x512xf32>
    %c3 = arith.constant 3 : index
    %c0_17 = arith.constant 0 : index
    %c0_18 = arith.constant 0 : index
    %15 = vector.load %arg1[%c3, %c0_17, %c0_18] : memref<4x64x512xbf16, #tpu.memory_space<vmem>>, vector<1x64x512xbf16>
    %16 = vector.shape_cast %15 : vector<1x64x512xbf16> to vector<64x512xbf16>
    %c3_19 = arith.constant 3 : index
    %c0_20 = arith.constant 0 : index
    %c0_21 = arith.constant 0 : index
    %17 = vector.load %arg0[%c3_19, %c0_20, %c0_21] : memref<4x8x64xbf16, #tpu.memory_space<vmem>>, vector<1x8x64xbf16>
    %18 = vector.shape_cast %17 : vector<1x8x64xbf16> to vector<8x64xbf16>
    %cst_22 = arith.constant dense<0.000000e+00> : vector<8x512xf32>
    %19 = tpu.matmul %18, %16, %cst_22 {dimension_numbers = #tpu.dot_dimension_numbers<[1], [0], [0], [1], [0, 0, 1, 1], [], []>} : vector<8x64xbf16>, vector<64x512xbf16>, vector<8x512xf32> -> vector<8x512xf32>
    %cst_23 = arith.constant dense<0.000000e+00> : vector<8xf32>
    %20 = vector.multi_reduction <add>, %4, %cst_23 [1] : vector<8x512xf32> to vector<8xf32>
    %21 = vector.shape_cast %20 : vector<8xf32> to vector<8x1xf32>
    %cst_24 = arith.constant dense<0.000000e+00> : vector<8xf32>
    %22 = vector.multi_reduction <add>, %9, %cst_24 [1] : vector<8x512xf32> to vector<8xf32>
    %23 = vector.shape_cast %22 : vector<8xf32> to vector<8x1xf32>
    %24 = arith.addf %21, %23 : vector<8x1xf32>
    %cst_25 = arith.constant dense<0.000000e+00> : vector<8xf32>
    %25 = vector.multi_reduction <add>, %14, %cst_25 [1] : vector<8x512xf32> to vector<8xf32>
    %26 = vector.shape_cast %25 : vector<8xf32> to vector<8x1xf32>
    %27 = arith.addf %24, %26 : vector<8x1xf32>
    %cst_26 = arith.constant dense<0.000000e+00> : vector<8xf32>
    %28 = vector.multi_reduction <add>, %19, %cst_26 [1] : vector<8x512xf32> to vector<8xf32>
    %29 = vector.shape_cast %28 : vector<8xf32> to vector<8x1xf32>
    %30 = arith.addf %27, %29 : vector<8x1xf32>
    %cst_27 = arith.constant 4.8828125E-4 : f32
    %31 = vector.broadcast %cst_27 : f32 to vector<8x1xf32>
    %32 = arith.mulf %30, %31 : vector<8x1xf32>
    %33 = vector.broadcast %32 : vector<8x1xf32> to vector<8x512xf32>
    %34 = arith.subf %4, %33 : vector<8x512xf32>
    %35 = arith.mulf %34, %34 : vector<8x512xf32>
    %cst_28 = arith.constant dense<0.000000e+00> : vector<8xf32>
    %36 = vector.multi_reduction <add>, %35, %cst_28 [1] : vector<8x512xf32> to vector<8xf32>
    %37 = vector.shape_cast %36 : vector<8xf32> to vector<8x1xf32>
    %38 = vector.broadcast %32 : vector<8x1xf32> to vector<8x512xf32>
    %39 = arith.subf %9, %38 : vector<8x512xf32>
    %40 = arith.mulf %39, %39 : vector<8x512xf32>
    %cst_29 = arith.constant dense<0.000000e+00> : vector<8xf32>
    %41 = vector.multi_reduction <add>, %40, %cst_29 [1] : vector<8x512xf32> to vector<8xf32>
    %42 = vector.shape_cast %41 : vector<8xf32> to vector<8x1xf32>
    %43 = arith.addf %37, %42 : vector<8x1xf32>
    %44 = vector.broadcast %32 : vector<8x1xf32> to vector<8x512xf32>
    %45 = arith.subf %14, %44 : vector<8x512xf32>
    %46 = arith.mulf %45, %45 : vector<8x512xf32>
    %cst_30 = arith.constant dense<0.000000e+00> : vector<8xf32>
    %47 = vector.multi_reduction <add>, %46, %cst_30 [1] : vector<8x512xf32> to vector<8xf32>
    %48 = vector.shape_cast %47 : vector<8xf32> to vector<8x1xf32>
    %49 = arith.addf %43, %48 : vector<8x1xf32>
    %50 = vector.broadcast %32 : vector<8x1xf32> to vector<8x512xf32>
    %51 = arith.subf %19, %50 : vector<8x512xf32>
    %52 = arith.mulf %51, %51 : vector<8x512xf32>
    %cst_31 = arith.constant dense<0.000000e+00> : vector<8xf32>
    %53 = vector.multi_reduction <add>, %52, %cst_31 [1] : vector<8x512xf32> to vector<8xf32>
    %54 = vector.shape_cast %53 : vector<8xf32> to vector<8x1xf32>
    %55 = arith.addf %49, %54 : vector<8x1xf32>
    %cst_32 = arith.constant 4.8828125E-4 : f32
    %56 = vector.broadcast %cst_32 : f32 to vector<8x1xf32>
    %57 = arith.mulf %55, %56 : vector<8x1xf32>
    %cst_33 = arith.constant 9.99999974E-6 : f32
    %58 = vector.broadcast %cst_33 : f32 to vector<8x1xf32>
    %59 = arith.addf %57, %58 : vector<8x1xf32>
    %60 = math.rsqrt %59 : vector<8x1xf32>
    %c0_34 = arith.constant 0 : index
    %c0_35 = arith.constant 0 : index
    %61 = vector.load %arg2[%c0_34, %c0_35] : memref<8x1xf32, #tpu.memory_space<vmem>>, vector<8x1xf32>
    %62 = arith.mulf %60, %61 : vector<8x1xf32>
    %c0_36 = arith.constant 0 : index
    %c0_37 = arith.constant 0 : index
    %63 = vector.load %arg3[%c0_36, %c0_37] : memref<8x1xf32, #tpu.memory_space<vmem>>, vector<8x1xf32>
    %64 = arith.mulf %32, %62 : vector<8x1xf32>
    %65 = arith.subf %63, %64 : vector<8x1xf32>
    %66 = vector.broadcast %62 : vector<8x1xf32> to vector<8x512xf32>
    %67 = arith.mulf %4, %66 : vector<8x512xf32>
    %68 = vector.broadcast %65 : vector<8x1xf32> to vector<8x512xf32>
    %69 = arith.addf %67, %68 : vector<8x512xf32>
    %cst_38 = arith.constant 0.000000e+00 : f32
    %70 = vector.broadcast %cst_38 : f32 to vector<8x512xf32>
    %71 = arith.maximumf %69, %70 : vector<8x512xf32>
    %c0_39 = arith.constant 0 : index
    %c0_40 = arith.constant 0 : index
    %c0_41 = arith.constant 0 : index
    %72 = vector.load %arg4[%c0_39, %c0_40, %c0_41] : memref<4x8x512xf32, #tpu.memory_space<vmem>>, vector<1x8x512xf32>
    %73 = vector.shape_cast %72 : vector<1x8x512xf32> to vector<8x512xf32>
    %74 = vector.shape_cast %71 : vector<8x512xf32> to vector<1x8x512xf32>
    tpu.vector_store %arg4[%c0_39, %c0_40, %c0_41], %74 {strides = array<i32>} : memref<4x8x512xf32, #tpu.memory_space<vmem>>, vector<1x8x512xf32>,
    %75 = vector.broadcast %62 : vector<8x1xf32> to vector<8x512xf32>
    %76 = arith.mulf %9, %75 : vector<8x512xf32>
    %77 = vector.broadcast %65 : vector<8x1xf32> to vector<8x512xf32>
    %78 = arith.addf %76, %77 : vector<8x512xf32>
    %cst_42 = arith.constant 0.000000e+00 : f32
    %79 = vector.broadcast %cst_42 : f32 to vector<8x512xf32>
    %80 = arith.maximumf %78, %79 : vector<8x512xf32>
    %c1_43 = arith.constant 1 : index
    %c0_44 = arith.constant 0 : index
    %c0_45 = arith.constant 0 : index
    %81 = vector.load %arg4[%c1_43, %c0_44, %c0_45] : memref<4x8x512xf32, #tpu.memory_space<vmem>>, vector<1x8x512xf32>
    %82 = vector.shape_cast %81 : vector<1x8x512xf32> to vector<8x512xf32>
    %83 = vector.shape_cast %80 : vector<8x512xf32> to vector<1x8x512xf32>
    tpu.vector_store %arg4[%c1_43, %c0_44, %c0_45], %83 {strides = array<i32>} : memref<4x8x512xf32, #tpu.memory_space<vmem>>, vector<1x8x512xf32>,
    %84 = vector.broadcast %62 : vector<8x1xf32> to vector<8x512xf32>
    %85 = arith.mulf %14, %84 : vector<8x512xf32>
    %86 = vector.broadcast %65 : vector<8x1xf32> to vector<8x512xf32>
    %87 = arith.addf %85, %86 : vector<8x512xf32>
    %cst_46 = arith.constant 0.000000e+00 : f32
    %88 = vector.broadcast %cst_46 : f32 to vector<8x512xf32>
    %89 = arith.maximumf %87, %88 : vector<8x512xf32>
    %c2_47 = arith.constant 2 : index
    %c0_48 = arith.constant 0 : index
    %c0_49 = arith.constant 0 : index
    %90 = vector.load %arg4[%c2_47, %c0_48, %c0_49] : memref<4x8x512xf32, #tpu.memory_space<vmem>>, vector<1x8x512xf32>
    %91 = vector.shape_cast %90 : vector<1x8x512xf32> to vector<8x512xf32>
    %92 = vector.shape_cast %89 : vector<8x512xf32> to vector<1x8x512xf32>
    tpu.vector_store %arg4[%c2_47, %c0_48, %c0_49], %92 {strides = array<i32>} : memref<4x8x512xf32, #tpu.memory_space<vmem>>, vector<1x8x512xf32>,
    %93 = vector.broadcast %62 : vector<8x1xf32> to vector<8x512xf32>
    %94 = arith.mulf %19, %93 : vector<8x512xf32>
    %95 = vector.broadcast %65 : vector<8x1xf32> to vector<8x512xf32>
    %96 = arith.addf %94, %95 : vector<8x512xf32>
    %cst_50 = arith.constant 0.000000e+00 : f32
    %97 = vector.broadcast %cst_50 : f32 to vector<8x512xf32>
    %98 = arith.maximumf %96, %97 : vector<8x512xf32>
    %c3_51 = arith.constant 3 : index
    %c0_52 = arith.constant 0 : index
    %c0_53 = arith.constant 0 : index
    %99 = vector.load %arg4[%c3_51, %c0_52, %c0_53] : memref<4x8x512xf32, #tpu.memory_space<vmem>>, vector<1x8x512xf32>
    %100 = vector.shape_cast %99 : vector<1x8x512xf32> to vector<8x512xf32>
    %101 = vector.shape_cast %98 : vector<8x512xf32> to vector<1x8x512xf32>
    tpu.vector_store %arg4[%c3_51, %c0_52, %c0_53], %101 {strides = array<i32>} : memref<4x8x512xf32, #tpu.memory_space<vmem>>, vector<1x8x512xf32>,
    return
  }
}

module attributes {stable_mosaic.version = 11 : i64} {
  func.func @_phase_gemm_tanh_kernel(%arg0: i32, %arg1: memref<4x3x32xbf16, #tpu.memory_space<vmem>>, %arg2: memref<4x32x1024xbf16, #tpu.memory_space<vmem>>, %arg3: memref<4x3x1024xf32, #tpu.memory_space<vmem>>) attributes {dimension_semantics = [#tpu.dimension_semantics<parallel>], iteration_bounds = array<i64: 2>, scalar_prefetch = 0 : i64, scratch_operands = 0 : i64, tpu.core_type = #tpu.core_type<tc>, window_params = [{pipeline_mode = #tpu.pipeline_mode<synchronous>, transform_indices = @transform_0, window_bounds = array<i64: 4, 3, 32>}, {transform_indices = @transform_1, window_bounds = array<i64: 4, 32, 1024>}, {transform_indices = @transform_2, window_bounds = array<i64: 4, 3, 1024>}]} {
    %c0 = arith.constant 0 : index
    %c0_0 = arith.constant 0 : index
    %c0_1 = arith.constant 0 : index
    %0 = vector.load %arg1[%c0, %c0_0, %c0_1] : memref<4x3x32xbf16, #tpu.memory_space<vmem>>, vector<1x3x32xbf16>
    %1 = vector.shape_cast %0 : vector<1x3x32xbf16> to vector<3x32xbf16>
    %c0_2 = arith.constant 0 : index
    %c0_3 = arith.constant 0 : index
    %c0_4 = arith.constant 0 : index
    %2 = vector.load %arg2[%c0_2, %c0_3, %c0_4] : memref<4x32x1024xbf16, #tpu.memory_space<vmem>>, vector<1x32x1024xbf16>
    %3 = vector.shape_cast %2 : vector<1x32x1024xbf16> to vector<32x1024xbf16>
    %cst = arith.constant dense<0.000000e+00> : vector<3x1024xf32>
    %4 = tpu.matmul %1, %3, %cst {dimension_numbers = #tpu.dot_dimension_numbers<[1], [0], [0], [1], [0, 0, 1, 1], [], []>} : vector<3x32xbf16>, vector<32x1024xbf16>, vector<3x1024xf32> -> vector<3x1024xf32>
    %5 = math.tanh %4 : vector<3x1024xf32>
    %c0_5 = arith.constant 0 : index
    %c0_6 = arith.constant 0 : index
    %c0_7 = arith.constant 0 : index
    %6 = vector.load %arg3[%c0_5, %c0_6, %c0_7] : memref<4x3x1024xf32, #tpu.memory_space<vmem>>, vector<1x3x1024xf32>
    %7 = vector.shape_cast %6 : vector<1x3x1024xf32> to vector<3x1024xf32>
    %8 = vector.shape_cast %5 : vector<3x1024xf32> to vector<1x3x1024xf32>
    tpu.vector_store %arg3[%c0_5, %c0_6, %c0_7], %8 {strides = array<i32>} : memref<4x3x1024xf32, #tpu.memory_space<vmem>>, vector<1x3x1024xf32>,
    %c1 = arith.constant 1 : index
    %c0_8 = arith.constant 0 : index
    %c0_9 = arith.constant 0 : index
    %9 = vector.load %arg1[%c1, %c0_8, %c0_9] : memref<4x3x32xbf16, #tpu.memory_space<vmem>>, vector<1x3x32xbf16>
    %10 = vector.shape_cast %9 : vector<1x3x32xbf16> to vector<3x32xbf16>
    %c1_10 = arith.constant 1 : index
    %c0_11 = arith.constant 0 : index
    %c0_12 = arith.constant 0 : index
    %11 = vector.load %arg2[%c1_10, %c0_11, %c0_12] : memref<4x32x1024xbf16, #tpu.memory_space<vmem>>, vector<1x32x1024xbf16>
    %12 = vector.shape_cast %11 : vector<1x32x1024xbf16> to vector<32x1024xbf16>
    %cst_13 = arith.constant dense<0.000000e+00> : vector<3x1024xf32>
    %13 = tpu.matmul %10, %12, %cst_13 {dimension_numbers = #tpu.dot_dimension_numbers<[1], [0], [0], [1], [0, 0, 1, 1], [], []>} : vector<3x32xbf16>, vector<32x1024xbf16>, vector<3x1024xf32> -> vector<3x1024xf32>
    %14 = math.tanh %13 : vector<3x1024xf32>
    %c1_14 = arith.constant 1 : index
    %c0_15 = arith.constant 0 : index
    %c0_16 = arith.constant 0 : index
    %15 = vector.load %arg3[%c1_14, %c0_15, %c0_16] : memref<4x3x1024xf32, #tpu.memory_space<vmem>>, vector<1x3x1024xf32>
    %16 = vector.shape_cast %15 : vector<1x3x1024xf32> to vector<3x1024xf32>
    %17 = vector.shape_cast %14 : vector<3x1024xf32> to vector<1x3x1024xf32>
    tpu.vector_store %arg3[%c1_14, %c0_15, %c0_16], %17 {strides = array<i32>} : memref<4x3x1024xf32, #tpu.memory_space<vmem>>, vector<1x3x1024xf32>,
    %c2 = arith.constant 2 : index
    %c0_17 = arith.constant 0 : index
    %c0_18 = arith.constant 0 : index
    %18 = vector.load %arg1[%c2, %c0_17, %c0_18] : memref<4x3x32xbf16, #tpu.memory_space<vmem>>, vector<1x3x32xbf16>
    %19 = vector.shape_cast %18 : vector<1x3x32xbf16> to vector<3x32xbf16>
    %c2_19 = arith.constant 2 : index
    %c0_20 = arith.constant 0 : index
    %c0_21 = arith.constant 0 : index
    %20 = vector.load %arg2[%c2_19, %c0_20, %c0_21] : memref<4x32x1024xbf16, #tpu.memory_space<vmem>>, vector<1x32x1024xbf16>
    %21 = vector.shape_cast %20 : vector<1x32x1024xbf16> to vector<32x1024xbf16>
    %cst_22 = arith.constant dense<0.000000e+00> : vector<3x1024xf32>
    %22 = tpu.matmul %19, %21, %cst_22 {dimension_numbers = #tpu.dot_dimension_numbers<[1], [0], [0], [1], [0, 0, 1, 1], [], []>} : vector<3x32xbf16>, vector<32x1024xbf16>, vector<3x1024xf32> -> vector<3x1024xf32>
    %23 = math.tanh %22 : vector<3x1024xf32>
    %c2_23 = arith.constant 2 : index
    %c0_24 = arith.constant 0 : index
    %c0_25 = arith.constant 0 : index
    %24 = vector.load %arg3[%c2_23, %c0_24, %c0_25] : memref<4x3x1024xf32, #tpu.memory_space<vmem>>, vector<1x3x1024xf32>
    %25 = vector.shape_cast %24 : vector<1x3x1024xf32> to vector<3x1024xf32>
    %26 = vector.shape_cast %23 : vector<3x1024xf32> to vector<1x3x1024xf32>
    tpu.vector_store %arg3[%c2_23, %c0_24, %c0_25], %26 {strides = array<i32>} : memref<4x3x1024xf32, #tpu.memory_space<vmem>>, vector<1x3x1024xf32>,
    %c3 = arith.constant 3 : index
    %c0_26 = arith.constant 0 : index
    %c0_27 = arith.constant 0 : index
    %27 = vector.load %arg1[%c3, %c0_26, %c0_27] : memref<4x3x32xbf16, #tpu.memory_space<vmem>>, vector<1x3x32xbf16>
    %28 = vector.shape_cast %27 : vector<1x3x32xbf16> to vector<3x32xbf16>
    %c3_28 = arith.constant 3 : index
    %c0_29 = arith.constant 0 : index
    %c0_30 = arith.constant 0 : index
    %29 = vector.load %arg2[%c3_28, %c0_29, %c0_30] : memref<4x32x1024xbf16, #tpu.memory_space<vmem>>, vector<1x32x1024xbf16>
    %30 = vector.shape_cast %29 : vector<1x32x1024xbf16> to vector<32x1024xbf16>
    %cst_31 = arith.constant dense<0.000000e+00> : vector<3x1024xf32>
    %31 = tpu.matmul %28, %30, %cst_31 {dimension_numbers = #tpu.dot_dimension_numbers<[1], [0], [0], [1], [0, 0, 1, 1], [], []>} : vector<3x32xbf16>, vector<32x1024xbf16>, vector<3x1024xf32> -> vector<3x1024xf32>
    %32 = math.tanh %31 : vector<3x1024xf32>
    %c3_32 = arith.constant 3 : index
    %c0_33 = arith.constant 0 : index
    %c0_34 = arith.constant 0 : index
    %33 = vector.load %arg3[%c3_32, %c0_33, %c0_34] : memref<4x3x1024xf32, #tpu.memory_space<vmem>>, vector<1x3x1024xf32>
    %34 = vector.shape_cast %33 : vector<1x3x1024xf32> to vector<3x1024xf32>
    %35 = vector.shape_cast %32 : vector<3x1024xf32> to vector<1x3x1024xf32>
    tpu.vector_store %arg3[%c3_32, %c0_33, %c0_34], %35 {strides = array<i32>} : memref<4x3x1024xf32, #tpu.memory_space<vmem>>, vector<1x3x1024xf32>,
    return
  }
  func.func @transform_0(%arg0: i32) -> (i32, i32, i32) {
    %c0_i32 = arith.constant 0 : i32
    %c0_i32_0 = arith.constant 0 : i32
    %c0_i32_1 = arith.constant 0 : i32
    %c0_i32_2 = arith.constant 0 : i32
    return %c0_i32, %c0_i32_0, %c0_i32_1 : i32, i32, i32
  }
  func.func @transform_1(%arg0: i32) -> (i32, i32, i32) {
    %c0_i32 = arith.constant 0 : i32
    %c0_i32_0 = arith.constant 0 : i32
    %c0_i32_1 = arith.constant 0 : i32
    return %c0_i32, %c0_i32_0, %arg0 : i32, i32, i32
  }
  func.func @transform_2(%arg0: i32) -> (i32, i32, i32) {
    %c0_i32 = arith.constant 0 : i32
    %c0_i32_0 = arith.constant 0 : i32
    %c0_i32_1 = arith.constant 0 : i32
    return %c0_i32, %c0_i32_0, %arg0 : i32, i32, i32
  }
}

</mosaic_0001>

<bundles_post_ra>
// kernel: generator_forward.5
= control target key start
LH: loop header
LB: loop body
LE: loop exit
PB: predicated region body
PF: predicated region fallthrough
CT: control target
= control target key end

     0   :  { %vm62_vm0 = vcmask 261120   ;;  %vm1730_vm1 = vcmask 15360   ;;  %s6901_s1 = inlined_call_operand.vmem [shape: bf16[1,32,2], index: 1, kind: input, shape index: {}]   ;;  %s6902_s0 = inlined_call_operand.vmem [shape: bf16[16,64,32], index: 0, kind: input, shape index: {}]   ;;  %s6903_s2 = inlined_call_operand.vmem [shape: f32[64,1], index: 2, kind: input, shape index: {}]   ;;  %s6904_s3 = inlined_call_operand.vmem [shape: f32[64,1], index: 3, kind: input, shape index: {}]   ;;  %s6905_s4 = inlined_call_operand.vmem [shape: f32[16,64,2], index: 4, kind: output, shape index: {}]  }
   0x1   :  { %v4450_v0 = vld [vmem:[%s6901_s1] sm:$0xff]   ;;  %v4455_v1 = vld [vmem:[%s6901_s1 + $0x8] sm:$0xff]   ;;  %v4345_v6 = vld [vmem:[%s6902_s0 + $0x10] sm:$0xff]  }
   0x2   :  { %4144 = vmatprep.subr.bf16.mxu0 %v4450_v0  ;;  %4156 = vmatprep.subr.bf16.mxu1 %v4450_v0  ;;  %v4341_v2 = vld [vmem:[%s6902_s0] sm:$0xff]   ;;  %v4343_v4 = vld [vmem:[%s6902_s0 + $0x8] sm:$0xff]   ;;  %v4347_v7 = vld [vmem:[%s6902_s0 + $0x30] sm:$0xff]  }
   0x3   :  { %4145 = vmatpush3.bf16.msra.mxu0 %v4450_v0  ;;  %4157 = vmatpush3.bf16.msra.mxu1 %v4450_v0  ;;  %v4342_v3 = vld [vmem:[%s6902_s0 + $0x20] sm:$0xff]   ;;  %v4344_v5 = vld [vmem:[%s6902_s0 + $0x28] sm:$0xff]   ;;  %v4346_v8 = vld [vmem:[%s6902_s0 + $0x18] sm:$0xff]  }
   0x4   :  { %4146 = vmatprep.subr.bf16.mxu0 %v4455_v1  ;;  %4158 = vmatprep.subr.bf16.mxu1 %v4455_v1  ;;  %v4348_v9 = vld [vmem:[%s6902_s0 + $0x38] sm:$0xff]   ;;  %v4349_v10 = vld [vmem:[%s6902_s0 + $0x40] sm:$0xff]   ;;  %v4350_v12 = vld [vmem:[%s6902_s0 + $0x48] sm:$0xff]  }
   0x5   :  { %4148 = vmatprep.mubr.msk.bf16.mxu0 %vm62_vm0, %v4341_v2  ;;  %4160 = vmatprep.mubr.msk.bf16.mxu1 %vm62_vm0, %v4342_v3  ;;  %v4351_v11 = vld [vmem:[%s6902_s0 + $0x60] sm:$0xff]   ;;  %v4352_v13 = vld [vmem:[%s6902_s0 + $0x68] sm:$0xff]   ;;  %v4353_v14 = vld [vmem:[%s6902_s0 + $0x50] sm:$0xff]  }
   0x6   :  { %v4355_v15 = vld [vmem:[%s6902_s0 + $0x70] sm:$0xff]   ;;  %v4354_v16 = vld [vmem:[%s6902_s0 + $0x58] sm:$0xff]   ;;  %v4357_v18 = vld [vmem:[%s6902_s0 + $0x80] sm:$0xff]  }
   0x7   :  { %4147 = vmatpush3.bf16.msra.mxu0 %v4455_v1  ;;  %4159 = vmatpush3.bf16.msra.mxu1 %v4455_v1  ;;  %v4356_v17 = vld [vmem:[%s6902_s0 + $0x78] sm:$0xff]   ;;  %v4359_v19 = vld [vmem:[%s6902_s0 + $0xa0] sm:$0xff]   ;;  %v4358_v20 = vld [vmem:[%s6902_s0 + $0x88] sm:$0xff]  }
   0x8   :  { %4168 = vmatprep.subr.bf16.mxu0 %v4450_v0  ;;  %4180 = vmatprep.subr.bf16.mxu1 %v4450_v0  ;;  %v4360_v21 = vld [vmem:[%s6902_s0 + $0xa8] sm:$0xff]   ;;  %v4361_v22 = vld [vmem:[%s6902_s0 + $0x90] sm:$0xff]   ;;  %v4362_v24 = vld [vmem:[%s6902_s0 + $0x98] sm:$0xff]  }
   0x9   :  { %v4363_v23 = vld [vmem:[%s6902_s0 + $0xb0] sm:$0xff]   ;;  %v4364_v25 = vld [vmem:[%s6902_s0 + $0xb8] sm:$0xff]   ;;  %v4365_v26 = vld [vmem:[%s6902_s0 + $0xc0] sm:$0xff]  }
   0xa   :  { %4149 = vmatmul.mubr.msk.bf16.vlgmr.msra.gmra.mrb[0].mxu0 %vm62_vm0, %v4343_v4  ;;  %4161 = vmatmul.mubr.msk.bf16.vlgmr.msra.gmra.mrb[0].mxu1 %vm62_vm0, %v4344_v5  ;;  %v4367_v27 = vld [vmem:[%s6902_s0 + $0xe0] sm:$0xff]   ;;  %v4366_v28 = vld [vmem:[%s6902_s0 + $0xc8] sm:$0xff]   ;;  %v4369_v30 = vld [vmem:[%s6902_s0 + $0xd0] sm:$0xff]  }
   0xb   :  { %4152 = vmatprep.mubr.msk.bf16.mxu0 %vm62_vm0, %v4345_v6  ;;  %4164 = vmatprep.mubr.msk.bf16.mxu1 %vm62_vm0, %v4347_v7  ;;  %v4368_v29 = vld [vmem:[%s6902_s0 + $0xe8] sm:$0xff]   ;;  %v4371_v31 = vld [vmem:[%s6902_s0 + $0xf0] sm:$0xff]   ;;  %v4370_v32 = vld [vmem:[%s6902_s0 + $0xd8] sm:$0xff]  }
   0xc   :  { %4169 = vmatpush3.bf16.msra.mxu0 %v4450_v0  ;;  %4181 = vmatpush3.bf16.msra.mxu1 %v4450_v0  ;;  %v4372_v33 = vld [vmem:[%s6902_s0 + $0xf8] sm:$0xff]   ;;  %v4373_v34 = vld [vmem:[%s6902_s0 + $0x100] sm:$0xff]   ;;  %v4374_v36 = vld [vmem:[%s6902_s0 + $0x108] sm:$0xff]  }
   0xd   :  { %4170 = vmatprep.subr.bf16.mxu0 %v4455_v1  ;;  %4182 = vmatprep.subr.bf16.mxu1 %v4455_v1  ;;  %v4375_v35 = vld [vmem:[%s6902_s0 + $0x120] sm:$0xff]   ;;  %v4376_v37 = vld [vmem:[%s6902_s0 + $0x128] sm:$0xff]   ;;  %v4377_v38 = vld [vmem:[%s6902_s0 + $0x110] sm:$0xff]  }
   0xe   :  { %v4379_v39 = vld [vmem:[%s6902_s0 + $0x130] sm:$0xff]   ;;  %v4378_v40 = vld [vmem:[%s6902_s0 + $0x118] sm:$0xff]   ;;  %v4381_v42 = vld [vmem:[%s6902_s0 + $0x140] sm:$0xff]  }
   0xf   :  { %v4380_v41 = vld [vmem:[%s6902_s0 + $0x138] sm:$0xff]   ;;  %v4383_v43 = vld [vmem:[%s6902_s0 + $0x160] sm:$0xff]   ;;  %v4382_v44 = vld [vmem:[%s6902_s0 + $0x148] sm:$0xff]  }
  0x10   :  { %4171 = vmatpush3.bf16.msra.mxu0 %v4455_v1  ;;  %4183 = vmatpush3.bf16.msra.mxu1 %v4455_v1  ;;  %v4384_v45 = vld [vmem:[%s6902_s0 + $0x168] sm:$0xff]   ;;  %v4385_v46 = vld [vmem:[%s6902_s0 + $0x150] sm:$0xff]   ;;  %v4386_v48 = vld [vmem:[%s6902_s0 + $0x158] sm:$0xff]  }
  0x11   :  { %4192 = vmatprep.subr.bf16.mxu0 %v4450_v0  ;;  %4204 = vmatprep.subr.bf16.mxu1 %v4450_v0  ;;  %v4387_v47 = vld [vmem:[%s6902_s0 + $0x170] sm:$0xff]   ;;  %v4388_v49 = vld [vmem:[%s6902_s0 + $0x178] sm:$0xff]   ;;  %v4389_v50 = vld [vmem:[%s6902_s0 + $0x180] sm:$0xff]  }
  0x12   :  { %4153 = vmatmul.mubr.msk.bf16.gmra.mrb[4].mxu0 %vm62_vm0, %v4346_v8  ;;  %4165 = vmatmul.mubr.msk.bf16.gmra.mrb[4].mxu1 %vm62_vm0, %v4348_v9  ;;  %v4391_v51 = vld [vmem:[%s6902_s0 + $0x1a0] sm:$0xff]   ;;  %v4390_v52 = vld [vmem:[%s6902_s0 + $0x188] sm:$0xff]   ;;  %v4393_v54 = vld [vmem:[%s6902_s0 + $0x190] sm:$0xff]  }
  0x13   :  { %4172 = vmatprep.mubr.msk.bf16.mxu0 %vm62_vm0, %v4349_v10  ;;  %4184 = vmatprep.mubr.msk.bf16.mxu1 %vm62_vm0, %v4351_v11  ;;  %v4392_v53 = vld [vmem:[%s6902_s0 + $0x1a8] sm:$0xff]   ;;  %v4395_v55 = vld [vmem:[%s6902_s0 + $0x1b0] sm:$0xff]   ;;  %v4394_v56 = vld [vmem:[%s6902_s0 + $0x198] sm:$0xff]  }
  0x14   :  { %v4396_v57 = vld [vmem:[%s6902_s0 + $0x1b8] sm:$0xff]   ;;  %v4397_v58 = vld [vmem:[%s6902_s0 + $0x1c0] sm:$0xff]   ;;  %v4398_v60 = vld [vmem:[%s6902_s0 + $0x1c8] sm:$0xff]  }
  0x15   :  { %v4399_v59 = vld [vmem:[%s6902_s0 + $0x1e0] sm:$0xff]   ;;  %v4400_v61 = vld [vmem:[%s6902_s0 + $0x1e8] sm:$0xff]   ;;  %v4401_v62 = vld [vmem:[%s6902_s0 + $0x1d0] sm:$0xff]  }
  0x16   :  { %v4403_v63 = vld [vmem:[%s6902_s0 + $0x1f0] sm:$0xff]  }
  0x1a   :  { %4173 = vmatmul.mubr.msk.bf16.vlgmr.msra.gmra.mrb[8].mxu0 %vm62_vm0, %v4350_v12  ;;  %4185 = vmatmul.mubr.msk.bf16.vlgmr.msra.gmra.mrb[8].mxu1 %vm62_vm0, %v4352_v13 }
  0x1b   :  { %4176 = vmatprep.mubr.msk.bf16.mxu0 %vm62_vm0, %v4353_v14  ;;  %4188 = vmatprep.mubr.msk.bf16.mxu1 %vm62_vm0, %v4355_v15 }
  0x1c   :  { %4193 = vmatpush3.bf16.msra.mxu0 %v4450_v0  ;;  %4205 = vmatpush3.bf16.msra.mxu1 %v4450_v0 }
  0x1d   :  { %4194 = vmatprep.subr.bf16.mxu0 %v4455_v1  ;;  %4206 = vmatprep.subr.bf16.mxu1 %v4455_v1 }
  0x20   :  { %4195 = vmatpush3.bf16.msra.mxu0 %v4455_v1  ;;  %4207 = vmatpush3.bf16.msra.mxu1 %v4455_v1 }
  0x21   :  { %4216 = vmatprep.subr.bf16.mxu0 %v4450_v0  ;;  %4228 = vmatprep.subr.bf16.mxu1 %v4450_v0 }
  0x22   :  { %4177 = vmatmul.mubr.msk.bf16.gmra.mrb[12].mxu0 %vm62_vm0, %v4354_v16  ;;  %4189 = vmatmul.mubr.msk.bf16.gmra.mrb[12].mxu1 %vm62_vm0, %v4356_v17 }
  0x23   :  { %4196 = vmatprep.mubr.msk.bf16.mxu0 %vm62_vm0, %v4357_v18  ;;  %4208 = vmatprep.mubr.msk.bf16.mxu1 %vm62_vm0, %v4359_v19 }
  0x2a   :  { %4197 = vmatmul.mubr.msk.bf16.vlgmr.msra.gmra.mrb[16].mxu0 %vm62_vm0, %v4358_v20  ;;  %4209 = vmatmul.mubr.msk.bf16.vlgmr.msra.gmra.mrb[16].mxu1 %vm62_vm0, %v4360_v21 }
  0x2b   :  { %4200 = vmatprep.mubr.msk.bf16.mxu0 %vm62_vm0, %v4361_v22  ;;  %4212 = vmatprep.mubr.msk.bf16.mxu1 %vm62_vm0, %v4363_v23 }
  0x2c   :  { %4217 = vmatpush3.bf16.msra.mxu0 %v4450_v0  ;;  %4229 = vmatpush3.bf16.msra.mxu1 %v4450_v0 }
  0x2d   :  { %4218 = vmatprep.subr.bf16.mxu0 %v4455_v1  ;;  %4230 = vmatprep.subr.bf16.mxu1 %v4455_v1 }
  0x30   :  { %4219 = vmatpush3.bf16.msra.mxu0 %v4455_v1  ;;  %4231 = vmatpush3.bf16.msra.mxu1 %v4455_v1 }
  0x31   :  { %4240 = vmatprep.subr.bf16.mxu0 %v4450_v0  ;;  %4252 = vmatprep.subr.bf16.mxu1 %v4450_v0 }
  0x32   :  { %4201 = vmatmul.mubr.msk.bf16.gmra.mrb[20].mxu0 %vm62_vm0, %v4362_v24  ;;  %4213 = vmatmul.mubr.msk.bf16.gmra.mrb[20].mxu1 %vm62_vm0, %v4364_v25 }
  0x33   :  { %4220 = vmatprep.mubr.msk.bf16.mxu0 %vm62_vm0, %v4365_v26  ;;  %4232 = vmatprep.mubr.msk.bf16.mxu1 %vm62_vm0, %v4367_v27 }
  0x3a   :  { %4221 = vmatmul.mubr.msk.bf16.vlgmr.msra.gmra.mrb[24].mxu0 %vm62_vm0, %v4366_v28  ;;  %4233 = vmatmul.mubr.msk.bf16.vlgmr.msra.gmra.mrb[24].mxu1 %vm62_vm0, %v4368_v29 }
  0x3b   :  { %4224 = vmatprep.mubr.msk.bf16.mxu0 %vm62_vm0, %v4369_v30  ;;  %4236 = vmatprep.mubr.msk.bf16.mxu1 %vm62_vm0, %v4371_v31 }
  0x3c   :  { %4241 = vmatpush3.bf16.msra.mxu0 %v4450_v0  ;;  %4253 = vmatpush3.bf16.msra.mxu1 %v4450_v0 }
  0x3d   :  { %4242 = vmatprep.subr.bf16.mxu0 %v4455_v1  ;;  %4254 = vmatprep.subr.bf16.mxu1 %v4455_v1 }
  0x40   :  { %4243 = vmatpush3.bf16.msra.mxu0 %v4455_v1  ;;  %4255 = vmatpush3.bf16.msra.mxu1 %v4455_v1 }
  0x41   :  { %4264 = vmatprep.subr.bf16.mxu0 %v4450_v0  ;;  %4276 = vmatprep.subr.bf16.mxu1 %v4450_v0 }
  0x42   :  { %4225 = vmatmul.mubr.msk.bf16.gmra.mrb[28].mxu0 %vm62_vm0, %v4370_v32  ;;  %4237 = vmatmul.mubr.msk.bf16.gmra.mrb[28].mxu1 %vm62_vm0, %v4372_v33 }
  0x43   :  { %4244 = vmatprep.mubr.msk.bf16.mxu0 %vm62_vm0, %v4373_v34  ;;  %4256 = vmatprep.mubr.msk.bf16.mxu1 %vm62_vm0, %v4375_v35 }
  0x4a   :  { %4245 = vmatmul.mubr.msk.bf16.vlgmr.msra.gmra.mrb[32].mxu0 %vm62_vm0, %v4374_v36  ;;  %4257 = vmatmul.mubr.msk.bf16.vlgmr.msra.gmra.mrb[32].mxu1 %vm62_vm0, %v4376_v37 }
  0x4b   :  { %4248 = vmatprep.mubr.msk.bf16.mxu0 %vm62_vm0, %v4377_v38  ;;  %4260 = vmatprep.mubr.msk.bf16.mxu1 %vm62_vm0, %v4379_v39 }
  0x4c   :  { %4265 = vmatpush3.bf16.msra.mxu0 %v4450_v0  ;;  %4277 = vmatpush3.bf16.msra.mxu1 %v4450_v0 }
  0x4d   :  { %4266 = vmatprep.subr.bf16.mxu0 %v4455_v1  ;;  %4278 = vmatprep.subr.bf16.mxu1 %v4455_v1 }
  0x50   :  { %4267 = vmatpush3.bf16.msra.mxu0 %v4455_v1  ;;  %4279 = vmatpush3.bf16.msra.mxu1 %v4455_v1 }
  0x51   :  { %4288 = vmatprep.subr.bf16.mxu0 %v4450_v0  ;;  %4300 = vmatprep.subr.bf16.mxu1 %v4450_v0 }
  0x52   :  { %4249 = vmatmul.mubr.msk.bf16.gmra.mrb[36].mxu0 %vm62_vm0, %v4378_v40  ;;  %4261 = vmatmul.mubr.msk.bf16.gmra.mrb[36].mxu1 %vm62_vm0, %v4380_v41 }
  0x53   :  { %4268 = vmatprep.mubr.msk.bf16.mxu0 %vm62_vm0, %v4381_v42  ;;  %4280 = vmatprep.mubr.msk.bf16.mxu1 %vm62_vm0, %v4383_v43 }
  0x5a   :  { %4269 = vmatmul.mubr.msk.bf16.vlgmr.msra.gmra.mrb[40].mxu0 %vm62_vm0, %v4382_v44  ;;  %4281 = vmatmul.mubr.msk.bf16.vlgmr.msra.gmra.mrb[40].mxu1 %vm62_vm0, %v4384_v45 }
  0x5b   :  { %4272 = vmatprep.mubr.msk.bf16.mxu0 %vm62_vm0, %v4385_v46  ;;  %4284 = vmatprep.mubr.msk.bf16.mxu1 %vm62_vm0, %v4387_v47 }
  0x5c   :  { %4289 = vmatpush3.bf16.msra.mxu0 %v4450_v0  ;;  %4301 = vmatpush3.bf16.msra.mxu1 %v4450_v0 }
  0x5d   :  { %4290 = vmatprep.subr.bf16.mxu0 %v4455_v1  ;;  %4302 = vmatprep.subr.bf16.mxu1 %v4455_v1 }
  0x60   :  { %4291 = vmatpush3.bf16.msra.mxu0 %v4455_v1  ;;  %4303 = vmatpush3.bf16.msra.mxu1 %v4455_v1 }
  0x61   :  { %4312 = vmatprep.subr.bf16.mxu0 %v4450_v0  ;;  %4324 = vmatprep.subr.bf16.mxu1 %v4450_v0 }
  0x62   :  { %4273 = vmatmul.mubr.msk.bf16.gmra.mrb[44].mxu0 %vm62_vm0, %v4386_v48  ;;  %4285 = vmatmul.mubr.msk.bf16.gmra.mrb[44].mxu1 %vm62_vm0, %v4388_v49 }
  0x63   :  { %4292 = vmatprep.mubr.msk.bf16.mxu0 %vm62_vm0, %v4389_v50  ;;  %4304 = vmatprep.mubr.msk.bf16.mxu1 %vm62_vm0, %v4391_v51 }
  0x6a   :  { %4293 = vmatmul.mubr.msk.bf16.vlgmr.msra.gmra.mrb[48].mxu0 %vm62_vm0, %v4390_v52  ;;  %4305 = vmatmul.mubr.msk.bf16.vlgmr.msra.gmra.mrb[48].mxu1 %vm62_vm0, %v4392_v53 }
  0x6b   :  { %4296 = vmatprep.mubr.msk.bf16.mxu0 %vm62_vm0, %v4393_v54  ;;  %4308 = vmatprep.mubr.msk.bf16.mxu1 %vm62_vm0, %v4395_v55 }
  0x6c   :  { %4313 = vmatpush3.bf16.msra.mxu0 %v4450_v0  ;;  %4325 = vmatpush3.bf16.msra.mxu1 %v4450_v0  ;;  %v4402_v0 = vld [vmem:[%s6902_s0 + $0x1d8] sm:$0xff]  }
  0x6d   :  { %4314 = vmatprep.subr.bf16.mxu0 %v4455_v1  ;;  %4326 = vmatprep.subr.bf16.mxu1 %v4455_v1 }
  0x70   :  { %4315 = vmatpush3.bf16.msra.mxu0 %v4455_v1  ;;  %4327 = vmatpush3.bf16.msra.mxu1 %v4455_v1  ;;  %v4404_v1 = vld [vmem:[%s6902_s0 + $0x1f8] sm:$0xff]  }
  0x72   :  { %4297 = vmatmul.mubr.msk.bf16.gmra.mrb[52].mxu0 %vm62_vm0, %v4394_v56  ;;  %4309 = vmatmul.mubr.msk.bf16.gmra.mrb[52].mxu1 %vm62_vm0, %v4396_v57 }
  0x73   :  { %4316 = vmatprep.mubr.msk.bf16.mxu0 %vm62_vm0, %v4397_v58  ;;  %4328 = vmatprep.mubr.msk.bf16.mxu1 %vm62_vm0, %v4399_v59 }
  0x7a   :  { %4317 = vmatmul.mubr.msk.bf16.vlgmr.msra.gmra.mrb[56].mxu0 %vm62_vm0, %v4398_v60  ;;  %4329 = vmatmul.mubr.msk.bf16.vlgmr.msra.gmra.mrb[56].mxu1 %vm62_vm0, %v4400_v61 }
  0x7b   :  { %4320 = vmatprep.mubr.msk.bf16.mxu0 %vm62_vm0, %v4401_v62  ;;  %4332 = vmatprep.mubr.msk.bf16.mxu1 %vm62_vm0, %v4403_v63 }
  0x82   :  { %4321 = vmatmul.mubr.msk.bf16.gmra.mrb[60].mxu0 %vm62_vm0, %v4402_v0  ;;  %4333 = vmatmul.mubr.msk.bf16.gmra.mrb[60].mxu1 %vm62_vm0, %v4404_v1 }
  0xdd   :  { %v4777_v2 = vpop.f32.mrb[0].mxu0  ;;  %v4779_v3 = vpop.f32.mrb[0].mxu1 }
  0xde   :  { %7144 = vst [vmem:[#allocation2_spill] sm:$0xff] %v4777_v2  ;;  %7145 = vst [vmem:[#allocation3_spill] sm:$0xff] %v4779_v3  ;;  %v4781_v4 = vpop.f32.mrb[1].mxu0  ;;  %v4783_v5 = vpop.f32.mrb[1].mxu1  ;;  %v1761_v6 = vsel %vm1730_vm1, %v4779_v3, 0.0  ;;  %v1737_v7 = vsel %vm1730_vm1, %v4777_v2, 0.0 }
  0xdf   :  { %7146 = vst [vmem:[#allocation4_spill] sm:$0xff] %v4781_v4  ;;  %7147 = vst [vmem:[#allocation5_spill] sm:$0xff] %v4783_v5  ;;  %1762 = vadd.xlane.f32.xlu0 %v1761_v6  ;;  %v4789_v8 = vpop.f32.mrb[2].mxu1  ;;  %1738 = vadd.xlane.f32.xlu1 %v1737_v7  ;;  %v4791_v9 = vpop.f32.mrb[2].mxu0  ;;  %v1731_v12 = vsel %vm1730_vm1, %v4781_v4, 0.0  ;;  %v1755_v16 = vsel %vm1730_vm1, %v4783_v5, 0.0 }
  0xe0   :  { %7148 = vst [vmem:[#allocation6_spill] sm:$0xff] %v4789_v8  ;;  %7149 = vst [vmem:[#allocation7_spill] sm:$0xff] %v4791_v9  ;;  %v4793_v10 = vpop.f32.mrb[3].mxu0  ;;  %v4795_v11 = vpop.f32.mrb[3].mxu1  ;;  %v1740_v13 = vsel %vm1730_vm1, %v4791_v9, 0.0  ;;  %v1764_v17 = vsel %vm1730_vm1, %v4789_v8, 0.0 }
  0xe1   :  { %7150 = vst [vmem:[#allocation8_spill] sm:$0xff] %v4793_v10  ;;  %7151 = vst [vmem:[#allocation9_spill] sm:$0xff] %v4795_v11  ;;  %v1758_v24 = vsel %vm1730_vm1, %v4795_v11, 0.0  ;;  %v1734_v25 = vsel %vm1730_vm1, %v4793_v10, 0.0 }
  0xe3   :  { %1732 = vadd.xlane.f32.xlu0 %v1731_v12  ;;  %1741 = vadd.xlane.f32.xlu1 %v1740_v13 }
  0xe5   :  { %v4801_v14 = vpop.f32.mrb[4].mxu0  ;;  %v4803_v15 = vpop.f32.mrb[4].mxu1 }
  0xe6   :  { %7152 = vst [vmem:[#allocation10_spill] sm:$0xff] %v4801_v14  ;;  %7153 = vst [vmem:[#allocation11_spill] sm:$0xff] %v4803_v15  ;;  %v4809_v18 = vpop.f32.mrb[5].mxu0  ;;  %v4811_v19 = vpop.f32.mrb[5].mxu1  ;;  %v1749_v26 = vsel %vm1730_vm1, %v4801_v14, 0.0  ;;  %v1773_v34 = vsel %vm1730_vm1, %v4803_v15, 0.0 }
  0xe7   :  { %7154 = vst [vmem:[#allocation12_spill] sm:$0xff] %v4809_v18  ;;  %7155 = vst [vmem:[#allocation13_spill] sm:$0xff] %v4811_v19  ;;  %1756 = vadd.xlane.f32.xlu0 %v1755_v16  ;;  %1765 = vadd.xlane.f32.xlu1 %v1764_v17  ;;  %v4813_v20 = vpop.f32.mrb[6].mxu0  ;;  %v4815_v21 = vpop.f32.mrb[6].mxu1  ;;  %v1743_v40 = vsel %vm1730_vm1, %v4809_v18, 0.0  ;;  %v1767_v48 = vsel %vm1730_vm1, %v4811_v19, 0.0 }
  0xe8   :  { %7156 = vst [vmem:[#allocation14_spill] sm:$0xff] %v4813_v20  ;;  %7157 = vst [vmem:[#allocation15_spill] sm:$0xff] %v4815_v21  ;;  %v4817_v22 = vpop.f32.mrb[7].mxu0  ;;  %v4819_v23 = vpop.f32.mrb[7].mxu1  ;;  %v1752_v27 = vsel %vm1730_vm1, %v4813_v20, 0.0  ;;  %v1776_v35 = vsel %vm1730_vm1, %v4815_v21, 0.0 }
  0xe9   :  { %7158 = vst [vmem:[#allocation16_spill] sm:$0xff] %v4817_v22  ;;  %7159 = vst [vmem:[#allocation17_spill] sm:$0xff] %v4819_v23  ;;  %v1746_v41 = vsel %vm1730_vm1, %v4817_v22, 0.0  ;;  %v1770_v49 = vsel %vm1730_vm1, %v4819_v23, 0.0 }
  0xeb   :  { %1759 = vadd.xlane.f32.xlu1 %v1758_v24  ;;  %1735 = vadd.xlane.f32.xlu0 %v1734_v25 }
  0xed   :  { %v4829_v28 = vpop.f32.mrb[8].mxu0  ;;  %v4831_v29 = vpop.f32.mrb[8].mxu1 }
  0xee   :  { %7160 = vst [vmem:[#allocation18_spill] sm:$0xff] %v4829_v28  ;;  %7161 = vst [vmem:[#allocation19_spill] sm:$0xff] %v4831_v29  ;;  %v4833_v30 = vpop.f32.mrb[9].mxu0  ;;  %v4835_v31 = vpop.f32.mrb[9].mxu1  ;;  %v1793_v50 = vsel %vm1730_vm1, %v4829_v28, 0.0  ;;  %v1825_v58 = vsel %vm1730_vm1, %v4831_v29, 0.0 }
  0xef   :  { %7162 = vst [vmem:[#allocation20_spill] sm:$0xff] %v4833_v30  ;;  %7163 = vst [vmem:[#allocation21_spill] sm:$0xff] %v4835_v31  ;;  %1750 = vadd.xlane.f32.xlu0 %v1749_v26  ;;  %1753 = vadd.xlane.f32.xlu1 %v1752_v27  ;;  %v4837_v32 = vpop.f32.mrb[10].mxu0  ;;  %v4839_v33 = vpop.f32.mrb[10].mxu1  ;;  %v1787_v0 = vsel %vm1730_vm1, %v4833_v30, 0.0  ;;  %v1819_v24 = vsel %vm1730_vm1, %v4835_v31, 0.0 }
  0xf0   :  { %7164 = vst [vmem:[#allocation22_spill] sm:$0xff] %v4837_v32  ;;  %7165 = vst [vmem:[#allocation23_spill] sm:$0xff] %v4839_v33  ;;  %v4845_v36 = vpop.f32.mrb[11].mxu0  ;;  %v4847_v37 = vpop.f32.mrb[11].mxu1  ;;  %v1796_v51 = vsel %vm1730_vm1, %v4837_v32, 0.0  ;;  %v1828_v59 = vsel %vm1730_vm1, %v4839_v33, 0.0 }
  0xf1   :  { %7166 = vst [vmem:[#allocation24_spill] sm:$0xff] %v4845_v36  ;;  %7167 = vst [vmem:[#allocation25_spill] sm:$0xff] %v4847_v37  ;;  %v1790_v1 = vsel %vm1730_vm1, %v4845_v36, 0.0  ;;  %v1822_v25 = vsel %vm1730_vm1, %v4847_v37, 0.0 }
  0xf3   :  { %1774 = vadd.xlane.f32.xlu0 %v1773_v34  ;;  %1777 = vadd.xlane.f32.xlu1 %v1776_v35 }
  0xf5   :  { %v4849_v38 = vpop.f32.mrb[12].mxu0  ;;  %v4851_v39 = vpop.f32.mrb[12].mxu1 }
  0xf6   :  { %7168 = vst [vmem:[#allocation26_spill] sm:$0xff] %v4849_v38  ;;  %7169 = vst [vmem:[#allocation27_spill] sm:$0xff] %v4851_v39  ;;  %v4857_v42 = vpop.f32.mrb[13].mxu0  ;;  %v4859_v43 = vpop.f32.mrb[13].mxu1  ;;  %v1805_v26 = vsel %vm1730_vm1, %v4849_v38, 0.0 }
  0xf7   :  { %7170 = vst [vmem:[#allocation28_spill] sm:$0xff] %v4857_v42  ;;  %7171 = vst [vmem:[#allocation29_spill] sm:$0xff] %v4859_v43  ;;  %1744 = vadd.xlane.f32.xlu0 %v1743_v40  ;;  %1747 = vadd.xlane.f32.xlu1 %v1746_v41  ;;  %v4861_v44 = vpop.f32.mrb[14].mxu0  ;;  %v4863_v45 = vpop.f32.mrb[14].mxu1 }
  0xf8   :  { %7172 = vst [vmem:[#allocation30_spill] sm:$0xff] %v4861_v44  ;;  %7173 = vst [vmem:[#allocation31_spill] sm:$0xff] %v4863_v45  ;;  %v4865_v46 = vpop.f32.mrb[15].mxu0  ;;  %v4867_v47 = vpop.f32.mrb[15].mxu1  ;;  %v1808_v27 = vsel %vm1730_vm1, %v4861_v44, 0.0 }
  0xf9   :  { %7174 = vst [vmem:[#allocation32_spill] sm:$0xff] %v4865_v46  ;;  %7175 = vst [vmem:[#allocation33_spill] sm:$0xff] %v4867_v47 }
  0xfb   :  { %1768 = vadd.xlane.f32.xlu0 %v1767_v48  ;;  %1771 = vadd.xlane.f32.xlu1 %v1770_v49 }
  0xfd   :  { %v4877_v52 = vpop.f32.mrb[16].mxu0  ;;  %v4879_v53 = vpop.f32.mrb[16].mxu1 }
  0xfe   :  { %7176 = vst [vmem:[#allocation34_spill] sm:$0xff] %v4877_v52  ;;  %7177 = vst [vmem:[#allocation35_spill] sm:$0xff] %v4879_v53  ;;  %v4881_v54 = vpop.f32.mrb[17].mxu0  ;;  %v4883_v55 = vpop.f32.mrb[17].mxu1 }
  0xff   :  { %7178 = vst [vmem:[#allocation36_spill] sm:$0xff] %v4881_v54  ;;  %7179 = vst [vmem:[#allocation37_spill] sm:$0xff] %v4883_v55  ;;  %1794 = vadd.xlane.f32.xlu0 %v1793_v50  ;;  %1797 = vadd.xlane.f32.xlu1 %v1796_v51  ;;  %v4885_v56 = vpop.f32.mrb[18].mxu0  ;;  %v4887_v57 = vpop.f32.mrb[18].mxu1  ;;  %v1837_v50 = vsel %vm1730_vm1, %v4851_v39, 0.0  ;;  %v1840_v51 = vsel %vm1730_vm1, %v4863_v45, 0.0 }
 0x100   :  { %7180 = vst [vmem:[#allocation38_spill] sm:$0xff] %v4885_v56  ;;  %7181 = vst [vmem:[#allocation39_spill] sm:$0xff] %v4887_v57  ;;  %v4893_v60 = vpop.f32.mrb[19].mxu0  ;;  %v4895_v61 = vpop.f32.mrb[19].mxu1 }
 0x101   :  { %7182 = vst [vmem:[#allocation40_spill] sm:$0xff] %v4893_v60  ;;  %7183 = vst [vmem:[#allocation41_spill] sm:$0xff] %v4895_v61  ;;  %v1854_v20 = vsel %vm1730_vm1, %v4893_v60, 0.0  ;;  %v1886_v60 = vsel %vm1730_vm1, %v4895_v61, 0.0 }
 0x103   :  { %1826 = vadd.xlane.f32.xlu0 %v1825_v58  ;;  %1829 = vadd.xlane.f32.xlu1 %v1828_v59 }
 0x105   :  { %v4897_v62 = vpop.f32.mrb[20].mxu0  ;;  %v4899_v63 = vpop.f32.mrb[20].mxu1 }
 0x106   :  { %7184 = vst [vmem:[#allocation42_spill] sm:$0xff] %v4897_v62  ;;  %7185 = vst [vmem:[#allocation43_spill] sm:$0xff] %v4899_v63  ;;  %v4905_v6 = vpop.f32.mrb[21].mxu0  ;;  %v4907_v7 = vpop.f32.mrb[21].mxu1 }
 0x107   :  { %7186 = vst [vmem:[#allocation44_spill] sm:$0xff] %v4905_v6  ;;  %7187 = vst [vmem:[#allocation45_spill] sm:$0xff] %v4907_v7  ;;  %1788 = vadd.xlane.f32.xlu0 %v1787_v0  ;;  %1791 = vadd.xlane.f32.xlu1 %v1790_v1  ;;  %v4909_v12 = vpop.f32.mrb[22].mxu0  ;;  %v4911_v13 = vpop.f32.mrb[22].mxu1 }
 0x108   :  { %7188 = vst [vmem:[#allocation46_spill] sm:$0xff] %v4909_v12  ;;  %7189 = vst [vmem:[#allocation47_spill] sm:$0xff] %v4911_v13  ;;  %v4913_v16 = vpop.f32.mrb[23].mxu0  ;;  %v4915_v17 = vpop.f32.mrb[23].mxu1 }
 0x109   :  { %7190 = vst [vmem:[#allocation48_spill] sm:$0xff] %v4913_v16  ;;  %7191 = vst [vmem:[#allocation49_spill] sm:$0xff] %v4915_v17  ;;  %v1866_v4 = vsel %vm1730_vm1, %v4913_v16, 0.0  ;;  %v1898_v16 = vsel %vm1730_vm1, %v4915_v17, 0.0 }
 0x10b   :  { %1820 = vadd.xlane.f32.xlu0 %v1819_v24  ;;  %1823 = vadd.xlane.f32.xlu1 %v1822_v25  ;;  %v1799_v24 = vsel %vm1730_vm1, %v4857_v42, 0.0  ;;  %v1802_v25 = vsel %vm1730_vm1, %v4865_v46, 0.0  ;;  %v1831_v42 = vsel %vm1730_vm1, %v4859_v43, 0.0  ;;  %v1834_v46 = vsel %vm1730_vm1, %v4867_v47, 0.0 }
 0x10c   :  { %v1892_v47 = vsel %vm1730_vm1, %v4887_v57, 0.0 }
 0x10d   :  { %v4925_v34 = vpop.f32.mrb[24].mxu0  ;;  %v4927_v35 = vpop.f32.mrb[24].mxu1 }
 0x10e   :  { %7192 = vst [vmem:[#allocation50_spill] sm:$0xff] %v4925_v34  ;;  %7193 = vst [vmem:[#allocation51_spill] sm:$0xff] %v4927_v35  ;;  %v4929_v40 = vpop.f32.mrb[25].mxu0  ;;  %v4931_v41 = vpop.f32.mrb[25].mxu1 }
 0x10f   :  { %7194 = vst [vmem:[#allocation52_spill] sm:$0xff] %v4929_v40  ;;  %7195 = vst [vmem:[#allocation53_spill] sm:$0xff] %v4931_v41  ;;  %1806 = vadd.xlane.f32.xlu0 %v1805_v26  ;;  %1809 = vadd.xlane.f32.xlu1 %v1808_v27  ;;  %v4933_v48 = vpop.f32.mrb[26].mxu0  ;;  %v4935_v49 = vpop.f32.mrb[26].mxu1 }
 0x110   :  { %7196 = vst [vmem:[#allocation54_spill] sm:$0xff] %v4933_v48  ;;  %7197 = vst [vmem:[#allocation55_spill] sm:$0xff] %v4935_v49  ;;  %v4941_v58 = vpop.f32.mrb[27].mxu0  ;;  %v4943_v59 = vpop.f32.mrb[27].mxu1  ;;  %v1956_v17 = vsel %vm1730_vm1, %v4935_v49, 0.0 }
 0x111   :  { %7198 = vst [vmem:[#allocation56_spill] sm:$0xff] %v4941_v58  ;;  %7199 = vst [vmem:[#allocation57_spill] sm:$0xff] %v4943_v59  ;;  %v1918_v28 = vsel %vm1730_vm1, %v4941_v58, 0.0  ;;  %v1950_v58 = vsel %vm1730_vm1, %v4943_v59, 0.0 }
 0x113   :  { %1838 = vadd.xlane.f32.xlu0 %v1837_v50  ;;  %1841 = vadd.xlane.f32.xlu1 %v1840_v51 }
 0x115   :  { %v4945_v0 = vpop.f32.mrb[28].mxu0  ;;  %v4947_v1 = vpop.f32.mrb[28].mxu1 }
 0x116   :  { %7200 = vst [vmem:[#allocation58_spill] sm:$0xff] %v4945_v0  ;;  %7201 = vst [vmem:[#allocation59_spill] sm:$0xff] %v4947_v1  ;;  %v4953_v26 = vpop.f32.mrb[29].mxu0  ;;  %v4955_v27 = vpop.f32.mrb[29].mxu1 }
 0x117   :  { %7202 = vst [vmem:[#allocation60_spill] sm:$0xff] %v4953_v26  ;;  %7203 = vst [vmem:[#allocation61_spill] sm:$0xff] %v4955_v27  ;;  %1800 = vadd.xlane.f32.xlu0 %v1799_v24  ;;  %1803 = vadd.xlane.f32.xlu1 %v1802_v25  ;;  %v4957_v23 = vpop.f32.mrb[30].mxu0  ;;  %v4959_v50 = vpop.f32.mrb[30].mxu1  ;;  %v1857_v24 = vsel %vm1730_vm1, %v4877_v52, 0.0  ;;  %v1860_v25 = vsel %vm1730_vm1, %v4885_v56, 0.0 }
 0x118   :  { %7204 = vst [vmem:[#allocation62_spill] sm:$0xff] %v4957_v23  ;;  %7205 = vst [vmem:[#allocation63_spill] sm:$0xff] %v4959_v50  ;;  %v4961_v51 = vpop.f32.mrb[31].mxu0  ;;  %v4963_v22 = vpop.f32.mrb[31].mxu1 }
 0x119   :  { %7206 = vst [vmem:[#allocation64_spill] sm:$0xff] %v4961_v51  ;;  %7207 = vst [vmem:[#allocation65_spill] sm:$0xff] %v4963_v22 }
 0x11b   :  { %1832 = vadd.xlane.f32.xlu0 %v1831_v42  ;;  %1835 = vadd.xlane.f32.xlu1 %v1834_v46  ;;  %v1889_v46 = vsel %vm1730_vm1, %v4879_v53, 0.0 }
 0x11d   :  { %v4973_v19 = vpop.f32.mrb[32].mxu0  ;;  %v4975_v18 = vpop.f32.mrb[32].mxu1 }
 0x11e   :  { %7208 = vst [vmem:[#allocation66_spill] sm:$0xff] %v4973_v19  ;;  %7209 = vst [vmem:[#allocation67_spill] sm:$0xff] %v4975_v18  ;;  %v4977_v45 = vpop.f32.mrb[33].mxu0  ;;  %v4979_v44 = vpop.f32.mrb[33].mxu1 }
 0x11f   :  { %7210 = vst [vmem:[#allocation68_spill] sm:$0xff] %v4977_v45  ;;  %7211 = vst [vmem:[#allocation69_spill] sm:$0xff] %v4979_v44  ;;  %1858 = vadd.xlane.f32.xlu0 %v1857_v24  ;;  %1861 = vadd.xlane.f32.xlu1 %v1860_v25  ;;  %v4981_v43 = vpop.f32.mrb[34].mxu0  ;;  %v4983_v42 = vpop.f32.mrb[34].mxu1  ;;  %v1851_v25 = vsel %vm1730_vm1, %v4881_v54, 0.0  ;;  %v1883_v54 = vsel %vm1730_vm1, %v4883_v55, 0.0 }
 0x120   :  { %7212 = vst [vmem:[#allocation70_spill] sm:$0xff] %v4981_v43  ;;  %7213 = vst [vmem:[#allocation71_spill] sm:$0xff] %v4983_v42  ;;  %v4989_v39 = vpop.f32.mrb[35].mxu0  ;;  %v4991_v21 = vpop.f32.mrb[35].mxu1 }
 0x121   :  { %7214 = vst [vmem:[#allocation72_spill] sm:$0xff] %v4989_v39  ;;  %7215 = vst [vmem:[#allocation73_spill] sm:$0xff] %v4991_v21 }
 0x123   :  { %1890 = vadd.xlane.f32.xlu0 %v1889_v46  ;;  %1893 = vadd.xlane.f32.xlu1 %v1892_v47 }
 0x125   :  { %v4993_v38 = vpop.f32.mrb[36].mxu0  ;;  %v4995_v24 = vpop.f32.mrb[36].mxu1 }
 0x126   :  { %7216 = vst [vmem:[#allocation74_spill] sm:$0xff] %v4993_v38  ;;  %7217 = vst [vmem:[#allocation75_spill] sm:$0xff] %v4995_v24  ;;  %v5001_v15 = vpop.f32.mrb[37].mxu0  ;;  %v5003_v14 = vpop.f32.mrb[37].mxu1 }
 0x127   :  { %7218 = vst [vmem:[#allocation76_spill] sm:$0xff] %v5001_v15  ;;  %7219 = vst [vmem:[#allocation77_spill] sm:$0xff] %v5003_v14  ;;  %1852 = vadd.xlane.f32.xlu0 %v1851_v25  ;;  %1855 = vadd.xlane.f32.xlu1 %v1854_v20  ;;  %v5005_v37 = vpop.f32.mrb[38].mxu0  ;;  %v5007_v46 = vpop.f32.mrb[38].mxu1  ;;  %v1869_v25 = vsel %vm1730_vm1, %v4897_v62, 0.0  ;;  %v1872_v20 = vsel %vm1730_vm1, %v4909_v12, 0.0 }
 0x128   :  { %7220 = vst [vmem:[#allocation78_spill] sm:$0xff] %v5005_v37  ;;  %7221 = vst [vmem:[#allocation79_spill] sm:$0xff] %v5007_v46  ;;  %v5009_v47 = vpop.f32.mrb[39].mxu0  ;;  %v5011_v31 = vpop.f32.mrb[39].mxu1  ;;  %v1904_v12 = vsel %vm1730_vm1, %v4911_v13, 0.0 }
 0x129   :  { %7222 = vst [vmem:[#allocation80_spill] sm:$0xff] %v5009_v47  ;;  %7223 = vst [vmem:[#allocation81_spill] sm:$0xff] %v5011_v31 }
 0x12b   :  { %1884 = vadd.xlane.f32.xlu0 %v1883_v54  ;;  %1887 = vadd.xlane.f32.xlu1 %v1886_v60  ;;  %v1901_v60 = vsel %vm1730_vm1, %v4899_v63, 0.0 }
 0x12d   :  { %v5021_v36 = vpop.f32.mrb[40].mxu0  ;;  %v5023_v30 = vpop.f32.mrb[40].mxu1 }
 0x12e   :  { %7224 = vst [vmem:[#allocation82_spill] sm:$0xff] %v5021_v36  ;;  %7225 = vst [vmem:[#allocation83_spill] sm:$0xff] %v5023_v30  ;;  %v5025_v11 = vpop.f32.mrb[41].mxu0  ;;  %v5027_v5 = vpop.f32.mrb[41].mxu1 }
 0x12f   :  { %7226 = vst [vmem:[#allocation84_spill] sm:$0xff] %v5025_v11  ;;  %7227 = vst [vmem:[#allocation85_spill] sm:$0xff] %v5027_v5  ;;  %1870 = vadd.xlane.f32.xlu0 %v1869_v25  ;;  %1873 = vadd.xlane.f32.xlu1 %v1872_v20  ;;  %v5029_v55 = vpop.f32.mrb[42].mxu0  ;;  %v5031_v54 = vpop.f32.mrb[42].mxu1  ;;  %v1863_v20 = vsel %vm1730_vm1, %v4905_v6, 0.0  ;;  %v1895_v6 = vsel %vm1730_vm1, %v4907_v7, 0.0 }
 0x130   :  { %7228 = vst [vmem:[#allocation86_spill] sm:$0xff] %v5029_v55  ;;  %7229 = vst [vmem:[#allocation87_spill] sm:$0xff] %v5031_v54  ;;  %v5037_v62 = vpop.f32.mrb[43].mxu0  ;;  %v5039_v61 = vpop.f32.mrb[43].mxu1 }
 0x131   :  { %7230 = vst [vmem:[#allocation88_spill] sm:$0xff] %v5037_v62  ;;  %7231 = vst [vmem:[#allocation89_spill] sm:$0xff] %v5039_v61 }
 0x133   :  { %1902 = vadd.xlane.f32.xlu0 %v1901_v60  ;;  %1905 = vadd.xlane.f32.xlu1 %v1904_v12 }
 0x135   :  { %v5041_v10 = vpop.f32.mrb[44].mxu0  ;;  %v5043_v25 = vpop.f32.mrb[44].mxu1 }
 0x136   :  { %7232 = vst [vmem:[#allocation90_spill] sm:$0xff] %v5041_v10  ;;  %7233 = vst [vmem:[#allocation91_spill] sm:$0xff] %v5043_v25  ;;  %v5049_v63 = vpop.f32.mrb[45].mxu0  ;;  %v5051_v57 = vpop.f32.mrb[45].mxu1 }
 0x137   :  { %7234 = vst [vmem:[#allocation92_spill] sm:$0xff] %v5049_v63  ;;  %7235 = vst [vmem:[#allocation93_spill] sm:$0xff] %v5051_v57  ;;  %1864 = vadd.xlane.f32.xlu0 %v1863_v20  ;;  %1867 = vadd.xlane.f32.xlu1 %v1866_v4  ;;  %v5053_v13 = vpop.f32.mrb[46].mxu0  ;;  %v5055_v60 = vpop.f32.mrb[46].mxu1  ;;  %v1921_v20 = vsel %vm1730_vm1, %v4925_v34, 0.0  ;;  %v1924_v4 = vsel %vm1730_vm1, %v4933_v48, 0.0 }
 0x138   :  { %7236 = vst [vmem:[#allocation94_spill] sm:$0xff] %v5053_v13  ;;  %7237 = vst [vmem:[#allocation95_spill] sm:$0xff] %v5055_v60  ;;  %v5057_v12 = vpop.f32.mrb[47].mxu0  ;;  %v5059_v53 = vpop.f32.mrb[47].mxu1 }
 0x139   :  { %7238 = vst [vmem:[#allocation96_spill] sm:$0xff] %v5057_v12  ;;  %7239 = vst [vmem:[#allocation97_spill] sm:$0xff] %v5059_v53 }
 0x13b   :  { %1896 = vadd.xlane.f32.xlu0 %v1895_v6  ;;  %1899 = vadd.xlane.f32.xlu1 %v1898_v16  ;;  %v1953_v16 = vsel %vm1730_vm1, %v4927_v35, 0.0 }
 0x13d   :  { %v5069_v56 = vpop.f32.mrb[48].mxu0  ;;  %v5071_v52 = vpop.f32.mrb[48].mxu1 }
 0x13e   :  { %7240 = vst [vmem:[#allocation98_spill] sm:$0xff] %v5069_v56  ;;  %7241 = vst [vmem:[#allocation99_spill] sm:$0xff] %v5071_v52  ;;  %v5073_v33 = vpop.f32.mrb[49].mxu0  ;;  %v5075_v29 = vpop.f32.mrb[49].mxu1 }
 0x13f   :  { %7242 = vst [vmem:[#allocation100_spill] sm:$0xff] %v5073_v33  ;;  %7243 = vst [vmem:[#allocation101_spill] sm:$0xff] %v5075_v29  ;;  %1922 = vadd.xlane.f32.xlu0 %v1921_v20  ;;  %1925 = vadd.xlane.f32.xlu1 %v1924_v4  ;;  %v5077_v7 = vpop.f32.mrb[50].mxu0  ;;  %v5079_v6 = vpop.f32.mrb[50].mxu1  ;;  %v1915_v4 = vsel %vm1730_vm1, %v4929_v40, 0.0  ;;  %v1947_v40 = vsel %vm1730_vm1, %v4931_v41, 0.0 }
 0x140   :  { %7244 = vst [vmem:[#allocation102_spill] sm:$0xff] %v5077_v7  ;;  %7245 = vst [vmem:[#allocation103_spill] sm:$0xff] %v5079_v6  ;;  %v5085_v48 = vpop.f32.mrb[51].mxu0  ;;  %v5087_v34 = vpop.f32.mrb[51].mxu1 }
 0x141   :  { %7246 = vst [vmem:[#allocation104_spill] sm:$0xff] %v5085_v48  ;;  %7247 = vst [vmem:[#allocation105_spill] sm:$0xff] %v5087_v34 }
 0x143   :  { %1954 = vadd.xlane.f32.xlu0 %v1953_v16  ;;  %1957 = vadd.xlane.f32.xlu1 %v1956_v17 }
 0x145   :  { %v5089_v32 = vpop.f32.mrb[52].mxu0  ;;  %v5091_v20 = vpop.f32.mrb[52].mxu1 }
 0x146   :  { %7248 = vst [vmem:[#allocation106_spill] sm:$0xff] %v5089_v32  ;;  %7249 = vst [vmem:[#allocation107_spill] sm:$0xff] %v5091_v20  ;;  %v5097_v35 = vpop.f32.mrb[53].mxu0  ;;  %v5099_v8 = vpop.f32.mrb[53].mxu1 }
 0x147   :  { %7250 = vst [vmem:[#allocation108_spill] sm:$0xff] %v5097_v35  ;;  %7251 = vst [vmem:[#allocation109_spill] sm:$0xff] %v5099_v8  ;;  %1916 = vadd.xlane.f32.xlu0 %v1915_v4  ;;  %1919 = vadd.xlane.f32.xlu1 %v1918_v28  ;;  %v5101_v49 = vpop.f32.mrb[54].mxu0  ;;  %v5103_v16 = vpop.f32.mrb[54].mxu1  ;;  %v1933_v4 = vsel %vm1730_vm1, %v4945_v0, 0.0  ;;  %v1936_v28 = vsel %vm1730_vm1, %v4957_v23, 0.0 }
 0x148   :  { %7252 = vst [vmem:[#allocation110_spill] sm:$0xff] %v5101_v49  ;;  %7253 = vst [vmem:[#allocation111_spill] sm:$0xff] %v5103_v16  ;;  %v5105_v17 = vpop.f32.mrb[55].mxu0  ;;  %v5107_v3 = vpop.f32.mrb[55].mxu1  ;;  %v1968_v23 = vsel %vm1730_vm1, %v4959_v50, 0.0 }
 0x149   :  { %7254 = vst [vmem:[#allocation112_spill] sm:$0xff] %v5105_v17  ;;  %7255 = vst [vmem:[#allocation113_spill] sm:$0xff] %v5107_v3 }
 0x14b   :  { %1948 = vadd.xlane.f32.xlu0 %v1947_v40  ;;  %1951 = vadd.xlane.f32.xlu1 %v1950_v58  ;;  %v1965_v58 = vsel %vm1730_vm1, %v4947_v1, 0.0 }
 0x14d   :  { %v5117_v9 = vpop.f32.mrb[56].mxu0  ;;  %v5119_v2 = vpop.f32.mrb[56].mxu1 }
 0x14e   :  { %7256 = vst [vmem:[#allocation114_spill] sm:$0xff] %v5117_v9  ;;  %7257 = vst [vmem:[#allocation115_spill] sm:$0xff] %v5119_v2  ;;  %v5121_v8 = vpop.f32.mrb[57].mxu0  ;;  %v5123_v3 = vpop.f32.mrb[57].mxu1 }
 0x14f   :  { %7258 = vst [vmem:[#allocation116_spill] sm:$0xff] %v5121_v8  ;;  %7259 = vst [vmem:[#allocation117_spill] sm:$0xff] %v5123_v3  ;;  %1934 = vadd.xlane.f32.xlu0 %v1933_v4  ;;  %1937 = vadd.xlane.f32.xlu1 %v1936_v28  ;;  %v5125_v41 = vpop.f32.mrb[58].mxu0  ;;  %v5127_v40 = vpop.f32.mrb[58].mxu1  ;;  %v1927_v28 = vsel %vm1730_vm1, %v4953_v26, 0.0  ;;  %v1930_v3 = vsel %vm1730_vm1, %v4961_v51, 0.0 }
 0x150   :  { %7260 = vst [vmem:[#allocation118_spill] sm:$0xff] %v5125_v41  ;;  %7261 = vst [vmem:[#allocation119_spill] sm:$0xff] %v5127_v40  ;;  %v5133_v0 = vpop.f32.mrb[59].mxu0  ;;  %v5135_v59 = vpop.f32.mrb[59].mxu1  ;;  %v1959_v26 = vsel %vm1730_vm1, %v4955_v27, 0.0  ;;  %v1962_v51 = vsel %vm1730_vm1, %v4963_v22, 0.0 }
 0x151   :  { %7262 = vst [vmem:[#allocation120_spill] sm:$0xff] %v5133_v0  ;;  %7263 = vst [vmem:[#allocation121_spill] sm:$0xff] %v5135_v59 }
 0x153   :  { %1966 = vadd.xlane.f32.xlu0 %v1965_v58  ;;  %1969 = vadd.xlane.f32.xlu1 %v1968_v23 }
 0x155   :  { %v5137_v8 = vpop.f32.mrb[60].mxu0  ;;  %v5139_v4 = vpop.f32.mrb[60].mxu1 }
 0x156   :  { %7264 = vst [vmem:[#allocation122_spill] sm:$0xff] %v5137_v8  ;;  %7265 = vst [vmem:[#allocation123_spill] sm:$0xff] %v5139_v4  ;;  %v5145_v1 = vpop.f32.mrb[61].mxu0  ;;  %v5147_v40 = vpop.f32.mrb[61].mxu1 }
 0x157   :  { %7266 = vst [vmem:[#allocation124_spill] sm:$0xff] %v5145_v1  ;;  %7267 = vst [vmem:[#allocation125_spill] sm:$0xff] %v5147_v40  ;;  %1928 = vadd.xlane.f32.xlu0 %v1927_v28  ;;  %1931 = vadd.xlane.f32.xlu1 %v1930_v3  ;;  %v5149_v50 = vpop.f32.mrb[62].mxu0  ;;  %v5151_v58 = vpop.f32.mrb[62].mxu1  ;;  %v1985_v28 = vsel %vm1730_vm1, %v4973_v19, 0.0  ;;  %v1988_v3 = vsel %vm1730_vm1, %v4981_v43, 0.0 }
 0x158   :  { %7268 = vst [vmem:[#allocation126_spill] sm:$0xff] %v5149_v50  ;;  %7269 = vst [vmem:[#allocation127_spill] sm:$0xff] %v5151_v58  ;;  %v5153_v23 = vpop.f32.mrb[63].mxu0  ;;  %v5155_v8 = vpop.f32.mrb[63].mxu1  ;;  %v2017_v40 = vsel %vm1730_vm1, %v4975_v18, 0.0 }
 0x159   :  { %7270 = vst [vmem:[#allocation128_spill] sm:$0xff] %v5153_v23  ;;  %7271 = vst [vmem:[#allocation129_spill] sm:$0xff] %v5155_v8  ;;  %v2020_v8 = vsel %vm1730_vm1, %v4983_v42, 0.0 }
 0x15b   :  { %1960 = vadd.xlane.f32.xlu0 %v1959_v26  ;;  %1963 = vadd.xlane.f32.xlu1 %v1962_v51  ;;  %v1979_v26 = vsel %vm1730_vm1, %v4977_v45, 0.0  ;;  %v1982_v51 = vsel %vm1730_vm1, %v4989_v39, 0.0 }
 0x15f   :  { %1986 = vadd.xlane.f32.xlu0 %v1985_v28  ;;  %1989 = vadd.xlane.f32.xlu1 %v1988_v3  ;;  %v2011_v28 = vsel %vm1730_vm1, %v4979_v44, 0.0  ;;  %v2014_v3 = vsel %vm1730_vm1, %v4991_v21, 0.0  ;;  %v2029_v44 = vsel %vm1730_vm1, %v4995_v24, 0.0 }
 0x163   :  { %2018 = vadd.xlane.f32.xlu0 %v2017_v40  ;;  %2021 = vadd.xlane.f32.xlu1 %v2020_v8  ;;  %v1997_v8 = vsel %vm1730_vm1, %v4993_v38, 0.0  ;;  %v2000_v40 = vsel %vm1730_vm1, %v5005_v37, 0.0  ;;  %v1991_v37 = vsel %vm1730_vm1, %v5001_v15, 0.0 }
 0x167   :  { %1980 = vadd.xlane.f32.xlu0 %v1979_v26  ;;  %1983 = vadd.xlane.f32.xlu1 %v1982_v51 }
 0x16b   :  { %2012 = vadd.xlane.f32.xlu0 %v2011_v28  ;;  %2015 = vadd.xlane.f32.xlu1 %v2014_v3  ;;  %v2032_v28 = vsel %vm1730_vm1, %v5007_v46, 0.0  ;;  %v2023_v46 = vsel %vm1730_vm1, %v5003_v14, 0.0 }
 0x16c   :  { %v1763_v22 = vpop.xlane.xlu0 %1762  ;;  %v1739_v27 = vpop.xlane.xlu1 %1738 }
 0x16d   :  { %v1781_v45 = vadd.f32 %v1763_v22, %v1739_v27  ;;  %v1994_v22 = vsel %vm1730_vm1, %v5009_v47, 0.0  ;;  %v2043_v47 = vsel %vm1730_vm1, %v5025_v11, 0.0 }
 0x16f   :  { %1998 = vadd.xlane.f32.xlu0 %v1997_v8  ;;  %2001 = vadd.xlane.f32.xlu1 %v2000_v40 }
 0x170   :  { %v1733_v26 = vpop.xlane.xlu0 %1732  ;;  %v1742_v51 = vpop.xlane.xlu1 %1741 }
 0x173   :  { %2030 = vadd.xlane.f32.xlu0 %v2029_v44  ;;  %2033 = vadd.xlane.f32.xlu1 %v2032_v28  ;;  %v2026_v44 = vsel %vm1730_vm1, %v5011_v31, 0.0 }
 0x174   :  { %v1757_v3 = vpop.xlane.xlu0 %1756  ;;  %v1766_v21 = vpop.xlane.xlu1 %1765 }
 0x175   :  { %v1779_v39 = vadd.f32 %v1757_v3, %v1733_v26  ;;  %v1782_v38 = vadd.f32 %v1766_v21, %v1742_v51  ;;  %v2049_v51 = vsel %vm1730_vm1, %v5021_v36, 0.0 }
 0x177   :  { %1992 = vadd.xlane.f32.xlu0 %v1991_v37  ;;  %1995 = vadd.xlane.f32.xlu1 %v1994_v22  ;;  %v2052_v37 = vsel %vm1730_vm1, %v5029_v55, 0.0  ;;  %v2081_v22 = vsel %vm1730_vm1, %v5023_v30, 0.0 }
 0x178   :  { %v1760_v27 = vpop.xlane.xlu1 %1759  ;;  %v1736_v8 = vpop.xlane.xlu0 %1735 }
 0x179   :  { %v1780_v40 = vadd.f32 %v1760_v27, %v1736_v8  ;;  %v2084_v27 = vsel %vm1730_vm1, %v5031_v54, 0.0 }
 0x17b   :  { %2024 = vadd.xlane.f32.xlu0 %v2023_v46  ;;  %2027 = vadd.xlane.f32.xlu1 %v2026_v44 }
 0x17c   :  { %v1751_v21 = vpop.xlane.xlu0 %1750  ;;  %v1754_v26 = vpop.xlane.xlu1 %1753 }
 0x17f   :  { %2050 = vadd.xlane.f32.xlu0 %v2049_v51  ;;  %2053 = vadd.xlane.f32.xlu1 %v2052_v37  ;;  %v2046_v51 = vsel %vm1730_vm1, %v5037_v62, 0.0 }
 0x180   :  { %v1775_v28 = vpop.xlane.xlu0 %1774  ;;  %v1778_v3 = vpop.xlane.xlu1 %1777 }
 0x181   :  { %v1785_v46 = vadd.f32 %v1775_v28, %v1751_v21  ;;  %v1786_v8 = vadd.f32 %v1778_v3, %v1754_v26  ;;  %v2075_v21 = vsel %vm1730_vm1, %v5027_v5, 0.0  ;;  %v2078_v26 = vsel %vm1730_vm1, %v5039_v61, 0.0 }
 0x183   :  { %2082 = vadd.xlane.f32.xlu0 %v2081_v22  ;;  %2085 = vadd.xlane.f32.xlu1 %v2084_v27  ;;  %v2061_v22 = vsel %vm1730_vm1, %v5041_v10, 0.0 }
 0x184   :  { %v1745_v44 = vpop.xlane.xlu0 %1744  ;;  %v1748_v31 = vpop.xlane.xlu1 %1747 }
 0x187   :  { %2044 = vadd.xlane.f32.xlu0 %v2043_v47  ;;  %2047 = vadd.xlane.f32.xlu1 %v2046_v51  ;;  %v2064_v47 = vsel %vm1730_vm1, %v5053_v13, 0.0 }
 0x188   :  { %v1769_v37 = vpop.xlane.xlu0 %1768  ;;  %v1772_v14 = vpop.xlane.xlu1 %1771 }
 0x189   :  { %v1783_v15 = vadd.f32 %v1769_v37, %v1745_v44  ;;  %v1784_v24 = vadd.f32 %v1772_v14, %v1748_v31  ;;  %v2093_v44 = vsel %vm1730_vm1, %v5043_v25, 0.0  ;;  %v2096_v37 = vsel %vm1730_vm1, %v5055_v60, 0.0  ;;  %v7290_v60 = vld [vmem:[#allocation117_spill] sm:$0xff] }
 0x18b   :  { %2076 = vadd.xlane.f32.xlu0 %v2075_v21  ;;  %2079 = vadd.xlane.f32.xlu1 %v2078_v26 }
 0x18c   :  { %v1795_v28 = vpop.xlane.xlu0 %1794  ;;  %v1798_v3 = vpop.xlane.xlu1 %1797 }
 0x18d   :  { %v1813_v27 = vadd.f32 %v1795_v28, %v1781_v45  ;;  %v1814_v51 = vadd.f32 %v1798_v3, %v1782_v38  ;;  %v2055_v28 = vsel %vm1730_vm1, %v5049_v63, 0.0  ;;  %v2058_v3 = vsel %vm1730_vm1, %v5057_v12, 0.0 }
 0x18f   :  { %2062 = vadd.xlane.f32.xlu0 %v2061_v22  ;;  %2065 = vadd.xlane.f32.xlu1 %v2064_v47 }
 0x190   :  { %v1827_v14 = vpop.xlane.xlu0 %1826  ;;  %v1830_v31 = vpop.xlane.xlu1 %1829 }
 0x191   :  { %v5217_v21 = vadd.f32 %v1827_v14, %v1813_v27  ;;  %v5219_v26 = vadd.f32 %v1830_v31, %v1814_v51  ;;  %v2087_v14 = vsel %vm1730_vm1, %v5051_v57, 0.0  ;;  %v2116_v31 = vsel %vm1730_vm1, %v5077_v7, 0.0 }
 0x193   :  { %2094 = vadd.xlane.f32.xlu0 %v2093_v44  ;;  %2097 = vadd.xlane.f32.xlu1 %v2096_v37 }
 0x194   :  { %v1789_v10 = vpop.xlane.xlu0 %1788  ;;  %v1792_v13 = vpop.xlane.xlu1 %1791 }
 0x195   :  { %v1811_v45 = vadd.f32 %v1789_v10, %v1779_v39  ;;  %v1812_v38 = vadd.f32 %v1792_v13, %v1780_v40  ;;  %v2090_v10 = vsel %vm1730_vm1, %v5059_v53, 0.0  ;;  %v2113_v40 = vsel %vm1730_vm1, %v5069_v56, 0.0  ;;  %v7278_v53 = vld [vmem:[#allocation109_spill] sm:$0xff] }
 0x197   :  { %2056 = vadd.xlane.f32.xlu0 %v2055_v28  ;;  %2059 = vadd.xlane.f32.xlu1 %v2058_v3  ;;  %v2145_v28 = vsel %vm1730_vm1, %v5071_v52, 0.0  ;;  %v2148_v3 = vsel %vm1730_vm1, %v5079_v6, 0.0 }
 0x198   :  { %v1821_v22 = vpop.xlane.xlu0 %1820  ;;  %v1824_v47 = vpop.xlane.xlu1 %1823 }
 0x199   :  { %v5225_v27 = vadd.f32 %v1821_v22, %v1811_v45  ;;  %v5227_v51 = vadd.f32 %v1824_v47, %v1812_v38 }
 0x19b   :  { %2088 = vadd.xlane.f32.xlu0 %v2087_v14  ;;  %2091 = vadd.xlane.f32.xlu1 %v2090_v10 }
 0x19c   :  { %v1807_v39 = vpop.xlane.xlu0 %1806  ;;  %v1810_v13 = vpop.xlane.xlu1 %1809 }
 0x19d   :  { %v1817_v44 = vadd.f32 %v1807_v39, %v1785_v46  ;;  %v1818_v37 = vadd.f32 %v1810_v13, %v1786_v8  ;;  %v2107_v39 = vsel %vm1730_vm1, %v5073_v33, 0.0  ;;  %v2110_v13 = vsel %vm1730_vm1, %v5085_v48, 0.0 }
 0x19f   :  { %2114 = vadd.xlane.f32.xlu0 %v2113_v40  ;;  %2117 = vadd.xlane.f32.xlu1 %v2116_v31 }
 0x1a0   :  { %v1839_v45 = vpop.xlane.xlu0 %1838  ;;  %v1842_v38 = vpop.xlane.xlu1 %1841 }
 0x1a1   :  { %v5241_v22 = vadd.f32 %v1839_v45, %v1817_v44  ;;  %v5243_v47 = vadd.f32 %v1842_v38, %v1818_v37  ;;  %v2139_v44 = vsel %vm1730_vm1, %v5075_v29, 0.0  ;;  %v2125_v45 = vsel %vm1730_vm1, %v5089_v32, 0.0 }
 0x1a2   :  { %v2128_v38 = vsel %vm1730_vm1, %v5101_v49, 0.0  ;;  %v7287_v49 = vld [vmem:[#allocation116_spill] sm:$0xff] }
 0x1a3   :  { %7272 = vst [vmem:[#allocation130_spill] sm:$0xff] %v5241_v22  ;;  %7273 = vst [vmem:[#allocation131_spill] sm:$0xff] %v5243_v47  ;;  %2146 = vadd.xlane.f32.xlu0 %v2145_v28  ;;  %2149 = vadd.xlane.f32.xlu1 %v2148_v3 }
 0x1a4   :  { %v1801_v14 = vpop.xlane.xlu0 %1800  ;;  %v1804_v10 = vpop.xlane.xlu1 %1803 }
 0x1a5   :  { %v5245_v46 = vadd.f32 %v1801_v14, %v1783_v15  ;;  %v5247_v8 = vadd.f32 %v1804_v10, %v1784_v24  ;;  %v2142_v15 = vsel %vm1730_vm1, %v5087_v34, 0.0  ;;  %v2157_v14 = vsel %vm1730_vm1, %v5091_v20, 0.0 }
 0x1a6   :  { %v2160_v10 = vsel %vm1730_vm1, %v5103_v16, 0.0 }
 0x1a7   :  { %7274 = vst [vmem:[#allocation132_spill] sm:$0xff] %v5245_v46  ;;  %7275 = vst [vmem:[#allocation133_spill] sm:$0xff] %v5247_v8  ;;  %2108 = vadd.xlane.f32.xlu0 %v2107_v39  ;;  %2111 = vadd.xlane.f32.xlu1 %v2110_v13 }
 0x1a8   :  { %v5253_v40 = vpop.xlane.xlu0 %1832  ;;  %v5255_v31 = vpop.xlane.xlu1 %1835 }
 0x1a9   :  { %7276 = vst [vmem:[#allocation134_spill] sm:$0xff] %v5253_v40  ;;  %7277 = vst [vmem:[#allocation135_spill] sm:$0xff] %v5255_v31  ;;  %v7292_v31 = vld [vmem:[#allocation125_spill] sm:$0xff] }
 0x1ab   :  { %2140 = vadd.xlane.f32.xlu0 %v2139_v44  ;;  %2143 = vadd.xlane.f32.xlu1 %v2142_v15  ;;  %v2119_v44 = vsel %vm1730_vm1, %v5097_v35, 0.0  ;;  %v2122_v15 = vsel %vm1730_vm1, %v5105_v17, 0.0 }
 0x1ac   :  { %v5261_v24 = vpop.xlane.xlu0 %1858  ;;  %v5263_v37 = vpop.xlane.xlu1 %1861 }
 0x1af   :  { %2126 = vadd.xlane.f32.xlu0 %v2125_v45  ;;  %2129 = vadd.xlane.f32.xlu1 %v2128_v38 }
 0x1b0   :  { %v5269_v28 = vpop.xlane.xlu0 %1890  ;;  %v5271_v3 = vpop.xlane.xlu1 %1893 }
 0x1b3   :  { %2158 = vadd.xlane.f32.xlu0 %v2157_v14  ;;  %2161 = vadd.xlane.f32.xlu1 %v2160_v10  ;;  %v2151_v14 = vsel %vm1730_vm1, %v7278_v53, 0.0  ;;  %v7279_v10 = vld [vmem:[#allocation113_spill] sm:$0xff] }
 0x1b4   :  { %v5277_v39 = vpop.xlane.xlu0 %1852  ;;  %v5279_v13 = vpop.xlane.xlu1 %1855  ;;  %v2154_v12 = vsel %vm1730_vm1, %v7279_v10, 0.0 }
 0x1b7   :  { %2120 = vadd.xlane.f32.xlu0 %v2119_v44  ;;  %2123 = vadd.xlane.f32.xlu1 %v2122_v15  ;;  %v2177_v44 = vsel %vm1730_vm1, %v5117_v9, 0.0  ;;  %v2180_v15 = vsel %vm1730_vm1, %v5125_v41, 0.0 }
 0x1b8   :  { %v5285_v45 = vpop.xlane.xlu0 %1884  ;;  %v5287_v38 = vpop.xlane.xlu1 %1887 }
 0x1bb   :  { %2152 = vadd.xlane.f32.xlu0 %v2151_v14  ;;  %2155 = vadd.xlane.f32.xlu1 %v2154_v12  ;;  %v2209_v14 = vsel %vm1730_vm1, %v5119_v2, 0.0  ;;  %v7284_v12 = vld [vmem:[#allocation119_spill] sm:$0xff] }
 0x1bc   :  { %v5293_v57 = vpop.xlane.xlu0 %1870  ;;  %v5295_v35 = vpop.xlane.xlu1 %1873  ;;  %v2212_v10 = vsel %vm1730_vm1, %v7284_v12, 0.0 }
 0x1bd   :  { %7280 = vst [vmem:[#allocation136_spill] sm:$0xff] %v5293_v57  ;;  %7281 = vst [vmem:[#allocation137_spill] sm:$0xff] %v5295_v35 }
 0x1bf   :  { %2178 = vadd.xlane.f32.xlu0 %v2177_v44  ;;  %2181 = vadd.xlane.f32.xlu1 %v2180_v15  ;;  %v2171_v44 = vsel %vm1730_vm1, %v7287_v49, 0.0  ;;  %v2174_v15 = vsel %vm1730_vm1, %v5133_v0, 0.0 }
 0x1c0   :  { %v5301_v17 = vpop.xlane.xlu0 %1902  ;;  %v5303_v53 = vpop.xlane.xlu1 %1905 }
 0x1c1   :  { %7282 = vst [vmem:[#allocation138_spill] sm:$0xff] %v5301_v17  ;;  %7283 = vst [vmem:[#allocation139_spill] sm:$0xff] %v5303_v53 }
 0x1c3   :  { %2210 = vadd.xlane.f32.xlu0 %v2209_v14  ;;  %2213 = vadd.xlane.f32.xlu1 %v2212_v10  ;;  %v2203_v14 = vsel %vm1730_vm1, %v7290_v60, 0.0  ;;  %v2206_v10 = vsel %vm1730_vm1, %v5135_v59, 0.0 }
 0x1c4   :  { %v5309_v63 = vpop.xlane.xlu0 %1864  ;;  %v5311_v16 = vpop.xlane.xlu1 %1867 }
 0x1c5   :  { %7285 = vst [vmem:[#allocation140_spill] sm:$0xff] %v5309_v63  ;;  %7286 = vst [vmem:[#allocation141_spill] sm:$0xff] %v5311_v16  ;;  %v7291_v16 = vld [vmem:[#allocation122_spill] sm:$0xff] }
 0x1c7   :  { %2172 = vadd.xlane.f32.xlu0 %v2171_v44  ;;  %2175 = vadd.xlane.f32.xlu1 %v2174_v15  ;;  %v2189_v44 = vsel %vm1730_vm1, %v7291_v16, 0.0  ;;  %v2192_v15 = vsel %vm1730_vm1, %v5149_v50, 0.0 }
 0x1c8   :  { %v5317_v20 = vpop.xlane.xlu0 %1896  ;;  %v5319_v2 = vpop.xlane.xlu1 %1899 }
 0x1c9   :  { %7288 = vst [vmem:[#allocation142_spill] sm:$0xff] %v5317_v20  ;;  %7289 = vst [vmem:[#allocation143_spill] sm:$0xff] %v5319_v2 }
 0x1cb   :  { %2204 = vadd.xlane.f32.xlu0 %v2203_v14  ;;  %2207 = vadd.xlane.f32.xlu1 %v2206_v10  ;;  %v2221_v14 = vsel %vm1730_vm1, %v5139_v4, 0.0  ;;  %v2224_v10 = vsel %vm1730_vm1, %v5151_v58, 0.0 }
 0x1cc   :  { %v5325_v32 = vpop.xlane.xlu0 %1922  ;;  %v5327_v25 = vpop.xlane.xlu1 %1925 }
 0x1cf   :  { %2190 = vadd.xlane.f32.xlu0 %v2189_v44  ;;  %2193 = vadd.xlane.f32.xlu1 %v2192_v15  ;;  %v2183_v44 = vsel %vm1730_vm1, %v5145_v1, 0.0  ;;  %v2186_v15 = vsel %vm1730_vm1, %v5153_v23, 0.0 }
 0x1d0   :  { %v5333_v2 = vpop.xlane.xlu0 %1954  ;;  %v5335_v20 = vpop.xlane.xlu1 %1957 }
 0x1d3   :  { %2222 = vadd.xlane.f32.xlu0 %v2221_v14  ;;  %2225 = vadd.xlane.f32.xlu1 %v2224_v10  ;;  %v2215_v14 = vsel %vm1730_vm1, %v7292_v31, 0.0  ;;  %v7293_v10 = vld [vmem:[#allocation129_spill] sm:$0xff] }
 0x1d4   :  { %v5341_v63 = vpop.xlane.xlu0 %1916  ;;  %v5343_v16 = vpop.xlane.xlu1 %1919  ;;  %v2218_v58 = vsel %vm1730_vm1, %v7293_v10, 0.0 }
 0x1d7   :  { %2184 = vadd.xlane.f32.xlu0 %v2183_v44  ;;  %2187 = vadd.xlane.f32.xlu1 %v2186_v15 }
 0x1d8   :  { %v5349_v50 = vpop.xlane.xlu0 %1948  ;;  %v5351_v4 = vpop.xlane.xlu1 %1951 }
 0x1db   :  { %2216 = vadd.xlane.f32.xlu0 %v2215_v14  ;;  %2219 = vadd.xlane.f32.xlu1 %v2218_v58 }
 0x1dc   :  { %v5357_v8 = vpop.xlane.xlu0 %1934  ;;  %v5359_v1 = vpop.xlane.xlu1 %1937 }
 0x1dd   :  { %7294 = vst [vmem:[#allocation144_spill] sm:$0xff] %v5357_v8  ;;  %7295 = vst [vmem:[#allocation145_spill] sm:$0xff] %v5359_v1 }
 0x1e0   :  { %v5361_v40 = vpop.xlane.xlu0 %1966  ;;  %v5363_v44 = vpop.xlane.xlu1 %1969 }
 0x1e1   :  { %7296 = vst [vmem:[#allocation146_spill] sm:$0xff] %v5361_v40  ;;  %7297 = vst [vmem:[#allocation147_spill] sm:$0xff] %v5363_v44 }
 0x1e4   :  { %v5365_v15 = vpop.xlane.xlu0 %1928  ;;  %v5367_v23 = vpop.xlane.xlu1 %1931 }
 0x1e5   :  { %7298 = vst [vmem:[#allocation148_spill] sm:$0xff] %v5365_v15  ;;  %7299 = vst [vmem:[#allocation149_spill] sm:$0xff] %v5367_v23 }
 0x1e8   :  { %v5369_v46 = vpop.xlane.xlu0 %1960  ;;  %v5371_v31 = vpop.xlane.xlu1 %1963 }
 0x1e9   :  { %7300 = vst [vmem:[#allocation150_spill] sm:$0xff] %v5369_v46  ;;  %7301 = vst [vmem:[#allocation151_spill] sm:$0xff] %v5371_v31 }
 0x1ec   :  { %v1987_v12 = vpop.xlane.xlu0 %1986  ;;  %v1990_v10 = vpop.xlane.xlu1 %1989 }
 0x1f0   :  { %v2019_v14 = vpop.xlane.xlu0 %2018  ;;  %v2022_v58 = vpop.xlane.xlu1 %2021 }
 0x1f4   :  { %v5373_v59 = vpop.xlane.xlu0 %1980  ;;  %v5375_v60 = vpop.xlane.xlu1 %1983 }
 0x1f8   :  { %v5377_v0 = vpop.xlane.xlu0 %2012  ;;  %v5379_v49 = vpop.xlane.xlu1 %2015 }
 0x1fc   :  { %v5381_v34 = vpop.xlane.xlu0 %1998  ;;  %v5383_v15 = vpop.xlane.xlu1 %2001 }
 0x1fd   :  { %7302 = vst [vmem:[#allocation152_spill] sm:$0xff] %v5381_v34  ;;  %7303 = vst [vmem:[#allocation153_spill] sm:$0xff] %v5383_v15 }
 0x200   :  { %v5385_v23 = vpop.xlane.xlu0 %2030  ;;  %v5387_v46 = vpop.xlane.xlu1 %2033 }
 0x201   :  { %7304 = vst [vmem:[#allocation154_spill] sm:$0xff] %v5385_v23  ;;  %7305 = vst [vmem:[#allocation155_spill] sm:$0xff] %v5387_v46 }
 0x204   :  { %v5389_v31 = vpop.xlane.xlu0 %1992  ;;  %v5391_v29 = vpop.xlane.xlu1 %1995 }
 0x205   :  { %7306 = vst [vmem:[#allocation156_spill] sm:$0xff] %v5389_v31  ;;  %7307 = vst [vmem:[#allocation157_spill] sm:$0xff] %v5391_v29 }
 0x208   :  { %v5393_v48 = vpop.xlane.xlu0 %2024  ;;  %v5395_v33 = vpop.xlane.xlu1 %2027 }
 0x209   :  { %7308 = vst [vmem:[#allocation158_spill] sm:$0xff] %v5393_v48  ;;  %7309 = vst [vmem:[#allocation159_spill] sm:$0xff] %v5395_v33 }
 0x20c   :  { %v2051_v61 = vpop.xlane.xlu0 %2050  ;;  %v2054_v5 = vpop.xlane.xlu1 %2053 }
 0x210   :  { %v2083_v44 = vpop.xlane.xlu0 %2082  ;;  %v2086_v1 = vpop.xlane.xlu1 %2085 }
 0x214   :  { %v5397_v62 = vpop.xlane.xlu0 %2044  ;;  %v5399_v34 = vpop.xlane.xlu1 %2047 }
 0x218   :  { %v5401_v15 = vpop.xlane.xlu0 %2076  ;;  %v5403_v23 = vpop.xlane.xlu1 %2079 }
 0x21c   :  { %v5405_v46 = vpop.xlane.xlu0 %2062  ;;  %v5407_v31 = vpop.xlane.xlu1 %2065 }
 0x21d   :  { %7310 = vst [vmem:[#allocation160_spill] sm:$0xff] %v5405_v46  ;;  %7311 = vst [vmem:[#allocation161_spill] sm:$0xff] %v5407_v31 }
 0x220   :  { %v5409_v29 = vpop.xlane.xlu0 %2094  ;;  %v5411_v48 = vpop.xlane.xlu1 %2097 }
 0x221   :  { %7312 = vst [vmem:[#allocation162_spill] sm:$0xff] %v5409_v29  ;;  %7313 = vst [vmem:[#allocation163_spill] sm:$0xff] %v5411_v48 }
 0x224   :  { %v5413_v33 = vpop.xlane.xlu0 %2056  ;;  %v5415_v11 = vpop.xlane.xlu1 %2059 }
 0x225   :  { %7314 = vst [vmem:[#allocation164_spill] sm:$0xff] %v5413_v33  ;;  %7315 = vst [vmem:[#allocation165_spill] sm:$0xff] %v5415_v11  ;;  %v1877_v33 = vadd.f32 %v5261_v24, %v5217_v21 }
 0x227   :  { %v1909_v48 = vadd.f32 %v5269_v28, %v1877_v33 }
 0x228   :  { %v5417_v40 = vpop.xlane.xlu0 %2088  ;;  %v5419_v53 = vpop.xlane.xlu1 %2091 }
 0x229   :  { %7316 = vst [vmem:[#allocation166_spill] sm:$0xff] %v5417_v40  ;;  %7317 = vst [vmem:[#allocation167_spill] sm:$0xff] %v5419_v53  ;;  %v1878_v40 = vadd.f32 %v5263_v37, %v5219_v26  ;;  %v1941_v41 = vadd.f32 %v5325_v32, %v1909_v48 }
 0x22b   :  { %v1910_v22 = vadd.f32 %v5271_v3, %v1878_v40  ;;  %v1973_v21 = vadd.f32 %v5333_v2, %v1941_v41 }
 0x22c   :  { %v2115_v8 = vpop.xlane.xlu0 %2114  ;;  %v2118_v35 = vpop.xlane.xlu1 %2117 }
 0x22d   :  { %v1942_v9 = vadd.f32 %v5327_v25, %v1910_v22  ;;  %v2005_v24 = vadd.f32 %v1987_v12, %v1973_v21 }
 0x22f   :  { %v1974_v26 = vadd.f32 %v5335_v20, %v1942_v9  ;;  %v2037_v33 = vadd.f32 %v2019_v14, %v2005_v24  ;;  %v7322_v24 = vld [vmem:[#allocation2_spill] sm:$0xff] }
 0x230   :  { %v2147_v47 = vpop.xlane.xlu0 %2146  ;;  %v2150_v17 = vpop.xlane.xlu1 %2149 }
 0x231   :  { %v2006_v37 = vadd.f32 %v1990_v10, %v1974_v26  ;;  %v2069_v28 = vadd.f32 %v2051_v61, %v2037_v33 }
 0x233   :  { %v2038_v40 = vadd.f32 %v2022_v58, %v2006_v37  ;;  %v2101_v22 = vadd.f32 %v2083_v44, %v2069_v28  ;;  %v7327_v28 = vld [vmem:[#allocation22_spill] sm:$0xff] }
 0x234   :  { %v5421_v57 = vpop.xlane.xlu0 %2108  ;;  %v5423_v46 = vpop.xlane.xlu1 %2111 }
 0x235   :  { %v2070_v32 = vadd.f32 %v2054_v5, %v2038_v40 }
 0x237   :  { %v2102_v3 = vadd.f32 %v2086_v1, %v2070_v32  ;;  %v7323_v1 = vld [vmem:[#allocation7_spill] sm:$0xff] }
 0x238   :  { %v5425_v31 = vpop.xlane.xlu0 %2140  ;;  %v5427_v29 = vpop.xlane.xlu1 %2143 }
 0x239   :  { %v2134_v2 = vadd.f32 %v2118_v35, %v2102_v3 }
 0x23b   :  { %v2166_v12 = vadd.f32 %v2150_v17, %v2134_v2  ;;  %v7325_v17 = vld [vmem:[#allocation6_spill] sm:$0xff] }
 0x23c   :  { %v5433_v11 = vpop.xlane.xlu0 %2126  ;;  %v5435_v53 = vpop.xlane.xlu1 %2129 }
 0x23d   :  { %7318 = vst [vmem:[#allocation168_spill] sm:$0xff] %v5433_v11  ;;  %7319 = vst [vmem:[#allocation169_spill] sm:$0xff] %v5435_v53 }
 0x240   :  { %v5441_v6 = vpop.xlane.xlu0 %2158  ;;  %v5443_v52 = vpop.xlane.xlu1 %2161 }
 0x241   :  { %7320 = vst [vmem:[#allocation170_spill] sm:$0xff] %v5443_v52  ;;  %v2133_v52 = vadd.f32 %v2115_v8, %v2101_v22  ;;  %v7324_v8 = vld [vmem:[#allocation3_spill] sm:$0xff] }
 0x243   :  { %v2165_v20 = vadd.f32 %v2147_v47, %v2133_v52 }
 0x244   :  { %v5447_v11 = vpop.xlane.xlu0 %2120  ;;  %v5449_v53 = vpop.xlane.xlu1 %2123 }
 0x245   :  { %7321 = vst [vmem:[#allocation171_spill] sm:$0xff] %v5449_v53 }
 0x248   :  { %v5451_v48 = vpop.xlane.xlu0 %2152  ;;  %v5453_v25 = vpop.xlane.xlu1 %2155 }
 0x24c   :  { %v2179_v41 = vpop.xlane.xlu0 %2178  ;;  %v2182_v9 = vpop.xlane.xlu1 %2181 }
 0x24d   :  { %v2197_v10 = vadd.f32 %v2179_v41, %v2165_v20  ;;  %v2198_v21 = vadd.f32 %v2182_v9, %v2166_v12 }
 0x250   :  { %v2211_v26 = vpop.xlane.xlu0 %2210  ;;  %v2214_v53 = vpop.xlane.xlu1 %2213 }
 0x251   :  { %v2229_v14 = vadd.f32 %v2211_v26, %v2197_v10  ;;  %v2230_v58 = vadd.f32 %v2214_v53, %v2198_v21  ;;  %v7326_v53 = vld [vmem:[#allocation18_spill] sm:$0xff]  ;;  %v7328_v21 = vld [vmem:[#allocation19_spill] sm:$0xff] }
 0x253   :  { %v5455_v61 = vmul.f32 0.03125, %v2229_v14  ;;  %v5457_v5 = vmul.f32 0.03125, %v2230_v58  ;;  %v7329_v14 = vld [vmem:[#allocation23_spill] sm:$0xff] }
 0x255   :  { %v2245_v44 = vsub.f32 %v7322_v24, %v5455_v61  ;;  %v2246_v35 = vsub.f32 %v7323_v1, %v5457_v5  ;;  %v2285_v52 = vsub.f32 %v7324_v8, %v5455_v61  ;;  %v2286_v47 = vsub.f32 %v7325_v17, %v5457_v5 }
 0x256   :  { %v2333_v40 = vsub.f32 %v7326_v53, %v5455_v61  ;;  %v2334_v32 = vsub.f32 %v7327_v28, %v5457_v5  ;;  %v2381_v26 = vsub.f32 %v7328_v21, %v5455_v61  ;;  %v2382_v58 = vsub.f32 %v7329_v14, %v5457_v5  ;;  %v7335_v28 = vld [vmem:[#allocation54_spill] sm:$0xff] }
 0x257   :  { %v2253_v37 = vmul.f32 %v2245_v44, %v2245_v44  ;;  %v2254_v33 = vmul.f32 %v2246_v35, %v2246_v35  ;;  %v2293_v2 = vmul.f32 %v2285_v52, %v2285_v52  ;;  %v2294_v41 = vmul.f32 %v2286_v47, %v2286_v47 }
 0x258   :  { %v2341_v9 = vmul.f32 %v2333_v40, %v2333_v40  ;;  %v2342_v20 = vmul.f32 %v2334_v32, %v2334_v32  ;;  %v2389_v52 = vmul.f32 %v2381_v26, %v2381_v26  ;;  %v2390_v47 = vmul.f32 %v2382_v58, %v2382_v58  ;;  %v7331_v40 = vld [vmem:[#allocation38_spill] sm:$0xff] }
 0x259   :  { %v2265_v22 = vsel %vm1730_vm1, %v2253_v37, 0.0  ;;  %v2268_v3 = vsel %vm1730_vm1, %v2254_v33, 0.0  ;;  %v2305_v12 = vsel %vm1730_vm1, %v2293_v2, 0.0  ;;  %v2308_v10 = vsel %vm1730_vm1, %v2294_v41, 0.0  ;;  %v7330_v37 = vld [vmem:[#allocation34_spill] sm:$0xff]  ;;  %v7333_v2 = vld [vmem:[#allocation39_spill] sm:$0xff] }
 0x25a   :  { %2266 = vadd.xlane.f32.xlu0 %v2265_v22  ;;  %2269 = vadd.xlane.f32.xlu1 %v2268_v3  ;;  %v2353_v44 = vsel %vm1730_vm1, %v2341_v9, 0.0  ;;  %v2356_v35 = vsel %vm1730_vm1, %v2342_v20, 0.0  ;;  %v2429_v33 = vsub.f32 %v7330_v37, %v5455_v61  ;;  %v2430_v32 = vsub.f32 %v7331_v40, %v5457_v5  ;;  %v7332_v22 = vld [vmem:[#allocation35_spill] sm:$0xff] }
 0x25b   :  { %v2477_v3 = vsub.f32 %v7332_v22, %v5455_v61  ;;  %v2478_v41 = vsub.f32 %v7333_v2, %v5457_v5  ;;  %v2401_v9 = vsel %vm1730_vm1, %v2389_v52, 0.0  ;;  %v2404_v20 = vsel %vm1730_vm1, %v2390_v47, 0.0  ;;  %v7336_v47 = vld [vmem:[#allocation51_spill] sm:$0xff] }
 0x25c   :  { %v2526_v2 = vsub.f32 %v7335_v28, %v5457_v5 }
 0x25d   :  { %v2485_v26 = vmul.f32 %v2477_v3, %v2477_v3  ;;  %v2486_v58 = vmul.f32 %v2478_v41, %v2478_v41 }
 0x25e   :  { %2306 = vadd.xlane.f32.xlu0 %v2305_v12  ;;  %2309 = vadd.xlane.f32.xlu1 %v2308_v10  ;;  %v2437_v12 = vmul.f32 %v2429_v33, %v2429_v33  ;;  %v2438_v10 = vmul.f32 %v2430_v32, %v2430_v32  ;;  %v2573_v33 = vsub.f32 %v7336_v47, %v5455_v61 }
 0x25f   :  { %v2497_v52 = vsel %vm1730_vm1, %v2485_v26, 0.0  ;;  %v2500_v32 = vsel %vm1730_vm1, %v2486_v58, 0.0  ;;  %v2534_v41 = vmul.f32 %v2526_v2, %v2526_v2 }
 0x260   :  { %v2449_v40 = vsel %vm1730_vm1, %v2437_v12, 0.0  ;;  %v1875_v12 = vadd.f32 %v5277_v39, %v5225_v27  ;;  %v2622_v27 = vsub.f32 %v4981_v43, %v5457_v5 }
 0x261   :  { %v2548_v58 = vsel %vm1730_vm1, %v2534_v41, 0.0 }
 0x262   :  { %2354 = vadd.xlane.f32.xlu0 %v2353_v44  ;;  %2357 = vadd.xlane.f32.xlu1 %v2356_v35  ;;  %v2452_v44 = vsel %vm1730_vm1, %v2438_v10, 0.0  ;;  %v7334_v35 = vld [vmem:[#allocation50_spill] sm:$0xff]  ;;  %v1876_v10 = vadd.f32 %v5279_v13, %v5227_v51 }
 0x263   :  { %v2525_v14 = vsub.f32 %v7334_v35, %v5455_v61 }
 0x264   :  { %v1908_v26 = vadd.f32 %v5287_v38, %v1876_v10 }
 0x265   :  { %v2533_v3 = vmul.f32 %v2525_v14, %v2525_v14  ;;  %v2621_v14 = vsub.f32 %v4973_v19, %v5455_v61 }
 0x266   :  { %2402 = vadd.xlane.f32.xlu0 %v2401_v9  ;;  %2405 = vadd.xlane.f32.xlu1 %v2404_v20  ;;  %v7337_v9 = vld [vmem:[#allocation55_spill] sm:$0xff]  ;;  %v1940_v39 = vadd.f32 %v5343_v16, %v1908_v26 }
 0x267   :  { %v2574_v20 = vsub.f32 %v7337_v9, %v5457_v5  ;;  %v2545_v2 = vsel %vm1730_vm1, %v2533_v3, 0.0  ;;  %v2669_v3 = vsub.f32 %v4975_v18, %v5455_v61 }
 0x269   :  { %v2582_v9 = vmul.f32 %v2574_v20, %v2574_v20  ;;  %v2677_v10 = vmul.f32 %v2669_v3, %v2669_v3 }
 0x26a   :  { %2450 = vadd.xlane.f32.xlu0 %v2449_v40  ;;  %2453 = vadd.xlane.f32.xlu1 %v2452_v44  ;;  %v1907_v40 = vadd.f32 %v5285_v45, %v1875_v12  ;;  %v2581_v44 = vmul.f32 %v2573_v33, %v2573_v33  ;;  %v1972_v45 = vadd.f32 %v5351_v4, %v1940_v39 }
 0x26b   :  { %v2596_v33 = vsel %vm1730_vm1, %v2582_v9, 0.0  ;;  %v2717_v9 = vsub.f32 %v5021_v36, %v5455_v61 }
 0x26c   :  { %v1939_v51 = vadd.f32 %v5341_v63, %v1907_v40  ;;  %v2593_v38 = vsel %vm1730_vm1, %v2581_v44, 0.0  ;;  %v2670_v63 = vsub.f32 %v4983_v42, %v5457_v5  ;;  %v2004_v41 = vadd.f32 %v5375_v60, %v1972_v45 }
 0x26e   :  { %2498 = vadd.xlane.f32.xlu0 %v2497_v52  ;;  %2501 = vadd.xlane.f32.xlu1 %v2500_v32  ;;  %v1971_v13 = vadd.f32 %v5349_v50, %v1939_v51  ;;  %v2629_v52 = vmul.f32 %v2621_v14, %v2621_v14  ;;  %v2630_v32 = vmul.f32 %v2622_v27, %v2622_v27  ;;  %v2689_v27 = vsel %vm1730_vm1, %v2677_v10, 0.0  ;;  %v7339_v10 = vld [vmem:[#allocation103_spill] sm:$0xff] }
 0x26f   :  { %v2036_v4 = vadd.f32 %v5379_v49, %v2004_v41  ;;  %v2678_v40 = vmul.f32 %v2670_v63, %v2670_v63  ;;  %v2176_v49 = vpop.xlane.xlu1 %2175  ;;  %v2725_v51 = vmul.f32 %v2717_v9, %v2717_v9  ;;  %v2813_v63 = vsub.f32 %v5069_v56, %v5455_v61  ;;  %v7338_v9 = vld [vmem:[#allocation99_spill] sm:$0xff] }
 0x270   :  { %v2003_v16 = vadd.f32 %v5373_v59, %v1971_v13  ;;  %v2641_v20 = vsel %vm1730_vm1, %v2629_v52, 0.0  ;;  %v2644_v12 = vsel %vm1730_vm1, %v2630_v32, 0.0  ;;  %v2718_v59 = vsub.f32 %v5029_v55, %v5457_v5 }
 0x271   :  { %v2068_v26 = vadd.f32 %v5399_v34, %v2036_v4  ;;  %v2737_v32 = vsel %vm1730_vm1, %v2725_v51, 0.0  ;;  %v2821_v4 = vmul.f32 %v2813_v63, %v2813_v63  ;;  %v7342_v51 = vld [vmem:[#allocation4_spill] sm:$0xff] }
 0x272   :  { %2546 = vadd.xlane.f32.xlu0 %v2545_v2  ;;  %2549 = vadd.xlane.f32.xlu1 %v2548_v58  ;;  %v2035_v50 = vadd.f32 %v5377_v0, %v2003_v16  ;;  %v2173_v0 = vpop.xlane.xlu0 %2172  ;;  %v2765_v2 = vsub.f32 %v5023_v30, %v5455_v61  ;;  %v2766_v58 = vsub.f32 %v5031_v54, %v5457_v5  ;;  %v7428_v30 = vld [vmem:[#allocation164_spill] sm:$0xff] }
 0x273   :  { %v2100_v14 = vadd.f32 %v5403_v23, %v2068_v26  ;;  %v2726_v34 = vmul.f32 %v2718_v59, %v2718_v59  ;;  %v7340_v26 = vld [vmem:[#allocation114_spill] sm:$0xff] }
 0x274   :  { %v2067_v60 = vadd.f32 %v5397_v62, %v2035_v50  ;;  %v2692_v62 = vsel %vm1730_vm1, %v2678_v40, 0.0  ;;  %v2773_v45 = vmul.f32 %v2765_v2, %v2765_v2  ;;  %v2862_v40 = vsub.f32 %v7339_v10, %v5457_v5  ;;  %v7371_v10 = vld [vmem:[#allocation88_spill] sm:$0xff] }
 0x275   :  { %v2132_v13 = vadd.f32 %v5423_v46, %v2100_v14  ;;  %v2740_v3 = vsel %vm1730_vm1, %v2726_v34, 0.0  ;;  %v2833_v14 = vsel %vm1730_vm1, %v2821_v4, 0.0 }
 0x276   :  { %2594 = vadd.xlane.f32.xlu0 %v2593_v38  ;;  %2597 = vadd.xlane.f32.xlu1 %v2596_v33  ;;  %v2099_v44 = vadd.f32 %v5401_v15, %v2067_v60  ;;  %v2774_v38 = vmul.f32 %v2766_v58, %v2766_v58  ;;  %v2205_v52 = vpop.xlane.xlu0 %2204  ;;  %v2208_v33 = vpop.xlane.xlu1 %2207  ;;  %v2785_v41 = vsel %vm1730_vm1, %v2773_v45, 0.0 }
 0x277   :  { %v2164_v15 = vadd.f32 %v5427_v29, %v2132_v13 }
 0x278   :  { %v2131_v39 = vadd.f32 %v5421_v57, %v2099_v44  ;;  %v2814_v57 = vsub.f32 %v5077_v7, %v5457_v5  ;;  %v2788_v50 = vsel %vm1730_vm1, %v2774_v38, 0.0 }
 0x279   :  { %v2196_v16 = vadd.f32 %v2176_v49, %v2164_v15  ;;  %v7341_v49 = vld [vmem:[#allocation118_spill] sm:$0xff]  ;;  %v7343_v15 = vld [vmem:[#allocation8_spill] sm:$0xff] }
 0x27a   :  { %2642 = vadd.xlane.f32.xlu0 %v2641_v20  ;;  %2645 = vadd.xlane.f32.xlu1 %v2644_v12  ;;  %v2163_v23 = vadd.f32 %v5425_v31, %v2131_v39  ;;  %v2822_v20 = vmul.f32 %v2814_v57, %v2814_v57  ;;  %v2861_v12 = vsub.f32 %v7338_v9, %v5455_v61  ;;  %v7345_v57 = vld [vmem:[#allocation9_spill] sm:$0xff] }
 0x27b   :  { %v2228_v29 = vadd.f32 %v2208_v33, %v2196_v16  ;;  %v2910_v44 = vsub.f32 %v7341_v49, %v5457_v5 }
 0x27c   :  { %v2195_v46 = vadd.f32 %v2173_v0, %v2163_v23  ;;  %v2909_v0 = vsub.f32 %v7340_v26, %v5455_v61  ;;  %v2836_v2 = vsel %vm1730_vm1, %v2822_v20, 0.0  ;;  %v2869_v58 = vmul.f32 %v2861_v12, %v2861_v12  ;;  %v7347_v20 = vld [vmem:[#allocation24_spill] sm:$0xff]  ;;  %v7413_v26 = vld [vmem:[#allocation142_spill] sm:$0xff] }
 0x27d   :  { %v5563_v60 = vmul.f32 0.03125, %v2228_v29  ;;  %v2918_v23 = vmul.f32 %v2910_v44, %v2910_v44  ;;  %v7349_v44 = vld [vmem:[#allocation25_spill] sm:$0xff] }
 0x27e   :  { %2690 = vadd.xlane.f32.xlu0 %v2689_v27  ;;  %2693 = vadd.xlane.f32.xlu1 %v2692_v62  ;;  %v2227_v31 = vadd.f32 %v2205_v52, %v2195_v46  ;;  %v2870_v27 = vmul.f32 %v2862_v40, %v2862_v40  ;;  %v2917_v62 = vmul.f32 %v2909_v0, %v2909_v0  ;;  %v2881_v39 = vsel %vm1730_vm1, %v2869_v58, 0.0  ;;  %v7348_v40 = vld [vmem:[#allocation21_spill] sm:$0xff] }
 0x27f   :  { %v2244_v45 = vsub.f32 %v7343_v15, %v5563_v60  ;;  %v2932_v33 = vsel %vm1730_vm1, %v2918_v23, 0.0  ;;  %v2284_v46 = vsub.f32 %v7345_v57, %v5563_v60  ;;  %v2332_v12 = vsub.f32 %v7347_v20, %v5563_v60  ;;  %v7366_v57 = vld [vmem:[#allocation137_spill] sm:$0xff] }
 0x280   :  { %v5561_v59 = vmul.f32 0.03125, %v2227_v31  ;;  %v2884_v13 = vsel %vm1730_vm1, %v2870_v27, 0.0  ;;  %v2929_v38 = vsel %vm1730_vm1, %v2917_v62, 0.0  ;;  %v7346_v31 = vld [vmem:[#allocation20_spill] sm:$0xff] }
 0x281   :  { %v2292_v4 = vmul.f32 %v2284_v46, %v2284_v46  ;;  %v2340_v62 = vmul.f32 %v2332_v12, %v2332_v12 }
 0x282   :  { %2738 = vadd.xlane.f32.xlu0 %v2737_v32  ;;  %2741 = vadd.xlane.f32.xlu1 %v2740_v3  ;;  %v2243_v34 = vsub.f32 %v7342_v51, %v5561_v59  ;;  %v2252_v32 = vmul.f32 %v2244_v45, %v2244_v45  ;;  %v7344_v3 = vld [vmem:[#allocation5_spill] sm:$0xff]  ;;  %v2331_v29 = vsub.f32 %v7346_v31, %v5561_v59 }
 0x283   :  { %v2283_v63 = vsub.f32 %v7344_v3, %v5561_v59  ;;  %v2379_v0 = vsub.f32 %v7348_v40, %v5561_v59  ;;  %v2302_v58 = vsel %vm1730_vm1, %v2292_v4, 0.0  ;;  %v2350_v45 = vsel %vm1730_vm1, %v2340_v62, 0.0  ;;  %v7355_v62 = vld [vmem:[#allocation56_spill] sm:$0xff] }
 0x284   :  { %v2251_v52 = vmul.f32 %v2243_v34, %v2243_v34  ;;  %v2339_v27 = vmul.f32 %v2331_v29, %v2331_v29  ;;  %v7352_v29 = vld [vmem:[#allocation37_spill] sm:$0xff] }
 0x285   :  { %v2387_v34 = vmul.f32 %v2379_v0, %v2379_v0  ;;  %v7354_v0 = vld [vmem:[#allocation52_spill] sm:$0xff] }
 0x286   :  { %2786 = vadd.xlane.f32.xlu0 %v2785_v41  ;;  %2789 = vadd.xlane.f32.xlu1 %v2788_v50  ;;  %v2259_v16 = vsel %vm1730_vm1, %v2251_v52, 0.0  ;;  %v2262_v41 = vsel %vm1730_vm1, %v2252_v32, 0.0  ;;  %v2291_v50 = vmul.f32 %v2283_v63, %v2283_v63  ;;  %v2347_v23 = vsel %vm1730_vm1, %v2339_v27, 0.0  ;;  %v7351_v52 = vld [vmem:[#allocation40_spill] sm:$0xff] }
 0x287   :  { %v2395_v32 = vsel %vm1730_vm1, %v2387_v34, 0.0  ;;  %v2524_v34 = vsub.f32 %v7355_v62, %v5563_v60 }
 0x28a   :  { %2834 = vadd.xlane.f32.xlu0 %v2833_v14  ;;  %2837 = vadd.xlane.f32.xlu1 %v2836_v2  ;;  %v2380_v14 = vsub.f32 %v7349_v44, %v5563_v60  ;;  %v2299_v2 = vsel %vm1730_vm1, %v2291_v50, 0.0  ;;  %v7353_v50 = vld [vmem:[#allocation41_spill] sm:$0xff] }
 0x28b   :  { %v2476_v4 = vsub.f32 %v7353_v50, %v5563_v60  ;;  %v7359_v50 = vld [vmem:[#allocation72_spill] sm:$0xff] }
 0x28d   :  { %v2484_v27 = vmul.f32 %v2476_v4, %v2476_v4 }
 0x28e   :  { %2882 = vadd.xlane.f32.xlu0 %v2881_v39  ;;  %2885 = vadd.xlane.f32.xlu1 %v2884_v13  ;;  %v7350_v39 = vld [vmem:[#allocation36_spill] sm:$0xff] }
 0x28f   :  { %v2427_v13 = vsub.f32 %v7350_v39, %v5561_v59 }
 0x291   :  { %v2435_v63 = vmul.f32 %v2427_v13, %v2427_v13  ;;  %v7356_v13 = vld [vmem:[#allocation53_spill] sm:$0xff] }
 0x292   :  { %2930 = vadd.xlane.f32.xlu0 %v2929_v38  ;;  %2933 = vadd.xlane.f32.xlu1 %v2932_v33  ;;  %v2388_v38 = vmul.f32 %v2380_v14, %v2380_v14  ;;  %v2428_v33 = vsub.f32 %v7351_v52, %v5563_v60  ;;  %v2523_v14 = vsub.f32 %v7354_v0, %v5561_v59  ;;  %v7360_v52 = vld [vmem:[#allocation130_spill] sm:$0xff] }
 0x293   :  { %v2443_v12 = vsel %vm1730_vm1, %v2435_v63, 0.0 }
 0x294   :  { %v2398_v46 = vsel %vm1730_vm1, %v2388_v38, 0.0  ;;  %v2531_v63 = vmul.f32 %v2523_v14, %v2523_v14  ;;  %v7362_v14 = vld [vmem:[#allocation138_spill] sm:$0xff] }
 0x296   :  { %2260 = vadd.xlane.f32.xlu0 %v2259_v16  ;;  %2263 = vadd.xlane.f32.xlu1 %v2262_v41  ;;  %v2436_v16 = vmul.f32 %v2428_v33, %v2428_v33  ;;  %v2475_v41 = vsub.f32 %v7352_v29, %v5561_v59 }
 0x29a   :  { %2300 = vadd.xlane.f32.xlu0 %v2299_v2  ;;  %2303 = vadd.xlane.f32.xlu1 %v2302_v58  ;;  %v2446_v2 = vsel %vm1730_vm1, %v2436_v16, 0.0  ;;  %v2483_v58 = vmul.f32 %v2475_v41, %v2475_v41  ;;  %v7358_v41 = vld [vmem:[#allocation68_spill] sm:$0xff] }
 0x29b   :  { %v2619_v4 = vsub.f32 %v7358_v41, %v5561_v59 }
 0x29c   :  { %v2491_v33 = vsel %vm1730_vm1, %v2483_v58, 0.0  ;;  %v7361_v58 = vld [vmem:[#allocation136_spill] sm:$0xff] }
 0x29d   :  { %v1881_v44 = vadd.f32 %v7361_v58, %v7360_v52  ;;  %v7367_v52 = vld [vmem:[#allocation144_spill] sm:$0xff] }
 0x29e   :  { %2348 = vadd.xlane.f32.xlu0 %v2347_v23  ;;  %2351 = vadd.xlane.f32.xlu1 %v2350_v45  ;;  %v2571_v23 = vsub.f32 %v7356_v13, %v5561_v59  ;;  %v7357_v45 = vld [vmem:[#allocation57_spill] sm:$0xff] }
 0x29f   :  { %v2572_v38 = vsub.f32 %v7357_v45, %v5563_v60  ;;  %v2620_v45 = vsub.f32 %v7359_v50, %v5563_v60  ;;  %v7365_v50 = vld [vmem:[#allocation131_spill] sm:$0xff] }
 0x2a0   :  { %v2579_v16 = vmul.f32 %v2571_v23, %v2571_v23  ;;  %v2627_v23 = vmul.f32 %v2619_v4, %v2619_v4  ;;  %v1882_v15 = vadd.f32 %v7366_v57, %v7365_v50  ;;  %v2716_v57 = vsub.f32 %v7371_v10, %v5563_v60  ;;  %v7372_v50 = vld [vmem:[#allocation145_spill] sm:$0xff] }
 0x2a1   :  { %v2580_v62 = vmul.f32 %v2572_v38, %v2572_v38  ;;  %v7364_v38 = vld [vmem:[#allocation73_spill] sm:$0xff] }
 0x2a2   :  { %2396 = vadd.xlane.f32.xlu0 %v2395_v32  ;;  %2399 = vadd.xlane.f32.xlu1 %v2398_v46  ;;  %v2494_v32 = vsel %vm1730_vm1, %v2484_v27, 0.0  ;;  %v2532_v46 = vmul.f32 %v2524_v34, %v2524_v34  ;;  %v1913_v27 = vadd.f32 %v7362_v14, %v1881_v44  ;;  %v2587_v34 = vsel %vm1730_vm1, %v2579_v16, 0.0  ;;  %v7368_v44 = vld [vmem:[#allocation139_spill] sm:$0xff]  ;;  %v7369_v16 = vld [vmem:[#allocation146_spill] sm:$0xff] }
 0x2a3   :  { %v2668_v20 = vsub.f32 %v7364_v38, %v5563_v60 }
 0x2a5   :  { %v2676_v38 = vmul.f32 %v2668_v20, %v2668_v20 }
 0x2a6   :  { %2444 = vadd.xlane.f32.xlu0 %v2443_v12  ;;  %2447 = vadd.xlane.f32.xlu1 %v2446_v2  ;;  %v2539_v12 = vsel %vm1730_vm1, %v2531_v63, 0.0  ;;  %v2542_v2 = vsel %vm1730_vm1, %v2532_v46, 0.0  ;;  %v7363_v63 = vld [vmem:[#allocation69_spill] sm:$0xff] }
 0x2a7   :  { %v2667_v46 = vsub.f32 %v7363_v63, %v5561_v59  ;;  %v2686_v10 = vsel %vm1730_vm1, %v2676_v38, 0.0 }
 0x2a9   :  { %v2675_v49 = vmul.f32 %v2667_v46, %v2667_v46 }
 0x2aa   :  { %2492 = vadd.xlane.f32.xlu0 %v2491_v33  ;;  %2495 = vadd.xlane.f32.xlu1 %v2494_v32  ;;  %v2590_v33 = vsel %vm1730_vm1, %v2580_v62, 0.0  ;;  %v2628_v32 = vmul.f32 %v2620_v45, %v2620_v45  ;;  %v2635_v62 = vsel %vm1730_vm1, %v2627_v23, 0.0  ;;  %v7370_v45 = vld [vmem:[#allocation84_spill] sm:$0xff] }
 0x2ab   :  { %v2715_v58 = vsub.f32 %v7370_v45, %v5561_v59  ;;  %v2683_v20 = vsel %vm1730_vm1, %v2675_v49, 0.0 }
 0x2ac   :  { %v2638_v14 = vsel %vm1730_vm1, %v2628_v32, 0.0  ;;  %v7377_v32 = vld [vmem:[#allocation89_spill] sm:$0xff] }
 0x2ad   :  { %v2764_v46 = vsub.f32 %v7377_v32, %v5563_v60  ;;  %v2723_v7 = vmul.f32 %v2715_v58, %v2715_v58  ;;  %v7382_v32 = vld [vmem:[#allocation100_spill] sm:$0xff] }
 0x2ae   :  { %2540 = vadd.xlane.f32.xlu0 %v2539_v12  ;;  %2543 = vadd.xlane.f32.xlu1 %v2542_v2  ;;  %v1945_v12 = vadd.f32 %v7367_v52, %v1913_v27  ;;  %v1914_v2 = vadd.f32 %v7368_v44, %v1882_v15  ;;  %v7374_v15 = vld [vmem:[#allocation147_spill] sm:$0xff]  ;;  %v7376_v44 = vld [vmem:[#allocation85_spill] sm:$0xff]  ;;  %v2811_v55 = vsub.f32 %v7382_v32, %v5561_v59 }
 0x2af   :  { %v2731_v49 = vsel %vm1730_vm1, %v2723_v7, 0.0  ;;  %v2772_v58 = vmul.f32 %v2764_v46, %v2764_v46 }
 0x2b0   :  { %v1977_v4 = vadd.f32 %v7369_v16, %v1945_v12  ;;  %v1946_v27 = vadd.f32 %v7372_v50, %v1914_v2  ;;  %v7375_v12 = vld [vmem:[#allocation154_spill] sm:$0xff]  ;;  %v2763_v16 = vsub.f32 %v7376_v44, %v5561_v59  ;;  %v2724_v2 = vmul.f32 %v2716_v57, %v2716_v57  ;;  %v7378_v50 = vld [vmem:[#allocation153_spill] sm:$0xff]  ;;  %v7383_v57 = vld [vmem:[#allocation104_spill] sm:$0xff] }
 0x2b1   :  { %v2819_v7 = vmul.f32 %v2811_v55, %v2811_v55  ;;  %v2782_v46 = vsel %vm1730_vm1, %v2772_v58, 0.0 }
 0x2b2   :  { %2588 = vadd.xlane.f32.xlu0 %v2587_v34  ;;  %2591 = vadd.xlane.f32.xlu1 %v2590_v33  ;;  %v7373_v34 = vld [vmem:[#allocation152_spill] sm:$0xff]  ;;  %v1978_v52 = vadd.f32 %v7374_v15, %v1946_v27  ;;  %v2191_v27 = vpop.xlane.xlu0 %2190  ;;  %v7381_v15 = vld [vmem:[#allocation162_spill] sm:$0xff]  ;;  %v2771_v54 = vmul.f32 %v2763_v16, %v2763_v16  ;;  %v2734_v38 = vsel %vm1730_vm1, %v2724_v2, 0.0 }
 0x2b3   :  { %v2009_v33 = vadd.f32 %v7373_v34, %v1977_v4  ;;  %v7380_v34 = vld [vmem:[#allocation155_spill] sm:$0xff]  ;;  %v2827_v55 = vsel %vm1730_vm1, %v2819_v7, 0.0 }
 0x2b4   :  { %v2010_v4 = vadd.f32 %v7378_v50, %v1978_v52  ;;  %v2812_v52 = vsub.f32 %v7383_v57, %v5563_v60  ;;  %v7387_v57 = vld [vmem:[#allocation101_spill] sm:$0xff] }
 0x2b5   :  { %v2041_v23 = vadd.f32 %v7375_v12, %v2009_v33  ;;  %v2859_v42 = vsub.f32 %v7387_v57, %v5561_v59 }
 0x2b6   :  { %2636 = vadd.xlane.f32.xlu0 %v2635_v62  ;;  %2639 = vadd.xlane.f32.xlu1 %v2638_v14  ;;  %v7379_v62 = vld [vmem:[#allocation160_spill] sm:$0xff]  ;;  %v2042_v33 = vadd.f32 %v7380_v34, %v2010_v4  ;;  %v2194_v4 = vpop.xlane.xlu1 %2193  ;;  %v2779_v34 = vsel %vm1730_vm1, %v2771_v54, 0.0  ;;  %v2820_v2 = vmul.f32 %v2812_v52, %v2812_v52 }
 0x2b7   :  { %v2073_v14 = vadd.f32 %v7379_v62, %v2041_v23  ;;  %v7384_v23 = vld [vmem:[#allocation161_spill] sm:$0xff]  ;;  %v7386_v62 = vld [vmem:[#allocation163_spill] sm:$0xff]  ;;  %v7391_v54 = vld [vmem:[#allocation116_spill] sm:$0xff] }
 0x2b8   :  { %v2907_v58 = vsub.f32 %v7391_v54, %v5561_v59 }
 0x2b9   :  { %v2105_v12 = vadd.f32 %v7381_v15, %v2073_v14  ;;  %v2223_v15 = vpop.xlane.xlu0 %2222 }
 0x2ba   :  { %2684 = vadd.xlane.f32.xlu0 %v2683_v20  ;;  %2687 = vadd.xlane.f32.xlu1 %v2686_v10  ;;  %v2074_v20 = vadd.f32 %v7384_v23, %v2042_v33  ;;  %v7385_v10 = vld [vmem:[#allocation168_spill] sm:$0xff]  ;;  %v7388_v33 = vld [vmem:[#allocation105_spill] sm:$0xff]  ;;  %v2226_v52 = vpop.xlane.xlu1 %2225 }
 0x2bb   :  { %v2137_v50 = vadd.f32 %v7385_v10, %v2105_v12  ;;  %v2860_v12 = vsub.f32 %v7388_v33, %v5563_v60  ;;  %v7392_v33 = vld [vmem:[#allocation120_spill] sm:$0xff] }
 0x2bc   :  { %v2106_v16 = vadd.f32 %v7386_v62, %v2074_v20  ;;  %v7390_v20 = vld [vmem:[#allocation170_spill] sm:$0xff]  ;;  %v2867_v62 = vmul.f32 %v2859_v42, %v2859_v42  ;;  %v2908_v28 = vsub.f32 %v7392_v33, %v5563_v60  ;;  %v7410_v33 = vld [vmem:[#allocation141_spill] sm:$0xff] }
 0x2bd   :  { %v2169_v14 = vadd.f32 %v5441_v6, %v2137_v50  ;;  %v2830_v50 = vsel %vm1730_vm1, %v2820_v2, 0.0  ;;  %v2868_v43 = vmul.f32 %v2860_v12, %v2860_v12  ;;  %v2915_v2 = vmul.f32 %v2907_v58, %v2907_v58 }
 0x2be   :  { %2732 = vadd.xlane.f32.xlu0 %v2731_v49  ;;  %2735 = vadd.xlane.f32.xlu1 %v2734_v38  ;;  %v7389_v49 = vld [vmem:[#allocation169_spill] sm:$0xff]  ;;  %v2916_v12 = vmul.f32 %v2908_v28, %v2908_v28 }
 0x2bf   :  { %v2138_v38 = vadd.f32 %v7389_v49, %v2106_v16  ;;  %v2201_v23 = vadd.f32 %v2191_v27, %v2169_v14  ;;  %v2875_v49 = vsel %vm1730_vm1, %v2867_v62, 0.0  ;;  %v2878_v42 = vsel %vm1730_vm1, %v2868_v43, 0.0 }
 0x2c1   :  { %v2170_v6 = vadd.f32 %v7390_v20, %v2138_v38  ;;  %v2233_v10 = vadd.f32 %v2223_v15, %v2201_v23  ;;  %v7394_v15 = vld [vmem:[#allocation121_spill] sm:$0xff]  ;;  %v7395_v23 = vld [vmem:[#allocation10_spill] sm:$0xff] }
 0x2c2   :  { %2780 = vadd.xlane.f32.xlu0 %v2779_v34  ;;  %2783 = vadd.xlane.f32.xlu1 %v2782_v46  ;;  %v7393_v34 = vld [vmem:[#allocation117_spill] sm:$0xff]  ;;  %v2956_v46 = vsub.f32 %v7394_v15, %v5563_v60 }
 0x2c3   :  { %v2202_v16 = vadd.f32 %v2194_v4, %v2170_v6  ;;  %v5683_v27 = vmul.f32 0.03125, %v2233_v10  ;;  %v2955_v7 = vsub.f32 %v7393_v34, %v5561_v59  ;;  %v2923_v6 = vsel %vm1730_vm1, %v2915_v2, 0.0 }
 0x2c4   :  { %v2926_v10 = vsel %vm1730_vm1, %v2916_v12, 0.0 }
 0x2c5   :  { %v2234_v14 = vadd.f32 %v2226_v52, %v2202_v16  ;;  %v2963_v38 = vmul.f32 %v2955_v7, %v2955_v7  ;;  %v2249_v20 = vsub.f32 %v7395_v23, %v5683_v27  ;;  %v7396_v52 = vld [vmem:[#allocation119_spill] sm:$0xff]  ;;  %v7398_v7 = vld [vmem:[#allocation14_spill] sm:$0xff] }
 0x2c6   :  { %2828 = vadd.xlane.f32.xlu0 %v2827_v55  ;;  %2831 = vadd.xlane.f32.xlu1 %v2830_v50  ;;  %v2964_v55 = vmul.f32 %v2956_v46, %v2956_v46  ;;  %v2958_v50 = vsub.f32 %v7396_v52, %v5457_v5  ;;  %v7397_v16 = vld [vmem:[#allocation11_spill] sm:$0xff] }
 0x2c7   :  { %v5691_v4 = vmul.f32 0.03125, %v2234_v14  ;;  %v2971_v43 = vsel %vm1730_vm1, %v2963_v38, 0.0  ;;  %v2257_v28 = vmul.f32 %v2249_v20, %v2249_v20  ;;  %v2289_v14 = vsub.f32 %v7397_v16, %v5683_v27 }
 0x2c8   :  { %v2974_v58 = vsel %vm1730_vm1, %v2964_v55, 0.0  ;;  %v2966_v62 = vmul.f32 %v2958_v50, %v2958_v50  ;;  %v7401_v55 = vld [vmem:[#allocation27_spill] sm:$0xff] }
 0x2c9   :  { %v2277_v46 = vsel %vm1730_vm1, %v2257_v28, 0.0  ;;  %v2297_v38 = vmul.f32 %v2289_v14, %v2289_v14  ;;  %v2385_v50 = vsub.f32 %v7401_v55, %v5683_v27  ;;  %v7403_v14 = vld [vmem:[#allocation42_spill] sm:$0xff] }
 0x2ca   :  { %2876 = vadd.xlane.f32.xlu0 %v2875_v49  ;;  %2879 = vadd.xlane.f32.xlu1 %v2878_v42  ;;  %v2250_v49 = vsub.f32 %v7398_v7, %v5691_v4  ;;  %v7399_v42 = vld [vmem:[#allocation26_spill] sm:$0xff]  ;;  %v2980_v12 = vsel %vm1730_vm1, %v2966_v62, 0.0 }
 0x2cb   :  { %v2337_v2 = vsub.f32 %v7399_v42, %v5683_v27  ;;  %v2317_v28 = vsel %vm1730_vm1, %v2297_v38, 0.0  ;;  %v2393_v62 = vmul.f32 %v2385_v50, %v2385_v50  ;;  %v7404_v38 = vld [vmem:[#allocation31_spill] sm:$0xff] }
 0x2cc   :  { %v2258_v20 = vmul.f32 %v2250_v49, %v2250_v49  ;;  %v2433_v49 = vsub.f32 %v7403_v14, %v5683_v27  ;;  %v7408_v50 = vld [vmem:[#allocation135_spill] sm:$0xff]  ;;  %v7409_v14 = vld [vmem:[#allocation140_spill] sm:$0xff] }
 0x2cd   :  { %v2345_v42 = vmul.f32 %v2337_v2, %v2337_v2  ;;  %v7405_v2 = vld [vmem:[#allocation132_spill] sm:$0xff] }
 0x2ce   :  { %2924 = vadd.xlane.f32.xlu0 %v2923_v6  ;;  %2927 = vadd.xlane.f32.xlu1 %v2926_v10  ;;  %v7400_v6 = vld [vmem:[#allocation15_spill] sm:$0xff]  ;;  %v2280_v16 = vsel %vm1730_vm1, %v2258_v20, 0.0  ;;  %v2386_v20 = vsub.f32 %v7404_v38, %v5691_v4  ;;  %v2441_v17 = vmul.f32 %v2433_v49, %v2433_v49 }
 0x2cf   :  { %v2290_v10 = vsub.f32 %v7400_v6, %v5691_v4  ;;  %v2365_v55 = vsel %vm1730_vm1, %v2345_v42, 0.0  ;;  %v2413_v42 = vsel %vm1730_vm1, %v2393_v62, 0.0  ;;  %v7411_v38 = vld [vmem:[#allocation43_spill] sm:$0xff] }
 0x2d0   :  { %v2481_v1 = vsub.f32 %v7411_v38, %v5683_v27 }
 0x2d1   :  { %v2298_v23 = vmul.f32 %v2290_v10, %v2290_v10  ;;  %v7406_v10 = vld [vmem:[#allocation134_spill] sm:$0xff] }
 0x2d2   :  { %2972 = vadd.xlane.f32.xlu0 %v2971_v43  ;;  %2975 = vadd.xlane.f32.xlu1 %v2974_v58  ;;  %v7402_v43 = vld [vmem:[#allocation30_spill] sm:$0xff] }
 0x2d3   :  { %v2338_v58 = vsub.f32 %v7402_v43, %v5691_v4  ;;  %v2320_v43 = vsel %vm1730_vm1, %v2298_v23, 0.0 }
 0x2d5   :  { %v2346_v6 = vmul.f32 %v2338_v58, %v2338_v58  ;;  %v2394_v58 = vmul.f32 %v2386_v20, %v2386_v20  ;;  %v2461_v20 = vsel %vm1730_vm1, %v2441_v17, 0.0 }
 0x2d6   :  { %2278 = vadd.xlane.f32.xlu0 %v2277_v46  ;;  %2981 = vadd.xlane.f32.xlu1 %v2980_v12  ;;  %v5719_v46 = vpop.xlane.xlu0 %2184  ;;  %v5721_v12 = vpop.xlane.xlu1 %2187 }
 0x2d7   :  { %v2368_v23 = vsel %vm1730_vm1, %v2346_v6, 0.0  ;;  %v7416_v6 = vld [vmem:[#allocation149_spill] sm:$0xff]  ;;  %v2416_v38 = vsel %vm1730_vm1, %v2394_v58, 0.0 }
 0x2da   :  { %2318 = vadd.xlane.f32.xlu0 %v2317_v28  ;;  %2281 = vadd.xlane.f32.xlu1 %v2280_v16  ;;  %v1847_v28 = vadd.f32 %v7406_v10, %v7405_v2  ;;  %v7407_v16 = vld [vmem:[#allocation133_spill] sm:$0xff]  ;;  %v7412_v2 = vld [vmem:[#allocation46_spill] sm:$0xff] }
 0x2db   :  { %v1848_v7 = vadd.f32 %v7408_v50, %v7407_v16  ;;  %v2434_v10 = vsub.f32 %v7412_v2, %v5691_v4  ;;  %v7420_v2 = vld [vmem:[#allocation151_spill] sm:$0xff] }
 0x2dc   :  { %v1879_v15 = vadd.f32 %v7409_v14, %v1847_v28  ;;  %v5741_v14 = vpop.xlane.xlu0 %2216  ;;  %v7417_v28 = vld [vmem:[#allocation58_spill] sm:$0xff] }
 0x2dd   :  { %v1880_v52 = vadd.f32 %v7410_v33, %v1848_v7  ;;  %v5743_v33 = vpop.xlane.xlu1 %2219  ;;  %v7415_v7 = vld [vmem:[#allocation148_spill] sm:$0xff]  ;;  %v2529_v50 = vsub.f32 %v7417_v28, %v5683_v27  ;;  %v7423_v28 = vld [vmem:[#allocation59_spill] sm:$0xff] }
 0x2de   :  { %2366 = vadd.xlane.f32.xlu0 %v2365_v55  ;;  %2321 = vadd.xlane.f32.xlu1 %v2320_v43  ;;  %v1911_v16 = vadd.f32 %v7413_v26, %v1879_v15  ;;  %v7414_v55 = vld [vmem:[#allocation143_spill] sm:$0xff]  ;;  %v2489_v26 = vmul.f32 %v2481_v1, %v2481_v1  ;;  %v2442_v15 = vmul.f32 %v2434_v10, %v2434_v10  ;;  %v7424_v1 = vld [vmem:[#allocation62_spill] sm:$0xff] }
 0x2df   :  { %v1912_v43 = vadd.f32 %v7414_v55, %v1880_v52  ;;  %v7418_v52 = vld [vmem:[#allocation47_spill] sm:$0xff]  ;;  %v2577_v58 = vsub.f32 %v7423_v28, %v5683_v27  ;;  %v2530_v10 = vsub.f32 %v7424_v1, %v5691_v4 }
 0x2e0   :  { %v1943_v62 = vadd.f32 %v7415_v7, %v1911_v16  ;;  %v7421_v7 = vld [vmem:[#allocation156_spill] sm:$0xff] }
 0x2e1   :  { %v1944_v49 = vadd.f32 %v7416_v6, %v1912_v43  ;;  %v7422_v6 = vld [vmem:[#allocation157_spill] sm:$0xff] }
 0x2e2   :  { %2414 = vadd.xlane.f32.xlu0 %v2413_v42  ;;  %2369 = vadd.xlane.f32.xlu1 %v2368_v23  ;;  %v2482_v42 = vsub.f32 %v7418_v52, %v5691_v4  ;;  %v7419_v23 = vld [vmem:[#allocation150_spill] sm:$0xff]  ;;  %v2509_v52 = vsel %vm1730_vm1, %v2489_v26, 0.0  ;;  %v2585_v26 = vmul.f32 %v2577_v58, %v2577_v58 }
 0x2e3   :  { %v1975_v55 = vadd.f32 %v7419_v23, %v1943_v62  ;;  %v1976_v9 = vadd.f32 %v7420_v2, %v1944_v49  ;;  %v2464_v62 = vsel %vm1730_vm1, %v2442_v15, 0.0  ;;  %v2537_v23 = vmul.f32 %v2529_v50, %v2529_v50  ;;  %v7425_v49 = vld [vmem:[#allocation158_spill] sm:$0xff] }
 0x2e4   :  { %v2490_v2 = vmul.f32 %v2482_v42, %v2482_v42  ;;  %v2538_v42 = vmul.f32 %v2530_v10, %v2530_v10  ;;  %v2605_v58 = vsel %vm1730_vm1, %v2585_v26, 0.0  ;;  %v7432_v10 = vld [vmem:[#allocation75_spill] sm:$0xff] }
 0x2e5   :  { %v2007_v17 = vadd.f32 %v7421_v7, %v1975_v55  ;;  %v2008_v56 = vadd.f32 %v7422_v6, %v1976_v9  ;;  %v7427_v6 = vld [vmem:[#allocation74_spill] sm:$0xff]  ;;  %v2557_v15 = vsel %vm1730_vm1, %v2537_v23, 0.0 }
 0x2e6   :  { %2462 = vadd.xlane.f32.xlu0 %v2461_v20  ;;  %2417 = vadd.xlane.f32.xlu1 %v2416_v38  ;;  %v7426_v20 = vld [vmem:[#allocation159_spill] sm:$0xff]  ;;  %v2625_v28 = vsub.f32 %v7427_v6, %v5683_v27  ;;  %v2512_v50 = vsel %vm1730_vm1, %v2490_v2, 0.0  ;;  %v2560_v23 = vsel %vm1730_vm1, %v2538_v42, 0.0 }
 0x2e7   :  { %v2267_v16 = vpop.xlane.xlu0 %2266  ;;  %v2270_v43 = vpop.xlane.xlu1 %2269  ;;  %v2039_v38 = vadd.f32 %v7425_v49, %v2007_v17  ;;  %v2040_v55 = vadd.f32 %v7426_v20, %v2008_v56  ;;  %v7430_v56 = vld [vmem:[#allocation165_spill] sm:$0xff]  ;;  %v7431_v49 = vld [vmem:[#allocation166_spill] sm:$0xff] }
 0x2e9   :  { %v2071_v36 = vadd.f32 %v7428_v30, %v2039_v38  ;;  %v2633_v30 = vmul.f32 %v2625_v28, %v2625_v28  ;;  %v2673_v38 = vsub.f32 %v7432_v10, %v5683_v27 }
 0x2ea   :  { %2510 = vadd.xlane.f32.xlu0 %v2509_v52  ;;  %2465 = vadd.xlane.f32.xlu1 %v2464_v62  ;;  %v7429_v52 = vld [vmem:[#allocation63_spill] sm:$0xff]  ;;  %v2072_v62 = vadd.f32 %v7430_v56, %v2040_v55 }
 0x2eb   :  { %v2307_v7 = vpop.xlane.xlu0 %2306  ;;  %v2310_v9 = vpop.xlane.xlu1 %2309  ;;  %v2578_v17 = vsub.f32 %v7429_v52, %v5691_v4  ;;  %v2103_v20 = vadd.f32 %v7431_v49, %v2071_v36  ;;  %v7434_v36 = vld [vmem:[#allocation167_spill] sm:$0xff]  ;;  %v2653_v26 = vsel %vm1730_vm1, %v2633_v30, 0.0  ;;  %v2681_v56 = vmul.f32 %v2673_v38, %v2673_v38 }
 0x2ec   :  { %v2325_v1 = vadd.f32 %v2307_v7, %v2267_v16  ;;  %v2326_v18 = vadd.f32 %v2310_v9, %v2270_v43  ;;  %v7433_v7 = vld [vmem:[#allocation78_spill] sm:$0xff]  ;;  %v2104_v28 = vadd.f32 %v7434_v36, %v2072_v62  ;;  %v7437_v62 = vld [vmem:[#allocation171_spill] sm:$0xff] }
 0x2ed   :  { %v2586_v2 = vmul.f32 %v2578_v17, %v2578_v17  ;;  %v2626_v9 = vsub.f32 %v7433_v7, %v5691_v4  ;;  %v7438_v36 = vld [vmem:[#allocation91_spill] sm:$0xff] }
 0x2ee   :  { %2558 = vadd.xlane.f32.xlu0 %v2557_v15  ;;  %2513 = vadd.xlane.f32.xlu1 %v2512_v50  ;;  %v4421_v15 = vmov 0   ;;  %v7435_v50 = vld [vmem:[#allocation90_spill] sm:$0xff] }
 0x2ef   :  { %v2355_v6 = vpop.xlane.xlu0 %2354  ;;  %v2358_v19 = vpop.xlane.xlu1 %2357  ;;  %4338 = vset.pattern.permute.xlu0 %v4421_v15  ;;  %4337 = vset.pattern.permute.xlu1 %v4421_v15  ;;  %v2721_v42 = vsub.f32 %v7435_v50, %v5683_v27  ;;  %v2608_v17 = vsel %vm1730_vm1, %v2586_v2, 0.0  ;;  %v2634_v49 = vmul.f32 %v2626_v9, %v2626_v9  ;;  %v7439_v2 = vld [vmem:[#allocation94_spill] sm:$0xff]  ;;  %v2701_v9 = vsel %vm1730_vm1, %v2681_v56, 0.0 }
 0x2f0   :  { %v2373_v16 = vadd.f32 %v2355_v6, %v2325_v1  ;;  %v2374_v43 = vadd.f32 %v2358_v19, %v2326_v18  ;;  %v2135_v18 = vadd.f32 %v5447_v11, %v2103_v20  ;;  %v2136_v11 = vadd.f32 %v7437_v62, %v2104_v28 }
 0x2f1   :  { %v2722_v38 = vsub.f32 %v7439_v2, %v5691_v4 }
 0x2f2   :  { %2606 = vadd.xlane.f32.xlu0 %v2605_v58  ;;  %2561 = vadd.xlane.f32.xlu1 %v2560_v23  ;;  %v7436_v58 = vld [vmem:[#allocation79_spill] sm:$0xff]  ;;  %v2167_v20 = vadd.f32 %v5451_v48, %v2135_v18  ;;  %v2168_v48 = vadd.f32 %v5453_v25, %v2136_v11 }
 0x2f3   :  { %v2403_v19 = vpop.xlane.xlu0 %2402  ;;  %v2406_v1 = vpop.xlane.xlu1 %2405  ;;  %v2674_v23 = vsub.f32 %v7436_v58, %v5691_v4  ;;  %v7464_v58 = vld [vmem:[#allocation77_spill] sm:$0xff] }
 0x2f4   :  { %v2421_v55 = vadd.f32 %v2403_v19, %v2373_v16  ;;  %v2422_v6 = vadd.f32 %v2406_v1, %v2374_v43  ;;  %v2769_v19 = vsub.f32 %v7438_v36, %v5683_v27  ;;  %v2656_v1 = vsel %vm1730_vm1, %v2634_v49, 0.0 }
 0x2f5   :  { %v2199_v28 = vadd.f32 %v5719_v46, %v2167_v20  ;;  %v2200_v25 = vadd.f32 %v5721_v12, %v2168_v48 }
 0x2f6   :  { %2654 = vadd.xlane.f32.xlu0 %v2653_v26  ;;  %2609 = vadd.xlane.f32.xlu1 %v2608_v17  ;;  %v2729_v26 = vmul.f32 %v2721_v42, %v2721_v42  ;;  %v2682_v17 = vmul.f32 %v2674_v23, %v2674_v23  ;;  %v2730_v42 = vmul.f32 %v2722_v38, %v2722_v38  ;;  %v7441_v23 = vld [vmem:[#allocation95_spill] sm:$0xff] }
 0x2f7   :  { %v2451_v16 = vpop.xlane.xlu0 %2450  ;;  %v2454_v43 = vpop.xlane.xlu1 %2453  ;;  %v2231_v46 = vadd.f32 %v5741_v14, %v2199_v28  ;;  %v7442_v38 = vld [vmem:[#allocation107_spill] sm:$0xff]  ;;  %v2232_v14 = vadd.f32 %v5743_v33, %v2200_v25 }
 0x2f8   :  { %v2469_v15 = vadd.f32 %v2451_v16, %v2421_v55  ;;  %v2470_v30 = vadd.f32 %v2454_v43, %v2422_v6  ;;  %v2777_v16 = vmul.f32 %v2769_v19, %v2769_v19  ;;  %v7440_v43 = vld [vmem:[#allocation106_spill] sm:$0xff]  ;;  %v2749_v56 = vsel %vm1730_vm1, %v2729_v26, 0.0 }
 0x2f9   :  { %v2817_v36 = vsub.f32 %v7440_v43, %v5683_v27  ;;  %v2704_v49 = vsel %vm1730_vm1, %v2682_v17, 0.0  ;;  %v2752_v26 = vsel %vm1730_vm1, %v2730_v42, 0.0  ;;  %v5812_v12 = vmul.f32 0.03125, %v2231_v46 }
 0x2fa   :  { %2702 = vadd.xlane.f32.xlu0 %v2701_v9  ;;  %2657 = vadd.xlane.f32.xlu1 %v2656_v1  ;;  %v2770_v9 = vsub.f32 %v7441_v23, %v5691_v4  ;;  %v2797_v19 = vsel %vm1730_vm1, %v2777_v16, 0.0  ;;  %v7444_v16 = vld [vmem:[#allocation122_spill] sm:$0xff]  ;;  %v5821_v46 = vmul.f32 0.03125, %v2232_v14 }
 0x2fb   :  { %v2499_v18 = vpop.xlane.xlu0 %2498  ;;  %v2502_v55 = vpop.xlane.xlu1 %2501  ;;  %v2825_v1 = vmul.f32 %v2817_v36, %v2817_v36  ;;  %v2671_v7 = vsub.f32 %v7464_v58, %v5812_v12 }
 0x2fc   :  { %v2517_v6 = vadd.f32 %v2499_v18, %v2469_v15  ;;  %v2518_v62 = vadd.f32 %v2502_v55, %v2470_v30  ;;  %v2778_v17 = vmul.f32 %v2770_v9, %v2770_v9  ;;  %v2865_v18 = vsub.f32 %v7442_v38, %v5683_v27  ;;  %v7443_v55 = vld [vmem:[#allocation110_spill] sm:$0xff] }
 0x2fd   :  { %v2845_v36 = vsel %vm1730_vm1, %v2825_v1, 0.0  ;;  %v7446_v1 = vld [vmem:[#allocation12_spill] sm:$0xff] }
 0x2fe   :  { %2750 = vadd.xlane.f32.xlu0 %v2749_v56  ;;  %2705 = vadd.xlane.f32.xlu1 %v2704_v49  ;;  %v2818_v56 = vsub.f32 %v7443_v55, %v5691_v4  ;;  %v2913_v49 = vsub.f32 %v7444_v16, %v5683_v27  ;;  %v2800_v42 = vsel %vm1730_vm1, %v2778_v17, 0.0  ;;  %v2873_v9 = vmul.f32 %v2865_v18, %v2865_v18 }
 0x2ff   :  { %v2547_v11 = vpop.xlane.xlu0 %2546  ;;  %v2550_v20 = vpop.xlane.xlu1 %2549 }
 0x300   :  { %v2565_v15 = vadd.f32 %v2547_v11, %v2517_v6  ;;  %v2566_v30 = vadd.f32 %v2550_v20, %v2518_v62  ;;  %v2826_v11 = vmul.f32 %v2818_v56, %v2818_v56  ;;  %v7445_v20 = vld [vmem:[#allocation111_spill] sm:$0xff]  ;;  %v2893_v17 = vsel %vm1730_vm1, %v2873_v9, 0.0  ;;  %v7449_v9 = vld [vmem:[#allocation16_spill] sm:$0xff] }
 0x301   :  { %v2921_v56 = vmul.f32 %v2913_v49, %v2913_v49 }
 0x302   :  { %2798 = vadd.xlane.f32.xlu0 %v2797_v19  ;;  %2753 = vadd.xlane.f32.xlu1 %v2752_v26  ;;  %v2866_v19 = vsub.f32 %v7445_v20, %v5691_v4  ;;  %v2247_v26 = vsub.f32 %v7446_v1, %v5812_v12  ;;  %v2848_v18 = vsel %vm1730_vm1, %v2826_v11, 0.0  ;;  %v2248_v11 = vsub.f32 %v7449_v9, %v5821_v46 }
 0x303   :  { %v2595_v48 = vpop.xlane.xlu0 %2594  ;;  %v2598_v28 = vpop.xlane.xlu1 %2597 }
 0x304   :  { %v2613_v6 = vadd.f32 %v2595_v48, %v2565_v15  ;;  %v2614_v62 = vadd.f32 %v2598_v28, %v2566_v30  ;;  %v7447_v48 = vld [vmem:[#allocation126_spill] sm:$0xff]  ;;  %v2874_v16 = vmul.f32 %v2866_v19, %v2866_v19 }
 0x305   :  { %v2914_v28 = vsub.f32 %v7447_v48, %v5691_v4 }
 0x306   :  { %2846 = vadd.xlane.f32.xlu0 %v2845_v36  ;;  %2801 = vadd.xlane.f32.xlu1 %v2800_v42  ;;  %v2896_v43 = vsel %vm1730_vm1, %v2874_v16, 0.0  ;;  %v7451_v16 = vld [vmem:[#allocation17_spill] sm:$0xff] }
 0x307   :  { %v2643_v33 = vpop.xlane.xlu0 %2642  ;;  %v2646_v25 = vpop.xlane.xlu1 %2645  ;;  %v2922_v50 = vmul.f32 %v2914_v28, %v2914_v28  ;;  %v2288_v28 = vsub.f32 %v7451_v16, %v5821_v46 }
 0x308   :  { %v2661_v15 = vadd.f32 %v2643_v33, %v2613_v6  ;;  %v2662_v30 = vadd.f32 %v2646_v25, %v2614_v62  ;;  %v2255_v6 = vmul.f32 %v2247_v26, %v2247_v26  ;;  %v7448_v62 = vld [vmem:[#allocation13_spill] sm:$0xff]  ;;  %v2941_v25 = vsel %vm1730_vm1, %v2921_v56, 0.0  ;;  %v7450_v56 = vld [vmem:[#allocation28_spill] sm:$0xff] }
 0x309   :  { %v2287_v33 = vsub.f32 %v7448_v62, %v5812_v12  ;;  %v2944_v26 = vsel %vm1730_vm1, %v2922_v50, 0.0 }
 0x30a   :  { %2894 = vadd.xlane.f32.xlu0 %v2893_v17  ;;  %2849 = vadd.xlane.f32.xlu1 %v2848_v18 }
 0x30b   :  { %v2691_v14 = vpop.xlane.xlu0 %2690  ;;  %v2694_v36 = vpop.xlane.xlu1 %2693 }
 0x30c   :  { %v2709_v42 = vadd.f32 %v2691_v14, %v2661_v15  ;;  %v2710_v38 = vadd.f32 %v2694_v36, %v2662_v30  ;;  %v2271_v15 = vsel %vm1730_vm1, %v2255_v6, 0.0  ;;  %v2295_v30 = vmul.f32 %v2287_v33, %v2287_v33 }
 0x30d   :  { %v2256_v14 = vmul.f32 %v2248_v11, %v2248_v11  ;;  %v2335_v36 = vsub.f32 %v7450_v56, %v5812_v12  ;;  %v2296_v11 = vmul.f32 %v2288_v28, %v2288_v28 }
 0x30e   :  { %2942 = vadd.xlane.f32.xlu0 %v2941_v25  ;;  %2897 = vadd.xlane.f32.xlu1 %v2896_v43 }
 0x30f   :  { %v2739_v49 = vpop.xlane.xlu0 %2738  ;;  %v2742_v19 = vpop.xlane.xlu1 %2741  ;;  %v2274_v50 = vsel %vm1730_vm1, %v2256_v14, 0.0  ;;  %v2343_v33 = vmul.f32 %v2335_v36, %v2335_v36  ;;  %v2314_v14 = vsel %vm1730_vm1, %v2296_v11, 0.0 }
 0x310   :  { %v2757_v17 = vadd.f32 %v2739_v49, %v2709_v42  ;;  %v2758_v18 = vadd.f32 %v2742_v19, %v2710_v38  ;;  %v2311_v38 = vsel %vm1730_vm1, %v2295_v30, 0.0  ;;  %v7452_v42 = vld [vmem:[#allocation29_spill] sm:$0xff]  ;;  %v7453_v49 = vld [vmem:[#allocation32_spill] sm:$0xff] }
 0x311   :  { %v2383_v6 = vsub.f32 %v7452_v42, %v5812_v12  ;;  %v2336_v19 = vsub.f32 %v7453_v49, %v5821_v46  ;;  %v7455_v30 = vld [vmem:[#allocation33_spill] sm:$0xff] }
 0x312   :  { %2272 = vadd.xlane.f32.xlu0 %v2271_v15  ;;  %2945 = vadd.xlane.f32.xlu1 %v2944_v26  ;;  %v7471_v42 = vld [vmem:[#allocation97_spill] sm:$0xff] }
 0x313   :  { %v2787_v25 = vpop.xlane.xlu0 %2786  ;;  %v2790_v43 = vpop.xlane.xlu1 %2789  ;;  %v2391_v36 = vmul.f32 %v2383_v6, %v2383_v6  ;;  %v2344_v28 = vmul.f32 %v2336_v19, %v2336_v19 }
 0x314   :  { %v2805_v10 = vadd.f32 %v2787_v25, %v2757_v17  ;;  %v2806_v9 = vadd.f32 %v2790_v43, %v2758_v18  ;;  %v7454_v17 = vld [vmem:[#allocation44_spill] sm:$0xff]  ;;  %v2384_v25 = vsub.f32 %v7455_v30, %v5821_v46  ;;  %v2359_v43 = vsel %vm1730_vm1, %v2343_v33, 0.0 }
 0x315   :  { %v2431_v18 = vsub.f32 %v7454_v17, %v5812_v12  ;;  %v2362_v30 = vsel %vm1730_vm1, %v2344_v28, 0.0  ;;  %v7457_v33 = vld [vmem:[#allocation48_spill] sm:$0xff] }
 0x316   :  { %2312 = vadd.xlane.f32.xlu0 %v2311_v38  ;;  %2275 = vadd.xlane.f32.xlu1 %v2274_v50  ;;  %v2392_v55 = vmul.f32 %v2384_v25, %v2384_v25  ;;  %v2432_v11 = vsub.f32 %v7457_v33, %v5821_v46  ;;  %v7458_v28 = vld [vmem:[#allocation60_spill] sm:$0xff] }
 0x317   :  { %v2835_v15 = vpop.xlane.xlu0 %2834  ;;  %v2838_v26 = vpop.xlane.xlu1 %2837  ;;  %v2527_v25 = vsub.f32 %v7458_v28, %v5812_v12 }
 0x318   :  { %v2853_v16 = vadd.f32 %v2835_v15, %v2805_v10  ;;  %v2854_v48 = vadd.f32 %v2838_v26, %v2806_v9  ;;  %v2439_v10 = vmul.f32 %v2431_v18, %v2431_v18  ;;  %v7456_v9 = vld [vmem:[#allocation45_spill] sm:$0xff]  ;;  %v2407_v26 = vsel %vm1730_vm1, %v2391_v36, 0.0 }
 0x319   :  { %v2479_v15 = vsub.f32 %v7456_v9, %v5812_v12  ;;  %v2440_v36 = vmul.f32 %v2432_v11, %v2432_v11 }
 0x31a   :  { %2360 = vadd.xlane.f32.xlu0 %v2359_v43  ;;  %2315 = vadd.xlane.f32.xlu1 %v2314_v14  ;;  %v2410_v14 = vsel %vm1730_vm1, %v2392_v55, 0.0 }
 0x31b   :  { %v2883_v38 = vpop.xlane.xlu0 %2882  ;;  %v2886_v50 = vpop.xlane.xlu1 %2885  ;;  %v2487_v18 = vmul.f32 %v2479_v15, %v2479_v15  ;;  %v2458_v55 = vsel %vm1730_vm1, %v2440_v36, 0.0 }
 0x31c   :  { %v2901_v49 = vadd.f32 %v2883_v38, %v2853_v16  ;;  %v2902_v20 = vadd.f32 %v2886_v50, %v2854_v48  ;;  %v2455_v48 = vsel %vm1730_vm1, %v2439_v10, 0.0  ;;  %v7459_v38 = vld [vmem:[#allocation49_spill] sm:$0xff] }
 0x31d   :  { %v2480_v50 = vsub.f32 %v7459_v38, %v5821_v46  ;;  %v7460_v10 = vld [vmem:[#allocation61_spill] sm:$0xff]  ;;  %v7462_v38 = vld [vmem:[#allocation76_spill] sm:$0xff] }
 0x31e   :  { %2408 = vadd.xlane.f32.xlu0 %v2407_v26  ;;  %2363 = vadd.xlane.f32.xlu1 %v2362_v30  ;;  %v2575_v15 = vsub.f32 %v7460_v10, %v5812_v12  ;;  %v2535_v26 = vmul.f32 %v2527_v25, %v2527_v25  ;;  %v2623_v33 = vsub.f32 %v7462_v38, %v5812_v12 }
 0x31f   :  { %v2931_v6 = vpop.xlane.xlu0 %2930  ;;  %v2934_v19 = vpop.xlane.xlu1 %2933  ;;  %v2488_v11 = vmul.f32 %v2480_v50, %v2480_v50 }
 0x320   :  { %v5859_v43 = vadd.f32 %v2931_v6, %v2901_v49  ;;  %v5861_v16 = vadd.f32 %v2934_v19, %v2902_v20  ;;  %v2503_v20 = vsel %vm1730_vm1, %v2487_v18, 0.0  ;;  %v7461_v6 = vld [vmem:[#allocation64_spill] sm:$0xff]  ;;  %v7463_v18 = vld [vmem:[#allocation65_spill] sm:$0xff]  ;;  %v2551_v2 = vsel %vm1730_vm1, %v2535_v26, 0.0 }
 0x321   :  { %v2528_v19 = vsub.f32 %v7461_v6, %v5821_v46  ;;  %v2576_v23 = vsub.f32 %v7463_v18, %v5821_v46  ;;  %v2506_v36 = vsel %vm1730_vm1, %v2488_v11, 0.0  ;;  %v2583_v25 = vmul.f32 %v2575_v15, %v2575_v15  ;;  %v7465_v26 = vld [vmem:[#allocation80_spill] sm:$0xff] }
 0x322   :  { %2456 = vadd.xlane.f32.xlu0 %v2455_v48  ;;  %2411 = vadd.xlane.f32.xlu1 %v2410_v14  ;;  %v2631_v6 = vmul.f32 %v2623_v33, %v2623_v33  ;;  %v2624_v11 = vsub.f32 %v7465_v26, %v5821_v46  ;;  %v2679_v33 = vmul.f32 %v2671_v7, %v2671_v7 }
 0x323   :  { %v5869_v30 = vpop.xlane.xlu0 %2260  ;;  %v5871_v49 = vpop.xlane.xlu1 %2263  ;;  %v2536_v50 = vmul.f32 %v2528_v19, %v2528_v19  ;;  %v2599_v52 = vsel %vm1730_vm1, %v2583_v25, 0.0  ;;  %v2584_v38 = vmul.f32 %v2576_v23, %v2576_v23  ;;  %v7466_v25 = vld [vmem:[#allocation92_spill] sm:$0xff]  ;;  %v7467_v23 = vld [vmem:[#allocation81_spill] sm:$0xff] }
 0x324   :  { %v2647_v19 = vsel %vm1730_vm1, %v2631_v6, 0.0  ;;  %v2632_v58 = vmul.f32 %v2624_v11, %v2624_v11  ;;  %v2719_v10 = vsub.f32 %v7466_v25, %v5812_v12  ;;  %v2695_v26 = vsel %vm1730_vm1, %v2679_v33, 0.0  ;;  %v7468_v6 = vld [vmem:[#allocation93_spill] sm:$0xff]  ;;  %v7469_v25 = vld [vmem:[#allocation96_spill] sm:$0xff] }
 0x325   :  { %v2554_v18 = vsel %vm1730_vm1, %v2536_v50, 0.0  ;;  %v2672_v50 = vsub.f32 %v7467_v23, %v5821_v46  ;;  %v2767_v7 = vsub.f32 %v7468_v6, %v5812_v12  ;;  %v2720_v9 = vsub.f32 %v7469_v25, %v5821_v46  ;;  %v7470_v23 = vld [vmem:[#allocation108_spill] sm:$0xff] }
 0x326   :  { %2504 = vadd.xlane.f32.xlu0 %v2503_v20  ;;  %2459 = vadd.xlane.f32.xlu1 %v2458_v55  ;;  %v2727_v11 = vmul.f32 %v2719_v10, %v2719_v10  ;;  %v2815_v17 = vsub.f32 %v7470_v23, %v5812_v12  ;;  %v2768_v33 = vsub.f32 %v7471_v42, %v5821_v46  ;;  %v7473_v42 = vld [vmem:[#allocation112_spill] sm:$0xff] }
 0x327   :  { %v5879_v48 = vpop.xlane.xlu0 %2300  ;;  %v5881_v14 = vpop.xlane.xlu1 %2303  ;;  %v2680_v28 = vmul.f32 %v2672_v50, %v2672_v50  ;;  %v2728_v10 = vmul.f32 %v2720_v9, %v2720_v9 }
 0x328   :  { %v2743_v56 = vsel %vm1730_vm1, %v2727_v11, 0.0  ;;  %v2776_v47 = vmul.f32 %v2768_v33, %v2768_v33  ;;  %v2816_v11 = vsub.f32 %v7473_v42, %v5821_v46 }
 0x329   :  { %v2698_v6 = vsel %vm1730_vm1, %v2680_v28, 0.0  ;;  %v2746_v23 = vsel %vm1730_vm1, %v2728_v10, 0.0 }
 0x32a   :  { %2552 = vadd.xlane.f32.xlu0 %v2551_v2  ;;  %2507 = vadd.xlane.f32.xlu1 %v2506_v36  ;;  %v2602_v36 = vsel %vm1730_vm1, %v2584_v38, 0.0  ;;  %v2650_v38 = vsel %vm1730_vm1, %v2632_v58, 0.0  ;;  %v2775_v58 = vmul.f32 %v2767_v7, %v2767_v7  ;;  %v2824_v7 = vmul.f32 %v2816_v11, %v2816_v11 }
 0x32b   :  { %v5889_v20 = vpop.xlane.xlu0 %2348  ;;  %v5891_v55 = vpop.xlane.xlu1 %2351 }
 0x32c   :  { %v2791_v1 = vsel %vm1730_vm1, %v2775_v58, 0.0  ;;  %v7475_v58 = vld [vmem:[#allocation113_spill] sm:$0xff]  ;;  %v2842_v11 = vsel %vm1730_vm1, %v2824_v7, 0.0 }
 0x32d   :  { %v2864_v10 = vsub.f32 %v7475_v58, %v5821_v46 }
 0x32e   :  { %2600 = vadd.xlane.f32.xlu0 %v2599_v52  ;;  %2555 = vadd.xlane.f32.xlu1 %v2554_v18 }
 0x32f   :  { %v5899_v2 = vpop.xlane.xlu0 %2396  ;;  %v5901_v15 = vpop.xlane.xlu1 %2399  ;;  %v2872_v22 = vmul.f32 %v2864_v10, %v2864_v10 }
 0x332   :  { %2648 = vadd.xlane.f32.xlu0 %v2647_v19  ;;  %2603 = vadd.xlane.f32.xlu1 %v2602_v36 }
 0x333   :  { %v5909_v52 = vpop.xlane.xlu0 %2444  ;;  %v5911_v18 = vpop.xlane.xlu1 %2447 }
 0x336   :  { %2696 = vadd.xlane.f32.xlu0 %v2695_v26  ;;  %2651 = vadd.xlane.f32.xlu1 %v2650_v38  ;;  %v2823_v26 = vmul.f32 %v2815_v17, %v2815_v17  ;;  %v7472_v38 = vld [vmem:[#allocation109_spill] sm:$0xff]  ;;  %v2794_v17 = vsel %vm1730_vm1, %v2776_v47, 0.0  ;;  %v7476_v47 = vld [vmem:[#allocation115_spill] sm:$0xff] }
 0x337   :  { %v2493_v19 = vpop.xlane.xlu0 %2492  ;;  %v2496_v36 = vpop.xlane.xlu1 %2495  ;;  %v2863_v62 = vsub.f32 %v7472_v38, %v5812_v12  ;;  %v7474_v38 = vld [vmem:[#allocation124_spill] sm:$0xff] }
 0x338   :  { %v2911_v35 = vsub.f32 %v7474_v38, %v5812_v12 }
 0x33a   :  { %2744 = vadd.xlane.f32.xlu0 %v2743_v56  ;;  %2699 = vadd.xlane.f32.xlu1 %v2698_v6  ;;  %v2839_v56 = vsel %vm1730_vm1, %v2823_v26, 0.0  ;;  %v2871_v6 = vmul.f32 %v2863_v62, %v2863_v62  ;;  %v2957_v26 = vsub.f32 %v7476_v47, %v5455_v61  ;;  %v2919_v38 = vmul.f32 %v2911_v35, %v2911_v35  ;;  %v7479_v35 = vld [vmem:[#allocation129_spill] sm:$0xff] }
 0x33b   :  { %v2541_v50 = vpop.xlane.xlu0 %2540  ;;  %v2544_v25 = vpop.xlane.xlu1 %2543  ;;  %v2960_v10 = vsub.f32 %v7479_v35, %v5821_v46 }
 0x33c   :  { %v2887_v62 = vsel %vm1730_vm1, %v2871_v6, 0.0  ;;  %v7478_v6 = vld [vmem:[#allocation125_spill] sm:$0xff] }
 0x33d   :  { %v2959_v7 = vsub.f32 %v7478_v6, %v5812_v12  ;;  %v7480_v6 = vld [vmem:[#allocation123_spill] sm:$0xff] }
 0x33e   :  { %2792 = vadd.xlane.f32.xlu0 %v2791_v1  ;;  %2747 = vadd.xlane.f32.xlu1 %v2746_v23  ;;  %v2323_v1 = vadd.f32 %v5879_v48, %v5869_v30  ;;  %v2324_v23 = vadd.f32 %v5881_v14, %v5871_v49  ;;  %v2961_v35 = vsub.f32 %v7480_v6, %v5683_v27 }
 0x33f   :  { %v2589_v28 = vpop.xlane.xlu0 %2588  ;;  %v2592_v9 = vpop.xlane.xlu1 %2591 }
 0x340   :  { %v2371_v58 = vadd.f32 %v5889_v20, %v2323_v1  ;;  %v2372_v37 = vadd.f32 %v5891_v55, %v2324_v23  ;;  %v2890_v20 = vsel %vm1730_vm1, %v2872_v22, 0.0  ;;  %v2965_v1 = vmul.f32 %v2957_v26, %v2957_v26 }
 0x341   :  { %v2968_v26 = vmul.f32 %v2960_v10, %v2960_v10 }
 0x342   :  { %2840 = vadd.xlane.f32.xlu0 %v2839_v56  ;;  %2795 = vadd.xlane.f32.xlu1 %v2794_v17  ;;  %v7477_v56 = vld [vmem:[#allocation128_spill] sm:$0xff]  ;;  %v2419_v48 = vadd.f32 %v5899_v2, %v2371_v58  ;;  %v2420_v14 = vadd.f32 %v5901_v15, %v2372_v37 }
 0x343   :  { %v2637_v33 = vpop.xlane.xlu0 %2636  ;;  %v2640_v42 = vpop.xlane.xlu1 %2639  ;;  %v2912_v17 = vsub.f32 %v7477_v56, %v5821_v46  ;;  %v2935_v56 = vsel %vm1730_vm1, %v2919_v38, 0.0  ;;  %v2977_v38 = vsel %vm1730_vm1, %v2965_v1, 0.0 }
 0x344   :  { %v2467_v23 = vadd.f32 %v5909_v52, %v2419_v48 }
 0x345   :  { %v2920_v55 = vmul.f32 %v2912_v17, %v2912_v17  ;;  %v7481_v17 = vld [vmem:[#allocation127_spill] sm:$0xff] }
 0x346   :  { %2888 = vadd.xlane.f32.xlu0 %v2887_v62  ;;  %2843 = vadd.xlane.f32.xlu1 %v2842_v11  ;;  %v2468_v62 = vadd.f32 %v5911_v18, %v2420_v14  ;;  %v2515_v15 = vadd.f32 %v2493_v19, %v2467_v23  ;;  %v2967_v11 = vmul.f32 %v2959_v7, %v2959_v7 }
 0x347   :  { %v2685_v30 = vpop.xlane.xlu0 %2684  ;;  %v2688_v49 = vpop.xlane.xlu1 %2687  ;;  %v2938_v22 = vsel %vm1730_vm1, %v2920_v55, 0.0  ;;  %v2962_v52 = vsub.f32 %v7481_v17, %v5691_v4  ;;  %v2969_v23 = vmul.f32 %v2961_v35, %v2961_v35 }
 0x348   :  { %v2516_v58 = vadd.f32 %v2496_v36, %v2468_v62  ;;  %v2563_v48 = vadd.f32 %v2541_v50, %v2515_v15  ;;  %v2983_v7 = vsel %vm1730_vm1, %v2967_v11, 0.0 }
 0x349   :  { %v2970_v1 = vmul.f32 %v2962_v52, %v2962_v52  ;;  %v2989_v15 = vsel %vm1730_vm1, %v2969_v23, 0.0 }
 0x34a   :  { %2936 = vadd.xlane.f32.xlu0 %v2935_v56  ;;  %2891 = vadd.xlane.f32.xlu1 %v2890_v20  ;;  %v2564_v18 = vadd.f32 %v2544_v25, %v2516_v58  ;;  %v2611_v19 = vadd.f32 %v2589_v28, %v2563_v48  ;;  %v2986_v20 = vsel %vm1730_vm1, %v2968_v26, 0.0 }
 0x34b   :  { %v2733_v2 = vpop.xlane.xlu0 %2732  ;;  %v2736_v37 = vpop.xlane.xlu1 %2735  ;;  %v2992_v58 = vsel %vm1730_vm1, %v2970_v1, 0.0 }
 0x34c   :  { %v2612_v36 = vadd.f32 %v2592_v9, %v2564_v18  ;;  %v2659_v62 = vadd.f32 %v2637_v33, %v2611_v19 }
 0x34e   :  { %2978 = vadd.xlane.f32.xlu0 %v2977_v38  ;;  %2939 = vadd.xlane.f32.xlu1 %v2938_v22  ;;  %v2660_v55 = vadd.f32 %v2640_v42, %v2612_v36  ;;  %v2707_v50 = vadd.f32 %v2685_v30, %v2659_v62 }
 0x34f   :  { %v2781_v56 = vpop.xlane.xlu0 %2780  ;;  %v2784_v14 = vpop.xlane.xlu1 %2783 }
 0x350   :  { %v2708_v25 = vadd.f32 %v2688_v49, %v2660_v55  ;;  %v2755_v28 = vadd.f32 %v2733_v2, %v2707_v50 }
 0x352   :  { %2984 = vadd.xlane.f32.xlu0 %v2983_v7  ;;  %2987 = vadd.xlane.f32.xlu1 %v2986_v20  ;;  %v2756_v9 = vadd.f32 %v2736_v37, %v2708_v25  ;;  %v2803_v35 = vadd.f32 %v2781_v56, %v2755_v28 }
 0x353   :  { %v2829_v10 = vpop.xlane.xlu0 %2828  ;;  %v2832_v6 = vpop.xlane.xlu1 %2831 }
 0x354   :  { %v2804_v22 = vadd.f32 %v2784_v14, %v2756_v9  ;;  %v2851_v33 = vadd.f32 %v2829_v10, %v2803_v35 }
 0x356   :  { %2990 = vadd.xlane.f32.xlu0 %v2989_v15  ;;  %2993 = vadd.xlane.f32.xlu1 %v2992_v58  ;;  %v2852_v42 = vadd.f32 %v2832_v6, %v2804_v22 }
 0x357   :  { %v2877_v11 = vpop.xlane.xlu0 %2876  ;;  %v2880_v38 = vpop.xlane.xlu1 %2879 }
 0x358   :  { %v2899_v48 = vadd.f32 %v2877_v11, %v2851_v33  ;;  %v2900_v18 = vadd.f32 %v2880_v38, %v2852_v42  ;;  %v3027_v11 = vld [vmem:[%s6903_s2] sm:$0xff] }
 0x35b   :  { %v2925_v26 = vpop.xlane.xlu0 %2924  ;;  %v2928_v52 = vpop.xlane.xlu1 %2927 }
 0x35c   :  { %v2947_v30 = vadd.f32 %v2925_v26, %v2899_v48  ;;  %v2948_v49 = vadd.f32 %v2928_v52, %v2900_v18  ;;  %v3030_v52 = vld [vmem:[%s6903_s2 + $0x18] sm:$0xff]  ;;  %v3028_v48 = vld [vmem:[%s6903_s2 + $0x8] sm:$0xff] }
 0x35f   :  { %v2973_v19 = vpop.xlane.xlu0 %2972  ;;  %v2976_v36 = vpop.xlane.xlu1 %2975 }
 0x360   :  { %v2995_v7 = vadd.f32 %v2973_v19, %v2947_v30  ;;  %v2996_v20 = vadd.f32 %v2976_v36, %v2948_v49 }
 0x362   :  { %v3003_v2 = vmul.f32 0.03125, %v2995_v7  ;;  %v3004_v37 = vmul.f32 0.03125, %v2996_v20 }
 0x363   :  { %v2279_v23 = vpop.xlane.xlu0 %2278  ;;  %v2982_v1 = vpop.xlane.xlu1 %2981 }
 0x364   :  { %v3011_v62 = vadd.f32 1e-05, %v3003_v2  ;;  %v3012_v55 = vadd.f32 1e-05, %v3004_v37  ;;  %v2998_v56 = vadd.f32 %v2982_v1, %v5861_v16  ;;  %v3046_v2 = vld [vmem:[%s6904_s3 + $0x18] sm:$0xff] }
 0x366   :  { %4405 = vrsqrt.f32 %v3011_v62  ;;  %v3006_v6 = vmul.f32 0.03125, %v2998_v56 }
 0x367   :  { %v2319_v14 = vpop.xlane.xlu0 %2318  ;;  %v2282_v10 = vpop.xlane.xlu1 %2281  ;;  %4407 = vrsqrt.f32 %v3012_v55 }
 0x368   :  { %v3014_v50 = vadd.f32 1e-05, %v3006_v6  ;;  %v2329_v25 = vadd.f32 %v2319_v14, %v2279_v23  ;;  %v3044_v14 = vld [vmem:[%s6904_s3 + $0x8] sm:$0xff] }
 0x36a   :  { %4409 = vrsqrt.f32 %v3014_v50 }
 0x36b   :  { %v2367_v15 = vpop.xlane.xlu0 %2366  ;;  %v2322_v58 = vpop.xlane.xlu1 %2321 }
 0x36c   :  { %v2377_v28 = vadd.f32 %v2367_v15, %v2329_v25  ;;  %v2330_v9 = vadd.f32 %v2322_v58, %v2282_v10 }
 0x36f   :  { %v2415_v38 = vpop.xlane.xlu0 %2414  ;;  %v2370_v35 = vpop.xlane.xlu1 %2369 }
 0x370   :  { %v4406_v22 = vpop.eup %4405  ;;  %v2425_v16 = vadd.f32 %v2415_v38, %v2377_v28  ;;  %v2378_v33 = vadd.f32 %v2370_v35, %v2330_v9 }
 0x371   :  { %v5973_v42 = vmul.f32 %v4406_v22, %v3027_v11  ;;  %v4408_v26 = vpop.eup %4407 }
 0x372   :  { %v5984_v20 = vmul.f32 %v4408_v26, %v3028_v48 }
 0x373   :  { %3069 = vperm.xlu0 %4338, %v5973_v42   ;;  %v2463_v18 = vpop.xlane.xlu0 %2462  ;;  %v2418_v30 = vpop.xlane.xlu1 %2417 }
 0x374   :  { %v4410_v49 = vpop.eup %4409  ;;  %v2473_v19 = vadd.f32 %v2463_v18, %v2425_v16  ;;  %v2426_v36 = vadd.f32 %v2418_v30, %v2378_v33  ;;  %v3052_v6 = vmul.f32 %v5984_v20, %v5563_v60 }
 0x375   :  { %v5982_v7 = vmul.f32 %v4410_v49, %v3030_v52 }
 0x376   :  { %v3060_v58 = vsub.f32 %v3044_v14, %v3052_v6 }
 0x377   :  { %v2511_v37 = vpop.xlane.xlu0 %2510  ;;  %v2466_v23 = vpop.xlane.xlu1 %2465  ;;  %v3054_v1 = vmul.f32 %v5982_v7, %v5457_v5 }
 0x378   :  { %v2521_v62 = vadd.f32 %v2511_v37, %v2473_v19  ;;  %v2474_v55 = vadd.f32 %v2466_v23, %v2426_v36 }
 0x379   :  { %v3062_v56 = vsub.f32 %v3046_v2, %v3054_v1 }
 0x37b   :  { %v2559_v10 = vpop.xlane.xlu0 %2558  ;;  %3132 = vperm.xlu0 %4338, %v3062_v56   ;;  %v2514_v50 = vpop.xlane.xlu1 %2513 }
 0x37c   :  { %v2569_v25 = vadd.f32 %v2559_v10, %v2521_v62  ;;  %v2522_v15 = vadd.f32 %v2514_v50, %v2474_v55 }
 0x37f   :  { %v2607_v28 = vpop.xlane.xlu0 %2606  ;;  %3122 = vperm.xlu0 %4338, %v3060_v58   ;;  %v2562_v9 = vpop.xlane.xlu1 %2561 }
 0x380   :  { %v2617_v5 = vadd.f32 %v2607_v28, %v2569_v25  ;;  %v2570_v11 = vadd.f32 %v2562_v9, %v2522_v15 }
 0x383   :  { %v2655_v38 = vpop.xlane.xlu0 %2654  ;;  %v2610_v35 = vpop.xlane.xlu1 %2609 }
 0x384   :  { %v2665_v22 = vadd.f32 %v2655_v38, %v2617_v5  ;;  %v2618_v16 = vadd.f32 %v2610_v35, %v2570_v11 }
 0x387   :  { %v2703_v60 = vpop.xlane.xlu0 %2702  ;;  %v2658_v33 = vpop.xlane.xlu1 %2657 }
 0x388   :  { %v2713_v26 = vadd.f32 %v2703_v60, %v2665_v22  ;;  %v2666_v52 = vadd.f32 %v2658_v33, %v2618_v16 }
 0x38b   :  { %v2751_v48 = vpop.xlane.xlu0 %2750  ;;  %v2706_v18 = vpop.xlane.xlu1 %2705 }
 0x38c   :  { %v2761_v30 = vadd.f32 %v2751_v48, %v2713_v26  ;;  %v2714_v49 = vadd.f32 %v2706_v18, %v2666_v52 }
 0x38f   :  { %v2799_v19 = vpop.xlane.xlu0 %2798  ;;  %v2754_v36 = vpop.xlane.xlu1 %2753 }
 0x390   :  { %v2809_v2 = vadd.f32 %v2799_v19, %v2761_v30  ;;  %v2762_v37 = vadd.f32 %v2754_v36, %v2714_v49 }
 0x393   :  { %v2847_v23 = vpop.xlane.xlu0 %2846  ;;  %v2802_v1 = vpop.xlane.xlu1 %2801 }
 0x394   :  { %v2857_v62 = vadd.f32 %v2847_v23, %v2809_v2  ;;  %v2810_v55 = vadd.f32 %v2802_v1, %v2762_v37 }
 0x397   :  { %v2895_v56 = vpop.xlane.xlu0 %2894  ;;  %v2850_v6 = vpop.xlane.xlu1 %2849 }
 0x398   :  { %v2905_v14 = vadd.f32 %v2895_v56, %v2857_v62  ;;  %v2858_v10 = vadd.f32 %v2850_v6, %v2810_v55 }
 0x39b   :  { %v2943_v50 = vpop.xlane.xlu0 %2942  ;;  %v2898_v25 = vpop.xlane.xlu1 %2897 }
 0x39c   :  { %v5996_v15 = vadd.f32 %v2943_v50, %v2905_v14  ;;  %v2906_v58 = vadd.f32 %v2898_v25, %v2858_v10 }
 0x39f   :  { %v2273_v28 = vpop.xlane.xlu0 %2272  ;;  %v2946_v9 = vpop.xlane.xlu1 %2945 }
 0x3a0   :  { %v5998_v5 = vadd.f32 %v2946_v9, %v2906_v58 }
 0x3a3   :  { %v2313_v11 = vpop.xlane.xlu0 %2312  ;;  %v2276_v38 = vpop.xlane.xlu1 %2275 }
 0x3a4   :  { %v2327_v47 = vadd.f32 %v2313_v11, %v2273_v28 }
 0x3a7   :  { %v2361_v35 = vpop.xlane.xlu0 %2360  ;;  %v2316_v22 = vpop.xlane.xlu1 %2315 }
 0x3a8   :  { %v2328_v1 = vadd.f32 %v2316_v22, %v2276_v38  ;;  %v2375_v53 = vadd.f32 %v2361_v35, %v2327_v47 }
 0x3ab   :  { %v2409_v16 = vpop.xlane.xlu0 %2408  ;;  %v2364_v60 = vpop.xlane.xlu1 %2363 }
 0x3ac   :  { %v2376_v62 = vadd.f32 %v2364_v60, %v2328_v1  ;;  %v2423_v54 = vadd.f32 %v2409_v16, %v2375_v53 }
 0x3af   :  { %v2457_v33 = vpop.xlane.xlu0 %2456  ;;  %v2412_v26 = vpop.xlane.xlu1 %2411 }
 0x3b0   :  { %v2424_v6 = vadd.f32 %v2412_v26, %v2376_v62  ;;  %v2471_v38 = vadd.f32 %v2457_v33, %v2423_v54 }
 0x3b3   :  { %v2505_v52 = vpop.xlane.xlu0 %2504  ;;  %v2460_v48 = vpop.xlane.xlu1 %2459 }
 0x3b4   :  { %v2472_v14 = vadd.f32 %v2460_v48, %v2424_v6  ;;  %v2519_v26 = vadd.f32 %v2505_v52, %v2471_v38 }
 0x3b7   :  { %v2553_v18 = vpop.xlane.xlu0 %2552  ;;  %v2508_v30 = vpop.xlane.xlu1 %2507 }
 0x3b8   :  { %v2520_v25 = vadd.f32 %v2508_v30, %v2472_v14  ;;  %v2567_v62 = vadd.f32 %v2553_v18, %v2519_v26 }
 0x3bb   :  { %v2601_v49 = vpop.xlane.xlu0 %2600  ;;  %v2556_v19 = vpop.xlane.xlu1 %2555 }
 0x3bc   :  { %v2568_v58 = vadd.f32 %v2556_v19, %v2520_v25  ;;  %v2615_v14 = vadd.f32 %v2601_v49, %v2567_v62  ;;  %v3048_v62 = vld [vmem:[%s6904_s3 + $0x28] sm:$0xff] }
 0x3bf   :  { %v2649_v36 = vpop.xlane.xlu0 %2648  ;;  %v2604_v2 = vpop.xlane.xlu1 %2603 }
 0x3c0   :  { %v2616_v21 = vadd.f32 %v2604_v2, %v2568_v58  ;;  %v2663_v47 = vadd.f32 %v2649_v36, %v2615_v14 }
 0x3c3   :  { %v2697_v37 = vpop.xlane.xlu0 %2696  ;;  %v2652_v23 = vpop.xlane.xlu1 %2651 }
 0x3c4   :  { %v2664_v8 = vadd.f32 %v2652_v23, %v2616_v21 }
 0x3c7   :  { %v2745_v55 = vpop.xlane.xlu0 %2744  ;;  %v2700_v56 = vpop.xlane.xlu1 %2699 }
 0x3c8   :  { %v2712_v57 = vadd.f32 %v2700_v56, %v2664_v8  ;;  %v2711_v8 = vadd.f32 %v2697_v37, %v2663_v47  ;;  %v3029_v37 = vld [vmem:[%s6903_s2 + $0x10] sm:$0xff]  ;;  %v3043_v47 = vld [vmem:[%s6904_s3] sm:$0xff] }
 0x3ca   :  { %v2759_v16 = vadd.f32 %v2745_v55, %v2711_v8  ;;  %v3047_v8 = vld [vmem:[%s6904_s3 + $0x20] sm:$0xff] }
 0x3cb   :  { %v2793_v10 = vpop.xlane.xlu0 %2792  ;;  %v2748_v50 = vpop.xlane.xlu1 %2747 }
 0x3cc   :  { %v2760_v22 = vadd.f32 %v2748_v50, %v2712_v57  ;;  %v2807_v52 = vadd.f32 %v2793_v10, %v2759_v16  ;;  %v3049_v16 = vld [vmem:[%s6904_s3 + $0x30] sm:$0xff] }
 0x3cf   :  { %v2841_v9 = vpop.xlane.xlu0 %2840  ;;  %v2796_v17 = vpop.xlane.xlu1 %2795 }
 0x3d0   :  { %v2808_v48 = vadd.f32 %v2796_v17, %v2760_v22  ;;  %v2855_v2 = vadd.f32 %v2841_v9, %v2807_v52 }
 0x3d3   :  { %v2889_v24 = vpop.xlane.xlu0 %2888  ;;  %v2844_v34 = vpop.xlane.xlu1 %2843 }
 0x3d4   :  { %v2856_v6 = vadd.f32 %v2844_v34, %v2808_v48 }
 0x3d7   :  { %v2937_v60 = vpop.xlane.xlu0 %2936  ;;  %v2892_v1 = vpop.xlane.xlu1 %2891 }
 0x3d8   :  { %v2904_v25 = vadd.f32 %v2892_v1, %v2856_v6  ;;  %v3034_v1 = vld [vmem:[%s6903_s2 + $0x38] sm:$0xff]  ;;  %v3045_v6 = vld [vmem:[%s6904_s3 + $0x10] sm:$0xff] }
 0x3db   :  { %v2979_v30 = vpop.xlane.xlu0 %2978  ;;  %v2940_v19 = vpop.xlane.xlu1 %2939 }
 0x3dc   :  { %v2997_v28 = vadd.f32 %v2979_v30, %v5859_v43  ;;  %v2952_v11 = vadd.f32 %v2940_v19, %v2904_v25  ;;  %v2903_v43 = vadd.f32 %v2889_v24, %v2855_v2  ;;  %v3032_v24 = vld [vmem:[%s6903_s2 + $0x28] sm:$0xff]  ;;  %v3050_v19 = vld [vmem:[%s6904_s3 + $0x38] sm:$0xff] }
 0x3de   :  { %v3005_v21 = vmul.f32 0.03125, %v2997_v28  ;;  %v2951_v50 = vadd.f32 %v2937_v60, %v2903_v43  ;;  %v3051_v28 = vmul.f32 %v5973_v42, %v5561_v59  ;;  %v3031_v59 = vld [vmem:[%s6903_s2 + $0x20] sm:$0xff] }
 0x3df   :  { %v2985_v35 = vpop.xlane.xlu0 %2984  ;;  %v2988_v53 = vpop.xlane.xlu1 %2987 }
 0x3e0   :  { %v3013_v54 = vadd.f32 1e-05, %v3005_v21  ;;  %v3000_v57 = vadd.f32 %v2988_v53, %v2952_v11  ;;  %v2999_v58 = vadd.f32 %v2985_v35, %v2951_v50  ;;  %v3033_v11 = vld [vmem:[%s6903_s2 + $0x30] sm:$0xff] }
 0x3e2   :  { %4411 = vrsqrt.f32 %v3013_v54  ;;  %v3008_v33 = vmul.f32 0.03125, %v3000_v57 }
 0x3e3   :  { %v2994_v17 = vpop.xlane.xlu1 %2993  ;;  %v2991_v49 = vpop.xlane.xlu0 %2990 }
 0x3e4   :  { %v3016_v34 = vadd.f32 1e-05, %v3008_v33  ;;  %v3002_v18 = vadd.f32 %v2994_v17, %v5998_v5  ;;  %v3001_v36 = vadd.f32 %v2991_v49, %v5996_v15  ;;  %v3007_v5 = vmul.f32 0.03125, %v2999_v58 }
 0x3e6   :  { %v3010_v23 = vmul.f32 0.03125, %v3002_v18  ;;  %4413 = vrsqrt.f32 %v3016_v34  ;;  %v3009_v10 = vmul.f32 0.03125, %v3001_v36  ;;  %v3015_v60 = vadd.f32 1e-05, %v3007_v5  ;;  %v7490_v5 = vld [vmem:[#allocation35_spill] sm:$0xff] }
 0x3e8   :  { %v3018_v56 = vadd.f32 1e-05, %v3010_v23  ;;  %v3017_v22 = vadd.f32 1e-05, %v3009_v10  ;;  %v7489_v10 = vld [vmem:[#allocation34_spill] sm:$0xff] }
 0x3ea   :  { %4415 = vrsqrt.f32 %v3018_v56  ;;  %v7485_v56 = vld [vmem:[#allocation2_spill] sm:$0xff] }
 0x3eb   :  { %4417 = vrsqrt.f32 %v3017_v22 }
 0x3ec   :  { %v4412_v55 = vpop.eup %4411  ;;  %4419 = vrsqrt.f32 %v3015_v60 }
 0x3ed   :  { %v3037_v38 = vmul.f32 %v4412_v55, %v3029_v37 }
 0x3ef   :  { %3079 = vperm.xlu1 %4337, %v3037_v38   ;;  %v3053_v48 = vmul.f32 %v3037_v38, %v5455_v61 }
 0x3f0   :  { %v4414_v9 = vpop.eup %4413 }
 0x3f1   :  { %v3040_v15 = vmul.f32 %v4414_v9, %v3032_v24  ;;  %v3061_v61 = vsub.f32 %v3045_v6, %v3053_v48  ;;  %v7491_v24 = vld [vmem:[#allocation50_spill] sm:$0xff]  ;;  %v7494_v48 = vld [vmem:[#allocation67_spill] sm:$0xff] }
 0x3f2   :  { %v3070_v17 = vpop.permute.xlu0 %3069  ;;  %v7495_v6 = vld [vmem:[#allocation82_spill] sm:$0xff] }
 0x3f3   :  { %3084 = vperm.xlu1 %4337, %v5982_v7   ;;  %v3056_v7 = vmul.f32 %v3040_v15, %v5821_v46  ;;  %v6046_v52 = vmul.f32 %v3070_v17, %v7342_v51  ;;  %v6052_v34 = vmul.f32 %v3070_v17, %v7346_v31  ;;  %v6055_v18 = vmul.f32 %v3070_v17, %v7348_v40 }
 0x3f4   :  { %v4416_v26 = vpop.eup %4415  ;;  %v6061_v49 = vmul.f32 %v3070_v17, %v7352_v29  ;;  %v6064_v2 = vmul.f32 %v3070_v17, %v7354_v0  ;;  %v6067_v51 = vmul.f32 %v3070_v17, %v7356_v13  ;;  %v6073_v31 = vmul.f32 %v3070_v17, %v7363_v63  ;;  %v7482_v0 = vld [vmem:[#allocation101_spill] sm:$0xff]  ;;  %v7483_v13 = vld [vmem:[#allocation116_spill] sm:$0xff] }
 0x3f5   :  { %v3042_v30 = vmul.f32 %v4416_v26, %v3034_v1  ;;  %v3064_v14 = vsub.f32 %v3048_v62, %v3056_v7  ;;  %v4418_v21 = vpop.eup %4417  ;;  %v6076_v40 = vmul.f32 %v3070_v17, %v7370_v45  ;;  %v6082_v29 = vmul.f32 %v3070_v17, %v7382_v32  ;;  %v7486_v45 = vld [vmem:[#allocation3_spill] sm:$0xff]  ;;  %v7493_v1 = vld [vmem:[#allocation66_spill] sm:$0xff] }
 0x3f6   :  { %v3041_v35 = vmul.f32 %v4418_v21, %v3033_v11  ;;  %v6085_v23 = vmul.f32 %v3070_v17, %v7482_v0  ;;  %v6088_v43 = vmul.f32 %v3070_v17, %v7483_v13  ;;  %v7488_v32 = vld [vmem:[#allocation19_spill] sm:$0xff] }
 0x3f7   :  { %3074 = vperm.xlu1 %4337, %v5984_v20   ;;  %v3058_v25 = vmul.f32 %v3042_v30, %v5691_v4  ;;  %3142 = vperm.xlu0 %4338, %v3064_v14   ;;  %v3059_v20 = vsub.f32 %v3043_v47, %v3051_v28  ;;  %v4420_v4 = vpop.eup %4419  ;;  %v7497_v14 = vld [vmem:[#allocation98_spill] sm:$0xff]  ;;  %v7506_v0 = vld [vmem:[#allocation39_spill] sm:$0xff] }
 0x3f8   :  { %v3039_v42 = vmul.f32 %v4420_v4, %v3031_v59  ;;  %v3057_v57 = vmul.f32 %v3041_v35, %v5683_v27  ;;  %v6058_v27 = vmul.f32 %v3070_v17, %v7350_v39  ;;  %v6079_v39 = vmul.f32 %v3070_v17, %v7376_v44  ;;  %v7487_v44 = vld [vmem:[#allocation18_spill] sm:$0xff] }
 0x3f9   :  { %v3066_v46 = vsub.f32 %v3050_v19, %v3058_v25  ;;  %v7498_v25 = vld [vmem:[#allocation99_spill] sm:$0xff]  ;;  %v7499_v47 = vld [vmem:[#allocation114_spill] sm:$0xff] }
 0x3fa   :  { %v3055_v53 = vmul.f32 %v3039_v42, %v5812_v12  ;;  %v3065_v33 = vsub.f32 %v3049_v16, %v3057_v57  ;;  %v6049_v12 = vmul.f32 %v3070_v17, %v7344_v3  ;;  %v6070_v3 = vmul.f32 %v3070_v17, %v7358_v41  ;;  %v7484_v41 = vld [vmem:[#allocation117_spill] sm:$0xff]  ;;  %v7502_v59 = vld [vmem:[#allocation6_spill] sm:$0xff]  ;;  %v3133_v16 = vpop.permute.xlu0 %3132 }
 0x3fb   :  { %3127 = vperm.xlu1 %4337, %v3061_v61   ;;  %3152 = vperm.xlu0 %4338, %v3066_v46   ;;  %v6091_v36 = vmul.f32 %v3070_v17, %v7484_v41  ;;  %v7507_v41 = vld [vmem:[#allocation54_spill] sm:$0xff] }
 0x3fc   :  { %v3063_v54 = vsub.f32 %v3047_v8, %v3055_v53  ;;  %v7503_v53 = vld [vmem:[#allocation22_spill] sm:$0xff] }
 0x3ff   :  { %3117 = vperm.xlu1 %4337, %v3059_v20   ;;  %v7500_v20 = vld [vmem:[#allocation115_spill] sm:$0xff] }
 0x403   :  { %3099 = vperm.xlu1 %4337, %v3041_v35   ;;  %v7501_v35 = vld [vmem:[#allocation7_spill] sm:$0xff] }
 0x407   :  { %3089 = vperm.xlu1 %4337, %v3039_v42  }
 0x40b   :  { %3104 = vperm.xlu1 %4337, %v3042_v30   ;;  %v7496_v30 = vld [vmem:[#allocation83_spill] sm:$0xff] }
 0x40f   :  { %3094 = vperm.xlu1 %4337, %v3040_v15   ;;  %v7492_v15 = vld [vmem:[#allocation51_spill] sm:$0xff] }
 0x413   :  { %3137 = vperm.xlu1 %4337, %v3063_v54   ;;  %v7504_v54 = vld [vmem:[#allocation23_spill] sm:$0xff] }
 0x417   :  { %3147 = vperm.xlu1 %4337, %v3065_v33   ;;  %v7505_v33 = vld [vmem:[#allocation38_spill] sm:$0xff] }
 0x46e   :  { %v3080_v63 = vpop.permute.xlu1 %3079 }
 0x46f   :  { %v6094_v50 = vmul.f32 %v7485_v56, %v3080_v63  ;;  %v6097_v37 = vmul.f32 %v7486_v45, %v3080_v63  ;;  %v6100_v55 = vmul.f32 %v7487_v44, %v3080_v63  ;;  %v6103_v58 = vmul.f32 %v7488_v32, %v3080_v63  ;;  %v7508_v45 = vld [vmem:[#allocation55_spill] sm:$0xff] }
 0x470   :  { %v6106_v38 = vmul.f32 %v7489_v10, %v3080_v63  ;;  %v6109_v22 = vmul.f32 %v7490_v5, %v3080_v63  ;;  %v6112_v9 = vmul.f32 %v7491_v24, %v3080_v63  ;;  %v6115_v60 = vmul.f32 %v7492_v15, %v3080_v63 }
 0x471   :  { %v6118_v26 = vmul.f32 %v7493_v1, %v3080_v63  ;;  %v6121_v62 = vmul.f32 %v7494_v48, %v3080_v63  ;;  %v6124_v7 = vmul.f32 %v7495_v6, %v3080_v63  ;;  %v6127_v19 = vmul.f32 %v7496_v30, %v3080_v63 }
 0x472   :  { %v6130_v61 = vmul.f32 %v7497_v14, %v3080_v63  ;;  %v6133_v28 = vmul.f32 %v7498_v25, %v3080_v63  ;;  %v6136_v46 = vmul.f32 %v7499_v47, %v3080_v63  ;;  %v6139_v21 = vmul.f32 %v7500_v20, %v3080_v63  ;;  %v3085_v11 = vpop.permute.xlu1 %3084 }
 0x473   :  { %v3110_v4 = vmul.f32 %v7501_v35, %v3085_v11  ;;  %v3182_v42 = vmul.f32 %v7502_v59, %v3085_v11  ;;  %v3215_v8 = vmul.f32 %v7503_v53, %v3085_v11  ;;  %v3248_v57 = vmul.f32 %v7504_v54, %v3085_v11  ;;  %v7510_v53 = vld [vmem:[#allocation71_spill] sm:$0xff]  ;;  %v7511_v54 = vld [vmem:[#allocation86_spill] sm:$0xff] }
 0x474   :  { %v3281_v17 = vmul.f32 %v7505_v33, %v3085_v11  ;;  %v3314_v13 = vmul.f32 %v7506_v0, %v3085_v11  ;;  %v3347_v56 = vmul.f32 %v7507_v41, %v3085_v11  ;;  %v3380_v44 = vmul.f32 %v7508_v45, %v3085_v11  ;;  %v7512_v33 = vld [vmem:[#allocation87_spill] sm:$0xff]  ;;  %v7513_v0 = vld [vmem:[#allocation102_spill] sm:$0xff] }
 0x475   :  { %v3158_v63 = vadd.f32 %v3133_v16, %v3110_v4  ;;  %v3190_v32 = vadd.f32 %v3182_v42, %v3133_v16  ;;  %v3223_v10 = vadd.f32 %v3215_v8, %v3133_v16  ;;  %v3256_v5 = vadd.f32 %v3248_v57, %v3133_v16  ;;  %v7509_v4 = vld [vmem:[#allocation70_spill] sm:$0xff]  ;;  %v7514_v41 = vld [vmem:[#allocation103_spill] sm:$0xff] }
 0x476   :  { %v3289_v24 = vadd.f32 %v3281_v17, %v3133_v16  ;;  %v3322_v15 = vadd.f32 %v3314_v13, %v3133_v16  ;;  %v3355_v1 = vadd.f32 %v3347_v56, %v3133_v16  ;;  %v3388_v48 = vadd.f32 %v3380_v44, %v3133_v16  ;;  %v7515_v45 = vld [vmem:[#allocation118_spill] sm:$0xff] }
 0x477   :  { %v3166_v6 = vmax.f32 %v3158_v63, 0.0  ;;  %v3198_v30 = vmax.f32 %v3190_v32, 0.0  ;;  %v3231_v14 = vmax.f32 %v3223_v10, 0.0  ;;  %v3264_v25 = vmax.f32 %v3256_v5, 0.0  ;;  %v7516_v63 = vld [vmem:[#allocation119_spill] sm:$0xff] }
 0x478   :  { %v3297_v47 = vmax.f32 %v3289_v24, 0.0  ;;  %v3330_v20 = vmax.f32 %v3322_v15, 0.0  ;;  %v3363_v35 = vmax.f32 %v3355_v1, 0.0  ;;  %v3396_v59 = vmax.f32 %v3388_v48, 0.0 }
 0x479   :  { %3174 = vst.msk [vmem:[%s6905_s4 + $0x18] sm:$0xff] %vm1730_vm1, %v3166_v6  ;;  %3931 = vst.msk [vmem:[%s6905_s4 + $0x58] sm:$0xff] %vm1730_vm1, %v3198_v30  ;;  %v3413_v42 = vmul.f32 %v7509_v4, %v3085_v11  ;;  %v3446_v8 = vmul.f32 %v7510_v53, %v3085_v11  ;;  %v3479_v57 = vmul.f32 %v7511_v54, %v3085_v11 }
 0x47a   :  { %3939 = vst.msk [vmem:[%s6905_s4 + $0x98] sm:$0xff] %vm1730_vm1, %v3231_v14  ;;  %3947 = vst.msk [vmem:[%s6905_s4 + $0xd8] sm:$0xff] %vm1730_vm1, %v3264_v25  ;;  %v3512_v17 = vmul.f32 %v7512_v33, %v3085_v11  ;;  %v3545_v13 = vmul.f32 %v7513_v0, %v3085_v11  ;;  %v3578_v56 = vmul.f32 %v7514_v41, %v3085_v11  ;;  %v3075_v14 = vpop.permute.xlu1 %3074  ;;  %v7521_v41 = vld [vmem:[#allocation40_spill] sm:$0xff] }
 0x47b   :  { %3955 = vst.msk [vmem:[%s6905_s4 + $0x118] sm:$0xff] %vm1730_vm1, %v3297_v47  ;;  %3963 = vst.msk [vmem:[%s6905_s4 + $0x158] sm:$0xff] %vm1730_vm1, %v3330_v20  ;;  %v3611_v44 = vmul.f32 %v7515_v45, %v3085_v11  ;;  %v3644_v32 = vmul.f32 %v7516_v63, %v3085_v11  ;;  %v3421_v10 = vadd.f32 %v3413_v42, %v3133_v16  ;;  %v7517_v11 = vld [vmem:[#allocation8_spill] sm:$0xff]  ;;  %v7518_v42 = vld [vmem:[#allocation9_spill] sm:$0xff] }
 0x47c   :  { %3971 = vst.msk [vmem:[%s6905_s4 + $0x198] sm:$0xff] %vm1730_vm1, %v3363_v35  ;;  %3979 = vst.msk [vmem:[%s6905_s4 + $0x1d8] sm:$0xff] %vm1730_vm1, %v3396_v59  ;;  %v3454_v5 = vadd.f32 %v3446_v8, %v3133_v16  ;;  %v3487_v24 = vadd.f32 %v3479_v57, %v3133_v16  ;;  %v3520_v15 = vadd.f32 %v3512_v17, %v3133_v16  ;;  %v7519_v57 = vld [vmem:[#allocation24_spill] sm:$0xff]  ;;  %v7520_v17 = vld [vmem:[#allocation25_spill] sm:$0xff] }
 0x47d   :  { %v3553_v1 = vadd.f32 %v3545_v13, %v3133_v16  ;;  %v3586_v48 = vadd.f32 %v3578_v56, %v3133_v16  ;;  %v3619_v6 = vadd.f32 %v3611_v44, %v3133_v16  ;;  %v3652_v30 = vadd.f32 %v3644_v32, %v3133_v16  ;;  %v3123_v13 = vpop.permute.xlu0 %3122  ;;  %v7522_v45 = vld [vmem:[#allocation41_spill] sm:$0xff]  ;;  %v7523_v63 = vld [vmem:[#allocation56_spill] sm:$0xff] }
 0x47e   :  { %v3429_v25 = vmax.f32 %v3421_v10, 0.0  ;;  %v3462_v47 = vmax.f32 %v3454_v5, 0.0  ;;  %v3495_v20 = vmax.f32 %v3487_v24, 0.0  ;;  %v3528_v35 = vmax.f32 %v3520_v15, 0.0  ;;  %v7524_v10 = vld [vmem:[#allocation57_spill] sm:$0xff] }
 0x47f   :  { %v3561_v59 = vmax.f32 %v3553_v1, 0.0  ;;  %v3594_v4 = vmax.f32 %v3586_v48, 0.0  ;;  %v3627_v53 = vmax.f32 %v3619_v6, 0.0  ;;  %v3660_v54 = vmax.f32 %v3652_v30, 0.0 }
 0x480   :  { %3987 = vst.msk [vmem:[%s6905_s4 + $0x218] sm:$0xff] %vm1730_vm1, %v3429_v25  ;;  %3995 = vst.msk [vmem:[%s6905_s4 + $0x258] sm:$0xff] %vm1730_vm1, %v3462_v47  ;;  %v3108_v16 = vmul.f32 %v3075_v14, %v7517_v11  ;;  %v3180_v8 = vmul.f32 %v3075_v14, %v7518_v42  ;;  %v3213_v33 = vmul.f32 %v3075_v14, %v7519_v57  ;;  %v6229_v57 = vpop.permute.xlu1 %3127 }
 0x481   :  { %4003 = vst.msk [vmem:[%s6905_s4 + $0x298] sm:$0xff] %vm1730_vm1, %v3495_v20  ;;  %4011 = vst.msk [vmem:[%s6905_s4 + $0x2d8] sm:$0xff] %vm1730_vm1, %v3528_v35  ;;  %v3246_v0 = vmul.f32 %v3075_v14, %v7520_v17  ;;  %v3279_v56 = vmul.f32 %v3075_v14, %v7521_v41  ;;  %v3312_v44 = vmul.f32 %v3075_v14, %v7522_v45 }
 0x482   :  { %4019 = vst.msk [vmem:[%s6905_s4 + $0x318] sm:$0xff] %vm1730_vm1, %v3561_v59  ;;  %4027 = vst.msk [vmem:[%s6905_s4 + $0x358] sm:$0xff] %vm1730_vm1, %v3594_v4  ;;  %v3345_v32 = vmul.f32 %v3075_v14, %v7523_v63  ;;  %v3378_v5 = vmul.f32 %v3075_v14, %v7524_v10  ;;  %v3156_v24 = vadd.f32 %v3123_v13, %v3108_v16  ;;  %v7525_v16 = vld [vmem:[#allocation72_spill] sm:$0xff] }
 0x483   :  { %4035 = vst.msk [vmem:[%s6905_s4 + $0x398] sm:$0xff] %vm1730_vm1, %v3627_v53  ;;  %4043 = vst.msk [vmem:[%s6905_s4 + $0x3d8] sm:$0xff] %vm1730_vm1, %v3660_v54  ;;  %v3188_v15 = vadd.f32 %v3180_v8, %v3123_v13  ;;  %v3221_v1 = vadd.f32 %v3213_v33, %v3123_v13  ;;  %v3254_v48 = vadd.f32 %v3246_v0, %v3123_v13  ;;  %v7526_v33 = vld [vmem:[#allocation73_spill] sm:$0xff]  ;;  %v7527_v0 = vld [vmem:[#allocation88_spill] sm:$0xff] }
 0x484   :  { %v3287_v6 = vadd.f32 %v3279_v56, %v3123_v13  ;;  %v3320_v30 = vadd.f32 %v3312_v44, %v3123_v13  ;;  %v3353_v25 = vadd.f32 %v3345_v32, %v3123_v13  ;;  %v3386_v47 = vadd.f32 %v3378_v5, %v3123_v13  ;;  %v7528_v56 = vld [vmem:[#allocation89_spill] sm:$0xff]  ;;  %v7529_v44 = vld [vmem:[#allocation104_spill] sm:$0xff] }
 0x485   :  { %v3164_v20 = vmax.f32 %v3156_v24, 0.0  ;;  %v3196_v35 = vmax.f32 %v3188_v15, 0.0  ;;  %v3229_v59 = vmax.f32 %v3221_v1, 0.0  ;;  %v3262_v4 = vmax.f32 %v3254_v48, 0.0  ;;  %v7530_v32 = vld [vmem:[#allocation105_spill] sm:$0xff]  ;;  %v7531_v5 = vld [vmem:[#allocation120_spill] sm:$0xff] }
 0x486   :  { %v3295_v53 = vmax.f32 %v3287_v6, 0.0  ;;  %v3328_v54 = vmax.f32 %v3320_v30, 0.0  ;;  %v3361_v11 = vmax.f32 %v3353_v25, 0.0  ;;  %v3394_v42 = vmax.f32 %v3386_v47, 0.0  ;;  %v7532_v15 = vld [vmem:[#allocation121_spill] sm:$0xff] }
 0x487   :  { %3172 = vst.msk [vmem:[%s6905_s4 + $0x8] sm:$0xff] %vm1730_vm1, %v3164_v20  ;;  %3929 = vst.msk [vmem:[%s6905_s4 + $0x48] sm:$0xff] %vm1730_vm1, %v3196_v35  ;;  %v3411_v8 = vmul.f32 %v3075_v14, %v7525_v16  ;;  %v3444_v17 = vmul.f32 %v3075_v14, %v7526_v33  ;;  %v3477_v41 = vmul.f32 %v3075_v14, %v7527_v0 }
 0x488   :  { %3937 = vst.msk [vmem:[%s6905_s4 + $0x88] sm:$0xff] %vm1730_vm1, %v3229_v59  ;;  %3945 = vst.msk [vmem:[%s6905_s4 + $0xc8] sm:$0xff] %vm1730_vm1, %v3262_v4  ;;  %v3510_v45 = vmul.f32 %v3075_v14, %v7528_v56  ;;  %v3543_v63 = vmul.f32 %v3075_v14, %v7529_v44  ;;  %v3576_v10 = vmul.f32 %v3075_v14, %v7530_v32  ;;  %v6271_v56 = vpop.permute.xlu1 %3117 }
 0x489   :  { %3953 = vst.msk [vmem:[%s6905_s4 + $0x108] sm:$0xff] %vm1730_vm1, %v3295_v53  ;;  %3961 = vst.msk [vmem:[%s6905_s4 + $0x148] sm:$0xff] %vm1730_vm1, %v3328_v54  ;;  %v3609_v24 = vmul.f32 %v3075_v14, %v7531_v5  ;;  %v3642_v1 = vmul.f32 %v3075_v14, %v7532_v15  ;;  %v3419_v48 = vadd.f32 %v3411_v8, %v3123_v13 }
 0x48a   :  { %3969 = vst.msk [vmem:[%s6905_s4 + $0x188] sm:$0xff] %vm1730_vm1, %v3361_v11  ;;  %3977 = vst.msk [vmem:[%s6905_s4 + $0x1c8] sm:$0xff] %vm1730_vm1, %v3394_v42  ;;  %v3452_v6 = vadd.f32 %v3444_v17, %v3123_v13  ;;  %v3485_v30 = vadd.f32 %v3477_v41, %v3123_v13  ;;  %v3518_v25 = vadd.f32 %v3510_v45, %v3123_v13 }
 0x48b   :  { %v3551_v47 = vadd.f32 %v3543_v63, %v3123_v13  ;;  %v3584_v20 = vadd.f32 %v3576_v10, %v3123_v13  ;;  %v3617_v35 = vadd.f32 %v3609_v24, %v3123_v13  ;;  %v3650_v59 = vadd.f32 %v3642_v1, %v3123_v13 }
 0x48c   :  { %v3427_v4 = vmax.f32 %v3419_v48, 0.0  ;;  %v3460_v53 = vmax.f32 %v3452_v6, 0.0  ;;  %v3493_v54 = vmax.f32 %v3485_v30, 0.0  ;;  %v3526_v11 = vmax.f32 %v3518_v25, 0.0  ;;  %v6369_v15 = vpop.permute.xlu1 %3099 }
 0x48d   :  { %v3559_v42 = vmax.f32 %v3551_v47, 0.0  ;;  %v3592_v16 = vmax.f32 %v3584_v20, 0.0  ;;  %v3625_v33 = vmax.f32 %v3617_v35, 0.0  ;;  %v3658_v0 = vmax.f32 %v3650_v59, 0.0 }
 0x48e   :  { %3985 = vst.msk [vmem:[%s6905_s4 + $0x208] sm:$0xff] %vm1730_vm1, %v3427_v4  ;;  %3993 = vst.msk [vmem:[%s6905_s4 + $0x248] sm:$0xff] %vm1730_vm1, %v3460_v53  ;;  %v3157_v14 = vadd.f32 %v6229_v57, %v6094_v50  ;;  %v3189_v13 = vadd.f32 %v6097_v37, %v6229_v57  ;;  %v3222_v8 = vadd.f32 %v6100_v55, %v6229_v57 }
 0x48f   :  { %4001 = vst.msk [vmem:[%s6905_s4 + $0x288] sm:$0xff] %vm1730_vm1, %v3493_v54  ;;  %4009 = vst.msk [vmem:[%s6905_s4 + $0x2c8] sm:$0xff] %vm1730_vm1, %v3526_v11  ;;  %v3255_v17 = vadd.f32 %v6103_v58, %v6229_v57  ;;  %v3288_v50 = vadd.f32 %v6106_v38, %v6229_v57  ;;  %v3321_v37 = vadd.f32 %v6109_v22, %v6229_v57 }
 0x490   :  { %4017 = vst.msk [vmem:[%s6905_s4 + $0x308] sm:$0xff] %vm1730_vm1, %v3559_v42  ;;  %4025 = vst.msk [vmem:[%s6905_s4 + $0x348] sm:$0xff] %vm1730_vm1, %v3592_v16  ;;  %v3354_v55 = vadd.f32 %v6112_v9, %v6229_v57  ;;  %v3387_v58 = vadd.f32 %v6115_v60, %v6229_v57  ;;  %v3165_v41 = vmax.f32 %v3157_v14, 0.0  ;;  %v3197_v45 = vmax.f32 %v3189_v13, 0.0 }
 0x491   :  { %4033 = vst.msk [vmem:[%s6905_s4 + $0x388] sm:$0xff] %vm1730_vm1, %v3625_v33  ;;  %4041 = vst.msk [vmem:[%s6905_s4 + $0x3c8] sm:$0xff] %vm1730_vm1, %v3658_v0  ;;  %v3230_v44 = vmax.f32 %v3222_v8, 0.0  ;;  %v3263_v63 = vmax.f32 %v3255_v17, 0.0  ;;  %v3296_v32 = vmax.f32 %v3288_v50, 0.0  ;;  %v3329_v10 = vmax.f32 %v3321_v37, 0.0  ;;  %v3090_v33 = vpop.permute.xlu1 %3089  ;;  %v6467_v17 = vpop.permute.xlu0 %3142 }
 0x492   :  { %v3362_v5 = vmax.f32 %v3354_v55, 0.0  ;;  %v3395_v24 = vmax.f32 %v3387_v58, 0.0  ;;  %3173 = vst.msk [vmem:[%s6905_s4 + $0x10] sm:$0xff] %vm1730_vm1, %v3165_v41  ;;  %3930 = vst.msk [vmem:[%s6905_s4 + $0x50] sm:$0xff] %vm1730_vm1, %v3197_v45  ;;  %v3420_v38 = vadd.f32 %v6118_v26, %v6229_v57  ;;  %v3453_v22 = vadd.f32 %v6121_v62, %v6229_v57  ;;  %v7536_v45 = vld [vmem:[#allocation29_spill] sm:$0xff] }
 0x493   :  { %3938 = vst.msk [vmem:[%s6905_s4 + $0x90] sm:$0xff] %vm1730_vm1, %v3230_v44  ;;  %3946 = vst.msk [vmem:[%s6905_s4 + $0xd0] sm:$0xff] %vm1730_vm1, %v3263_v63  ;;  %v3486_v9 = vadd.f32 %v6124_v7, %v6229_v57  ;;  %v3519_v60 = vadd.f32 %v6127_v19, %v6229_v57  ;;  %v3552_v26 = vadd.f32 %v6130_v61, %v6229_v57  ;;  %v7537_v63 = vld [vmem:[#allocation44_spill] sm:$0xff] }
 0x494   :  { %3954 = vst.msk [vmem:[%s6905_s4 + $0x110] sm:$0xff] %vm1730_vm1, %v3296_v32  ;;  %3962 = vst.msk [vmem:[%s6905_s4 + $0x150] sm:$0xff] %vm1730_vm1, %v3329_v10  ;;  %v3585_v62 = vadd.f32 %v6133_v28, %v6229_v57  ;;  %v3618_v7 = vadd.f32 %v6136_v46, %v6229_v57  ;;  %v3651_v19 = vadd.f32 %v6139_v21, %v6229_v57  ;;  %v3428_v1 = vmax.f32 %v3420_v38, 0.0  ;;  %v7538_v10 = vld [vmem:[#allocation45_spill] sm:$0xff] }
 0x495   :  { %3970 = vst.msk [vmem:[%s6905_s4 + $0x190] sm:$0xff] %vm1730_vm1, %v3362_v5  ;;  %3978 = vst.msk [vmem:[%s6905_s4 + $0x1d0] sm:$0xff] %vm1730_vm1, %v3395_v24  ;;  %v3461_v48 = vmax.f32 %v3453_v22, 0.0  ;;  %v3494_v6 = vmax.f32 %v3486_v9, 0.0  ;;  %v3527_v30 = vmax.f32 %v3519_v60, 0.0  ;;  %v3560_v25 = vmax.f32 %v3552_v26, 0.0  ;;  %v3105_v60 = vpop.permute.xlu1 %3104 }
 0x496   :  { %v3593_v47 = vmax.f32 %v3585_v62, 0.0  ;;  %v3626_v20 = vmax.f32 %v3618_v7, 0.0  ;;  %v3659_v35 = vmax.f32 %v3651_v19, 0.0  ;;  %3986 = vst.msk [vmem:[%s6905_s4 + $0x210] sm:$0xff] %vm1730_vm1, %v3428_v1  ;;  %v3155_v61 = vadd.f32 %v6271_v56, %v6046_v52  ;;  %v7539_v24 = vld [vmem:[#allocation60_spill] sm:$0xff]  ;;  %v7540_v22 = vld [vmem:[#allocation61_spill] sm:$0xff] }
 0x497   :  { %3994 = vst.msk [vmem:[%s6905_s4 + $0x250] sm:$0xff] %vm1730_vm1, %v3461_v48  ;;  %4002 = vst.msk [vmem:[%s6905_s4 + $0x290] sm:$0xff] %vm1730_vm1, %v3494_v6  ;;  %v3187_v28 = vadd.f32 %v6049_v12, %v6271_v56  ;;  %v3220_v46 = vadd.f32 %v6052_v34, %v6271_v56  ;;  %v3253_v21 = vadd.f32 %v6055_v18, %v6271_v56  ;;  %v7541_v26 = vld [vmem:[#allocation76_spill] sm:$0xff]  ;;  %v7542_v7 = vld [vmem:[#allocation77_spill] sm:$0xff] }
 0x498   :  { %4010 = vst.msk [vmem:[%s6905_s4 + $0x2d0] sm:$0xff] %vm1730_vm1, %v3527_v30  ;;  %4018 = vst.msk [vmem:[%s6905_s4 + $0x310] sm:$0xff] %vm1730_vm1, %v3560_v25  ;;  %v3286_v52 = vadd.f32 %v6058_v27, %v6271_v56  ;;  %v3319_v12 = vadd.f32 %v6061_v49, %v6271_v56  ;;  %v3352_v34 = vadd.f32 %v6064_v2, %v6271_v56  ;;  %v3163_v57 = vmax.f32 %v3155_v61, 0.0  ;;  %v7543_v1 = vld [vmem:[#allocation92_spill] sm:$0xff]  ;;  %v7544_v6 = vld [vmem:[#allocation93_spill] sm:$0xff] }
 0x499   :  { %4026 = vst.msk [vmem:[%s6905_s4 + $0x350] sm:$0xff] %vm1730_vm1, %v3593_v47  ;;  %4034 = vst.msk [vmem:[%s6905_s4 + $0x390] sm:$0xff] %vm1730_vm1, %v3626_v20  ;;  %v3385_v18 = vadd.f32 %v6067_v51, %v6271_v56  ;;  %v3195_v59 = vmax.f32 %v3187_v28, 0.0  ;;  %v3228_v4 = vmax.f32 %v3220_v46, 0.0  ;;  %v3261_v53 = vmax.f32 %v3253_v21, 0.0  ;;  %v7545_v25 = vld [vmem:[#allocation108_spill] sm:$0xff] }
 0x49a   :  { %4042 = vst.msk [vmem:[%s6905_s4 + $0x3d0] sm:$0xff] %vm1730_vm1, %v3659_v35  ;;  %v3294_v54 = vmax.f32 %v3286_v52, 0.0  ;;  %v3327_v11 = vmax.f32 %v3319_v12, 0.0  ;;  %v3360_v42 = vmax.f32 %v3352_v34, 0.0  ;;  %3171 = vst.msk [vmem:[%s6905_s4] sm:$0xff] %vm1730_vm1, %v3163_v57  ;;  %v3418_v27 = vadd.f32 %v6070_v3, %v6271_v56  ;;  %v7546_v20 = vld [vmem:[#allocation109_spill] sm:$0xff] }
 0x49b   :  { %v3393_v16 = vmax.f32 %v3385_v18, 0.0  ;;  %3928 = vst.msk [vmem:[%s6905_s4 + $0x40] sm:$0xff] %vm1730_vm1, %v3195_v59  ;;  %3936 = vst.msk [vmem:[%s6905_s4 + $0x80] sm:$0xff] %vm1730_vm1, %v3228_v4  ;;  %v3451_v49 = vadd.f32 %v6073_v31, %v6271_v56  ;;  %v3484_v2 = vadd.f32 %v6076_v40, %v6271_v56  ;;  %v3517_v51 = vadd.f32 %v6079_v39, %v6271_v56  ;;  %v7547_v61 = vld [vmem:[#allocation124_spill] sm:$0xff]  ;;  %v7548_v46 = vld [vmem:[#allocation125_spill] sm:$0xff] }
 0x49c   :  { %3944 = vst.msk [vmem:[%s6905_s4 + $0xc0] sm:$0xff] %vm1730_vm1, %v3261_v53  ;;  %3952 = vst.msk [vmem:[%s6905_s4 + $0x100] sm:$0xff] %vm1730_vm1, %v3294_v54  ;;  %v3550_v3 = vadd.f32 %v6082_v29, %v6271_v56  ;;  %v3583_v31 = vadd.f32 %v6085_v23, %v6271_v56  ;;  %v3616_v40 = vadd.f32 %v6088_v43, %v6271_v56  ;;  %v3426_v0 = vmax.f32 %v3418_v27, 0.0  ;;  %v7533_v29 = vld [vmem:[#allocation12_spill] sm:$0xff]  ;;  %v7534_v43 = vld [vmem:[#allocation13_spill] sm:$0xff]  ;;  %v3153_v54 = vpop.permute.xlu0 %3152 }
 0x49d   :  { %3960 = vst.msk [vmem:[%s6905_s4 + $0x140] sm:$0xff] %vm1730_vm1, %v3327_v11  ;;  %3968 = vst.msk [vmem:[%s6905_s4 + $0x180] sm:$0xff] %vm1730_vm1, %v3360_v42  ;;  %v3649_v39 = vadd.f32 %v6091_v36, %v6271_v56  ;;  %v3459_v14 = vmax.f32 %v3451_v49, 0.0  ;;  %v3492_v13 = vmax.f32 %v3484_v2, 0.0  ;;  %v3525_v8 = vmax.f32 %v3517_v51, 0.0  ;;  %v7535_v56 = vld [vmem:[#allocation28_spill] sm:$0xff] }
 0x49e   :  { %3976 = vst.msk [vmem:[%s6905_s4 + $0x1c0] sm:$0xff] %vm1730_vm1, %v3393_v16  ;;  %v3558_v50 = vmax.f32 %v3550_v3, 0.0  ;;  %v3591_v37 = vmax.f32 %v3583_v31, 0.0  ;;  %v3624_v55 = vmax.f32 %v3616_v40, 0.0  ;;  %3984 = vst.msk [vmem:[%s6905_s4 + $0x200] sm:$0xff] %vm1730_vm1, %v3426_v0  ;;  %v6486_v23 = vmul.f32 %v3090_v33, %v7533_v29  ;;  %v7549_v52 = vld [vmem:[#allocation14_spill] sm:$0xff] }
 0x49f   :  { %v3657_v58 = vmax.f32 %v3649_v39, 0.0  ;;  %3992 = vst.msk [vmem:[%s6905_s4 + $0x240] sm:$0xff] %vm1730_vm1, %v3459_v14  ;;  %4000 = vst.msk [vmem:[%s6905_s4 + $0x280] sm:$0xff] %vm1730_vm1, %v3492_v13  ;;  %v6489_v36 = vmul.f32 %v3090_v33, %v7534_v43  ;;  %v6492_v41 = vmul.f32 %v3090_v33, %v7535_v56  ;;  %v6495_v44 = vmul.f32 %v3090_v33, %v7536_v45  ;;  %v7550_v34 = vld [vmem:[#allocation15_spill] sm:$0xff]  ;;  %v7551_v57 = vld [vmem:[#allocation30_spill] sm:$0xff] }
 0x4a0   :  { %4008 = vst.msk [vmem:[%s6905_s4 + $0x2c0] sm:$0xff] %vm1730_vm1, %v3525_v8  ;;  %4016 = vst.msk [vmem:[%s6905_s4 + $0x300] sm:$0xff] %vm1730_vm1, %v3558_v50  ;;  %v6514_v32 = vmul.f32 %v3090_v33, %v7537_v63  ;;  %v6517_v5 = vmul.f32 %v3090_v33, %v7538_v10  ;;  %v6520_v38 = vmul.f32 %v3090_v33, %v7539_v24  ;;  %v7552_v4 = vld [vmem:[#allocation31_spill] sm:$0xff]  ;;  %v7553_v11 = vld [vmem:[#allocation46_spill] sm:$0xff] }
 0x4a1   :  { %4024 = vst.msk [vmem:[%s6905_s4 + $0x340] sm:$0xff] %vm1730_vm1, %v3591_v37  ;;  %4032 = vst.msk [vmem:[%s6905_s4 + $0x380] sm:$0xff] %vm1730_vm1, %v3624_v55  ;;  %v6523_v9 = vmul.f32 %v3090_v33, %v7540_v22  ;;  %v6526_v62 = vmul.f32 %v3090_v33, %v7541_v26  ;;  %v6529_v19 = vmul.f32 %v3090_v33, %v7542_v7  ;;  %v7554_v16 = vld [vmem:[#allocation47_spill] sm:$0xff]  ;;  %v7555_v49 = vld [vmem:[#allocation62_spill] sm:$0xff] }
 0x4a2   :  { %4040 = vst.msk [vmem:[%s6905_s4 + $0x3c0] sm:$0xff] %vm1730_vm1, %v3657_v58  ;;  %v6532_v48 = vmul.f32 %v3090_v33, %v7543_v1  ;;  %v6535_v30 = vmul.f32 %v3090_v33, %v7544_v6  ;;  %v6538_v47 = vmul.f32 %v3090_v33, %v7545_v25  ;;  %v6541_v35 = vmul.f32 %v3090_v33, %v7546_v20  ;;  %v7556_v51 = vld [vmem:[#allocation63_spill] sm:$0xff]  ;;  %v7557_v63 = vld [vmem:[#allocation78_spill] sm:$0xff] }
 0x4a3   :  { %v6544_v28 = vmul.f32 %v3090_v33, %v7547_v61  ;;  %v6547_v21 = vmul.f32 %v3090_v33, %v7548_v46  ;;  %v3114_v12 = vmul.f32 %v7549_v52, %v3105_v60  ;;  %v3186_v18 = vmul.f32 %v7550_v34, %v3105_v60  ;;  %v7558_v24 = vld [vmem:[#allocation79_spill] sm:$0xff]  ;;  %v7559_v26 = vld [vmem:[#allocation94_spill] sm:$0xff] }
 0x4a4   :  { %v3219_v59 = vmul.f32 %v7551_v57, %v3105_v60  ;;  %v3252_v53 = vmul.f32 %v7552_v4, %v3105_v60  ;;  %v3285_v42 = vmul.f32 %v7553_v11, %v3105_v60  ;;  %v3318_v27 = vmul.f32 %v7554_v16, %v3105_v60  ;;  %v7560_v1 = vld [vmem:[#allocation95_spill] sm:$0xff]  ;;  %v7561_v25 = vld [vmem:[#allocation110_spill] sm:$0xff] }
 0x4a5   :  { %v3351_v2 = vmul.f32 %v7555_v49, %v3105_v60  ;;  %v3384_v3 = vmul.f32 %v7556_v51, %v3105_v60  ;;  %v3162_v31 = vadd.f32 %v3153_v54, %v3114_v12  ;;  %v3194_v33 = vadd.f32 %v3186_v18, %v3153_v54  ;;  %v7562_v61 = vld [vmem:[#allocation111_spill] sm:$0xff]  ;;  %v7563_v52 = vld [vmem:[#allocation126_spill] sm:$0xff]  ;;  %v3095_v49 = vpop.permute.xlu1 %3094 }
 0x4a6   :  { %v3227_v40 = vadd.f32 %v3219_v59, %v3153_v54  ;;  %v3260_v39 = vadd.f32 %v3252_v53, %v3153_v54  ;;  %v3293_v0 = vadd.f32 %v3285_v42, %v3153_v54  ;;  %v3326_v14 = vadd.f32 %v3318_v27, %v3153_v54  ;;  %v7564_v34 = vld [vmem:[#allocation127_spill] sm:$0xff] }
 0x4a7   :  { %v3359_v13 = vadd.f32 %v3351_v2, %v3153_v54  ;;  %v3392_v8 = vadd.f32 %v3384_v3, %v3153_v54  ;;  %v3170_v50 = vmax.f32 %v3162_v31, 0.0  ;;  %v3202_v37 = vmax.f32 %v3194_v33, 0.0 }
 0x4a8   :  { %v3235_v55 = vmax.f32 %v3227_v40, 0.0  ;;  %v3268_v58 = vmax.f32 %v3260_v39, 0.0  ;;  %v3301_v29 = vmax.f32 %v3293_v0, 0.0  ;;  %v3334_v43 = vmax.f32 %v3326_v14, 0.0  ;;  %v7566_v14 = vld [vmem:[#allocation17_spill] sm:$0xff] }
 0x4a9   :  { %v3367_v56 = vmax.f32 %v3359_v13, 0.0  ;;  %v3400_v45 = vmax.f32 %v3392_v8, 0.0  ;;  %3178 = vst.msk [vmem:[%s6905_s4 + $0x38] sm:$0xff] %vm1730_vm1, %v3170_v50  ;;  %3935 = vst.msk [vmem:[%s6905_s4 + $0x78] sm:$0xff] %vm1730_vm1, %v3202_v37  ;;  %v3417_v10 = vmul.f32 %v7557_v63, %v3105_v60  ;;  %v3450_v22 = vmul.f32 %v7558_v24, %v3105_v60  ;;  %v7567_v8 = vld [vmem:[#allocation32_spill] sm:$0xff]  ;;  %v7568_v37 = vld [vmem:[#allocation33_spill] sm:$0xff] }
 0x4aa   :  { %3943 = vst.msk [vmem:[%s6905_s4 + $0xb8] sm:$0xff] %vm1730_vm1, %v3235_v55  ;;  %3951 = vst.msk [vmem:[%s6905_s4 + $0xf8] sm:$0xff] %vm1730_vm1, %v3268_v58  ;;  %v3483_v7 = vmul.f32 %v7559_v26, %v3105_v60  ;;  %v3516_v6 = vmul.f32 %v7560_v1, %v3105_v60  ;;  %v3549_v20 = vmul.f32 %v7561_v25, %v3105_v60  ;;  %v7569_v58 = vld [vmem:[#allocation48_spill] sm:$0xff] }
 0x4ab   :  { %3959 = vst.msk [vmem:[%s6905_s4 + $0x138] sm:$0xff] %vm1730_vm1, %v3301_v29  ;;  %3967 = vst.msk [vmem:[%s6905_s4 + $0x178] sm:$0xff] %vm1730_vm1, %v3334_v43  ;;  %v3582_v46 = vmul.f32 %v7562_v61, %v3105_v60  ;;  %v3615_v12 = vmul.f32 %v7563_v52, %v3105_v60  ;;  %v3648_v18 = vmul.f32 %v7564_v34, %v3105_v60  ;;  %v7565_v60 = vld [vmem:[#allocation16_spill] sm:$0xff]  ;;  %v7570_v43 = vld [vmem:[#allocation49_spill] sm:$0xff] }
 0x4ac   :  { %3975 = vst.msk [vmem:[%s6905_s4 + $0x1b8] sm:$0xff] %vm1730_vm1, %v3367_v56  ;;  %3983 = vst.msk [vmem:[%s6905_s4 + $0x1f8] sm:$0xff] %vm1730_vm1, %v3400_v45  ;;  %v3425_v57 = vadd.f32 %v3417_v10, %v3153_v54  ;;  %v3458_v59 = vadd.f32 %v3450_v22, %v3153_v54  ;;  %v3491_v4 = vadd.f32 %v3483_v7, %v3153_v54  ;;  %v7571_v45 = vld [vmem:[#allocation64_spill] sm:$0xff]  ;;  %v7572_v10 = vld [vmem:[#allocation65_spill] sm:$0xff] }
 0x4ad   :  { %v3524_v53 = vadd.f32 %v3516_v6, %v3153_v54  ;;  %v3557_v11 = vadd.f32 %v3549_v20, %v3153_v54  ;;  %v3590_v42 = vadd.f32 %v3582_v46, %v3153_v54  ;;  %v3623_v16 = vadd.f32 %v3615_v12, %v3153_v54 }
 0x4ae   :  { %v3656_v27 = vadd.f32 %v3648_v18, %v3153_v54  ;;  %v3433_v2 = vmax.f32 %v3425_v57, 0.0  ;;  %v3466_v51 = vmax.f32 %v3458_v59, 0.0  ;;  %v3499_v3 = vmax.f32 %v3491_v4, 0.0 }
 0x4af   :  { %v3532_v31 = vmax.f32 %v3524_v53, 0.0  ;;  %v3565_v33 = vmax.f32 %v3557_v11, 0.0  ;;  %v3598_v40 = vmax.f32 %v3590_v42, 0.0  ;;  %v3631_v39 = vmax.f32 %v3623_v16, 0.0  ;;  %v7573_v53 = vld [vmem:[#allocation80_spill] sm:$0xff]  ;;  %v7574_v42 = vld [vmem:[#allocation81_spill] sm:$0xff] }
 0x4b0   :  { %v3664_v0 = vmax.f32 %v3656_v27, 0.0  ;;  %3991 = vst.msk [vmem:[%s6905_s4 + $0x238] sm:$0xff] %vm1730_vm1, %v3433_v2  ;;  %3999 = vst.msk [vmem:[%s6905_s4 + $0x278] sm:$0xff] %vm1730_vm1, %v3466_v51  ;;  %v3112_v54 = vmul.f32 %v3095_v49, %v7565_v60  ;;  %v3184_v13 = vmul.f32 %v3095_v49, %v7566_v14  ;;  %v3217_v50 = vmul.f32 %v3095_v49, %v7567_v8  ;;  %v7575_v27 = vld [vmem:[#allocation96_spill] sm:$0xff]  ;;  %v7576_v51 = vld [vmem:[#allocation97_spill] sm:$0xff] }
 0x4b1   :  { %4007 = vst.msk [vmem:[%s6905_s4 + $0x2b8] sm:$0xff] %vm1730_vm1, %v3499_v3  ;;  %4015 = vst.msk [vmem:[%s6905_s4 + $0x2f8] sm:$0xff] %vm1730_vm1, %v3532_v31  ;;  %v3250_v55 = vmul.f32 %v3095_v49, %v7568_v37  ;;  %v3283_v29 = vmul.f32 %v3095_v49, %v7569_v58  ;;  %v3316_v56 = vmul.f32 %v3095_v49, %v7570_v43  ;;  %v7577_v31 = vld [vmem:[#allocation112_spill] sm:$0xff] }
 0x4b2   :  { %4023 = vst.msk [vmem:[%s6905_s4 + $0x338] sm:$0xff] %vm1730_vm1, %v3565_v33  ;;  %4031 = vst.msk [vmem:[%s6905_s4 + $0x378] sm:$0xff] %vm1730_vm1, %v3598_v40  ;;  %v3349_v63 = vmul.f32 %v3095_v49, %v7571_v45  ;;  %v3382_v24 = vmul.f32 %v3095_v49, %v7572_v10  ;;  %v3160_v22 = vadd.f32 %v6467_v17, %v3112_v54  ;;  %v7578_v40 = vld [vmem:[#allocation113_spill] sm:$0xff] }
 0x4b3   :  { %4039 = vst.msk [vmem:[%s6905_s4 + $0x3b8] sm:$0xff] %vm1730_vm1, %v3631_v39  ;;  %4047 = vst.msk [vmem:[%s6905_s4 + $0x3f8] sm:$0xff] %vm1730_vm1, %v3664_v0  ;;  %v3192_v26 = vadd.f32 %v3184_v13, %v6467_v17  ;;  %v3225_v7 = vadd.f32 %v3217_v50, %v6467_v17  ;;  %v3258_v1 = vadd.f32 %v3250_v55, %v6467_v17  ;;  %v7579_v0 = vld [vmem:[#allocation128_spill] sm:$0xff]  ;;  %v7580_v54 = vld [vmem:[#allocation129_spill] sm:$0xff] }
 0x4b4   :  { %v3291_v6 = vadd.f32 %v3283_v29, %v6467_v17  ;;  %v3324_v25 = vadd.f32 %v3316_v56, %v6467_v17  ;;  %v3357_v20 = vadd.f32 %v3349_v63, %v6467_v17  ;;  %v3390_v61 = vadd.f32 %v3382_v24, %v6467_v17  ;;  %v3138_v56 = vpop.permute.xlu1 %3137 }
 0x4b5   :  { %v3168_v46 = vmax.f32 %v3160_v22, 0.0  ;;  %v3200_v52 = vmax.f32 %v3192_v26, 0.0  ;;  %v3233_v12 = vmax.f32 %v3225_v7, 0.0  ;;  %v3266_v34 = vmax.f32 %v3258_v1, 0.0 }
 0x4b6   :  { %v3299_v18 = vmax.f32 %v3291_v6, 0.0  ;;  %v3332_v57 = vmax.f32 %v3324_v25, 0.0  ;;  %v3365_v59 = vmax.f32 %v3357_v20, 0.0  ;;  %v3398_v4 = vmax.f32 %v3390_v61, 0.0 }
 0x4b7   :  { %3176 = vst.msk [vmem:[%s6905_s4 + $0x28] sm:$0xff] %vm1730_vm1, %v3168_v46  ;;  %3933 = vst.msk [vmem:[%s6905_s4 + $0x68] sm:$0xff] %vm1730_vm1, %v3200_v52  ;;  %v3415_v11 = vmul.f32 %v3095_v49, %v7573_v53  ;;  %v3448_v16 = vmul.f32 %v3095_v49, %v7574_v42  ;;  %v3481_v2 = vmul.f32 %v3095_v49, %v7575_v27 }
 0x4b8   :  { %3941 = vst.msk [vmem:[%s6905_s4 + $0xa8] sm:$0xff] %vm1730_vm1, %v3233_v12  ;;  %3949 = vst.msk [vmem:[%s6905_s4 + $0xe8] sm:$0xff] %vm1730_vm1, %v3266_v34  ;;  %v3514_v3 = vmul.f32 %v3095_v49, %v7576_v51  ;;  %v3547_v33 = vmul.f32 %v3095_v49, %v7577_v31  ;;  %v3580_v39 = vmul.f32 %v3095_v49, %v7578_v40  ;;  %v7583_v51 = vld [vmem:[#allocation26_spill] sm:$0xff]  ;;  %v7584_v31 = vld [vmem:[#allocation27_spill] sm:$0xff] }
 0x4b9   :  { %3957 = vst.msk [vmem:[%s6905_s4 + $0x128] sm:$0xff] %vm1730_vm1, %v3299_v18  ;;  %3965 = vst.msk [vmem:[%s6905_s4 + $0x168] sm:$0xff] %vm1730_vm1, %v3332_v57  ;;  %v3613_v60 = vmul.f32 %v3095_v49, %v7579_v0  ;;  %v3646_v14 = vmul.f32 %v3095_v49, %v7580_v54  ;;  %v3423_v13 = vadd.f32 %v3415_v11, %v6467_v17  ;;  %v7585_v40 = vld [vmem:[#allocation42_spill] sm:$0xff]  ;;  %v7586_v0 = vld [vmem:[#allocation43_spill] sm:$0xff] }
 0x4ba   :  { %3973 = vst.msk [vmem:[%s6905_s4 + $0x1a8] sm:$0xff] %vm1730_vm1, %v3365_v59  ;;  %3981 = vst.msk [vmem:[%s6905_s4 + $0x1e8] sm:$0xff] %vm1730_vm1, %v3398_v4  ;;  %v3456_v8 = vadd.f32 %v3448_v16, %v6467_v17  ;;  %v3489_v50 = vadd.f32 %v3481_v2, %v6467_v17  ;;  %v3522_v37 = vadd.f32 %v3514_v3, %v6467_v17  ;;  %v7587_v54 = vld [vmem:[#allocation58_spill] sm:$0xff] }
 0x4bb   :  { %v3555_v55 = vadd.f32 %v3547_v33, %v6467_v17  ;;  %v3588_v58 = vadd.f32 %v3580_v39, %v6467_v17  ;;  %v3621_v29 = vadd.f32 %v3613_v60, %v6467_v17  ;;  %v3654_v43 = vadd.f32 %v3646_v14, %v6467_v17 }
 0x4bc   :  { %v3431_v45 = vmax.f32 %v3423_v13, 0.0  ;;  %v3464_v63 = vmax.f32 %v3456_v8, 0.0  ;;  %v3497_v49 = vmax.f32 %v3489_v50, 0.0  ;;  %v3530_v10 = vmax.f32 %v3522_v37, 0.0  ;;  %v7588_v13 = vld [vmem:[#allocation59_spill] sm:$0xff]  ;;  %v3148_v50 = vpop.permute.xlu1 %3147  ;;  %v7589_v37 = vld [vmem:[#allocation74_spill] sm:$0xff] }
 0x4bd   :  { %v3563_v24 = vmax.f32 %v3555_v55, 0.0  ;;  %v3596_v22 = vmax.f32 %v3588_v58, 0.0  ;;  %v3629_v26 = vmax.f32 %v3621_v29, 0.0  ;;  %v3662_v7 = vmax.f32 %v3654_v43, 0.0  ;;  %v7590_v58 = vld [vmem:[#allocation75_spill] sm:$0xff]  ;;  %v7591_v43 = vld [vmem:[#allocation90_spill] sm:$0xff] }
 0x4be   :  { %3989 = vst.msk [vmem:[%s6905_s4 + $0x228] sm:$0xff] %vm1730_vm1, %v3431_v45  ;;  %3997 = vst.msk [vmem:[%s6905_s4 + $0x268] sm:$0xff] %vm1730_vm1, %v3464_v63  ;;  %v3159_v17 = vadd.f32 %v3138_v56, %v6486_v23  ;;  %v3191_v1 = vadd.f32 %v6489_v36, %v3138_v56  ;;  %v3224_v6 = vadd.f32 %v6492_v41, %v3138_v56  ;;  %v7592_v45 = vld [vmem:[#allocation91_spill] sm:$0xff] }
 0x4bf   :  { %4005 = vst.msk [vmem:[%s6905_s4 + $0x2a8] sm:$0xff] %vm1730_vm1, %v3497_v49  ;;  %4013 = vst.msk [vmem:[%s6905_s4 + $0x2e8] sm:$0xff] %vm1730_vm1, %v3530_v10  ;;  %v3257_v25 = vadd.f32 %v6495_v44, %v3138_v56  ;;  %v3290_v23 = vadd.f32 %v6514_v32, %v3138_v56  ;;  %v3323_v36 = vadd.f32 %v6517_v5, %v3138_v56  ;;  %v7593_v49 = vld [vmem:[#allocation106_spill] sm:$0xff] }
 0x4c0   :  { %4021 = vst.msk [vmem:[%s6905_s4 + $0x328] sm:$0xff] %vm1730_vm1, %v3563_v24  ;;  %4029 = vst.msk [vmem:[%s6905_s4 + $0x368] sm:$0xff] %vm1730_vm1, %v3596_v22  ;;  %v3356_v41 = vadd.f32 %v6520_v38, %v3138_v56  ;;  %v3389_v44 = vadd.f32 %v6523_v9, %v3138_v56  ;;  %v3167_v20 = vmax.f32 %v3159_v17, 0.0  ;;  %v3199_v61 = vmax.f32 %v3191_v1, 0.0  ;;  %v7594_v24 = vld [vmem:[#allocation107_spill] sm:$0xff] }
 0x4c1   :  { %4037 = vst.msk [vmem:[%s6905_s4 + $0x3a8] sm:$0xff] %vm1730_vm1, %v3629_v26  ;;  %4045 = vst.msk [vmem:[%s6905_s4 + $0x3e8] sm:$0xff] %vm1730_vm1, %v3662_v7  ;;  %v3232_v46 = vmax.f32 %v3224_v6, 0.0  ;;  %v3265_v52 = vmax.f32 %v3257_v25, 0.0  ;;  %v3298_v12 = vmax.f32 %v3290_v23, 0.0  ;;  %v3331_v34 = vmax.f32 %v3323_v36, 0.0 }
 0x4c2   :  { %v3364_v18 = vmax.f32 %v3356_v41, 0.0  ;;  %v3397_v57 = vmax.f32 %v3389_v44, 0.0  ;;  %3175 = vst.msk [vmem:[%s6905_s4 + $0x20] sm:$0xff] %vm1730_vm1, %v3167_v20  ;;  %3932 = vst.msk [vmem:[%s6905_s4 + $0x60] sm:$0xff] %vm1730_vm1, %v3199_v61  ;;  %v3422_v32 = vadd.f32 %v6526_v62, %v3138_v56  ;;  %v3455_v5 = vadd.f32 %v6529_v19, %v3138_v56  ;;  %v7595_v26 = vld [vmem:[#allocation122_spill] sm:$0xff]  ;;  %v7596_v17 = vld [vmem:[#allocation123_spill] sm:$0xff] }
 0x4c3   :  { %3940 = vst.msk [vmem:[%s6905_s4 + $0xa0] sm:$0xff] %vm1730_vm1, %v3232_v46  ;;  %3948 = vst.msk [vmem:[%s6905_s4 + $0xe0] sm:$0xff] %vm1730_vm1, %v3265_v52  ;;  %v3488_v38 = vadd.f32 %v6532_v48, %v3138_v56  ;;  %v3521_v9 = vadd.f32 %v6535_v30, %v3138_v56  ;;  %v3554_v62 = vadd.f32 %v6538_v47, %v3138_v56  ;;  %v7581_v47 = vld [vmem:[#allocation10_spill] sm:$0xff] }
 0x4c4   :  { %3956 = vst.msk [vmem:[%s6905_s4 + $0x120] sm:$0xff] %vm1730_vm1, %v3298_v12  ;;  %3964 = vst.msk [vmem:[%s6905_s4 + $0x160] sm:$0xff] %vm1730_vm1, %v3331_v34  ;;  %v3587_v19 = vadd.f32 %v6541_v35, %v3138_v56  ;;  %v3620_v48 = vadd.f32 %v6544_v28, %v3138_v56  ;;  %v3653_v30 = vadd.f32 %v6547_v21, %v3138_v56  ;;  %v3430_v59 = vmax.f32 %v3422_v32, 0.0  ;;  %v7582_v28 = vld [vmem:[#allocation11_spill] sm:$0xff] }
 0x4c5   :  { %3972 = vst.msk [vmem:[%s6905_s4 + $0x1a0] sm:$0xff] %vm1730_vm1, %v3364_v18  ;;  %3980 = vst.msk [vmem:[%s6905_s4 + $0x1e0] sm:$0xff] %vm1730_vm1, %v3397_v57  ;;  %v3463_v4 = vmax.f32 %v3455_v5, 0.0  ;;  %v3496_v53 = vmax.f32 %v3488_v38, 0.0  ;;  %v3529_v11 = vmax.f32 %v3521_v9, 0.0  ;;  %v3562_v42 = vmax.f32 %v3554_v62, 0.0 }
 0x4c6   :  { %v3595_v16 = vmax.f32 %v3587_v19, 0.0  ;;  %v3628_v27 = vmax.f32 %v3620_v48, 0.0  ;;  %v3661_v2 = vmax.f32 %v3653_v30, 0.0  ;;  %3988 = vst.msk [vmem:[%s6905_s4 + $0x220] sm:$0xff] %vm1730_vm1, %v3430_v59  ;;  %v3113_v35 = vmul.f32 %v7581_v47, %v6369_v15 }
 0x4c7   :  { %3996 = vst.msk [vmem:[%s6905_s4 + $0x260] sm:$0xff] %vm1730_vm1, %v3463_v4  ;;  %4004 = vst.msk [vmem:[%s6905_s4 + $0x2a0] sm:$0xff] %vm1730_vm1, %v3496_v53  ;;  %v3185_v21 = vmul.f32 %v7582_v28, %v6369_v15  ;;  %v3218_v3 = vmul.f32 %v7583_v51, %v6369_v15  ;;  %v3251_v33 = vmul.f32 %v7584_v31, %v6369_v15 }
 0x4c8   :  { %4012 = vst.msk [vmem:[%s6905_s4 + $0x2e0] sm:$0xff] %vm1730_vm1, %v3529_v11  ;;  %4020 = vst.msk [vmem:[%s6905_s4 + $0x320] sm:$0xff] %vm1730_vm1, %v3562_v42  ;;  %v3284_v39 = vmul.f32 %v7585_v40, %v6369_v15  ;;  %v3317_v60 = vmul.f32 %v7586_v0, %v6369_v15  ;;  %v3350_v14 = vmul.f32 %v7587_v54, %v6369_v15 }
 0x4c9   :  { %4028 = vst.msk [vmem:[%s6905_s4 + $0x360] sm:$0xff] %vm1730_vm1, %v3595_v16  ;;  %4036 = vst.msk [vmem:[%s6905_s4 + $0x3a0] sm:$0xff] %vm1730_vm1, %v3628_v27  ;;  %v3383_v8 = vmul.f32 %v7588_v13, %v6369_v15  ;;  %v3416_v55 = vmul.f32 %v7589_v37, %v6369_v15  ;;  %v3449_v29 = vmul.f32 %v7590_v58, %v6369_v15 }
 0x4ca   :  { %4044 = vst.msk [vmem:[%s6905_s4 + $0x3e0] sm:$0xff] %vm1730_vm1, %v3661_v2  ;;  %v3482_v56 = vmul.f32 %v7591_v43, %v6369_v15  ;;  %v3515_v63 = vmul.f32 %v7592_v45, %v6369_v15  ;;  %v3548_v10 = vmul.f32 %v7593_v49, %v6369_v15  ;;  %v3581_v22 = vmul.f32 %v7594_v24, %v6369_v15 }
 0x4cb   :  { %v3614_v7 = vmul.f32 %v7595_v26, %v6369_v15  ;;  %v3647_v1 = vmul.f32 %v7596_v17, %v6369_v15  ;;  %v3161_v6 = vadd.f32 %v3148_v50, %v3113_v35  ;;  %v3193_v25 = vadd.f32 %v3185_v21, %v3148_v50 }
 0x4cc   :  { %v3226_v23 = vadd.f32 %v3218_v3, %v3148_v50  ;;  %v3259_v36 = vadd.f32 %v3251_v33, %v3148_v50  ;;  %v3292_v41 = vadd.f32 %v3284_v39, %v3148_v50  ;;  %v3325_v44 = vadd.f32 %v3317_v60, %v3148_v50 }
 0x4cd   :  { %v3358_v20 = vadd.f32 %v3350_v14, %v3148_v50  ;;  %v3391_v61 = vadd.f32 %v3383_v8, %v3148_v50  ;;  %v3169_v46 = vmax.f32 %v3161_v6, 0.0  ;;  %v3201_v52 = vmax.f32 %v3193_v25, 0.0 }
 0x4ce   :  { %v3234_v12 = vmax.f32 %v3226_v23, 0.0  ;;  %v3267_v34 = vmax.f32 %v3259_v36, 0.0  ;;  %v3300_v18 = vmax.f32 %v3292_v41, 0.0  ;;  %v3333_v57 = vmax.f32 %v3325_v44, 0.0 }
 0x4cf   :  { %v3366_v32 = vmax.f32 %v3358_v20, 0.0  ;;  %v3399_v5 = vmax.f32 %v3391_v61, 0.0  ;;  %3177 = vst.msk [vmem:[%s6905_s4 + $0x30] sm:$0xff] %vm1730_vm1, %v3169_v46  ;;  %3934 = vst.msk [vmem:[%s6905_s4 + $0x70] sm:$0xff] %vm1730_vm1, %v3201_v52  ;;  %v3424_v15 = vadd.f32 %v3416_v55, %v3148_v50  ;;  %v3457_v38 = vadd.f32 %v3449_v29, %v3148_v50 }
 0x4d0   :  { %3942 = vst.msk [vmem:[%s6905_s4 + $0xb0] sm:$0xff] %vm1730_vm1, %v3234_v12  ;;  %3950 = vst.msk [vmem:[%s6905_s4 + $0xf0] sm:$0xff] %vm1730_vm1, %v3267_v34  ;;  %v3490_v9 = vadd.f32 %v3482_v56, %v3148_v50  ;;  %v3523_v62 = vadd.f32 %v3515_v63, %v3148_v50  ;;  %v3556_v19 = vadd.f32 %v3548_v10, %v3148_v50 }
 0x4d1   :  { %3958 = vst.msk [vmem:[%s6905_s4 + $0x130] sm:$0xff] %vm1730_vm1, %v3300_v18  ;;  %3966 = vst.msk [vmem:[%s6905_s4 + $0x170] sm:$0xff] %vm1730_vm1, %v3333_v57  ;;  %v3589_v48 = vadd.f32 %v3581_v22, %v3148_v50  ;;  %v3622_v30 = vadd.f32 %v3614_v7, %v3148_v50  ;;  %v3655_v59 = vadd.f32 %v3647_v1, %v3148_v50  ;;  %v3432_v4 = vmax.f32 %v3424_v15, 0.0 }
 0x4d2   :  { %3974 = vst.msk [vmem:[%s6905_s4 + $0x1b0] sm:$0xff] %vm1730_vm1, %v3366_v32  ;;  %3982 = vst.msk [vmem:[%s6905_s4 + $0x1f0] sm:$0xff] %vm1730_vm1, %v3399_v5  ;;  %v3465_v53 = vmax.f32 %v3457_v38, 0.0  ;;  %v3498_v11 = vmax.f32 %v3490_v9, 0.0  ;;  %v3531_v42 = vmax.f32 %v3523_v62, 0.0  ;;  %v3564_v16 = vmax.f32 %v3556_v19, 0.0 }
 0x4d3   :  { %v3597_v27 = vmax.f32 %v3589_v48, 0.0  ;;  %v3630_v2 = vmax.f32 %v3622_v30, 0.0  ;;  %v3663_v47 = vmax.f32 %v3655_v59, 0.0  ;;  %3990 = vst.msk [vmem:[%s6905_s4 + $0x230] sm:$0xff] %vm1730_vm1, %v3432_v4 }
 0x4d4   :  { %3998 = vst.msk [vmem:[%s6905_s4 + $0x270] sm:$0xff] %vm1730_vm1, %v3465_v53  ;;  %4006 = vst.msk [vmem:[%s6905_s4 + $0x2b0] sm:$0xff] %vm1730_vm1, %v3498_v11 }
 0x4d5   :  { %4014 = vst.msk [vmem:[%s6905_s4 + $0x2f0] sm:$0xff] %vm1730_vm1, %v3531_v42  ;;  %4022 = vst.msk [vmem:[%s6905_s4 + $0x330] sm:$0xff] %vm1730_vm1, %v3564_v16 }
 0x4d6   :  { %4030 = vst.msk [vmem:[%s6905_s4 + $0x370] sm:$0xff] %vm1730_vm1, %v3597_v27  ;;  %4038 = vst.msk [vmem:[%s6905_s4 + $0x3b0] sm:$0xff] %vm1730_vm1, %v3630_v2 }
 0x4d7   :  { %4046 = vst.msk [vmem:[%s6905_s4 + $0x3f0] sm:$0xff] %vm1730_vm1, %v3663_v47 }

// kernel: generator_forward.6
= control target key start
LH: loop header
LB: loop body
LE: loop exit
PB: predicated region body
PF: predicated region fallthrough
CT: control target
= control target key end

     0   :  { %vm828_vm0 = vcmask 261120   ;;  %s2033_s1 = inlined_call_operand.vmem [shape: bf16[4,256,32], index: 1, kind: input, shape index: {}]   ;;  %s2034_s0 = inlined_call_operand.vmem [shape: bf16[4,32,256], index: 0, kind: input, shape index: {}]   ;;  %s2035_s2 = inlined_call_operand.vmem [shape: f32[32,1], index: 2, kind: input, shape index: {}]   ;;  %s2036_s3 = inlined_call_operand.vmem [shape: f32[32,1], index: 3, kind: input, shape index: {}]   ;;  %s2037_s4 = inlined_call_operand.vmem [shape: f32[4,32,32], index: 4, kind: output, shape index: {}]  }
   0x1   :  { %v1443_v0 = vld [vmem:[%s2033_s1 + $0x40] sm:$0xff]   ;;  %v1447_v4 = vld [vmem:[%s2033_s1 + $0x48] sm:$0xff]   ;;  %v1451_v8 = vld [vmem:[%s2033_s1 + $0x50] sm:$0xff]  }
   0x2   :  { %v1444_v1 = vld [vmem:[%s2033_s1] sm:$0xff]   ;;  %1328 = vmatprep.subr.bf16.mxu0 %v1443_v0  ;;  %v1448_v5 = vld [vmem:[%s2033_s1 + $0x8] sm:$0xff]   ;;  %v1452_v9 = vld [vmem:[%s2033_s1 + $0x10] sm:$0xff]  }
   0x3   :  { %v1445_v2 = vld [vmem:[%s2033_s1 + $0xc0] sm:$0xff]   ;;  %1329 = vmatpush3.bf16.msra.mxu0 %v1444_v1  ;;  %v1449_v6 = vld [vmem:[%s2033_s1 + $0xc8] sm:$0xff]   ;;  %v1453_v10 = vld [vmem:[%s2033_s1 + $0xd0] sm:$0xff]  }
   0x4   :  { %v1446_v3 = vld [vmem:[%s2033_s1 + $0x80] sm:$0xff]   ;;  %1356 = vmatprep.subr.bf16.mxu1 %v1445_v2  ;;  %1330 = vmatprep.subr.bf16.mxu0 %v1447_v4  ;;  %v1450_v7 = vld [vmem:[%s2033_s1 + $0x88] sm:$0xff]   ;;  %v1454_v11 = vld [vmem:[%s2033_s1 + $0x90] sm:$0xff]  }
   0x5   :  { %1357 = vmatpush3.bf16.msra.mxu1 %v1446_v3  ;;  %v1455_v12 = vld [vmem:[%s2033_s1 + $0x58] sm:$0xff]   ;;  %v1459_v16 = vld [vmem:[%s2033_s1 + $0x60] sm:$0xff]   ;;  %v1463_v20 = vld [vmem:[%s2033_s1 + $0x68] sm:$0xff]  }
   0x6   :  { %1358 = vmatprep.subr.bf16.mxu1 %v1449_v6  ;;  %v1456_v13 = vld [vmem:[%s2033_s1 + $0x18] sm:$0xff]   ;;  %v1460_v17 = vld [vmem:[%s2033_s1 + $0x20] sm:$0xff]   ;;  %v1464_v21 = vld [vmem:[%s2033_s1 + $0x28] sm:$0xff]  }
   0x7   :  { %1331 = vmatpush3.bf16.msra.mxu0 %v1448_v5  ;;  %v1457_v14 = vld [vmem:[%s2033_s1 + $0xd8] sm:$0xff]   ;;  %v1461_v18 = vld [vmem:[%s2033_s1 + $0xe0] sm:$0xff]   ;;  %v1465_v22 = vld [vmem:[%s2033_s1 + $0xe8] sm:$0xff]  }
   0x8   :  { %1332 = vmatprep.subr.bf16.mxu0 %v1451_v8  ;;  %v1458_v15 = vld [vmem:[%s2033_s1 + $0x98] sm:$0xff]   ;;  %v1462_v19 = vld [vmem:[%s2033_s1 + $0xa0] sm:$0xff]   ;;  %v1466_v23 = vld [vmem:[%s2033_s1 + $0xa8] sm:$0xff]  }
   0x9   :  { %1359 = vmatpush3.bf16.msra.mxu1 %v1450_v7  ;;  %v1467_v24 = vld [vmem:[%s2033_s1 + $0x70] sm:$0xff]   ;;  %v1471_v28 = vld [vmem:[%s2033_s1 + $0x78] sm:$0xff]   ;;  %v1475_v32 = vld [vmem:[%s2034_s0] ss:$8 sps:$4 sm:$0xff]  }
   0xa   :  { %1360 = vmatprep.subr.bf16.mxu1 %v1453_v10  ;;  %v1468_v25 = vld [vmem:[%s2033_s1 + $0x30] sm:$0xff]   ;;  %v1472_v29 = vld [vmem:[%s2033_s1 + $0x38] sm:$0xff]   ;;  %v1477_v33 = vld [vmem:[%s2034_s0 + $0x4] ss:$8 sps:$4 sm:$0xff]  }
   0xb   :  { %1333 = vmatpush3.bf16.msra.mxu0 %v1452_v9  ;;  %v1469_v26 = vld [vmem:[%s2033_s1 + $0xf0] sm:$0xff]   ;;  %v1473_v30 = vld [vmem:[%s2033_s1 + $0xf8] sm:$0xff]   ;;  %v1478_v34 = vld [vmem:[%s2033_s1 + $0x140] sm:$0xff]   ;;  %202 = vmatprep.mubr.bf16.mxu0 %v1477_v33 }
   0xc   :  { %1334 = vmatprep.subr.bf16.mxu0 %v1455_v12  ;;  %v1470_v27 = vld [vmem:[%s2033_s1 + $0xb0] sm:$0xff]   ;;  %v1474_v31 = vld [vmem:[%s2033_s1 + $0xb8] sm:$0xff]   ;;  %v1479_v35 = vld [vmem:[%s2034_s0 + $0x20] ss:$8 sps:$4 sm:$0xff]  }
   0xd   :  { %1361 = vmatpush3.bf16.msra.mxu1 %v1454_v11  ;;  %v1481_v36 = vld [vmem:[%s2034_s0 + $0x24] ss:$8 sps:$4 sm:$0xff]   ;;  %v1489_v44 = vld [vmem:[%s2033_s1 + $0x150] sm:$0xff]   ;;  %v1493_v48 = vld [vmem:[%s2033_s1 + $0x158] sm:$0xff]  }
   0xe   :  { %1362 = vmatprep.subr.bf16.mxu1 %v1457_v14  ;;  %v1482_v37 = vld [vmem:[%s2033_s1 + $0x100] sm:$0xff]   ;;  %405 = vmatprep.mubr.bf16.mxu1 %v1481_v36  ;;  %v1485_v40 = vld [vmem:[%s2033_s1 + $0x148] sm:$0xff]   ;;  %v1490_v45 = vld [vmem:[%s2033_s1 + $0x110] sm:$0xff]  }
   0xf   :  { %1335 = vmatpush3.bf16.msra.mxu0 %v1456_v13  ;;  %v1483_v38 = vld [vmem:[%s2033_s1 + $0x1c0] sm:$0xff]   ;;  %v1486_v41 = vld [vmem:[%s2033_s1 + $0x108] sm:$0xff]   ;;  %v1491_v46 = vld [vmem:[%s2033_s1 + $0x1d0] sm:$0xff]  }
  0x10   :  { %1336 = vmatprep.subr.bf16.mxu0 %v1459_v16  ;;  %v1484_v39 = vld [vmem:[%s2033_s1 + $0x180] sm:$0xff]   ;;  %v1487_v42 = vld [vmem:[%s2033_s1 + $0x1c8] sm:$0xff]   ;;  %v1492_v47 = vld [vmem:[%s2033_s1 + $0x190] sm:$0xff]  }
  0x11   :  { %1363 = vmatpush3.bf16.msra.mxu1 %v1458_v15  ;;  %v1488_v43 = vld [vmem:[%s2033_s1 + $0x188] sm:$0xff]   ;;  %v1494_v49 = vld [vmem:[%s2033_s1 + $0x118] sm:$0xff]   ;;  %v1500_v54 = vld [vmem:[%s2033_s1 + $0x160] sm:$0xff]  }
  0x12   :  { %1364 = vmatprep.subr.bf16.mxu1 %v1461_v18  ;;  %v1495_v50 = vld [vmem:[%s2033_s1 + $0x1d8] sm:$0xff]   ;;  %v1501_v55 = vld [vmem:[%s2033_s1 + $0x120] sm:$0xff]   ;;  %v1506_v59 = vld [vmem:[%s2033_s1 + $0x168] sm:$0xff]  }
  0x13   :  { %1337 = vmatpush3.bf16.msra.mxu0 %v1460_v17  ;;  %v1496_v51 = vld [vmem:[%s2034_s0 + $0x14] ss:$8 sps:$4 sm:$0xff]   ;;  %v1499_v53 = vld [vmem:[%s2034_s0 + $0x10] ss:$8 sps:$4 sm:$0xff]   ;;  %v1502_v56 = vld [vmem:[%s2033_s1 + $0x1e0] sm:$0xff]  }
  0x14   :  { %1338 = vmatprep.subr.bf16.mxu0 %v1463_v20  ;;  %v1498_v52 = vld [vmem:[%s2033_s1 + $0x198] sm:$0xff]   ;;  %v1503_v57 = vld [vmem:[%s2033_s1 + $0x1a0] sm:$0xff]   ;;  %v1508_v61 = vld [vmem:[%s2033_s1 + $0x128] sm:$0xff]  }
  0x15   :  { %1365 = vmatpush3.bf16.msra.mxu1 %v1462_v19  ;;  %v1504_v58 = vld [vmem:[%s2034_s0 + $0x34] ss:$8 sps:$4 sm:$0xff]   ;;  %v1507_v60 = vld [vmem:[%s2034_s0 + $0x30] ss:$8 sps:$4 sm:$0xff]   ;;  %v1509_v62 = vld [vmem:[%s2033_s1 + $0x1e8] sm:$0xff]  }
  0x16   :  { %1366 = vmatprep.subr.bf16.mxu1 %v1465_v22  ;;  %v1510_v63 = vld [vmem:[%s2033_s1 + $0x1a8] sm:$0xff]   ;;  %v1511_v0 = vld [vmem:[%s2033_s1 + $0x170] sm:$0xff]   ;;  %v1515_v4 = vld [vmem:[%s2033_s1 + $0x178] sm:$0xff]  }
  0x17   :  { %1339 = vmatpush3.bf16.msra.mxu0 %v1464_v21  ;;  %v1512_v1 = vld [vmem:[%s2033_s1 + $0x130] sm:$0xff]   ;;  %v1516_v5 = vld [vmem:[%s2033_s1 + $0x138] sm:$0xff]   ;;  %v1519_v8 = vld [vmem:[%s2034_s0 + $0x40] ss:$8 sps:$4 sm:$0xff]  }
  0x18   :  { %1340 = vmatprep.subr.bf16.mxu0 %v1467_v24  ;;  %v1513_v2 = vld [vmem:[%s2033_s1 + $0x1f0] sm:$0xff]   ;;  %v1517_v6 = vld [vmem:[%s2033_s1 + $0x1f8] sm:$0xff]   ;;  %v1521_v9 = vld [vmem:[%s2034_s0 + $0x44] ss:$8 sps:$4 sm:$0xff]  }
  0x19   :  { %1367 = vmatpush3.bf16.msra.mxu1 %v1466_v23  ;;  %v1514_v3 = vld [vmem:[%s2033_s1 + $0x1b0] sm:$0xff]   ;;  %v1518_v7 = vld [vmem:[%s2033_s1 + $0x1b8] sm:$0xff]   ;;  %v1522_v10 = vld [vmem:[%s2034_s0 + $0x60] ss:$8 sps:$4 sm:$0xff]  }
  0x1a   :  { %1368 = vmatprep.subr.bf16.mxu1 %v1469_v26  ;;  %v1524_v11 = vld [vmem:[%s2034_s0 + $0x64] ss:$8 sps:$4 sm:$0xff]   ;;  %v1525_v12 = vld [vmem:[%s2034_s0 + $0x54] ss:$8 sps:$4 sm:$0xff]   ;;  %v1527_v14 = vld [vmem:[%s2034_s0 + $0x50] ss:$8 sps:$4 sm:$0xff]  }
  0x1b   :  { %1341 = vmatpush3.bf16.msra.mxu0 %v1468_v25  ;;  %v1528_v13 = vld [vmem:[%s2034_s0 + $0x74] ss:$8 sps:$4 sm:$0xff]   ;;  %v1530_v15 = vld [vmem:[%s2034_s0 + $0x70] ss:$8 sps:$4 sm:$0xff]  }
  0x1c   :  { %1342 = vmatprep.subr.bf16.mxu0 %v1471_v28 }
  0x1d   :  { %1369 = vmatpush3.bf16.msra.mxu1 %v1470_v27 }
  0x1e   :  { %1370 = vmatprep.subr.bf16.mxu1 %v1473_v30 }
  0x1f   :  { %1343 = vmatpush3.bf16.msra.mxu0 %v1472_v29 }
  0x20   :  { %1384 = vmatprep.subr.bf16.mxu0 %v1478_v34 }
  0x21   :  { %1371 = vmatpush3.bf16.msra.mxu1 %v1474_v31 }
  0x22   :  { %203 = vmatmul.mubr.bf16.vlgmr.msra.gmra.mrb[0].mxu0 %v1475_v32  ;;  %1412 = vmatprep.subr.bf16.mxu1 %v1483_v38 }
  0x23   :  { %1385 = vmatpush3.bf16.msra.mxu0 %v1482_v37  ;;  %210 = vmatprep.mubr.bf16.mxu0 %v1496_v51 }
  0x24   :  { %406 = vmatmul.mubr.bf16.vlgmr.msra.gmra.mrb[0].mxu1 %v1479_v35  ;;  %1386 = vmatprep.subr.bf16.mxu0 %v1485_v40 }
  0x25   :  { %1413 = vmatpush3.bf16.msra.mxu1 %v1484_v39  ;;  %413 = vmatprep.mubr.bf16.mxu1 %v1504_v58 }
  0x26   :  { %1414 = vmatprep.subr.bf16.mxu1 %v1487_v42 }
  0x27   :  { %1387 = vmatpush3.bf16.msra.mxu0 %v1486_v41 }
  0x28   :  { %1388 = vmatprep.subr.bf16.mxu0 %v1489_v44 }
  0x29   :  { %1415 = vmatpush3.bf16.msra.mxu1 %v1488_v43 }
  0x2a   :  { %1416 = vmatprep.subr.bf16.mxu1 %v1491_v46  ;;  %211 = vmatmul.mubr.bf16.gmra.mrb[4].mxu0 %v1499_v53 }
  0x2b   :  { %1389 = vmatpush3.bf16.msra.mxu0 %v1490_v45  ;;  %608 = vmatprep.mubr.bf16.mxu0 %v1521_v9 }
  0x2c   :  { %1390 = vmatprep.subr.bf16.mxu0 %v1493_v48  ;;  %414 = vmatmul.mubr.bf16.gmra.mrb[4].mxu1 %v1507_v60 }
  0x2d   :  { %1417 = vmatpush3.bf16.msra.mxu1 %v1492_v47  ;;  %811 = vmatprep.mubr.bf16.mxu1 %v1524_v11 }
  0x2e   :  { %1418 = vmatprep.subr.bf16.mxu1 %v1495_v50 }
  0x2f   :  { %1391 = vmatpush3.bf16.msra.mxu0 %v1494_v49 }
  0x30   :  { %1392 = vmatprep.subr.bf16.mxu0 %v1500_v54 }
  0x31   :  { %1419 = vmatpush3.bf16.msra.mxu1 %v1498_v52 }
  0x32   :  { %1420 = vmatprep.subr.bf16.mxu1 %v1502_v56 }
  0x33   :  { %1393 = vmatpush3.bf16.msra.mxu0 %v1501_v55 }
  0x34   :  { %1394 = vmatprep.subr.bf16.mxu0 %v1506_v59 }
  0x35   :  { %1421 = vmatpush3.bf16.msra.mxu1 %v1503_v57 }
  0x36   :  { %1422 = vmatprep.subr.bf16.mxu1 %v1509_v62 }
  0x37   :  { %1395 = vmatpush3.bf16.msra.mxu0 %v1508_v61 }
  0x38   :  { %1396 = vmatprep.subr.bf16.mxu0 %v1511_v0 }
  0x39   :  { %1423 = vmatpush3.bf16.msra.mxu1 %v1510_v63 }
  0x3a   :  { %1424 = vmatprep.subr.bf16.mxu1 %v1513_v2 }
  0x3b   :  { %1397 = vmatpush3.bf16.msra.mxu0 %v1512_v1 }
  0x3c   :  { %1398 = vmatprep.subr.bf16.mxu0 %v1515_v4 }
  0x3d   :  { %1425 = vmatpush3.bf16.msra.mxu1 %v1514_v3 }
  0x3e   :  { %1426 = vmatprep.subr.bf16.mxu1 %v1517_v6 }
  0x3f   :  { %1399 = vmatpush3.bf16.msra.mxu0 %v1516_v5 }
  0x41   :  { %1427 = vmatpush3.bf16.msra.mxu1 %v1518_v7 }
  0x42   :  { %609 = vmatmul.mubr.bf16.vlgmr.msra.gmra.mrb[8].mxu0 %v1519_v8 }
  0x43   :  { %616 = vmatprep.mubr.bf16.mxu0 %v1525_v12 }
  0x44   :  { %812 = vmatmul.mubr.bf16.vlgmr.msra.gmra.mrb[8].mxu1 %v1522_v10 }
  0x45   :  { %819 = vmatprep.mubr.bf16.mxu1 %v1528_v13 }
  0x4a   :  { %617 = vmatmul.mubr.bf16.gmra.mrb[12].mxu0 %v1527_v14 }
  0x4c   :  { %820 = vmatmul.mubr.bf16.gmra.mrb[12].mxu1 %v1530_v15 }
  0xf5   :  { %v1344_v16 = vpop.f32.mrb[0].mxu0 }
  0xf6   :  { %v1345_v17 = vpop.f32.mrb[1].mxu0 }
  0xf7   :  { %v1805_v18 = vadd.f32 %v1345_v17, %v1344_v16  ;;  %v1347_v19 = vpop.f32.mrb[2].mxu0  ;;  %v1372_v20 = vpop.f32.mrb[0].mxu1 }
  0xf8   :  { %v1348_v21 = vpop.f32.mrb[3].mxu0  ;;  %v1373_v22 = vpop.f32.mrb[1].mxu1 }
  0xf9   :  { %v1807_v23 = vadd.f32 %v1348_v21, %v1347_v19  ;;  %v1809_v24 = vadd.f32 %v1373_v22, %v1372_v20  ;;  %v1375_v25 = vpop.f32.mrb[2].mxu1  ;;  %v829_v26 = vsel %vm828_vm0, %v1805_v18, 0.0 }
  0xfa   :  { %v1376_v27 = vpop.f32.mrb[3].mxu1  ;;  %830 = vadd.xlane.f32.xlu0 %v829_v26 }
  0xfb   :  { %v1813_v28 = vadd.f32 %v1376_v27, %v1375_v25  ;;  %v841_v29 = vsel %vm828_vm0, %v1809_v24, 0.0  ;;  %v832_v31 = vsel %vm828_vm0, %v1807_v23, 0.0 }
  0xfd   :  { %v844_v30 = vsel %vm828_vm0, %v1813_v28, 0.0  ;;  %v1350_v32 = vpop.f32.mrb[4].mxu0 }
  0xfe   :  { %845 = vadd.xlane.f32.xlu1 %v844_v30  ;;  %842 = vadd.xlane.f32.xlu0 %v841_v29  ;;  %v1351_v33 = vpop.f32.mrb[5].mxu0 }
  0xff   :  { %v1821_v34 = vadd.f32 %v1351_v33, %v1350_v32  ;;  %v1353_v35 = vpop.f32.mrb[6].mxu0  ;;  %v1378_v40 = vpop.f32.mrb[4].mxu1 }
 0x100   :  { %v1354_v36 = vpop.f32.mrb[7].mxu0  ;;  %v1379_v41 = vpop.f32.mrb[5].mxu1 }
 0x101   :  { %v1823_v37 = vadd.f32 %v1354_v36, %v1353_v35  ;;  %v835_v38 = vsel %vm828_vm0, %v1821_v34, 0.0  ;;  %v1829_v42 = vadd.f32 %v1379_v41, %v1378_v40  ;;  %v1381_v43 = vpop.f32.mrb[6].mxu1 }
 0x102   :  { %833 = vadd.xlane.f32.xlu0 %v832_v31  ;;  %836 = vadd.xlane.f32.xlu1 %v835_v38  ;;  %v1382_v44 = vpop.f32.mrb[7].mxu1 }
 0x103   :  { %v838_v39 = vsel %vm828_vm0, %v1823_v37, 0.0  ;;  %v1831_v45 = vadd.f32 %v1382_v44, %v1381_v43  ;;  %v847_v46 = vsel %vm828_vm0, %v1829_v42, 0.0 }
 0x105   :  { %v850_v47 = vsel %vm828_vm0, %v1831_v45, 0.0 }
 0x106   :  { %839 = vadd.xlane.f32.xlu1 %v838_v39  ;;  %848 = vadd.xlane.f32.xlu0 %v847_v46 }
 0x10a   :  { %851 = vadd.xlane.f32.xlu1 %v850_v47 }
 0x115   :  { %v1400_v48 = vpop.f32.mrb[8].mxu0 }
 0x116   :  { %v1401_v49 = vpop.f32.mrb[9].mxu0 }
 0x117   :  { %v1428_v50 = vpop.f32.mrb[8].mxu1  ;;  %v1837_v51 = vadd.f32 %v1401_v49, %v1400_v48  ;;  %v1403_v52 = vpop.f32.mrb[10].mxu0 }
 0x118   :  { %v1429_v53 = vpop.f32.mrb[9].mxu1  ;;  %v1404_v55 = vpop.f32.mrb[11].mxu0 }
 0x119   :  { %v1839_v54 = vadd.f32 %v1429_v53, %v1428_v50  ;;  %v1431_v56 = vpop.f32.mrb[10].mxu1  ;;  %v1841_v57 = vadd.f32 %v1404_v55, %v1403_v52  ;;  %v857_v59 = vsel %vm828_vm0, %v1837_v51, 0.0 }
 0x11a   :  { %v1432_v58 = vpop.f32.mrb[11].mxu1  ;;  %858 = vadd.xlane.f32.xlu0 %v857_v59 }
 0x11b   :  { %v1845_v60 = vadd.f32 %v1432_v58, %v1431_v56  ;;  %v860_v61 = vsel %vm828_vm0, %v1841_v57, 0.0  ;;  %v873_v62 = vsel %vm828_vm0, %v1839_v54, 0.0 }
 0x11c   :  { %861 = vadd.xlane.f32.xlu1 %v860_v61 }
 0x11d   :  { %v1406_v63 = vpop.f32.mrb[12].mxu0  ;;  %v876_v4 = vsel %vm828_vm0, %v1845_v60, 0.0 }
 0x11e   :  { %v1407_v0 = vpop.f32.mrb[13].mxu0  ;;  %874 = vadd.xlane.f32.xlu0 %v873_v62 }
 0x11f   :  { %v1434_v1 = vpop.f32.mrb[12].mxu1  ;;  %v1851_v2 = vadd.f32 %v1407_v0, %v1406_v63  ;;  %v1409_v3 = vpop.f32.mrb[14].mxu0 }
 0x120   :  { %v1435_v5 = vpop.f32.mrb[13].mxu1  ;;  %v1410_v6 = vpop.f32.mrb[15].mxu0  ;;  %877 = vadd.xlane.f32.xlu1 %v876_v4 }
 0x121   :  { %v1855_v7 = vadd.f32 %v1435_v5, %v1434_v1  ;;  %v1437_v8 = vpop.f32.mrb[14].mxu1  ;;  %v1857_v9 = vadd.f32 %v1410_v6, %v1409_v3  ;;  %v863_v10 = vsel %vm828_vm0, %v1851_v2, 0.0 }
 0x122   :  { %v1438_v11 = vpop.f32.mrb[15].mxu1  ;;  %864 = vadd.xlane.f32.xlu0 %v863_v10 }
 0x123   :  { %v1861_v12 = vadd.f32 %v1438_v11, %v1437_v8  ;;  %v866_v13 = vsel %vm828_vm0, %v1857_v9, 0.0  ;;  %v879_v14 = vsel %vm828_vm0, %v1855_v7, 0.0 }
 0x124   :  { %867 = vadd.xlane.f32.xlu1 %v866_v13 }
 0x125   :  { %v882_v15 = vsel %vm828_vm0, %v1861_v12, 0.0 }
 0x126   :  { %880 = vadd.xlane.f32.xlu0 %v879_v14 }
 0x128   :  { %883 = vadd.xlane.f32.xlu1 %v882_v15 }
 0x187   :  { %v831_v16 = vpop.xlane.xlu0 %830 }
 0x18b   :  { %v846_v17 = vpop.xlane.xlu1 %845  ;;  %v843_v19 = vpop.xlane.xlu0 %842 }
 0x18c   :  { %v853_v29 = vadd.f32 %v843_v19, %v831_v16 }
 0x18f   :  { %v837_v20 = vpop.xlane.xlu1 %836  ;;  %v834_v21 = vpop.xlane.xlu0 %833 }
 0x190   :  { %v854_v31 = vadd.f32 %v846_v17, %v834_v21 }
 0x193   :  { %v840_v22 = vpop.xlane.xlu1 %839  ;;  %v849_v25 = vpop.xlane.xlu0 %848 }
 0x194   :  { %v855_v43 = vadd.f32 %v849_v25, %v837_v20 }
 0x197   :  { %v852_v26 = vpop.xlane.xlu1 %851 }
 0x198   :  { %v856_v48 = vadd.f32 %v852_v26, %v840_v22 }
 0x1a7   :  { %v859_v27 = vpop.xlane.xlu0 %858 }
 0x1a8   :  { %v869_v32 = vadd.f32 %v859_v27, %v853_v29 }
 0x1a9   :  { %v862_v30 = vpop.xlane.xlu1 %861 }
 0x1aa   :  { %v870_v35 = vadd.f32 %v862_v30, %v854_v31 }
 0x1ab   :  { %v875_v33 = vpop.xlane.xlu0 %874 }
 0x1ac   :  { %v885_v36 = vadd.f32 %v875_v33, %v869_v32 }
 0x1ad   :  { %v878_v38 = vpop.xlane.xlu1 %877 }
 0x1ae   :  { %v1869_v39 = vmul.f32 0.0078125, %v885_v36  ;;  %v886_v40 = vadd.f32 %v878_v38, %v870_v35 }
 0x1af   :  { %v865_v41 = vpop.xlane.xlu0 %864 }
 0x1b0   :  { %v1871_v44 = vmul.f32 0.0078125, %v886_v40  ;;  %v893_v46 = vsub.f32 %v1805_v18, %v1869_v39  ;;  %v913_v47 = vsub.f32 %v1809_v24, %v1869_v39  ;;  %v871_v50 = vadd.f32 %v865_v41, %v855_v43 }
 0x1b1   :  { %v868_v49 = vpop.xlane.xlu1 %867  ;;  %v937_v59 = vsub.f32 %v1837_v51, %v1869_v39  ;;  %v961_v13 = vsub.f32 %v1839_v54, %v1869_v39 }
 0x1b2   :  { %v897_v52 = vmul.f32 %v893_v46, %v893_v46  ;;  %v894_v53 = vsub.f32 %v1807_v23, %v1871_v44  ;;  %v872_v55 = vadd.f32 %v868_v49, %v856_v48  ;;  %v914_v58 = vsub.f32 %v1813_v28, %v1871_v44 }
 0x1b3   :  { %v881_v56 = vpop.xlane.xlu0 %880  ;;  %v917_v0 = vmul.f32 %v913_v47, %v913_v47  ;;  %v938_v6 = vsub.f32 %v1841_v57, %v1871_v44  ;;  %v941_v11 = vmul.f32 %v937_v59, %v937_v59  ;;  %v962_v17 = vsub.f32 %v1845_v60, %v1871_v44 }
 0x1b4   :  { %v887_v61 = vadd.f32 %v881_v56, %v871_v50  ;;  %v901_v62 = vsel %vm828_vm0, %v897_v52, 0.0  ;;  %v898_v63 = vmul.f32 %v894_v53, %v894_v53  ;;  %v918_v5 = vmul.f32 %v914_v58, %v914_v58 }
 0x1b5   :  { %v884_v1 = vpop.xlane.xlu1 %883  ;;  %902 = vadd.xlane.f32.xlu0 %v901_v62  ;;  %v921_v10 = vsel %vm828_vm0, %v917_v0, 0.0  ;;  %v942_v16 = vmul.f32 %v938_v6, %v938_v6  ;;  %v945_v19 = vsel %vm828_vm0, %v941_v11, 0.0  ;;  %v965_v20 = vmul.f32 %v961_v13, %v961_v13 }
 0x1b6   :  { %v888_v3 = vadd.f32 %v884_v1, %v872_v55  ;;  %v904_v4 = vsel %vm828_vm0, %v898_v63, 0.0  ;;  %v1887_v8 = vmul.f32 0.0078125, %v887_v61  ;;  %v924_v15 = vsel %vm828_vm0, %v918_v5, 0.0 }
 0x1b7   :  { %905 = vadd.xlane.f32.xlu1 %v904_v4  ;;  %v948_v22 = vsel %vm828_vm0, %v942_v16, 0.0  ;;  %v966_v25 = vmul.f32 %v962_v17, %v962_v17  ;;  %v969_v27 = vsel %vm828_vm0, %v965_v20, 0.0  ;;  %v1539_v62 = vmov 0  }
 0x1b8   :  { %v1892_v14 = vmul.f32 0.0078125, %v888_v3  ;;  %v895_v21 = vsub.f32 %v1821_v34, %v1887_v8  ;;  %v915_v30 = vsub.f32 %v1829_v42, %v1887_v8  ;;  %v939_v38 = vsub.f32 %v1851_v2, %v1887_v8  ;;  %1441 = vset.pattern.permute.xlu0 %v1539_v62  ;;  %1442 = vset.pattern.permute.xlu1 %v1539_v62 }
 0x1b9   :  { %922 = vadd.xlane.f32.xlu0 %v921_v10  ;;  %v972_v31 = vsel %vm828_vm0, %v966_v25, 0.0  ;;  %v963_v48 = vsub.f32 %v1855_v7, %v1887_v8 }
 0x1ba   :  { %v896_v26 = vsub.f32 %v1823_v37, %v1892_v14  ;;  %v899_v29 = vmul.f32 %v895_v21, %v895_v21  ;;  %v916_v33 = vsub.f32 %v1831_v45, %v1892_v14  ;;  %v919_v36 = vmul.f32 %v915_v30, %v915_v30 }
 0x1bb   :  { %925 = vadd.xlane.f32.xlu1 %v924_v15  ;;  %v940_v43 = vsub.f32 %v1857_v9, %v1892_v14  ;;  %v943_v47 = vmul.f32 %v939_v38, %v939_v38  ;;  %v964_v52 = vsub.f32 %v1861_v12, %v1892_v14  ;;  %v967_v55 = vmul.f32 %v963_v48, %v963_v48  ;;  %v997_v38 = vld [vmem:[%s2035_s2] sm:$0xff] }
 0x1bc   :  { %v900_v32 = vmul.f32 %v896_v26, %v896_v26  ;;  %v907_v35 = vsel %vm828_vm0, %v899_v29, 0.0  ;;  %v920_v41 = vmul.f32 %v916_v33, %v916_v33  ;;  %v927_v46 = vsel %vm828_vm0, %v919_v36, 0.0 }
 0x1bd   :  { %946 = vadd.xlane.f32.xlu0 %v945_v19  ;;  %v944_v50 = vmul.f32 %v940_v43, %v940_v43  ;;  %v951_v53 = vsel %vm828_vm0, %v943_v47, 0.0  ;;  %v968_v58 = vmul.f32 %v964_v52, %v964_v52  ;;  %v975_v59 = vsel %vm828_vm0, %v967_v55, 0.0  ;;  %v998_v47 = vld [vmem:[%s2035_s2 + $0x8] sm:$0xff] }
 0x1be   :  { %v910_v40 = vsel %vm828_vm0, %v900_v32, 0.0  ;;  %v930_v49 = vsel %vm828_vm0, %v920_v41, 0.0 }
 0x1bf   :  { %949 = vadd.xlane.f32.xlu1 %v948_v22  ;;  %v954_v56 = vsel %vm828_vm0, %v944_v50, 0.0  ;;  %v978_v61 = vsel %vm828_vm0, %v968_v58, 0.0 }
 0x1c1   :  { %970 = vadd.xlane.f32.xlu0 %v969_v27 }
 0x1c3   :  { %973 = vadd.xlane.f32.xlu1 %v972_v31 }
 0x1c5   :  { %908 = vadd.xlane.f32.xlu0 %v907_v35 }
 0x1c7   :  { %911 = vadd.xlane.f32.xlu1 %v910_v40 }
 0x1c9   :  { %928 = vadd.xlane.f32.xlu0 %v927_v46 }
 0x1cb   :  { %931 = vadd.xlane.f32.xlu1 %v930_v49 }
 0x1cd   :  { %952 = vadd.xlane.f32.xlu0 %v951_v53 }
 0x1cf   :  { %955 = vadd.xlane.f32.xlu1 %v954_v56 }
 0x1d1   :  { %976 = vadd.xlane.f32.xlu0 %v975_v59 }
 0x1d3   :  { %979 = vadd.xlane.f32.xlu1 %v978_v61  ;;  %v1005_v61 = vld [vmem:[%s2036_s3] sm:$0xff] }
 0x242   :  { %v903_v63 = vpop.xlane.xlu0 %902 }
 0x244   :  { %v906_v0 = vpop.xlane.xlu1 %905 }
 0x246   :  { %v923_v1 = vpop.xlane.xlu0 %922 }
 0x247   :  { %v933_v5 = vadd.f32 %v923_v1, %v903_v63  ;;  %v1006_v1 = vld [vmem:[%s2036_s3 + $0x8] sm:$0xff] }
 0x248   :  { %v926_v3 = vpop.xlane.xlu1 %925 }
 0x249   :  { %v934_v10 = vadd.f32 %v926_v3, %v906_v0 }
 0x24a   :  { %v947_v4 = vpop.xlane.xlu0 %946 }
 0x24b   :  { %v957_v11 = vadd.f32 %v947_v4, %v933_v5 }
 0x24c   :  { %v950_v6 = vpop.xlane.xlu1 %949 }
 0x24d   :  { %v958_v15 = vadd.f32 %v950_v6, %v934_v10  ;;  %v1000_v10 = vld [vmem:[%s2035_s2 + $0x18] sm:$0xff] }
 0x24e   :  { %v971_v13 = vpop.xlane.xlu0 %970 }
 0x24f   :  { %v981_v16 = vadd.f32 %v971_v13, %v957_v11  ;;  %v1007_v13 = vld [vmem:[%s2036_s3 + $0x10] sm:$0xff] }
 0x250   :  { %v974_v17 = vpop.xlane.xlu1 %973 }
 0x251   :  { %v985_v19 = vmul.f32 0.0078125, %v981_v16  ;;  %v982_v20 = vadd.f32 %v974_v17, %v958_v15  ;;  %v1008_v17 = vld [vmem:[%s2036_s3 + $0x18] sm:$0xff] }
 0x252   :  { %v909_v21 = vpop.xlane.xlu0 %908 }
 0x253   :  { %v989_v22 = vadd.f32 1e-05, %v985_v19  ;;  %v986_v25 = vmul.f32 0.0078125, %v982_v20 }
 0x254   :  { %v912_v26 = vpop.xlane.xlu1 %911 }
 0x255   :  { %1531 = vrsqrt.f32 %v989_v22  ;;  %v990_v27 = vadd.f32 1e-05, %v986_v25 }
 0x256   :  { %v929_v29 = vpop.xlane.xlu0 %928 }
 0x257   :  { %1533 = vrsqrt.f32 %v990_v27  ;;  %v935_v32 = vadd.f32 %v929_v29, %v909_v21 }
 0x258   :  { %v932_v30 = vpop.xlane.xlu1 %931 }
 0x259   :  { %v936_v35 = vadd.f32 %v932_v30, %v912_v26 }
 0x25a   :  { %v953_v31 = vpop.xlane.xlu0 %952 }
 0x25b   :  { %v959_v36 = vadd.f32 %v953_v31, %v935_v32 }
 0x25c   :  { %v956_v33 = vpop.xlane.xlu1 %955 }
 0x25d   :  { %v960_v43 = vadd.f32 %v956_v33, %v936_v35 }
 0x25e   :  { %v977_v40 = vpop.xlane.xlu0 %976 }
 0x25f   :  { %v1532_v41 = vpop.eup %1531  ;;  %v983_v46 = vadd.f32 %v977_v40, %v959_v36 }
 0x260   :  { %v980_v48 = vpop.xlane.xlu1 %979  ;;  %v1001_v49 = vmul.f32 %v1532_v41, %v997_v38 }
 0x261   :  { %v1534_v50 = vpop.eup %1533  ;;  %v987_v52 = vmul.f32 0.0078125, %v983_v46  ;;  %v984_v53 = vadd.f32 %v980_v48, %v960_v43 }
 0x262   :  { %1019 = vperm.xlu0 %1441, %v1001_v49   ;;  %v1002_v55 = vmul.f32 %v1534_v50, %v998_v47  ;;  %v1009_v56 = vmul.f32 %v1001_v49, %v1869_v39  ;;  %v999_v39 = vld [vmem:[%s2035_s2 + $0x10] sm:$0xff] }
 0x263   :  { %v991_v58 = vadd.f32 1e-05, %v987_v52  ;;  %v988_v59 = vmul.f32 0.0078125, %v984_v53 }
 0x264   :  { %1024 = vperm.xlu1 %1442, %v1002_v55   ;;  %v1013_v63 = vsub.f32 %v1005_v61, %v1009_v56  ;;  %v1010_v0 = vmul.f32 %v1002_v55, %v1871_v44 }
 0x265   :  { %1535 = vrsqrt.f32 %v991_v58  ;;  %v992_v62 = vadd.f32 1e-05, %v988_v59 }
 0x266   :  { %v1014_v3 = vsub.f32 %v1006_v1, %v1010_v0 }
 0x267   :  { %1537 = vrsqrt.f32 %v992_v62 }
 0x268   :  { %1043 = vperm.xlu1 %1442, %v1013_v63  }
 0x26c   :  { %1048 = vperm.xlu1 %1442, %v1014_v3  }
 0x26f   :  { %v1536_v4 = vpop.eup %1535 }
 0x270   :  { %v1003_v5 = vmul.f32 %v1536_v4, %v999_v39 }
 0x271   :  { %v1538_v6 = vpop.eup %1537 }
 0x272   :  { %1029 = vperm.xlu1 %1442, %v1003_v5   ;;  %v1004_v44 = vmul.f32 %v1538_v6, %v1000_v10  ;;  %v1011_v11 = vmul.f32 %v1003_v5, %v1887_v8 }
 0x274   :  { %v1015_v15 = vsub.f32 %v1007_v13, %v1011_v11  ;;  %v1012_v16 = vmul.f32 %v1004_v44, %v1892_v14 }
 0x276   :  { %1034 = vperm.xlu1 %1442, %v1004_v44   ;;  %v1016_v19 = vsub.f32 %v1008_v17, %v1012_v16 }
 0x27a   :  { %1053 = vperm.xlu1 %1442, %v1015_v15  }
 0x27e   :  { %1058 = vperm.xlu1 %1442, %v1016_v19  }
 0x2e1   :  { %v1020_v20 = vpop.permute.xlu0 %1019 }
 0x2e2   :  { %v1037_v22 = vmul.f32 %v1805_v18, %v1020_v20  ;;  %v1073_v8 = vmul.f32 %v1809_v24, %v1020_v20  ;;  %v1090_v25 = vmul.f32 %v1837_v51, %v1020_v20  ;;  %v1107_v26 = vmul.f32 %v1839_v54, %v1020_v20 }
 0x2e3   :  { %v1025_v21 = vpop.permute.xlu1 %1024 }
 0x2e4   :  { %v1038_v32 = vmul.f32 %v1807_v23, %v1025_v21  ;;  %v1074_v33 = vmul.f32 %v1813_v28, %v1025_v21  ;;  %v1091_v35 = vmul.f32 %v1841_v57, %v1025_v21  ;;  %v1108_v36 = vmul.f32 %v1845_v60, %v1025_v21 }
 0x2e7   :  { %v1044_v27 = vpop.permute.xlu1 %1043 }
 0x2e8   :  { %v1061_v29 = vadd.f32 %v1044_v27, %v1037_v22  ;;  %v1077_v14 = vadd.f32 %v1073_v8, %v1044_v27  ;;  %v1094_v30 = vadd.f32 %v1090_v25, %v1044_v27  ;;  %v1111_v31 = vadd.f32 %v1107_v26, %v1044_v27 }
 0x2ea   :  { %v1065_v18 = vmax.f32 %v1061_v29, 0.0  ;;  %v1081_v38 = vmax.f32 %v1077_v14, 0.0  ;;  %v1098_v24 = vmax.f32 %v1094_v30, 0.0  ;;  %v1115_v40 = vmax.f32 %v1111_v31, 0.0 }
 0x2eb   :  { %v1049_v51 = vpop.permute.xlu1 %1048 }
 0x2ec   :  { %1069 = vst.msk [vmem:[%s2037_s4] sm:$0xff] %vm828_vm0, %v1065_v18  ;;  %1316 = vst.msk [vmem:[%s2037_s4 + $0x20] sm:$0xff] %vm828_vm0, %v1081_v38  ;;  %v1062_v23 = vadd.f32 %v1049_v51, %v1038_v32  ;;  %v1078_v28 = vadd.f32 %v1074_v33, %v1049_v51  ;;  %v1095_v54 = vadd.f32 %v1091_v35, %v1049_v51 }
 0x2ed   :  { %1320 = vst.msk [vmem:[%s2037_s4 + $0x40] sm:$0xff] %vm828_vm0, %v1098_v24  ;;  %1324 = vst.msk [vmem:[%s2037_s4 + $0x60] sm:$0xff] %vm828_vm0, %v1115_v40  ;;  %v1112_v57 = vadd.f32 %v1108_v36, %v1049_v51 }
 0x2ee   :  { %v1066_v60 = vmax.f32 %v1062_v23, 0.0  ;;  %v1082_v41 = vmax.f32 %v1078_v28, 0.0  ;;  %v1099_v43 = vmax.f32 %v1095_v54, 0.0 }
 0x2ef   :  { %v1116_v46 = vmax.f32 %v1112_v57, 0.0 }
 0x2f0   :  { %1070 = vst.msk [vmem:[%s2037_s4 + $0x8] sm:$0xff] %vm828_vm0, %v1066_v60  ;;  %1317 = vst.msk [vmem:[%s2037_s4 + $0x28] sm:$0xff] %vm828_vm0, %v1082_v41 }
 0x2f1   :  { %1321 = vst.msk [vmem:[%s2037_s4 + $0x48] sm:$0xff] %vm828_vm0, %v1099_v43  ;;  %1325 = vst.msk [vmem:[%s2037_s4 + $0x68] sm:$0xff] %vm828_vm0, %v1116_v46  ;;  %v1030_v47 = vpop.permute.xlu1 %1029 }
 0x2f2   :  { %v1039_v49 = vmul.f32 %v1821_v34, %v1030_v47  ;;  %v1075_v50 = vmul.f32 %v1829_v42, %v1030_v47  ;;  %v1092_v52 = vmul.f32 %v1851_v2, %v1030_v47  ;;  %v1109_v53 = vmul.f32 %v1855_v7, %v1030_v47 }
 0x2f5   :  { %v1035_v48 = vpop.permute.xlu1 %1034 }
 0x2f6   :  { %v1040_v62 = vmul.f32 %v1823_v37, %v1035_v48  ;;  %v1076_v63 = vmul.f32 %v1831_v45, %v1035_v48  ;;  %v1093_v0 = vmul.f32 %v1857_v9, %v1035_v48  ;;  %v1110_v1 = vmul.f32 %v1861_v12, %v1035_v48 }
 0x2f9   :  { %v1054_v55 = vpop.permute.xlu1 %1053 }
 0x2fa   :  { %v1063_v56 = vadd.f32 %v1054_v55, %v1039_v49  ;;  %v1079_v58 = vadd.f32 %v1075_v50, %v1054_v55  ;;  %v1096_v59 = vadd.f32 %v1092_v52, %v1054_v55  ;;  %v1113_v61 = vadd.f32 %v1109_v53, %v1054_v55 }
 0x2fc   :  { %v1067_v34 = vmax.f32 %v1063_v56, 0.0  ;;  %v1083_v3 = vmax.f32 %v1079_v58, 0.0  ;;  %v1100_v42 = vmax.f32 %v1096_v59, 0.0  ;;  %v1117_v39 = vmax.f32 %v1113_v61, 0.0 }
 0x2fd   :  { %v1059_v2 = vpop.permute.xlu1 %1058 }
 0x2fe   :  { %1071 = vst.msk [vmem:[%s2037_s4 + $0x10] sm:$0xff] %vm828_vm0, %v1067_v34  ;;  %1318 = vst.msk [vmem:[%s2037_s4 + $0x30] sm:$0xff] %vm828_vm0, %v1083_v3  ;;  %v1064_v37 = vadd.f32 %v1059_v2, %v1040_v62  ;;  %v1080_v45 = vadd.f32 %v1076_v63, %v1059_v2  ;;  %v1097_v7 = vadd.f32 %v1093_v0, %v1059_v2 }
 0x2ff   :  { %1322 = vst.msk [vmem:[%s2037_s4 + $0x50] sm:$0xff] %vm828_vm0, %v1100_v42  ;;  %1326 = vst.msk [vmem:[%s2037_s4 + $0x70] sm:$0xff] %vm828_vm0, %v1117_v39  ;;  %v1114_v9 = vadd.f32 %v1110_v1, %v1059_v2 }
 0x300   :  { %v1068_v12 = vmax.f32 %v1064_v37, 0.0  ;;  %v1084_v4 = vmax.f32 %v1080_v45, 0.0  ;;  %v1101_v5 = vmax.f32 %v1097_v7, 0.0 }
 0x301   :  { %v1118_v6 = vmax.f32 %v1114_v9, 0.0 }
 0x302   :  { %1072 = vst.msk [vmem:[%s2037_s4 + $0x18] sm:$0xff] %vm828_vm0, %v1068_v12  ;;  %1319 = vst.msk [vmem:[%s2037_s4 + $0x38] sm:$0xff] %vm828_vm0, %v1084_v4 }
 0x303   :  { %1323 = vst.msk [vmem:[%s2037_s4 + $0x58] sm:$0xff] %vm828_vm0, %v1101_v5  ;;  %1327 = vst.msk [vmem:[%s2037_s4 + $0x78] sm:$0xff] %vm828_vm0, %v1118_v6 }

// kernel: generator_forward.7
= control target key start
LH: loop header
LB: loop body
LE: loop exit
PB: predicated region body
PF: predicated region fallthrough
CT: control target
= control target key end

     0   :  { %v870_v0 = vmov 0.0   ;;  %vm871_vm0 = vmmov 0   ;;  %s1122_s1 = inlined_call_operand.vmem [shape: bf16[4,128,128], index: 1, kind: input, shape index: {}]   ;;  %s1123_s0 = inlined_call_operand.vmem [shape: bf16[4,16,128], index: 0, kind: input, shape index: {}]   ;;  %s1124_s2 = inlined_call_operand.vmem [shape: f32[16,1], index: 2, kind: input, shape index: {}]   ;;  %s1125_s3 = inlined_call_operand.vmem [shape: f32[16,1], index: 3, kind: input, shape index: {}]   ;;  %s1126_s4 = inlined_call_operand.vmem [shape: f32[4,16,128], index: 4, kind: output, shape index: {}]  }
   0x1   :  { %745 = vmatprep.subr.bf16.mxu0 %v870_v0  ;;  %765 = vmatprep.subr.bf16.mxu1 %v870_v0  ;;  %v830_v1 = vld [vmem:[%s1122_s1] sm:$0xff]   ;;  %v832_v3 = vld [vmem:[%s1122_s1 + $0x8] sm:$0xff]   ;;  %v834_v5 = vld [vmem:[%s1122_s1 + $0x10] sm:$0xff]  }
   0x2   :  { %v831_v2 = vld [vmem:[%s1122_s1 + $0x40] sm:$0xff]   ;;  %761 = vmatprep.mubr.msk.bf16.mxu0 %vm871_vm0, %v870_v0  ;;  %781 = vmatprep.mubr.msk.bf16.mxu1 %vm871_vm0, %v870_v0  ;;  %v833_v4 = vld [vmem:[%s1122_s1 + $0x48] sm:$0xff]   ;;  %v835_v6 = vld [vmem:[%s1122_s1 + $0x50] sm:$0xff]  }
   0x3   :  { %746 = vmatpush3.bf16.msra.mxu0 %v830_v1  ;;  %766 = vmatpush3.bf16.msra.mxu1 %v831_v2  ;;  %v836_v7 = vld [vmem:[%s1122_s1 + $0x18] sm:$0xff]   ;;  %v838_v9 = vld [vmem:[%s1122_s1 + $0x20] sm:$0xff]   ;;  %v840_v11 = vld [vmem:[%s1122_s1 + $0x28] sm:$0xff]  }
   0x4   :  { %747 = vmatprep.subr.bf16.mxu0 %v870_v0  ;;  %767 = vmatprep.subr.bf16.mxu1 %v870_v0  ;;  %v837_v8 = vld [vmem:[%s1122_s1 + $0x58] sm:$0xff]   ;;  %v839_v10 = vld [vmem:[%s1122_s1 + $0x60] sm:$0xff]   ;;  %v841_v12 = vld [vmem:[%s1122_s1 + $0x68] sm:$0xff]  }
   0x5   :  { %v842_v13 = vld [vmem:[%s1122_s1 + $0x30] sm:$0xff]   ;;  %v844_v15 = vld [vmem:[%s1122_s1 + $0x38] sm:$0xff]   ;;  %v846_v17 = vld [vmem:[%s1123_s0] sm:$0xff]  }
   0x6   :  { %v843_v14 = vld [vmem:[%s1122_s1 + $0x70] sm:$0xff]   ;;  %v845_v16 = vld [vmem:[%s1122_s1 + $0x78] sm:$0xff]   ;;  %v847_v18 = vld [vmem:[%s1123_s0 + $0x8] sm:$0xff]  }
   0x7   :  { %748 = vmatpush3.bf16.msra.mxu0 %v832_v3  ;;  %768 = vmatpush3.bf16.msra.mxu1 %v833_v4  ;;  %v848_v19 = vld [vmem:[%s1122_s1 + $0x80] sm:$0xff]   ;;  %v850_v21 = vld [vmem:[%s1122_s1 + $0x88] sm:$0xff]   ;;  %v852_v23 = vld [vmem:[%s1122_s1 + $0x90] sm:$0xff]  }
   0x8   :  { %749 = vmatprep.subr.bf16.mxu0 %v870_v0  ;;  %769 = vmatprep.subr.bf16.mxu1 %v870_v0  ;;  %v849_v20 = vld [vmem:[%s1122_s1 + $0xc0] sm:$0xff]   ;;  %v851_v22 = vld [vmem:[%s1122_s1 + $0xc8] sm:$0xff]   ;;  %v853_v24 = vld [vmem:[%s1122_s1 + $0xd0] sm:$0xff]  }
   0x9   :  { %v854_v25 = vld [vmem:[%s1122_s1 + $0x98] sm:$0xff]   ;;  %v856_v27 = vld [vmem:[%s1122_s1 + $0xa0] sm:$0xff]   ;;  %v858_v29 = vld [vmem:[%s1122_s1 + $0xa8] sm:$0xff]  }
   0xa   :  { %v855_v26 = vld [vmem:[%s1122_s1 + $0xd8] sm:$0xff]   ;;  %v857_v28 = vld [vmem:[%s1122_s1 + $0xe0] sm:$0xff]   ;;  %v859_v30 = vld [vmem:[%s1122_s1 + $0xe8] sm:$0xff]  }
   0xb   :  { %750 = vmatpush3.bf16.msra.mxu0 %v834_v5  ;;  %770 = vmatpush3.bf16.msra.mxu1 %v835_v6  ;;  %v860_v31 = vld [vmem:[%s1122_s1 + $0xb0] sm:$0xff]   ;;  %v862_v33 = vld [vmem:[%s1122_s1 + $0xb8] sm:$0xff]  }
   0xc   :  { %751 = vmatprep.subr.bf16.mxu0 %v870_v0  ;;  %771 = vmatprep.subr.bf16.mxu1 %v870_v0  ;;  %v861_v32 = vld [vmem:[%s1122_s1 + $0xf0] sm:$0xff]   ;;  %v863_v34 = vld [vmem:[%s1122_s1 + $0xf8] sm:$0xff]  }
   0xd   :  { %v864_v35 = vld [vmem:[%s1123_s0 + $0x10] sm:$0xff]   ;;  %v865_v36 = vld [vmem:[%s1123_s0 + $0x18] sm:$0xff]  }
   0xf   :  { %752 = vmatpush3.bf16.msra.mxu0 %v836_v7  ;;  %772 = vmatpush3.bf16.msra.mxu1 %v837_v8 }
  0x10   :  { %753 = vmatprep.subr.bf16.mxu0 %v870_v0  ;;  %773 = vmatprep.subr.bf16.mxu1 %v870_v0 }
  0x13   :  { %754 = vmatpush3.bf16.msra.mxu0 %v838_v9  ;;  %774 = vmatpush3.bf16.msra.mxu1 %v839_v10 }
  0x14   :  { %755 = vmatprep.subr.bf16.mxu0 %v870_v0  ;;  %775 = vmatprep.subr.bf16.mxu1 %v870_v0 }
  0x17   :  { %756 = vmatpush3.bf16.msra.mxu0 %v840_v11  ;;  %776 = vmatpush3.bf16.msra.mxu1 %v841_v12 }
  0x18   :  { %757 = vmatprep.subr.bf16.mxu0 %v870_v0  ;;  %777 = vmatprep.subr.bf16.mxu1 %v870_v0 }
  0x1b   :  { %758 = vmatpush3.bf16.msra.mxu0 %v842_v13  ;;  %778 = vmatpush3.bf16.msra.mxu1 %v843_v14 }
  0x1c   :  { %759 = vmatprep.subr.bf16.mxu0 %v870_v0  ;;  %779 = vmatprep.subr.bf16.mxu1 %v870_v0 }
  0x1f   :  { %760 = vmatpush3.bf16.msra.mxu0 %v844_v15  ;;  %780 = vmatpush3.bf16.msra.mxu1 %v845_v16 }
  0x20   :  { %785 = vmatprep.subr.bf16.mxu0 %v870_v0  ;;  %805 = vmatprep.subr.bf16.mxu1 %v870_v0 }
  0x22   :  { %762 = vmatmul.mubr.bf16.vlgmr.msra.gmra.mrb[0].mxu0 %v846_v17  ;;  %782 = vmatmul.mubr.bf16.vlgmr.msra.gmra.mrb[0].mxu1 %v847_v18 }
  0x23   :  { %786 = vmatpush3.bf16.msra.mxu0 %v848_v19  ;;  %806 = vmatpush3.bf16.msra.mxu1 %v849_v20 }
  0x24   :  { %787 = vmatprep.subr.bf16.mxu0 %v870_v0  ;;  %807 = vmatprep.subr.bf16.mxu1 %v870_v0 }
  0x25   :  { %801 = vmatprep.mubr.msk.bf16.mxu0 %vm871_vm0, %v870_v0  ;;  %821 = vmatprep.mubr.msk.bf16.mxu1 %vm871_vm0, %v870_v0 }
  0x27   :  { %788 = vmatpush3.bf16.msra.mxu0 %v850_v21  ;;  %808 = vmatpush3.bf16.msra.mxu1 %v851_v22  ;;  %v872_v21 = vmov 0  }
  0x28   :  { %789 = vmatprep.subr.bf16.mxu0 %v870_v0  ;;  %809 = vmatprep.subr.bf16.mxu1 %v870_v0 }
  0x29   :  { %828 = vset.pattern.permute.xlu0 %v872_v21  ;;  %829 = vset.pattern.permute.xlu1 %v872_v21 }
  0x2b   :  { %790 = vmatpush3.bf16.msra.mxu0 %v852_v23  ;;  %810 = vmatpush3.bf16.msra.mxu1 %v853_v24 }
  0x2c   :  { %791 = vmatprep.subr.bf16.mxu0 %v870_v0  ;;  %811 = vmatprep.subr.bf16.mxu1 %v870_v0 }
  0x2f   :  { %792 = vmatpush3.bf16.msra.mxu0 %v854_v25  ;;  %812 = vmatpush3.bf16.msra.mxu1 %v855_v26 }
  0x30   :  { %793 = vmatprep.subr.bf16.mxu0 %v870_v0  ;;  %813 = vmatprep.subr.bf16.mxu1 %v870_v0 }
  0x33   :  { %794 = vmatpush3.bf16.msra.mxu0 %v856_v27  ;;  %814 = vmatpush3.bf16.msra.mxu1 %v857_v28 }
  0x34   :  { %795 = vmatprep.subr.bf16.mxu0 %v870_v0  ;;  %815 = vmatprep.subr.bf16.mxu1 %v870_v0 }
  0x37   :  { %796 = vmatpush3.bf16.msra.mxu0 %v858_v29  ;;  %816 = vmatpush3.bf16.msra.mxu1 %v859_v30 }
  0x38   :  { %797 = vmatprep.subr.bf16.mxu0 %v870_v0  ;;  %817 = vmatprep.subr.bf16.mxu1 %v870_v0 }
  0x3b   :  { %798 = vmatpush3.bf16.msra.mxu0 %v860_v31  ;;  %818 = vmatpush3.bf16.msra.mxu1 %v861_v32 }
  0x3c   :  { %799 = vmatprep.subr.bf16.mxu0 %v870_v0  ;;  %819 = vmatprep.subr.bf16.mxu1 %v870_v0 }
  0x3f   :  { %800 = vmatpush3.bf16.msra.mxu0 %v862_v33  ;;  %820 = vmatpush3.bf16.msra.mxu1 %v863_v34 }
  0x42   :  { %802 = vmatmul.mubr.bf16.vlgmr.msra.gmra.mrb[4].mxu0 %v864_v35  ;;  %822 = vmatmul.mubr.bf16.vlgmr.msra.gmra.mrb[4].mxu1 %v865_v36 }
  0xf5   :  { %v1046_v37 = vpop.f32.mrb[0].mxu0  ;;  %v1048_v38 = vpop.f32.mrb[0].mxu1 }
  0xf6   :  { %476 = vadd.xlane.f32.xlu0 %v1046_v37  ;;  %v763_v39 = vpop.f32.mrb[1].mxu0  ;;  %480 = vadd.xlane.f32.xlu1 %v1048_v38  ;;  %v783_v41 = vpop.f32.mrb[1].mxu1 }
  0xf7   :  { %v1052_v40 = vpop.f32.mrb[2].mxu0  ;;  %v1054_v43 = vpop.f32.mrb[2].mxu1 }
  0xf8   :  { %v764_v42 = vpop.f32.mrb[3].mxu0  ;;  %v784_v44 = vpop.f32.mrb[3].mxu1 }
  0xf9   :  { %v544_v44 = vld [vmem:[%s1124_s2] sm:$0xff] }
  0xfa   :  { %478 = vadd.xlane.f32.xlu0 %v1052_v40  ;;  %482 = vadd.xlane.f32.xlu1 %v1054_v43 }
 0x115   :  { %v1058_v45 = vpop.f32.mrb[4].mxu0  ;;  %v1060_v46 = vpop.f32.mrb[4].mxu1 }
 0x116   :  { %486 = vadd.xlane.f32.xlu0 %v1058_v45  ;;  %v803_v47 = vpop.f32.mrb[5].mxu0  ;;  %v823_v49 = vpop.f32.mrb[5].mxu1 }
 0x117   :  { %v1063_v48 = vpop.f32.mrb[6].mxu0  ;;  %v1065_v50 = vpop.f32.mrb[6].mxu1  ;;  %v545_v49 = vld [vmem:[%s1124_s2 + $0x8] sm:$0xff] }
 0x118   :  { %488 = vadd.xlane.f32.xlu1 %v1063_v48  ;;  %v804_v51 = vpop.f32.mrb[7].mxu0  ;;  %v824_v52 = vpop.f32.mrb[7].mxu1 }
 0x11a   :  { %492 = vadd.xlane.f32.xlu0 %v1060_v46 }
 0x11c   :  { %494 = vadd.xlane.f32.xlu1 %v1065_v50 }
 0x183   :  { %v477_v53 = vpop.xlane.xlu0 %476  ;;  %v481_v54 = vpop.xlane.xlu1 %480 }
 0x184   :  { %v484_v58 = vadd.f32 %v481_v54, %v477_v53 }
 0x187   :  { %v479_v55 = vpop.xlane.xlu0 %478  ;;  %v483_v56 = vpop.xlane.xlu1 %482 }
 0x188   :  { %v485_v60 = vadd.f32 %v483_v56, %v479_v55  ;;  %v548_v55 = vld [vmem:[%s1125_s3] sm:$0xff] }
 0x1a3   :  { %v487_v57 = vpop.xlane.xlu0 %486 }
 0x1a4   :  { %v490_v61 = vadd.f32 %v487_v57, %v484_v58  ;;  %v549_v58 = vld [vmem:[%s1125_s3 + $0x8] sm:$0xff] }
 0x1a5   :  { %v489_v59 = vpop.xlane.xlu1 %488 }
 0x1a6   :  { %v491_v63 = vadd.f32 %v489_v59, %v485_v60 }
 0x1a7   :  { %v493_v62 = vpop.xlane.xlu0 %492 }
 0x1a8   :  { %v496_v0 = vadd.f32 %v493_v62, %v490_v61 }
 0x1a9   :  { %v495_v1 = vpop.xlane.xlu1 %494 }
 0x1aa   :  { %v498_v2 = vmul.f32 0.001953125, %v496_v0  ;;  %v497_v3 = vadd.f32 %v495_v1, %v491_v63 }
 0x1ac   :  { %v499_v4 = vmul.f32 0.001953125, %v497_v3  ;;  %v500_v5 = vsub.f32 %v1046_v37, %v498_v2  ;;  %v508_v8 = vsub.f32 %v1048_v38, %v498_v2  ;;  %v518_v12 = vsub.f32 %v1058_v45, %v498_v2 }
 0x1ad   :  { %v528_v16 = vsub.f32 %v1060_v46, %v498_v2 }
 0x1ae   :  { %v502_v6 = vmul.f32 %v500_v5, %v500_v5  ;;  %v501_v7 = vsub.f32 %v1052_v40, %v499_v4  ;;  %v509_v10 = vsub.f32 %v1054_v43, %v499_v4  ;;  %v510_v11 = vmul.f32 %v508_v8, %v508_v8 }
 0x1af   :  { %v519_v14 = vsub.f32 %v1063_v48, %v499_v4  ;;  %v520_v15 = vmul.f32 %v518_v12, %v518_v12  ;;  %v529_v18 = vsub.f32 %v1065_v50, %v499_v4  ;;  %v530_v19 = vmul.f32 %v528_v16, %v528_v16 }
 0x1b0   :  { %504 = vadd.xlane.f32.xlu0 %v502_v6  ;;  %v503_v9 = vmul.f32 %v501_v7, %v501_v7  ;;  %v511_v13 = vmul.f32 %v509_v10, %v509_v10 }
 0x1b1   :  { %v521_v17 = vmul.f32 %v519_v14, %v519_v14  ;;  %v531_v20 = vmul.f32 %v529_v18, %v529_v18 }
 0x1b2   :  { %506 = vadd.xlane.f32.xlu1 %v503_v9 }
 0x1b4   :  { %512 = vadd.xlane.f32.xlu0 %v510_v11 }
 0x1b6   :  { %514 = vadd.xlane.f32.xlu1 %v511_v13 }
 0x1b8   :  { %522 = vadd.xlane.f32.xlu0 %v520_v15 }
 0x1ba   :  { %524 = vadd.xlane.f32.xlu1 %v521_v17 }
 0x1bc   :  { %532 = vadd.xlane.f32.xlu0 %v530_v19 }
 0x1be   :  { %534 = vadd.xlane.f32.xlu1 %v531_v20 }
 0x23d   :  { %v505_v22 = vpop.xlane.xlu0 %504 }
 0x23f   :  { %v507_v23 = vpop.xlane.xlu1 %506 }
 0x241   :  { %v513_v24 = vpop.xlane.xlu0 %512 }
 0x242   :  { %v516_v27 = vadd.f32 %v513_v24, %v505_v22 }
 0x243   :  { %v515_v25 = vpop.xlane.xlu1 %514 }
 0x244   :  { %v517_v29 = vadd.f32 %v515_v25, %v507_v23 }
 0x245   :  { %v523_v26 = vpop.xlane.xlu0 %522 }
 0x246   :  { %v526_v30 = vadd.f32 %v523_v26, %v516_v27 }
 0x247   :  { %v525_v28 = vpop.xlane.xlu1 %524 }
 0x248   :  { %v527_v32 = vadd.f32 %v525_v28, %v517_v29 }
 0x249   :  { %v533_v31 = vpop.xlane.xlu0 %532 }
 0x24a   :  { %v536_v33 = vadd.f32 %v533_v31, %v526_v30 }
 0x24b   :  { %v535_v34 = vpop.xlane.xlu1 %534 }
 0x24c   :  { %v538_v35 = vmul.f32 0.001953125, %v536_v33  ;;  %v537_v36 = vadd.f32 %v535_v34, %v527_v32 }
 0x24e   :  { %v540_v39 = vadd.f32 1e-05, %v538_v35  ;;  %v539_v41 = vmul.f32 0.001953125, %v537_v36 }
 0x250   :  { %866 = vrsqrt.f32 %v540_v39  ;;  %v541_v42 = vadd.f32 1e-05, %v539_v41 }
 0x252   :  { %868 = vrsqrt.f32 %v541_v42 }
 0x25a   :  { %v867_v47 = vpop.eup %866 }
 0x25b   :  { %v546_v51 = vmul.f32 %v867_v47, %v544_v44 }
 0x25c   :  { %v869_v52 = vpop.eup %868 }
 0x25d   :  { %556 = vperm.xlu0 %828, %v546_v51   ;;  %v547_v53 = vmul.f32 %v869_v52, %v545_v49  ;;  %v550_v54 = vmul.f32 %v546_v51, %v498_v2 }
 0x25f   :  { %561 = vperm.xlu1 %829, %v547_v53   ;;  %v552_v56 = vsub.f32 %v548_v55, %v550_v54  ;;  %v551_v57 = vmul.f32 %v547_v53, %v499_v4 }
 0x261   :  { %v553_v59 = vsub.f32 %v549_v58, %v551_v57 }
 0x263   :  { %568 = vperm.xlu1 %829, %v552_v56  }
 0x267   :  { %573 = vperm.xlu1 %829, %v553_v59  }
 0x2dc   :  { %v557_v60 = vpop.permute.xlu0 %556 }
 0x2dd   :  { %v564_v62 = vmul.f32 %v557_v60, %v1046_v37  ;;  %v582_v63 = vmul.f32 %v557_v60, %v1048_v38  ;;  %v591_v0 = vmul.f32 %v557_v60, %v1058_v45  ;;  %v600_v1 = vmul.f32 %v557_v60, %v1060_v46 }
 0x2de   :  { %v562_v61 = vpop.permute.xlu1 %561 }
 0x2df   :  { %v565_v7 = vmul.f32 %v562_v61, %v1052_v40  ;;  %v583_v8 = vmul.f32 %v562_v61, %v1054_v43  ;;  %v592_v9 = vmul.f32 %v562_v61, %v1063_v48  ;;  %v601_v10 = vmul.f32 %v562_v61, %v1065_v50 }
 0x2e2   :  { %v569_v2 = vpop.permute.xlu1 %568 }
 0x2e3   :  { %v576_v3 = vadd.f32 %v569_v2, %v564_v62  ;;  %v584_v4 = vadd.f32 %v582_v63, %v569_v2  ;;  %v593_v5 = vadd.f32 %v591_v0, %v569_v2  ;;  %v602_v6 = vadd.f32 %v600_v1, %v569_v2 }
 0x2e5   :  { %v578_v37 = vmax.f32 %v576_v3, 0.0  ;;  %v586_v11 = vmax.f32 %v584_v4, 0.0  ;;  %v595_v38 = vmax.f32 %v593_v5, 0.0  ;;  %v604_v12 = vmax.f32 %v602_v6, 0.0 }
 0x2e6   :  { %v574_v45 = vpop.permute.xlu1 %573 }
 0x2e7   :  { %580 = vst [vmem:[%s1126_s4] sm:$0xff] %v578_v37  ;;  %703 = vst [vmem:[%s1126_s4 + $0x10] sm:$0xff] %v586_v11  ;;  %v577_v40 = vadd.f32 %v574_v45, %v565_v7  ;;  %v585_v43 = vadd.f32 %v583_v8, %v574_v45  ;;  %v594_v46 = vadd.f32 %v592_v9, %v574_v45 }
 0x2e8   :  { %705 = vst [vmem:[%s1126_s4 + $0x20] sm:$0xff] %v595_v38  ;;  %707 = vst [vmem:[%s1126_s4 + $0x30] sm:$0xff] %v604_v12  ;;  %v603_v48 = vadd.f32 %v601_v10, %v574_v45 }
 0x2e9   :  { %v579_v50 = vmax.f32 %v577_v40, 0.0  ;;  %v587_v13 = vmax.f32 %v585_v43, 0.0  ;;  %v596_v14 = vmax.f32 %v594_v46, 0.0 }
 0x2ea   :  { %v605_v15 = vmax.f32 %v603_v48, 0.0 }
 0x2eb   :  { %581 = vst [vmem:[%s1126_s4 + $0x8] sm:$0xff] %v579_v50  ;;  %704 = vst [vmem:[%s1126_s4 + $0x18] sm:$0xff] %v587_v13 }
 0x2ec   :  { %706 = vst [vmem:[%s1126_s4 + $0x28] sm:$0xff] %v596_v14  ;;  %708 = vst [vmem:[%s1126_s4 + $0x38] sm:$0xff] %v605_v15 }

// kernel: generator_forward.8
= control target key start
LH: loop header
LB: loop body
LE: loop exit
PB: predicated region body
PF: predicated region fallthrough
CT: control target
= control target key end

     0   :  { %v1157_v1 = vmov 0   ;;  %vm115_vm0 = vcmask 523264   ;;  %s1558_s1 = inlined_call_operand.vmem [shape: bf16[4,64,512], index: 1, kind: input, shape index: {}]   ;;  %s1559_s0 = inlined_call_operand.vmem [shape: bf16[4,8,64], index: 0, kind: input, shape index: {}]   ;;  %s1560_s2 = inlined_call_operand.vmem [shape: f32[8,1], index: 2, kind: input, shape index: {}]   ;;  %s1561_s3 = inlined_call_operand.vmem [shape: f32[8,1], index: 3, kind: input, shape index: {}]   ;;  %s1562_s4 = inlined_call_operand.vmem [shape: f32[4,8,512], index: 4, kind: output, shape index: {}]  }
   0x1   :  { %v1059_v0 = vld [vmem:[%s1558_s1 + $0x4] ss:$16 sps:$4 sm:$0xff]   ;;  %151 = vmatprep.mubr.bf16.mxu0 %v1157_v1  ;;  %192 = vmatprep.mubr.bf16.mxu1 %v1157_v1  ;;  %v1061_v2 = vld [vmem:[%s1558_s1 + $0xc] ss:$16 sps:$4 sm:$0xff]   ;;  %v1063_v3 = vld [vmem:[%s1558_s1] ss:$16 sps:$4 sm:$0xff]  }
   0x2   :  { %1057 = vset.pattern.permute.xlu0 %v1157_v1  ;;  %1058 = vset.pattern.permute.xlu1 %v1157_v1  ;;  %v1064_v4 = vld [vmem:[%s1558_s1 + $0x8] ss:$16 sps:$4 sm:$0xff]   ;;  %v1065_v5 = vld [vmem:[%s1558_s1 + $0x24] ss:$16 sps:$4 sm:$0xff]   ;;  %v1067_v6 = vld [vmem:[%s1558_s1 + $0x2c] ss:$16 sps:$4 sm:$0xff]  }
   0x3   :  { %119 = vmatprep.subr.bf16.mxu0 %v1059_v0  ;;  %160 = vmatprep.subr.bf16.mxu1 %v1061_v2  ;;  %v1069_v7 = vld [vmem:[%s1558_s1 + $0x20] ss:$16 sps:$4 sm:$0xff]   ;;  %v1070_v8 = vld [vmem:[%s1558_s1 + $0x28] ss:$16 sps:$4 sm:$0xff]   ;;  %v1071_v9 = vld [vmem:[%s1558_s1 + $0x44] ss:$16 sps:$4 sm:$0xff]  }
   0x4   :  { %120 = vmatpush1.bf16.msra.mxu0 %v1063_v3  ;;  %161 = vmatpush1.bf16.msra.mxu1 %v1064_v4  ;;  %v1073_v10 = vld [vmem:[%s1558_s1 + $0x4c] ss:$16 sps:$4 sm:$0xff]   ;;  %v1075_v11 = vld [vmem:[%s1558_s1 + $0x40] ss:$16 sps:$4 sm:$0xff]   ;;  %v1076_v12 = vld [vmem:[%s1558_s1 + $0x48] ss:$16 sps:$4 sm:$0xff]  }
   0x5   :  { %121 = vmatprep.subr.bf16.mxu0 %v1065_v5  ;;  %162 = vmatprep.subr.bf16.mxu1 %v1067_v6  ;;  %v1077_v13 = vld [vmem:[%s1558_s1 + $0x64] ss:$16 sps:$4 sm:$0xff]   ;;  %v1079_v14 = vld [vmem:[%s1558_s1 + $0x6c] ss:$16 sps:$4 sm:$0xff]   ;;  %v1081_v15 = vld [vmem:[%s1558_s1 + $0x60] ss:$16 sps:$4 sm:$0xff]  }
   0x6   :  { %v1082_v16 = vld [vmem:[%s1558_s1 + $0x68] ss:$16 sps:$4 sm:$0xff]   ;;  %v1085_v17 = vld [vmem:[%s1558_s1 + $0x84] ss:$16 sps:$4 sm:$0xff]   ;;  %v1088_v18 = vld [vmem:[%s1558_s1 + $0x8c] ss:$16 sps:$4 sm:$0xff]  }
   0x7   :  { %v34_v19 = vld [vmem:[%s1559_s0] sm:$0xf]  ;;  %v1086_v21 = vld [vmem:[%s1558_s1 + $0x88] ss:$16 sps:$4 sm:$0xff]   ;;  %v1091_v22 = vld [vmem:[%s1558_s1 + $0xa4] ss:$16 sps:$4 sm:$0xff]  }
   0x8   :  { %122 = vmatpush1.bf16.msra.mxu0 %v1069_v7  ;;  %163 = vmatpush1.bf16.msra.mxu1 %v1070_v8  ;;  %v1083_v20 = vld [vmem:[%s1558_s1 + $0x80] ss:$16 sps:$4 sm:$0xff]   ;;  %v1094_v23 = vld [vmem:[%s1558_s1 + $0xac] ss:$16 sps:$4 sm:$0xff]   ;;  %v1092_v25 = vld [vmem:[%s1558_s1 + $0xa8] ss:$16 sps:$4 sm:$0xff]  }
   0x9   :  { %123 = vmatprep.subr.bf16.mxu0 %v1071_v9  ;;  %164 = vmatprep.subr.bf16.mxu1 %v1073_v10  ;;  %v1089_v24 = vld [vmem:[%s1558_s1 + $0xa0] ss:$16 sps:$4 sm:$0xff]   ;;  %v1097_v26 = vld [vmem:[%s1558_s1 + $0xc4] ss:$16 sps:$4 sm:$0xff]   ;;  %v1100_v27 = vld [vmem:[%s1558_s1 + $0xcc] ss:$16 sps:$4 sm:$0xff]  }
   0xa   :  { %v1095_v28 = vld [vmem:[%s1558_s1 + $0xc0] ss:$16 sps:$4 sm:$0xff]   ;;  %v1098_v29 = vld [vmem:[%s1558_s1 + $0xc8] ss:$16 sps:$4 sm:$0xff]   ;;  %v1103_v30 = vld [vmem:[%s1558_s1 + $0xe4] ss:$16 sps:$4 sm:$0xff]  }
   0xb   :  { %v1106_v31 = vld [vmem:[%s1558_s1 + $0xec] ss:$16 sps:$4 sm:$0xff]   ;;  %v1101_v32 = vld [vmem:[%s1558_s1 + $0xe0] ss:$16 sps:$4 sm:$0xff]   ;;  %v1104_v33 = vld [vmem:[%s1558_s1 + $0xe8] ss:$16 sps:$4 sm:$0xff]  }
   0xc   :  { %124 = vmatpush1.bf16.msra.mxu0 %v1075_v11  ;;  %165 = vmatpush1.bf16.msra.mxu1 %v1076_v12  ;;  %v1109_v34 = vld [vmem:[%s1558_s1 + $0x104] ss:$16 sps:$4 sm:$0xff]   ;;  %v1112_v35 = vld [vmem:[%s1558_s1 + $0x10c] ss:$16 sps:$4 sm:$0xff]   ;;  %v1107_v37 = vld [vmem:[%s1558_s1 + $0x100] ss:$16 sps:$4 sm:$0xff]  }
   0xd   :  { %125 = vmatprep.subr.bf16.mxu0 %v1077_v13  ;;  %166 = vmatprep.subr.bf16.mxu1 %v1079_v14  ;;  %v955_v36 = vld [vmem:[%s1559_s0 + $0x4] sm:$0xf]  ;;  %v1110_v38 = vld [vmem:[%s1558_s1 + $0x108] ss:$16 sps:$4 sm:$0xff]   ;;  %v1118_v40 = vld [vmem:[%s1558_s1 + $0x12c] ss:$16 sps:$4 sm:$0xff]  }
   0xe   :  { %v1115_v39 = vld [vmem:[%s1558_s1 + $0x124] ss:$16 sps:$4 sm:$0xff]   ;;  %v1113_v41 = vld [vmem:[%s1558_s1 + $0x120] ss:$16 sps:$4 sm:$0xff]   ;;  %v1116_v42 = vld [vmem:[%s1558_s1 + $0x128] ss:$16 sps:$4 sm:$0xff]  }
   0xf   :  { %v1121_v43 = vld [vmem:[%s1558_s1 + $0x144] ss:$16 sps:$4 sm:$0xff]   ;;  %v1124_v44 = vld [vmem:[%s1558_s1 + $0x14c] ss:$16 sps:$4 sm:$0xff]   ;;  %v1119_v45 = vld [vmem:[%s1558_s1 + $0x140] ss:$16 sps:$4 sm:$0xff]  }
  0x10   :  { %126 = vmatpush1.bf16.msra.mxu0 %v1081_v15  ;;  %167 = vmatpush1.bf16.msra.mxu1 %v1082_v16  ;;  %v1122_v46 = vld [vmem:[%s1558_s1 + $0x148] ss:$16 sps:$4 sm:$0xff]   ;;  %v1127_v47 = vld [vmem:[%s1558_s1 + $0x164] ss:$16 sps:$4 sm:$0xff]   ;;  %v1130_v48 = vld [vmem:[%s1558_s1 + $0x16c] ss:$16 sps:$4 sm:$0xff]  }
  0x11   :  { %303 = vmatprep.subr.bf16.mxu0 %v1085_v17  ;;  %344 = vmatprep.subr.bf16.mxu1 %v1088_v18  ;;  %v1125_v49 = vld [vmem:[%s1558_s1 + $0x160] ss:$16 sps:$4 sm:$0xff]   ;;  %v1128_v50 = vld [vmem:[%s1558_s1 + $0x168] ss:$16 sps:$4 sm:$0xff]   ;;  %v1133_v51 = vld [vmem:[%s1558_s1 + $0x184] ss:$16 sps:$4 sm:$0xff]  }
  0x12   :  { %v1136_v52 = vld [vmem:[%s1558_s1 + $0x18c] ss:$16 sps:$4 sm:$0xff]   ;;  %v990_v53 = vld [vmem:[%s1559_s0 + $0x8] sm:$0xf]  ;;  %v1131_v54 = vld [vmem:[%s1558_s1 + $0x180] ss:$16 sps:$4 sm:$0xff]  }
  0x13   :  { %937 = vmatmul.mubr.msk.bf16.vlgmr.msra.gmra.mrb[0].mxu0 %vm115_vm0, %v34_v19  ;;  %938 = vmatmul.mubr.msk.bf16.vlgmr.msra.gmra.mrb[0].mxu1 %vm115_vm0, %v34_v19  ;;  %v1134_v55 = vld [vmem:[%s1558_s1 + $0x188] ss:$16 sps:$4 sm:$0xff]   ;;  %v1139_v56 = vld [vmem:[%s1558_s1 + $0x1a4] ss:$16 sps:$4 sm:$0xff]   ;;  %v1142_v57 = vld [vmem:[%s1558_s1 + $0x1ac] ss:$16 sps:$4 sm:$0xff]  }
  0x14   :  { %304 = vmatpush1.bf16.msra.mxu0 %v1083_v20  ;;  %345 = vmatpush1.bf16.msra.mxu1 %v1086_v21  ;;  %v1137_v58 = vld [vmem:[%s1558_s1 + $0x1a0] ss:$16 sps:$4 sm:$0xff]   ;;  %v1140_v59 = vld [vmem:[%s1558_s1 + $0x1a8] ss:$16 sps:$4 sm:$0xff]   ;;  %v1145_v60 = vld [vmem:[%s1558_s1 + $0x1c4] ss:$16 sps:$4 sm:$0xff]  }
  0x15   :  { %305 = vmatprep.subr.bf16.mxu0 %v1091_v22  ;;  %346 = vmatprep.subr.bf16.mxu1 %v1094_v23  ;;  %v1148_v61 = vld [vmem:[%s1558_s1 + $0x1cc] ss:$16 sps:$4 sm:$0xff]   ;;  %v1143_v62 = vld [vmem:[%s1558_s1 + $0x1c0] ss:$16 sps:$4 sm:$0xff]   ;;  %v1146_v63 = vld [vmem:[%s1558_s1 + $0x1c8] ss:$16 sps:$4 sm:$0xff]  }
  0x16   :  { %335 = vmatprep.mubr.bf16.mxu0 %v1157_v1  ;;  %376 = vmatprep.mubr.bf16.mxu1 %v1157_v1  ;;  %v1151_v0 = vld [vmem:[%s1558_s1 + $0x1e4] ss:$16 sps:$4 sm:$0xff]   ;;  %v1149_v2 = vld [vmem:[%s1558_s1 + $0x1e0] ss:$16 sps:$4 sm:$0xff]   ;;  %v1152_v3 = vld [vmem:[%s1558_s1 + $0x1e8] ss:$16 sps:$4 sm:$0xff]  }
  0x17   :  { %v1025_v4 = vld [vmem:[%s1559_s0 + $0xc] sm:$0xf] }
  0x18   :  { %306 = vmatpush1.bf16.msra.mxu0 %v1089_v24  ;;  %347 = vmatpush1.bf16.msra.mxu1 %v1092_v25 }
  0x19   :  { %307 = vmatprep.subr.bf16.mxu0 %v1097_v26  ;;  %348 = vmatprep.subr.bf16.mxu1 %v1100_v27 }
  0x1c   :  { %308 = vmatpush1.bf16.msra.mxu0 %v1095_v28  ;;  %349 = vmatpush1.bf16.msra.mxu1 %v1098_v29 }
  0x1d   :  { %309 = vmatprep.subr.bf16.mxu0 %v1103_v30  ;;  %350 = vmatprep.subr.bf16.mxu1 %v1106_v31 }
  0x20   :  { %310 = vmatpush1.bf16.msra.mxu0 %v1101_v32  ;;  %351 = vmatpush1.bf16.msra.mxu1 %v1104_v33 }
  0x21   :  { %487 = vmatprep.subr.bf16.mxu0 %v1109_v34  ;;  %528 = vmatprep.subr.bf16.mxu1 %v1112_v35 }
  0x23   :  { %972 = vmatmul.mubr.msk.bf16.vlgmr.msra.gmra.mrb[4].mxu0 %vm115_vm0, %v955_v36  ;;  %973 = vmatmul.mubr.msk.bf16.vlgmr.msra.gmra.mrb[4].mxu1 %vm115_vm0, %v955_v36 }
  0x24   :  { %488 = vmatpush1.bf16.msra.mxu0 %v1107_v37  ;;  %529 = vmatpush1.bf16.msra.mxu1 %v1110_v38 }
  0x25   :  { %489 = vmatprep.subr.bf16.mxu0 %v1115_v39  ;;  %530 = vmatprep.subr.bf16.mxu1 %v1118_v40 }
  0x26   :  { %519 = vmatprep.mubr.bf16.mxu0 %v1157_v1  ;;  %560 = vmatprep.mubr.bf16.mxu1 %v1157_v1 }
  0x28   :  { %490 = vmatpush1.bf16.msra.mxu0 %v1113_v41  ;;  %531 = vmatpush1.bf16.msra.mxu1 %v1116_v42 }
  0x29   :  { %491 = vmatprep.subr.bf16.mxu0 %v1121_v43  ;;  %532 = vmatprep.subr.bf16.mxu1 %v1124_v44 }
  0x2c   :  { %492 = vmatpush1.bf16.msra.mxu0 %v1119_v45  ;;  %533 = vmatpush1.bf16.msra.mxu1 %v1122_v46 }
  0x2d   :  { %493 = vmatprep.subr.bf16.mxu0 %v1127_v47  ;;  %534 = vmatprep.subr.bf16.mxu1 %v1130_v48 }
  0x30   :  { %494 = vmatpush1.bf16.msra.mxu0 %v1125_v49  ;;  %535 = vmatpush1.bf16.msra.mxu1 %v1128_v50 }
  0x31   :  { %671 = vmatprep.subr.bf16.mxu0 %v1133_v51  ;;  %712 = vmatprep.subr.bf16.mxu1 %v1136_v52 }
  0x33   :  { %1007 = vmatmul.mubr.msk.bf16.vlgmr.msra.gmra.mrb[8].mxu0 %vm115_vm0, %v990_v53  ;;  %1008 = vmatmul.mubr.msk.bf16.vlgmr.msra.gmra.mrb[8].mxu1 %vm115_vm0, %v990_v53 }
  0x34   :  { %672 = vmatpush1.bf16.msra.mxu0 %v1131_v54  ;;  %713 = vmatpush1.bf16.msra.mxu1 %v1134_v55 }
  0x35   :  { %673 = vmatprep.subr.bf16.mxu0 %v1139_v56  ;;  %714 = vmatprep.subr.bf16.mxu1 %v1142_v57 }
  0x36   :  { %703 = vmatprep.mubr.bf16.mxu0 %v1157_v1  ;;  %744 = vmatprep.mubr.bf16.mxu1 %v1157_v1  ;;  %v1154_v1 = vld [vmem:[%s1558_s1 + $0x1ec] ss:$16 sps:$4 sm:$0xff]  }
  0x38   :  { %674 = vmatpush1.bf16.msra.mxu0 %v1137_v58  ;;  %715 = vmatpush1.bf16.msra.mxu1 %v1140_v59 }
  0x39   :  { %675 = vmatprep.subr.bf16.mxu0 %v1145_v60  ;;  %716 = vmatprep.subr.bf16.mxu1 %v1148_v61 }
  0x3c   :  { %676 = vmatpush1.bf16.msra.mxu0 %v1143_v62  ;;  %717 = vmatpush1.bf16.msra.mxu1 %v1146_v63 }
  0x3d   :  { %677 = vmatprep.subr.bf16.mxu0 %v1151_v0  ;;  %718 = vmatprep.subr.bf16.mxu1 %v1154_v1 }
  0x40   :  { %678 = vmatpush1.bf16.msra.mxu0 %v1149_v2  ;;  %719 = vmatpush1.bf16.msra.mxu1 %v1152_v3 }
  0x43   :  { %1042 = vmatmul.mubr.msk.bf16.vlgmr.msra.gmra.mrb[12].mxu0 %vm115_vm0, %v1025_v4  ;;  %1043 = vmatmul.mubr.msk.bf16.vlgmr.msra.gmra.mrb[12].mxu1 %vm115_vm0, %v1025_v4 }
  0xe6   :  { %v1405_v5 = vpop.f32.mrb[0].mxu0  ;;  %v1407_v6 = vpop.f32.mrb[0].mxu1 }
  0xe7   :  { %v1409_v7 = vpop.f32.mrb[1].mxu0  ;;  %v1411_v8 = vpop.f32.mrb[1].mxu1 }
  0xe8   :  { %v753_v9 = vadd.f32 %v1409_v7, %v1405_v5  ;;  %v157_v10 = vpop.f32.mrb[2].mxu0  ;;  %v198_v11 = vpop.f32.mrb[2].mxu1 }
  0xe9   :  { %v158_v12 = vpop.f32.mrb[3].mxu0  ;;  %v199_v13 = vpop.f32.mrb[3].mxu1 }
  0xea   :  { %v754_v14 = vadd.f32 %v753_v9, %v1407_v6 }
  0xec   :  { %v755_v15 = vadd.f32 %v754_v14, %v1411_v8 }
  0xee   :  { %756 = vadd.xlane.f32.xlu0 %v755_v15 }
  0xf6   :  { %v1417_v16 = vpop.f32.mrb[4].mxu0  ;;  %v1419_v17 = vpop.f32.mrb[4].mxu1 }
  0xf7   :  { %v1421_v18 = vpop.f32.mrb[5].mxu0  ;;  %v1423_v19 = vpop.f32.mrb[5].mxu1 }
  0xf8   :  { %v758_v20 = vadd.f32 %v1421_v18, %v1417_v16  ;;  %v341_v21 = vpop.f32.mrb[6].mxu0  ;;  %v382_v22 = vpop.f32.mrb[6].mxu1 }
  0xf9   :  { %v342_v23 = vpop.f32.mrb[7].mxu0  ;;  %v383_v24 = vpop.f32.mrb[7].mxu1 }
  0xfa   :  { %v759_v25 = vadd.f32 %v758_v20, %v1419_v17 }
  0xfc   :  { %v760_v26 = vadd.f32 %v759_v25, %v1423_v19 }
  0xfe   :  { %761 = vadd.xlane.f32.xlu0 %v760_v26 }
 0x106   :  { %v1429_v27 = vpop.f32.mrb[8].mxu0  ;;  %v1431_v28 = vpop.f32.mrb[8].mxu1 }
 0x107   :  { %v1433_v29 = vpop.f32.mrb[9].mxu0  ;;  %v1435_v30 = vpop.f32.mrb[9].mxu1 }
 0x108   :  { %v764_v31 = vadd.f32 %v1433_v29, %v1429_v27  ;;  %v525_v32 = vpop.f32.mrb[10].mxu0  ;;  %v566_v33 = vpop.f32.mrb[10].mxu1 }
 0x109   :  { %v526_v34 = vpop.f32.mrb[11].mxu0  ;;  %v567_v35 = vpop.f32.mrb[11].mxu1 }
 0x10a   :  { %v765_v36 = vadd.f32 %v764_v31, %v1431_v28 }
 0x10c   :  { %v766_v37 = vadd.f32 %v765_v36, %v1435_v30 }
 0x10e   :  { %767 = vadd.xlane.f32.xlu1 %v766_v37 }
 0x116   :  { %v1441_v38 = vpop.f32.mrb[12].mxu0  ;;  %v1443_v39 = vpop.f32.mrb[12].mxu1 }
 0x117   :  { %v1445_v40 = vpop.f32.mrb[13].mxu0  ;;  %v1447_v41 = vpop.f32.mrb[13].mxu1 }
 0x118   :  { %v770_v42 = vadd.f32 %v1445_v40, %v1441_v38  ;;  %v709_v43 = vpop.f32.mrb[14].mxu0  ;;  %v750_v44 = vpop.f32.mrb[14].mxu1 }
 0x119   :  { %v710_v45 = vpop.f32.mrb[15].mxu0  ;;  %v751_v46 = vpop.f32.mrb[15].mxu1 }
 0x11a   :  { %v771_v47 = vadd.f32 %v770_v42, %v1443_v39 }
 0x11c   :  { %v772_v48 = vadd.f32 %v771_v47, %v1447_v41 }
 0x11e   :  { %773 = vadd.xlane.f32.xlu1 %v772_v48 }
 0x17b   :  { %v757_v49 = vpop.xlane.xlu0 %756 }
 0x18b   :  { %v762_v50 = vpop.xlane.xlu0 %761 }
 0x18c   :  { %v763_v52 = vadd.f32 %v762_v50, %v757_v49 }
 0x19b   :  { %v768_v51 = vpop.xlane.xlu1 %767 }
 0x19c   :  { %v769_v53 = vadd.f32 %v768_v51, %v763_v52 }
 0x1ab   :  { %v774_v54 = vpop.xlane.xlu1 %773 }
 0x1ac   :  { %v775_v55 = vadd.f32 %v774_v54, %v769_v53 }
 0x1ae   :  { %v1453_v56 = vmul.f32 0.00048828125, %v775_v55 }
 0x1b0   :  { %v790_v57 = vsub.f32 %v1417_v16, %v1453_v56  ;;  %v791_v58 = vsub.f32 %v1421_v18, %v1453_v56  ;;  %v792_v59 = vsub.f32 %v1419_v17, %v1453_v56  ;;  %v793_v60 = vsub.f32 %v1423_v19, %v1453_v56 }
 0x1b1   :  { %v777_v61 = vsub.f32 %v1405_v5, %v1453_v56  ;;  %v778_v62 = vsub.f32 %v1409_v7, %v1453_v56  ;;  %v779_v63 = vsub.f32 %v1407_v6, %v1453_v56  ;;  %v780_v0 = vsub.f32 %v1411_v8, %v1453_v56 }
 0x1b2   :  { %v794_v1 = vmul.f32 %v790_v57, %v790_v57  ;;  %v795_v2 = vmul.f32 %v791_v58, %v791_v58  ;;  %v796_v3 = vmul.f32 %v792_v59, %v792_v59  ;;  %v797_v4 = vmul.f32 %v793_v60, %v793_v60 }
 0x1b3   :  { %v781_v9 = vmul.f32 %v777_v61, %v777_v61  ;;  %v782_v10 = vmul.f32 %v778_v62, %v778_v62  ;;  %v783_v11 = vmul.f32 %v779_v63, %v779_v63  ;;  %v818_v13 = vsub.f32 %v1441_v38, %v1453_v56  ;;  %v835_v63 = vld [vmem:[%s1560_s2] sm:$0xff] }
 0x1b4   :  { %v798_v12 = vadd.f32 %v795_v2, %v794_v1  ;;  %v819_v14 = vsub.f32 %v1445_v40, %v1453_v56  ;;  %v820_v15 = vsub.f32 %v1443_v39, %v1453_v56  ;;  %v784_v20 = vmul.f32 %v780_v0, %v780_v0  ;;  %v837_v2 = vld [vmem:[%s1561_s3] sm:$0xff] }
 0x1b5   :  { %v785_v21 = vadd.f32 %v782_v10, %v781_v9  ;;  %v804_v22 = vsub.f32 %v1429_v27, %v1453_v56  ;;  %v805_v23 = vsub.f32 %v1433_v29, %v1453_v56  ;;  %v821_v25 = vsub.f32 %v1447_v41, %v1453_v56 }
 0x1b6   :  { %v799_v24 = vadd.f32 %v798_v12, %v796_v3  ;;  %v822_v26 = vmul.f32 %v818_v13, %v818_v13  ;;  %v823_v31 = vmul.f32 %v819_v14, %v819_v14  ;;  %v824_v33 = vmul.f32 %v820_v15, %v820_v15 }
 0x1b7   :  { %v786_v32 = vadd.f32 %v785_v21, %v783_v11  ;;  %v806_v34 = vsub.f32 %v1431_v28, %v1453_v56  ;;  %v807_v35 = vsub.f32 %v1435_v30, %v1453_v56  ;;  %v808_v42 = vmul.f32 %v804_v22, %v804_v22 }
 0x1b8   :  { %v800_v36 = vadd.f32 %v799_v24, %v797_v4  ;;  %v826_v37 = vadd.f32 %v823_v31, %v822_v26  ;;  %v809_v43 = vmul.f32 %v805_v23, %v805_v23  ;;  %v825_v45 = vmul.f32 %v821_v25, %v821_v25 }
 0x1b9   :  { %v787_v44 = vadd.f32 %v786_v32, %v784_v20  ;;  %v810_v47 = vmul.f32 %v806_v34, %v806_v34  ;;  %v811_v50 = vmul.f32 %v807_v35, %v807_v35 }
 0x1ba   :  { %801 = vadd.xlane.f32.xlu1 %v800_v36  ;;  %v827_v46 = vadd.f32 %v826_v37, %v824_v33  ;;  %v812_v48 = vadd.f32 %v809_v43, %v808_v42 }
 0x1bb   :  { %788 = vadd.xlane.f32.xlu0 %v787_v44 }
 0x1bc   :  { %v828_v49 = vadd.f32 %v827_v46, %v825_v45  ;;  %v813_v51 = vadd.f32 %v812_v48, %v810_v47 }
 0x1be   :  { %829 = vadd.xlane.f32.xlu1 %v828_v49  ;;  %v814_v52 = vadd.f32 %v813_v51, %v811_v50 }
 0x1c0   :  { %815 = vadd.xlane.f32.xlu0 %v814_v52 }
 0x247   :  { %v802_v54 = vpop.xlane.xlu1 %801 }
 0x248   :  { %v789_v53 = vpop.xlane.xlu0 %788 }
 0x249   :  { %v803_v55 = vadd.f32 %v802_v54, %v789_v53 }
 0x24b   :  { %v830_v59 = vpop.xlane.xlu1 %829 }
 0x24d   :  { %v816_v57 = vpop.xlane.xlu0 %815 }
 0x24e   :  { %v817_v58 = vadd.f32 %v816_v57, %v803_v55 }
 0x250   :  { %v831_v60 = vadd.f32 %v830_v59, %v817_v58 }
 0x252   :  { %v832_v61 = vmul.f32 0.00048828125, %v831_v60 }
 0x254   :  { %v833_v62 = vadd.f32 1e-05, %v832_v61 }
 0x256   :  { %1155 = vrsqrt.f32 %v833_v62 }
 0x260   :  { %v1156_v0 = vpop.eup %1155 }
 0x261   :  { %v836_v1 = vmul.f32 %v1156_v0, %v835_v63 }
 0x263   :  { %842 = vperm.xlu0 %1057, %v836_v1   ;;  %v838_v3 = vmul.f32 %v836_v1, %v1453_v56 }
 0x265   :  { %v839_v4 = vsub.f32 %v837_v2, %v838_v3 }
 0x267   :  { %851 = vperm.xlu1 %1058, %v839_v4  }
 0x2e2   :  { %v843_v9 = vpop.permute.xlu0 %842 }
 0x2e3   :  { %v845_v10 = vmul.f32 %v843_v9, %v1405_v5  ;;  %v846_v11 = vmul.f32 %v843_v9, %v1409_v7  ;;  %v847_v12 = vmul.f32 %v843_v9, %v1407_v6  ;;  %v848_v13 = vmul.f32 %v843_v9, %v1411_v8 }
 0x2e4   :  { %v866_v14 = vmul.f32 %v843_v9, %v1417_v16  ;;  %v867_v15 = vmul.f32 %v843_v9, %v1421_v18  ;;  %v868_v20 = vmul.f32 %v843_v9, %v1419_v17  ;;  %v869_v21 = vmul.f32 %v843_v9, %v1423_v19 }
 0x2e5   :  { %v883_v56 = vmul.f32 %v843_v9, %v1429_v27  ;;  %v884_v22 = vmul.f32 %v843_v9, %v1433_v29  ;;  %v885_v5 = vmul.f32 %v843_v9, %v1431_v28  ;;  %v886_v7 = vmul.f32 %v843_v9, %v1435_v30 }
 0x2e6   :  { %v900_v6 = vmul.f32 %v843_v9, %v1441_v38  ;;  %v901_v8 = vmul.f32 %v843_v9, %v1445_v40  ;;  %v902_v16 = vmul.f32 %v843_v9, %v1443_v39  ;;  %v903_v18 = vmul.f32 %v843_v9, %v1447_v41  ;;  %v852_v23 = vpop.permute.xlu1 %851 }
 0x2e7   :  { %v854_v17 = vadd.f32 %v852_v23, %v845_v10  ;;  %v855_v24 = vadd.f32 %v852_v23, %v846_v11  ;;  %v856_v19 = vadd.f32 %v852_v23, %v847_v12  ;;  %v857_v25 = vadd.f32 %v852_v23, %v848_v13 }
 0x2e8   :  { %v870_v27 = vadd.f32 %v866_v14, %v852_v23  ;;  %v871_v26 = vadd.f32 %v867_v15, %v852_v23  ;;  %v872_v29 = vadd.f32 %v868_v20, %v852_v23  ;;  %v873_v31 = vadd.f32 %v869_v21, %v852_v23 }
 0x2e9   :  { %v858_v28 = vmax.f32 %v854_v17, 0.0  ;;  %v859_v32 = vmax.f32 %v855_v24, 0.0  ;;  %v860_v30 = vmax.f32 %v856_v19, 0.0  ;;  %v861_v33 = vmax.f32 %v857_v25, 0.0 }
 0x2ea   :  { %v874_v38 = vmax.f32 %v870_v27, 0.0  ;;  %v875_v34 = vmax.f32 %v871_v26, 0.0  ;;  %v876_v40 = vmax.f32 %v872_v29, 0.0  ;;  %v877_v35 = vmax.f32 %v873_v31, 0.0 }
 0x2eb   :  { %862 = vst [vmem:[%s1562_s4] sm:$0xff] %v858_v28  ;;  %863 = vst [vmem:[%s1562_s4 + $0x8] sm:$0xff] %v859_v32  ;;  %v887_v39 = vadd.f32 %v883_v56, %v852_v23  ;;  %v888_v41 = vadd.f32 %v884_v22, %v852_v23  ;;  %v889_v36 = vadd.f32 %v885_v5, %v852_v23 }
 0x2ec   :  { %864 = vst [vmem:[%s1562_s4 + $0x10] sm:$0xff] %v860_v30  ;;  %865 = vst [vmem:[%s1562_s4 + $0x18] sm:$0xff] %v861_v33  ;;  %v890_v37 = vadd.f32 %v886_v7, %v852_v23  ;;  %v904_v42 = vadd.f32 %v900_v6, %v852_v23  ;;  %v905_v43 = vadd.f32 %v901_v8, %v852_v23 }
 0x2ed   :  { %1044 = vst [vmem:[%s1562_s4 + $0x20] sm:$0xff] %v874_v38  ;;  %1045 = vst [vmem:[%s1562_s4 + $0x28] sm:$0xff] %v875_v34  ;;  %v906_v44 = vadd.f32 %v902_v16, %v852_v23  ;;  %v907_v45 = vadd.f32 %v903_v18, %v852_v23  ;;  %v891_v46 = vmax.f32 %v887_v39, 0.0  ;;  %v892_v47 = vmax.f32 %v888_v41, 0.0 }
 0x2ee   :  { %1046 = vst [vmem:[%s1562_s4 + $0x30] sm:$0xff] %v876_v40  ;;  %1047 = vst [vmem:[%s1562_s4 + $0x38] sm:$0xff] %v877_v35  ;;  %v893_v48 = vmax.f32 %v889_v36, 0.0  ;;  %v894_v49 = vmax.f32 %v890_v37, 0.0  ;;  %v908_v50 = vmax.f32 %v904_v42, 0.0  ;;  %v909_v51 = vmax.f32 %v905_v43, 0.0 }
 0x2ef   :  { %v910_v52 = vmax.f32 %v906_v44, 0.0  ;;  %v911_v53 = vmax.f32 %v907_v45, 0.0  ;;  %1048 = vst [vmem:[%s1562_s4 + $0x40] sm:$0xff] %v891_v46  ;;  %1049 = vst [vmem:[%s1562_s4 + $0x48] sm:$0xff] %v892_v47 }
 0x2f0   :  { %1050 = vst [vmem:[%s1562_s4 + $0x50] sm:$0xff] %v893_v48  ;;  %1051 = vst [vmem:[%s1562_s4 + $0x58] sm:$0xff] %v894_v49 }
 0x2f1   :  { %1052 = vst [vmem:[%s1562_s4 + $0x60] sm:$0xff] %v908_v50  ;;  %1053 = vst [vmem:[%s1562_s4 + $0x68] sm:$0xff] %v909_v51 }
 0x2f2   :  { %1054 = vst [vmem:[%s1562_s4 + $0x70] sm:$0xff] %v910_v52  ;;  %1055 = vst [vmem:[%s1562_s4 + $0x78] sm:$0xff] %v911_v53 }

// kernel: generator_forward.9
= control target key start
LH: loop header
LB: loop body
LE: loop exit
PB: predicated region body
PF: predicated region fallthrough
CT: control target
= control target key end

     0   :  { %s1867_s9 = smov 0   ;;  %s1869_s10 = smov 0   ;;  %s2207_s0 = inlined_call_operand.vmem [shape: bf16[4,3,32], index: 0, kind: input, shape index: {}]   ;;  %s2208_s1 = inlined_call_operand.vmem [shape: bf16[4,32,2048], index: 1, kind: input, shape index: {}]   ;;  %s2209_s2 = inlined_call_operand.vmem [shape: f32[4,3,2048], index: 2, kind: output, shape index: {}]  }
   0x1   :  { %s1871_s11 = smov 0  }
   0x2 LB: > { %s1578_s12 = sadd.s32 4294967295, %s1849_s11   ;;  %s1884_s13 = sadd.s32 1, %s1849_s11   ;;  %s1849_s11 = sphi %s1871_s11, %s2213_s11   ;;  %s1845_s10 = sphi %s1869_s10, %s2212_s10   ;;  %s1841_s9 = sphi %s1867_s9, %s2211_s9  }
   0x3   : > { %s37_s14 = ssub.s32 %s1849_s11, %s1884_s13  ;;  %s40_s15 = sadd.s32 1, %s1845_s10 }
   0x4   : > { %p38_p0 = scmp.eq.s32.totalorder %s37_s14, 0  ;;  %p47_p1 = scmp.ne.s32.totalorder %s1845_s10, %s1841_s9 }
   0x5   : > { %p48_p2 = scmp.eq.s32.totalorder %s1849_s11, 0  ;;  %p77_p3 = scmp.eq.s32.totalorder %s1578_s12, 1 }
   0x6   : > { %s1895_s16 = scalar_select %p38_p0, %s1845_s10, %s40_s15  }
   0x7   : > { %p49_p4 = por %p48_p2, %p47_p1  ;;  %p1897_p5 = por %p77_p3, %p47_p1 }
   0x8   : > { %p1581_p6 = scmp.ge.s32.totalorder %s1849_s11, 2 }
   0xa   : > { %102 = sbr.rel (%p1581_p6) target bundleno = 53 (0x35), region = 20 }
  0x11   : > { %105 = sbr.rel (!%p49_p4) target bundleno = 53 (0x35), region = 24  ;;  %s107_s18 = sand.u32 (%p49_p4), 1, %s1845_s10  }
  0x12   : > { %s1736_s19 = sshll.u32 (%p49_p4), %s1849_s11, 5  ;;  %s1582_s20 = sshll.u32 (%p49_p4), %s107_s18, 9 }
  0x13   : > { %s1907_s23 = scalar_lea.vmem (%p49_p4), %s2208_s1, %s1736_s19  ;;  %s1912_s24 = scalar_lea.vmem (%p49_p4), [#allocation2], %s1582_s20 }
  0x14   : > { %v125_v0 = vld [vmem:[%s1907_s23] sm:$0xff] (%p49_p4)  ;;  %v127_v1 = vld [vmem:[%s1907_s23 + $0x8] sm:$0xff] (%p49_p4)  ;;  %v129_v2 = vld [vmem:[%s1907_s23 + $0x10] sm:$0xff] (%p49_p4) }
  0x15   : > { %126 = vst [vmem:[%s1912_s24] sm:$0xff] (%p49_p4), %v125_v0  ;;  %128 = vst [vmem:[%s1912_s24 + $0x8] sm:$0xff] (%p49_p4), %v127_v1  ;;  %v131_v3 = vld [vmem:[%s1907_s23 + $0x18] sm:$0xff] (%p49_p4)  ;;  %v133_v4 = vld [vmem:[%s1907_s23 + $0x40] sm:$0xff] (%p49_p4) }
  0x16   : > { %130 = vst [vmem:[%s1912_s24 + $0x10] sm:$0xff] (%p49_p4), %v129_v2  ;;  %v135_v5 = vld [vmem:[%s1907_s23 + $0x48] sm:$0xff] (%p49_p4)  ;;  %132 = vst [vmem:[%s1912_s24 + $0x18] sm:$0xff] (%p49_p4), %v131_v3  ;;  %v137_v6 = vld [vmem:[%s1907_s23 + $0x50] sm:$0xff] (%p49_p4) }
  0x17   : > { %134 = vst [vmem:[%s1912_s24 + $0x20] sm:$0xff] (%p49_p4), %v133_v4  ;;  %136 = vst [vmem:[%s1912_s24 + $0x28] sm:$0xff] (%p49_p4), %v135_v5  ;;  %v139_v7 = vld [vmem:[%s1907_s23 + $0x58] sm:$0xff] (%p49_p4)  ;;  %v141_v8 = vld [vmem:[%s1907_s23 + $0x80] sm:$0xff] (%p49_p4) }
  0x18   : > { %138 = vst [vmem:[%s1912_s24 + $0x30] sm:$0xff] %v137_v6  ;;  %140 = vst [vmem:[%s1912_s24 + $0x38] sm:$0xff] %v139_v7  ;;  %v143_v9 = vld [vmem:[%s1907_s23 + $0x88] sm:$0xff]  ;;  %v145_v10 = vld [vmem:[%s1907_s23 + $0x90] sm:$0xff] }
  0x19   : > { %142 = vst [vmem:[%s1912_s24 + $0x40] sm:$0xff] %v141_v8  ;;  %v147_v11 = vld [vmem:[%s1907_s23 + $0x98] sm:$0xff]  ;;  %144 = vst [vmem:[%s1912_s24 + $0x48] sm:$0xff] %v143_v9  ;;  %v149_v12 = vld [vmem:[%s1907_s23 + $0xc0] sm:$0xff] }
  0x1a   : > { %146 = vst [vmem:[%s1912_s24 + $0x50] sm:$0xff] %v145_v10  ;;  %148 = vst [vmem:[%s1912_s24 + $0x58] sm:$0xff] %v147_v11  ;;  %v151_v13 = vld [vmem:[%s1907_s23 + $0xc8] sm:$0xff]  ;;  %v153_v14 = vld [vmem:[%s1907_s23 + $0xd0] sm:$0xff] }
  0x1b   : > { %150 = vst [vmem:[%s1912_s24 + $0x60] sm:$0xff] %v149_v12  ;;  %152 = vst [vmem:[%s1912_s24 + $0x68] sm:$0xff] %v151_v13  ;;  %v155_v15 = vld [vmem:[%s1907_s23 + $0xd8] sm:$0xff]  ;;  %v157_v16 = vld [vmem:[%s1907_s23 + $0x100] sm:$0xff] }
  0x1c   : > { %154 = vst [vmem:[%s1912_s24 + $0x70] sm:$0xff] %v153_v14  ;;  %v159_v17 = vld [vmem:[%s1907_s23 + $0x108] sm:$0xff]  ;;  %156 = vst [vmem:[%s1912_s24 + $0x78] sm:$0xff] %v155_v15  ;;  %v161_v18 = vld [vmem:[%s1907_s23 + $0x110] sm:$0xff] }
  0x1d   : > { %158 = vst [vmem:[%s1912_s24 + $0x80] sm:$0xff] %v157_v16  ;;  %160 = vst [vmem:[%s1912_s24 + $0x88] sm:$0xff] %v159_v17  ;;  %v163_v19 = vld [vmem:[%s1907_s23 + $0x118] sm:$0xff]  ;;  %v165_v20 = vld [vmem:[%s1907_s23 + $0x140] sm:$0xff] }
  0x1e   : > { %162 = vst [vmem:[%s1912_s24 + $0x90] sm:$0xff] %v161_v18  ;;  %164 = vst [vmem:[%s1912_s24 + $0x98] sm:$0xff] %v163_v19  ;;  %v167_v21 = vld [vmem:[%s1907_s23 + $0x148] sm:$0xff]  ;;  %v169_v22 = vld [vmem:[%s1907_s23 + $0x150] sm:$0xff] }
  0x1f   : > { %166 = vst [vmem:[%s1912_s24 + $0xa0] sm:$0xff] %v165_v20  ;;  %v171_v23 = vld [vmem:[%s1907_s23 + $0x158] sm:$0xff]  ;;  %168 = vst [vmem:[%s1912_s24 + $0xa8] sm:$0xff] %v167_v21  ;;  %v173_v24 = vld [vmem:[%s1907_s23 + $0x180] sm:$0xff] }
  0x20   : > { %170 = vst [vmem:[%s1912_s24 + $0xb0] sm:$0xff] %v169_v22  ;;  %172 = vst [vmem:[%s1912_s24 + $0xb8] sm:$0xff] %v171_v23  ;;  %v175_v25 = vld [vmem:[%s1907_s23 + $0x188] sm:$0xff]  ;;  %v177_v26 = vld [vmem:[%s1907_s23 + $0x190] sm:$0xff] }
  0x21   : > { %174 = vst [vmem:[%s1912_s24 + $0xc0] sm:$0xff] %v173_v24  ;;  %176 = vst [vmem:[%s1912_s24 + $0xc8] sm:$0xff] %v175_v25  ;;  %v179_v27 = vld [vmem:[%s1907_s23 + $0x198] sm:$0xff]  ;;  %v181_v28 = vld [vmem:[%s1907_s23 + $0x1c0] sm:$0xff] }
  0x22   : > { %178 = vst [vmem:[%s1912_s24 + $0xd0] sm:$0xff] %v177_v26  ;;  %v183_v29 = vld [vmem:[%s1907_s23 + $0x1c8] sm:$0xff]  ;;  %180 = vst [vmem:[%s1912_s24 + $0xd8] sm:$0xff] %v179_v27  ;;  %v185_v30 = vld [vmem:[%s1907_s23 + $0x1d0] sm:$0xff] }
  0x23   : > { %182 = vst [vmem:[%s1912_s24 + $0xe0] sm:$0xff] %v181_v28  ;;  %184 = vst [vmem:[%s1912_s24 + $0xe8] sm:$0xff] %v183_v29  ;;  %v187_v31 = vld [vmem:[%s1907_s23 + $0x1d8] sm:$0xff]  ;;  %v189_v32 = vld [vmem:[%s1907_s23 + $0x200] sm:$0xff] }
  0x24   : > { %186 = vst [vmem:[%s1912_s24 + $0xf0] sm:$0xff] %v185_v30  ;;  %188 = vst [vmem:[%s1912_s24 + $0xf8] sm:$0xff] %v187_v31  ;;  %v191_v33 = vld [vmem:[%s1907_s23 + $0x208] sm:$0xff]  ;;  %v193_v34 = vld [vmem:[%s1907_s23 + $0x210] sm:$0xff] }
  0x25   : > { %190 = vst [vmem:[%s1912_s24 + $0x100] sm:$0xff] %v189_v32  ;;  %v195_v35 = vld [vmem:[%s1907_s23 + $0x218] sm:$0xff]  ;;  %192 = vst [vmem:[%s1912_s24 + $0x108] sm:$0xff] %v191_v33  ;;  %v197_v36 = vld [vmem:[%s1907_s23 + $0x240] sm:$0xff] }
  0x26   : > { %194 = vst [vmem:[%s1912_s24 + $0x110] sm:$0xff] %v193_v34  ;;  %196 = vst [vmem:[%s1912_s24 + $0x118] sm:$0xff] %v195_v35  ;;  %v199_v37 = vld [vmem:[%s1907_s23 + $0x248] sm:$0xff]  ;;  %v201_v38 = vld [vmem:[%s1907_s23 + $0x250] sm:$0xff] }
  0x27   : > { %198 = vst [vmem:[%s1912_s24 + $0x120] sm:$0xff] %v197_v36  ;;  %200 = vst [vmem:[%s1912_s24 + $0x128] sm:$0xff] %v199_v37  ;;  %v203_v39 = vld [vmem:[%s1907_s23 + $0x258] sm:$0xff]  ;;  %v205_v40 = vld [vmem:[%s1907_s23 + $0x280] sm:$0xff] }
  0x28   : > { %202 = vst [vmem:[%s1912_s24 + $0x130] sm:$0xff] %v201_v38  ;;  %v207_v41 = vld [vmem:[%s1907_s23 + $0x288] sm:$0xff]  ;;  %204 = vst [vmem:[%s1912_s24 + $0x138] sm:$0xff] %v203_v39  ;;  %v209_v42 = vld [vmem:[%s1907_s23 + $0x290] sm:$0xff] }
  0x29   : > { %206 = vst [vmem:[%s1912_s24 + $0x140] sm:$0xff] %v205_v40  ;;  %208 = vst [vmem:[%s1912_s24 + $0x148] sm:$0xff] %v207_v41  ;;  %v211_v43 = vld [vmem:[%s1907_s23 + $0x298] sm:$0xff]  ;;  %v213_v44 = vld [vmem:[%s1907_s23 + $0x2c0] sm:$0xff] }
  0x2a   : > { %210 = vst [vmem:[%s1912_s24 + $0x150] sm:$0xff] %v209_v42  ;;  %212 = vst [vmem:[%s1912_s24 + $0x158] sm:$0xff] %v211_v43  ;;  %v215_v45 = vld [vmem:[%s1907_s23 + $0x2c8] sm:$0xff]  ;;  %v217_v46 = vld [vmem:[%s1907_s23 + $0x2d0] sm:$0xff] }
  0x2b   : > { %214 = vst [vmem:[%s1912_s24 + $0x160] sm:$0xff] %v213_v44  ;;  %v219_v47 = vld [vmem:[%s1907_s23 + $0x2d8] sm:$0xff]  ;;  %216 = vst [vmem:[%s1912_s24 + $0x168] sm:$0xff] %v215_v45  ;;  %v221_v48 = vld [vmem:[%s1907_s23 + $0x300] sm:$0xff] }
  0x2c   : > { %218 = vst [vmem:[%s1912_s24 + $0x170] sm:$0xff] %v217_v46  ;;  %220 = vst [vmem:[%s1912_s24 + $0x178] sm:$0xff] %v219_v47  ;;  %v223_v49 = vld [vmem:[%s1907_s23 + $0x308] sm:$0xff]  ;;  %v225_v50 = vld [vmem:[%s1907_s23 + $0x310] sm:$0xff] }
  0x2d   : > { %222 = vst [vmem:[%s1912_s24 + $0x180] sm:$0xff] %v221_v48  ;;  %224 = vst [vmem:[%s1912_s24 + $0x188] sm:$0xff] %v223_v49  ;;  %v227_v51 = vld [vmem:[%s1907_s23 + $0x318] sm:$0xff]  ;;  %v229_v52 = vld [vmem:[%s1907_s23 + $0x340] sm:$0xff] }
  0x2e   : > { %226 = vst [vmem:[%s1912_s24 + $0x190] sm:$0xff] %v225_v50  ;;  %v231_v53 = vld [vmem:[%s1907_s23 + $0x348] sm:$0xff]  ;;  %228 = vst [vmem:[%s1912_s24 + $0x198] sm:$0xff] %v227_v51  ;;  %v233_v54 = vld [vmem:[%s1907_s23 + $0x350] sm:$0xff] }
  0x2f   : > { %230 = vst [vmem:[%s1912_s24 + $0x1a0] sm:$0xff] %v229_v52  ;;  %232 = vst [vmem:[%s1912_s24 + $0x1a8] sm:$0xff] %v231_v53  ;;  %v235_v55 = vld [vmem:[%s1907_s23 + $0x358] sm:$0xff]  ;;  %v237_v56 = vld [vmem:[%s1907_s23 + $0x380] sm:$0xff] }
  0x30   : > { %234 = vst [vmem:[%s1912_s24 + $0x1b0] sm:$0xff] %v233_v54  ;;  %236 = vst [vmem:[%s1912_s24 + $0x1b8] sm:$0xff] %v235_v55  ;;  %v239_v57 = vld [vmem:[%s1907_s23 + $0x388] sm:$0xff]  ;;  %v241_v58 = vld [vmem:[%s1907_s23 + $0x390] sm:$0xff] }
  0x31   : > { %238 = vst [vmem:[%s1912_s24 + $0x1c0] sm:$0xff] %v237_v56  ;;  %v243_v59 = vld [vmem:[%s1907_s23 + $0x398] sm:$0xff]  ;;  %240 = vst [vmem:[%s1912_s24 + $0x1c8] sm:$0xff] %v239_v57  ;;  %v245_v60 = vld [vmem:[%s1907_s23 + $0x3c0] sm:$0xff] }
  0x32   : > { %242 = vst [vmem:[%s1912_s24 + $0x1d0] sm:$0xff] %v241_v58  ;;  %244 = vst [vmem:[%s1912_s24 + $0x1d8] sm:$0xff] %v243_v59  ;;  %v247_v61 = vld [vmem:[%s1907_s23 + $0x3c8] sm:$0xff]  ;;  %v249_v62 = vld [vmem:[%s1907_s23 + $0x3d0] sm:$0xff] }
  0x33   : > { %246 = vst [vmem:[%s1912_s24 + $0x1e0] sm:$0xff] %v245_v60  ;;  %248 = vst [vmem:[%s1912_s24 + $0x1e8] sm:$0xff] %v247_v61  ;;  %v251_v63 = vld [vmem:[%s1907_s23 + $0x3d8] sm:$0xff] }
  0x34   : > { %250 = vst [vmem:[%s1912_s24 + $0x1f0] sm:$0xff] %v249_v62  ;;  %252 = vst [vmem:[%s1912_s24 + $0x1f8] sm:$0xff] %v251_v63 }
  0x35 PF: > { %p1585_p7 = scmp.ge.s32.totalorder %s1849_s11, 1  ;;  %p257_p8 = scmp.lt.s32.totalorder %s1849_s11, 3 }
  0x37   : > { %p258_p9 = pnand %p1585_p7, %p257_p8 }
  0x38   : > { %s264_s25 = sand.u32 (!%p258_p9), 1, %s1841_s9   ;;  %v1851_v0 = vmov (!%p258_p9), 0   ;;  %v287_v27 = vld [vmem:[%s2207_s0] sm:$0x3] (!%p258_p9)  ;;  %vm384_vm0 = vcmask (!%p258_p9), 261120  }
  0x39   : > { %261 = sbr.rel (%p258_p9) target bundleno = 364 (0x16c), region = 47  ;;  %s1586_s26 = sshll.u32 (!%p258_p9), %s264_s25, 9  ;;  %420 = vmatprep.mubr.bf16.mxu0 (!%p258_p9), %v1851_v0  ;;  %461 = vmatprep.mubr.bf16.mxu1 (!%p258_p9), %v1851_v0  ;;  %v1608_v60 = vld [vmem:[%s2207_s0 + $0x2] sm:$0x3] (!%p258_p9) }
  0x3a   : > { %s2046_s27 = scalar_lea.vmem (!%p258_p9), [#allocation2], %s1586_s26  ;;  %s1587_s8 = sshll.u32 (!%p258_p9), %s264_s25, 7 }
  0x3b   : > { %v288_v1 = vld [vmem:[%s2046_s27] sm:$0xff] (!%p258_p9)  ;;  %v289_v3 = vld [vmem:[%s2046_s27 + $0x8] sm:$0xff] (!%p258_p9)  ;;  %v290_v14 = vld [vmem:[%s2046_s27 + $0x10] sm:$0xff] (!%p258_p9)  ;;  %s2156_s14 = scalar_lea.vmem (!%p258_p9), [#allocation3], %s1587_s8 }
  0x3c   : > { %v292_v2 = vld [vmem:[%s2046_s27 + $0x20] sm:$0xff] (!%p258_p9)  ;;  %v293_v5 = vld [vmem:[%s2046_s27 + $0x28] sm:$0xff] (!%p258_p9)  ;;  %v294_v16 = vld [vmem:[%s2046_s27 + $0x30] sm:$0xff] (!%p258_p9) }
  0x3d   : > { %v1589_v4 = vcombine.high (!%p258_p9), %v288_v1, %v292_v2  ;;  %v1588_v6 = vcombine.low (!%p258_p9), %v288_v1, %v292_v2  ;;  %v296_v7 = vld [vmem:[%s2046_s27 + $0x40] sm:$0xff] (!%p258_p9)  ;;  %v1591_v9 = vcombine.high (!%p258_p9), %v289_v3, %v293_v5  ;;  %v1590_v10 = vcombine.low (!%p258_p9), %v289_v3, %v293_v5  ;;  %v297_v12 = vld [vmem:[%s2046_s27 + $0x48] sm:$0xff] (!%p258_p9)  ;;  %v291_v17 = vld [vmem:[%s2046_s27 + $0x18] sm:$0xff] (!%p258_p9) }
  0x3e   : > { %v300_v8 = vld [vmem:[%s2046_s27 + $0x60] sm:$0xff] (!%p258_p9)  ;;  %v301_v13 = vld [vmem:[%s2046_s27 + $0x68] sm:$0xff] (!%p258_p9)  ;;  %v295_v18 = vld [vmem:[%s2046_s27 + $0x38] sm:$0xff] (!%p258_p9)  ;;  %v1593_v21 = vcombine.high (!%p258_p9), %v290_v14, %v294_v16  ;;  %v1592_v28 = vcombine.low (!%p258_p9), %v290_v14, %v294_v16 }
  0x3f   : > { %v1597_v11 = vcombine.high (!%p258_p9), %v296_v7, %v300_v8  ;;  %388 = vmatprep.subr.bf16.mxu0 (!%p258_p9), %v1589_v4  ;;  %v1599_v15 = vcombine.high (!%p258_p9), %v297_v12, %v301_v13  ;;  %429 = vmatprep.subr.bf16.mxu1 (!%p258_p9), %v1591_v9  ;;  %v1596_v19 = vcombine.low (!%p258_p9), %v296_v7, %v300_v8  ;;  %v298_v23 = vld [vmem:[%s2046_s27 + $0x50] sm:$0xff] (!%p258_p9)  ;;  %v299_v25 = vld [vmem:[%s2046_s27 + $0x58] sm:$0xff] (!%p258_p9)  ;;  %v1609_v32 = vld [vmem:[%s2046_s27 + $0x80] sm:$0xff] (!%p258_p9) }
  0x40   : > { %389 = vmatpush1.bf16.msra.mxu0 %v1588_v6  ;;  %430 = vmatpush1.bf16.msra.mxu1 %v1590_v10  ;;  %v1598_v20 = vcombine.low %v297_v12, %v301_v13  ;;  %v1595_v22 = vcombine.high %v291_v17, %v295_v18  ;;  %v302_v24 = vld [vmem:[%s2046_s27 + $0x70] sm:$0xff]  ;;  %v303_v26 = vld [vmem:[%s2046_s27 + $0x78] sm:$0xff]  ;;  %v1594_v29 = vcombine.low %v291_v17, %v295_v18  ;;  %v1613_v33 = vld [vmem:[%s2046_s27 + $0xa0] sm:$0xff]  ;;  %s1737_s9 = sshll.u32 (%p1897_p5), %s1578_s12, 5 }
  0x41   : > { %390 = vmatprep.subr.bf16.mxu0 %v1597_v11  ;;  %431 = vmatprep.subr.bf16.mxu1 %v1599_v15  ;;  %v1601_v30 = vcombine.high %v298_v23, %v302_v24  ;;  %v1603_v31 = vcombine.high %v299_v25, %v303_v26  ;;  %v1610_v34 = vld [vmem:[%s2046_s27 + $0x88] sm:$0xff]  ;;  %v1600_v36 = vcombine.low %v298_v23, %v302_v24  ;;  %v1617_v40 = vld [vmem:[%s2046_s27 + $0xc0] sm:$0xff]  ;;  %v1611_v48 = vld [vmem:[%s2046_s27 + $0x90] sm:$0xff]  ;;  %s1474_s17 = scalar_lea.vmem (%p1897_p5), %s2209_s2, %s1737_s9 }
  0x42   : > { %v1614_v35 = vld [vmem:[%s2046_s27 + $0xa8] sm:$0xff]  ;;  %v1602_v37 = vcombine.low %v299_v25, %v303_v26  ;;  %v1626_v38 = vcombine.high %v1609_v32, %v1613_v33  ;;  %v1621_v41 = vld [vmem:[%s2046_s27 + $0xe0] sm:$0xff]  ;;  %v1625_v44 = vcombine.low %v1609_v32, %v1613_v33  ;;  %v1615_v49 = vld [vmem:[%s2046_s27 + $0xb0] sm:$0xff] }
  0x43   : > { %v1628_v39 = vcombine.high %v1610_v34, %v1614_v35  ;;  %v1618_v42 = vld [vmem:[%s2046_s27 + $0xc8] sm:$0xff]  ;;  %v1627_v45 = vcombine.low %v1610_v34, %v1614_v35  ;;  %v1634_v46 = vcombine.high %v1617_v40, %v1621_v41  ;;  %v1612_v50 = vld [vmem:[%s2046_s27 + $0x98] sm:$0xff]  ;;  %v1633_v52 = vcombine.low %v1617_v40, %v1621_v41  ;;  %v1619_v56 = vld [vmem:[%s2046_s27 + $0xd0] sm:$0xff] }
  0x44   : > { %391 = vmatpush1.bf16.msra.mxu0 %v1596_v19  ;;  %432 = vmatpush1.bf16.msra.mxu1 %v1598_v20  ;;  %v1622_v43 = vld [vmem:[%s2046_s27 + $0xe8] sm:$0xff]  ;;  %v1616_v51 = vld [vmem:[%s2046_s27 + $0xb8] sm:$0xff]  ;;  %v1630_v54 = vcombine.high %v1611_v48, %v1615_v49  ;;  %v1623_v57 = vld [vmem:[%s2046_s27 + $0xf0] sm:$0xff]  ;;  %v1629_v61 = vcombine.low %v1611_v48, %v1615_v49 }
  0x45   : > { %470 = vmatprep.subr.bf16.mxu0 %v1593_v21  ;;  %511 = vmatprep.subr.bf16.mxu1 %v1595_v22  ;;  %v1636_v47 = vcombine.high %v1618_v42, %v1622_v43  ;;  %v1635_v53 = vcombine.low %v1618_v42, %v1622_v43  ;;  %v1632_v55 = vcombine.high %v1612_v50, %v1616_v51  ;;  %v1620_v58 = vld [vmem:[%s2046_s27 + $0xd8] sm:$0xff]  ;;  %v1650_v2 = vld [vmem:[%s2046_s27 + $0x100] sm:$0xff]  ;;  %v1651_v4 = vld [vmem:[%s2046_s27 + $0x108] sm:$0xff] }
  0x46   : > { %v1624_v59 = vld [vmem:[%s2046_s27 + $0xf8] sm:$0xff]  ;;  %v1631_v62 = vcombine.low %v1612_v50, %v1616_v51  ;;  %v1638_v63 = vcombine.high %v1619_v56, %v1623_v57  ;;  %v1654_v3 = vld [vmem:[%s2046_s27 + $0x120] sm:$0xff]  ;;  %v1655_v5 = vld [vmem:[%s2046_s27 + $0x128] sm:$0xff]  ;;  %v1637_v6 = vcombine.low %v1619_v56, %v1623_v57 }
  0x47   : > { %1604 = vmatmul.mubr.msk.bf16.vlgmr.msra.gmra.mrb[0].mxu0 %vm384_vm0, %v287_v27  ;;  %1605 = vmatmul.mubr.msk.bf16.vlgmr.msra.gmra.mrb[0].mxu1 %vm384_vm0, %v287_v27  ;;  %v1640_v1 = vcombine.high %v1620_v58, %v1624_v59  ;;  %v1639_v7 = vcombine.low %v1620_v58, %v1624_v59  ;;  %v1667_v8 = vcombine.high %v1650_v2, %v1654_v3  ;;  %v1658_v10 = vld [vmem:[%s2046_s27 + $0x140] sm:$0xff]  ;;  %v1659_v12 = vld [vmem:[%s2046_s27 + $0x148] sm:$0xff]  ;;  %v1652_v18 = vld [vmem:[%s2046_s27 + $0x110] sm:$0xff] }
  0x48   : > { %471 = vmatpush1.bf16.msra.mxu0 %v1592_v28  ;;  %512 = vmatpush1.bf16.msra.mxu1 %v1594_v29  ;;  %v1669_v9 = vcombine.high %v1651_v4, %v1655_v5  ;;  %v1662_v11 = vld [vmem:[%s2046_s27 + $0x160] sm:$0xff]  ;;  %v1663_v13 = vld [vmem:[%s2046_s27 + $0x168] sm:$0xff]  ;;  %v1666_v14 = vcombine.low %v1650_v2, %v1654_v3  ;;  %v1668_v15 = vcombine.low %v1651_v4, %v1655_v5  ;;  %v1656_v19 = vld [vmem:[%s2046_s27 + $0x130] sm:$0xff] }
  0x49   : > { %472 = vmatprep.subr.bf16.mxu0 %v1601_v30  ;;  %513 = vmatprep.subr.bf16.mxu1 %v1603_v31  ;;  %v1675_v16 = vcombine.high %v1658_v10, %v1662_v11  ;;  %v1677_v17 = vcombine.high %v1659_v12, %v1663_v13  ;;  %v1653_v20 = vld [vmem:[%s2046_s27 + $0x118] sm:$0xff]  ;;  %v1674_v22 = vcombine.low %v1658_v10, %v1662_v11  ;;  %v1660_v26 = vld [vmem:[%s2046_s27 + $0x150] sm:$0xff]  ;;  %v1649_v30 = vld [vmem:[%s2207_s0 + $0x4] sm:$0x3] }
  0x4a   : > { %502 = vmatprep.mubr.bf16.mxu0 %v1851_v0  ;;  %543 = vmatprep.mubr.bf16.mxu1 %v1851_v0  ;;  %v1657_v21 = vld [vmem:[%s2046_s27 + $0x138] sm:$0xff]  ;;  %v1676_v23 = vcombine.low %v1659_v12, %v1663_v13  ;;  %v1671_v24 = vcombine.high %v1652_v18, %v1656_v19  ;;  %v1670_v31 = vcombine.low %v1652_v18, %v1656_v19  ;;  %v1691_v35 = vld [vmem:[%s2046_s27 + $0x180] sm:$0xff]  ;;  %v1693_v51 = vld [vmem:[%s2046_s27 + $0x190] sm:$0xff] }
  0x4b   : > { %v1673_v25 = vcombine.high %v1653_v20, %v1657_v21  ;;  %v1661_v28 = vld [vmem:[%s2046_s27 + $0x158] sm:$0xff]  ;;  %v1672_v32 = vcombine.low %v1653_v20, %v1657_v21  ;;  %v1699_v43 = vld [vmem:[%s2046_s27 + $0x1c0] sm:$0xff]  ;;  %v1701_v59 = vld [vmem:[%s2046_s27 + $0x1d0] sm:$0xff] }
  0x4c   : > { %473 = vmatpush1.bf16.msra.mxu0 %v1600_v36  ;;  %514 = vmatpush1.bf16.msra.mxu1 %v1602_v37  ;;  %v1665_v29 = vld [vmem:[%s2046_s27 + $0x178] sm:$0xff]  ;;  %v1695_v36 = vld [vmem:[%s2046_s27 + $0x1a0] sm:$0xff]  ;;  %v1692_v37 = vld [vmem:[%s2046_s27 + $0x188] sm:$0xff] }
  0x4d   : > { %682 = vmatprep.subr.bf16.mxu0 %v1626_v38  ;;  %723 = vmatprep.subr.bf16.mxu1 %v1628_v39  ;;  %v1681_v34 = vcombine.high %v1661_v28, %v1665_v29  ;;  %v1696_v38 = vld [vmem:[%s2046_s27 + $0x1a8] sm:$0xff]  ;;  %v1680_v40 = vcombine.low %v1661_v28, %v1665_v29  ;;  %v1708_v41 = vcombine.high %v1691_v35, %v1695_v36 }
  0x4e   : > { %v1710_v42 = vcombine.high %v1692_v37, %v1696_v38  ;;  %v1709_v48 = vcombine.low %v1692_v37, %v1696_v38 }
  0x4f   : > { %1606 = vmatmul.mubr.msk.bf16.vlgmr.msra.gmra.mrb[4].mxu0 %vm384_vm0, %v287_v27  ;;  %1607 = vmatmul.mubr.msk.bf16.vlgmr.msra.gmra.mrb[4].mxu1 %vm384_vm0, %v287_v27  ;;  %v1664_v27 = vld [vmem:[%s2046_s27 + $0x170] sm:$0xff] }
  0x50   : > { %683 = vmatpush1.bf16.msra.mxu0 %v1625_v44  ;;  %724 = vmatpush1.bf16.msra.mxu1 %v1627_v45  ;;  %v1679_v33 = vcombine.high %v1660_v26, %v1664_v27  ;;  %v1678_v39 = vcombine.low %v1660_v26, %v1664_v27  ;;  %v1703_v44 = vld [vmem:[%s2046_s27 + $0x1e0] sm:$0xff]  ;;  %v1700_v45 = vld [vmem:[%s2046_s27 + $0x1c8] sm:$0xff] }
  0x51   : > { %684 = vmatprep.subr.bf16.mxu0 %v1634_v46  ;;  %725 = vmatprep.subr.bf16.mxu1 %v1636_v47  ;;  %v1704_v46 = vld [vmem:[%s2046_s27 + $0x1e8] sm:$0xff]  ;;  %v1707_v47 = vcombine.low %v1691_v35, %v1695_v36  ;;  %v1716_v49 = vcombine.high %v1699_v43, %v1703_v44 }
  0x52   : > { %714 = vmatprep.mubr.bf16.mxu0 %v1851_v0  ;;  %755 = vmatprep.mubr.bf16.mxu1 %v1851_v0  ;;  %v1718_v50 = vcombine.high %v1700_v45, %v1704_v46  ;;  %v1717_v56 = vcombine.low %v1700_v45, %v1704_v46 }
  0x54   : > { %685 = vmatpush1.bf16.msra.mxu0 %v1633_v52  ;;  %726 = vmatpush1.bf16.msra.mxu1 %v1635_v53  ;;  %v1697_v52 = vld [vmem:[%s2046_s27 + $0x1b0] sm:$0xff]  ;;  %v1694_v53 = vld [vmem:[%s2046_s27 + $0x198] sm:$0xff] }
  0x55   : > { %764 = vmatprep.subr.bf16.mxu0 %v1630_v54  ;;  %805 = vmatprep.subr.bf16.mxu1 %v1632_v55  ;;  %v1698_v54 = vld [vmem:[%s2046_s27 + $0x1b8] sm:$0xff]  ;;  %v1715_v55 = vcombine.low %v1699_v43, %v1703_v44  ;;  %v1712_v57 = vcombine.high %v1693_v51, %v1697_v52 }
  0x56   : > { %v1714_v58 = vcombine.high %v1694_v53, %v1698_v54  ;;  %v1713_v2 = vcombine.low %v1694_v53, %v1698_v54 }
  0x57   : > { %1641 = vmatmul.mubr.msk.bf16.vlgmr.msra.gmra.mrb[8].mxu0 %vm384_vm0, %v1608_v60  ;;  %1642 = vmatmul.mubr.msk.bf16.vlgmr.msra.gmra.mrb[8].mxu1 %vm384_vm0, %v1608_v60 }
  0x58   : > { %765 = vmatpush1.bf16.msra.mxu0 %v1629_v61  ;;  %806 = vmatpush1.bf16.msra.mxu1 %v1631_v62  ;;  %v1702_v61 = vld [vmem:[%s2046_s27 + $0x1d8] sm:$0xff] }
  0x59   : > { %766 = vmatprep.subr.bf16.mxu0 %v1638_v63  ;;  %807 = vmatprep.subr.bf16.mxu1 %v1640_v1  ;;  %v1706_v62 = vld [vmem:[%s2046_s27 + $0x1f8] sm:$0xff]  ;;  %v1690_v63 = vld [vmem:[%s2207_s0 + $0x6] sm:$0x3]  ;;  %v1711_v1 = vcombine.low %v1693_v51, %v1697_v52 }
  0x5a   : > { %796 = vmatprep.mubr.bf16.mxu0 %v1851_v0  ;;  %837 = vmatprep.mubr.bf16.mxu1 %v1851_v0  ;;  %v1722_v4 = vcombine.high %v1702_v61, %v1706_v62 }
  0x5c   : > { %767 = vmatpush1.bf16.msra.mxu0 %v1637_v6  ;;  %808 = vmatpush1.bf16.msra.mxu1 %v1639_v7  ;;  %v1721_v6 = vcombine.low %v1702_v61, %v1706_v62 }
  0x5d   : > { %977 = vmatprep.subr.bf16.mxu0 %v1667_v8  ;;  %1018 = vmatprep.subr.bf16.mxu1 %v1669_v9 }
  0x5f   : > { %1643 = vmatmul.mubr.msk.bf16.vlgmr.msra.gmra.mrb[12].mxu0 %vm384_vm0, %v1608_v60  ;;  %1644 = vmatmul.mubr.msk.bf16.vlgmr.msra.gmra.mrb[12].mxu1 %vm384_vm0, %v1608_v60  ;;  %v1705_v60 = vld [vmem:[%s2046_s27 + $0x1f0] sm:$0xff] }
  0x60   : > { %978 = vmatpush1.bf16.msra.mxu0 %v1666_v14  ;;  %1019 = vmatpush1.bf16.msra.mxu1 %v1668_v15  ;;  %v1720_v3 = vcombine.high %v1701_v59, %v1705_v60  ;;  %v1719_v5 = vcombine.low %v1701_v59, %v1705_v60 }
  0x61   : > { %979 = vmatprep.subr.bf16.mxu0 %v1675_v16  ;;  %1020 = vmatprep.subr.bf16.mxu1 %v1677_v17 }
  0x62   : > { %1009 = vmatprep.mubr.bf16.mxu0 %v1851_v0  ;;  %1050 = vmatprep.mubr.bf16.mxu1 %v1851_v0 }
  0x64   : > { %980 = vmatpush1.bf16.msra.mxu0 %v1674_v22  ;;  %1021 = vmatpush1.bf16.msra.mxu1 %v1676_v23 }
  0x65   : > { %1059 = vmatprep.subr.bf16.mxu0 %v1671_v24  ;;  %1100 = vmatprep.subr.bf16.mxu1 %v1673_v25 }
  0x67   : > { %1682 = vmatmul.mubr.msk.bf16.vlgmr.msra.gmra.mrb[16].mxu0 %vm384_vm0, %v1649_v30  ;;  %1683 = vmatmul.mubr.msk.bf16.vlgmr.msra.gmra.mrb[16].mxu1 %vm384_vm0, %v1649_v30 }
  0x68   : > { %1060 = vmatpush1.bf16.msra.mxu0 %v1670_v31  ;;  %1101 = vmatpush1.bf16.msra.mxu1 %v1672_v32 }
  0x69   : > { %1061 = vmatprep.subr.bf16.mxu0 %v1679_v33  ;;  %1102 = vmatprep.subr.bf16.mxu1 %v1681_v34 }
  0x6a   : > { %1091 = vmatprep.mubr.bf16.mxu0 %v1851_v0  ;;  %1132 = vmatprep.mubr.bf16.mxu1 %v1851_v0 }
  0x6c   : > { %1062 = vmatpush1.bf16.msra.mxu0 %v1678_v39  ;;  %1103 = vmatpush1.bf16.msra.mxu1 %v1680_v40 }
  0x6d   : > { %1272 = vmatprep.subr.bf16.mxu0 %v1708_v41  ;;  %1313 = vmatprep.subr.bf16.mxu1 %v1710_v42 }
  0x6f   : > { %1684 = vmatmul.mubr.msk.bf16.vlgmr.msra.gmra.mrb[20].mxu0 %vm384_vm0, %v1649_v30  ;;  %1685 = vmatmul.mubr.msk.bf16.vlgmr.msra.gmra.mrb[20].mxu1 %vm384_vm0, %v1649_v30 }
  0x70   : > { %1273 = vmatpush1.bf16.msra.mxu0 %v1707_v47  ;;  %1314 = vmatpush1.bf16.msra.mxu1 %v1709_v48 }
  0x71   : > { %1274 = vmatprep.subr.bf16.mxu0 %v1716_v49  ;;  %1315 = vmatprep.subr.bf16.mxu1 %v1718_v50 }
  0x72   : > { %1304 = vmatprep.mubr.bf16.mxu0 %v1851_v0  ;;  %1345 = vmatprep.mubr.bf16.mxu1 %v1851_v0 }
  0x74   : > { %1275 = vmatpush1.bf16.msra.mxu0 %v1715_v55  ;;  %1316 = vmatpush1.bf16.msra.mxu1 %v1717_v56 }
  0x75   : > { %1354 = vmatprep.subr.bf16.mxu0 %v1712_v57  ;;  %1395 = vmatprep.subr.bf16.mxu1 %v1714_v58 }
  0x77   : > { %1723 = vmatmul.mubr.msk.bf16.vlgmr.msra.gmra.mrb[24].mxu0 %vm384_vm0, %v1690_v63  ;;  %1724 = vmatmul.mubr.msk.bf16.vlgmr.msra.gmra.mrb[24].mxu1 %vm384_vm0, %v1690_v63 }
  0x78   : > { %1355 = vmatpush1.bf16.msra.mxu0 %v1711_v1  ;;  %1396 = vmatpush1.bf16.msra.mxu1 %v1713_v2 }
  0x79   : > { %1356 = vmatprep.subr.bf16.mxu0 %v1720_v3  ;;  %1397 = vmatprep.subr.bf16.mxu1 %v1722_v4 }
  0x7a   : > { %1386 = vmatprep.mubr.bf16.mxu0 %v1851_v0  ;;  %1427 = vmatprep.mubr.bf16.mxu1 %v1851_v0 }
  0x7c   : > { %1357 = vmatpush1.bf16.msra.mxu0 %v1719_v5  ;;  %1398 = vmatpush1.bf16.msra.mxu1 %v1721_v6 }
  0x7f   : > { %1725 = vmatmul.mubr.msk.bf16.vlgmr.msra.gmra.mrb[28].mxu0 %vm384_vm0, %v1690_v63  ;;  %1726 = vmatmul.mubr.msk.bf16.vlgmr.msra.gmra.mrb[28].mxu1 %vm384_vm0, %v1690_v63 }
 0x11a   : > { %v422_v7 = vpop.f32.mrb[0].mxu0  ;;  %v463_v8 = vpop.f32.mrb[0].mxu1 }
 0x11b   : > { %1763 = vtanh.f32 %v422_v7  ;;  %v424_v9 = vpop.f32.mrb[1].mxu0  ;;  %v465_v10 = vpop.f32.mrb[1].mxu1 }
 0x11c   : > { %1765 = vtanh.f32 %v463_v8  ;;  %v426_v11 = vpop.f32.mrb[2].mxu0  ;;  %v467_v12 = vpop.f32.mrb[2].mxu1 }
 0x11d   : > { %1767 = vtanh.f32 %v424_v9  ;;  %v427_v13 = vpop.f32.mrb[3].mxu0  ;;  %v468_v14 = vpop.f32.mrb[3].mxu1 }
 0x11e   : > { %1769 = vtanh.f32 %v465_v10 }
 0x122   : > { %v504_v0 = vpop.f32.mrb[4].mxu0  ;;  %v545_v15 = vpop.f32.mrb[4].mxu1 }
 0x123   : > { %1771 = vtanh.f32 %v504_v0  ;;  %v506_v16 = vpop.f32.mrb[5].mxu0  ;;  %v547_v17 = vpop.f32.mrb[5].mxu1 }
 0x124   : > { %1773 = vtanh.f32 %v545_v15  ;;  %v508_v18 = vpop.f32.mrb[6].mxu0  ;;  %v549_v20 = vpop.f32.mrb[6].mxu1 }
 0x125   : > { %v1764_v19 = vpop.eup %1763  ;;  %1775 = vtanh.f32 %v506_v16  ;;  %v509_v21 = vpop.f32.mrb[7].mxu0 }
 0x126   : > { %v1766_v22 = vpop.eup %1765  ;;  %1777 = vtanh.f32 %v547_v17  ;;  %v550_v23 = vpop.f32.mrb[7].mxu1 }
 0x127   : > { %v1768_v24 = vpop.eup %1767 }
 0x128   : > { %v1770_v25 = vpop.eup %1769  ;;  %v568_v26 = vcombine.low %v1764_v19, %v1768_v24 }
 0x129   : > { %v569_v27 = vcombine.low %v1766_v22, %v1770_v25 }
 0x12a   : > { %576 = vst [vmem:[%s2156_s14] sm:$0x77] %v568_v26  ;;  %v716_v28 = vpop.f32.mrb[8].mxu0  ;;  %v757_v29 = vpop.f32.mrb[8].mxu1 }
 0x12b   : > { %577 = vst [vmem:[%s2156_s14 + $0x8] sm:$0x77] %v569_v27  ;;  %1779 = vtanh.f32 %v716_v28  ;;  %v718_v30 = vpop.f32.mrb[9].mxu0  ;;  %v759_v31 = vpop.f32.mrb[9].mxu1 }
 0x12c   : > { %1781 = vtanh.f32 %v757_v29  ;;  %v720_v32 = vpop.f32.mrb[10].mxu0  ;;  %v761_v34 = vpop.f32.mrb[10].mxu1 }
 0x12d   : > { %v1772_v33 = vpop.eup %1771  ;;  %1783 = vtanh.f32 %v718_v30  ;;  %v721_v35 = vpop.f32.mrb[11].mxu0 }
 0x12e   : > { %v1774_v36 = vpop.eup %1773  ;;  %1785 = vtanh.f32 %v759_v31  ;;  %v762_v37 = vpop.f32.mrb[11].mxu1 }
 0x12f   : > { %v1776_v38 = vpop.eup %1775 }
 0x130   : > { %v1778_v39 = vpop.eup %1777  ;;  %v570_v40 = vcombine.low %v1772_v33, %v1776_v38 }
 0x131   : > { %v571_v41 = vcombine.low %v1774_v36, %v1778_v39 }
 0x132   : > { %578 = vst [vmem:[%s2156_s14 + $0x10] sm:$0x77] %v570_v40  ;;  %v798_v42 = vpop.f32.mrb[12].mxu0  ;;  %v839_v43 = vpop.f32.mrb[12].mxu1 }
 0x133   : > { %579 = vst [vmem:[%s2156_s14 + $0x18] sm:$0x77] %v571_v41  ;;  %1787 = vtanh.f32 %v798_v42  ;;  %v800_v44 = vpop.f32.mrb[13].mxu0  ;;  %v841_v45 = vpop.f32.mrb[13].mxu1 }
 0x134   : > { %1789 = vtanh.f32 %v839_v43  ;;  %v802_v46 = vpop.f32.mrb[14].mxu0  ;;  %v843_v48 = vpop.f32.mrb[14].mxu1 }
 0x135   : > { %v1780_v47 = vpop.eup %1779  ;;  %1791 = vtanh.f32 %v800_v44  ;;  %v803_v49 = vpop.f32.mrb[15].mxu0 }
 0x136   : > { %v1782_v50 = vpop.eup %1781  ;;  %1793 = vtanh.f32 %v841_v45  ;;  %v844_v51 = vpop.f32.mrb[15].mxu1 }
 0x137   : > { %v1784_v52 = vpop.eup %1783 }
 0x138   : > { %v1786_v53 = vpop.eup %1785  ;;  %v862_v54 = vcombine.low %v1780_v47, %v1784_v52 }
 0x139   : > { %v863_v55 = vcombine.low %v1782_v50, %v1786_v53 }
 0x13a   : > { %1645 = vst [vmem:[%s2156_s14 + $0x20] sm:$0x77] %v862_v54  ;;  %v1011_v56 = vpop.f32.mrb[16].mxu0  ;;  %v1052_v57 = vpop.f32.mrb[16].mxu1  ;;  %v1487_v54 = vld [vmem:[%s2156_s14] sm:$0xff] (%p1897_p5) }
 0x13b   : > { %1646 = vst [vmem:[%s2156_s14 + $0x28] sm:$0x77] %v863_v55  ;;  %1795 = vtanh.f32 %v1011_v56  ;;  %v1013_v58 = vpop.f32.mrb[17].mxu0  ;;  %v1054_v59 = vpop.f32.mrb[17].mxu1  ;;  %v1489_v55 = vld [vmem:[%s2156_s14 + $0x8] sm:$0xff] (%p1897_p5)  ;;  %v1491_v56 = vld [vmem:[%s2156_s14 + $0x10] sm:$0xff] (%p1897_p5)  ;;  %1488 = vst [vmem:[%s1474_s17] sm:$0xff] (%p1897_p5), %v1487_v54 }
 0x13c   : > { %1797 = vtanh.f32 %v1052_v57  ;;  %v1015_v60 = vpop.f32.mrb[18].mxu0  ;;  %v1056_v62 = vpop.f32.mrb[18].mxu1  ;;  %v1493_v57 = vld [vmem:[%s2156_s14 + $0x18] sm:$0xff] (%p1897_p5)  ;;  %1490 = vst [vmem:[%s1474_s17 + $0x8] sm:$0xff] (%p1897_p5), %v1489_v55  ;;  %1492 = vst [vmem:[%s1474_s17 + $0x10] sm:$0xff] (%p1897_p5), %v1491_v56 }
 0x13d   : > { %v1788_v61 = vpop.eup %1787  ;;  %1799 = vtanh.f32 %v1013_v58  ;;  %v1016_v63 = vpop.f32.mrb[19].mxu0  ;;  %1494 = vst [vmem:[%s1474_s17 + $0x18] sm:$0xff] (%p1897_p5), %v1493_v57 }
 0x13e   : > { %v1790_v1 = vpop.eup %1789  ;;  %1801 = vtanh.f32 %v1054_v59  ;;  %v1057_v2 = vpop.f32.mrb[19].mxu1 }
 0x13f   : > { %v1792_v3 = vpop.eup %1791 }
 0x140   : > { %v1794_v4 = vpop.eup %1793  ;;  %v864_v5 = vcombine.low %v1788_v61, %v1792_v3 }
 0x141   : > { %v865_v6 = vcombine.low %v1790_v1, %v1794_v4  ;;  %v1495_v58 = vld [vmem:[%s2156_s14 + $0x20] sm:$0xff] (%p1897_p5) }
 0x142   : > { %1647 = vst [vmem:[%s2156_s14 + $0x30] sm:$0x77] %v864_v5  ;;  %v1093_v7 = vpop.f32.mrb[20].mxu0  ;;  %v1134_v8 = vpop.f32.mrb[20].mxu1  ;;  %v1497_v59 = vld [vmem:[%s2156_s14 + $0x28] sm:$0xff] (%p1897_p5)  ;;  %1496 = vst [vmem:[%s1474_s17 + $0x40] sm:$0xff] (%p1897_p5), %v1495_v58 }
 0x143   : > { %1648 = vst [vmem:[%s2156_s14 + $0x38] sm:$0x77] %v865_v6  ;;  %1803 = vtanh.f32 %v1093_v7  ;;  %v1095_v9 = vpop.f32.mrb[21].mxu0  ;;  %v1136_v10 = vpop.f32.mrb[21].mxu1  ;;  %1498 = vst [vmem:[%s1474_s17 + $0x48] sm:$0xff] (%p1897_p5), %v1497_v59 }
 0x144   : > { %1805 = vtanh.f32 %v1134_v8  ;;  %v1097_v11 = vpop.f32.mrb[22].mxu0  ;;  %v1138_v13 = vpop.f32.mrb[22].mxu1 }
 0x145   : > { %v1796_v12 = vpop.eup %1795  ;;  %1807 = vtanh.f32 %v1095_v9  ;;  %v1098_v14 = vpop.f32.mrb[23].mxu0 }
 0x146   : > { %v1798_v0 = vpop.eup %1797  ;;  %1809 = vtanh.f32 %v1136_v10  ;;  %v1139_v15 = vpop.f32.mrb[23].mxu1 }
 0x147   : > { %v1800_v16 = vpop.eup %1799 }
 0x148   : > { %v1802_v17 = vpop.eup %1801  ;;  %v1157_v18 = vcombine.low %v1796_v12, %v1800_v16 }
 0x149   : > { %v1158_v19 = vcombine.low %v1798_v0, %v1802_v17  ;;  %v1499_v60 = vld [vmem:[%s2156_s14 + $0x30] sm:$0xff] (%p1897_p5) }
 0x14a   : > { %1686 = vst [vmem:[%s2156_s14 + $0x40] sm:$0x77] %v1157_v18  ;;  %v1306_v20 = vpop.f32.mrb[24].mxu0  ;;  %v1347_v21 = vpop.f32.mrb[24].mxu1  ;;  %v1501_v61 = vld [vmem:[%s2156_s14 + $0x38] sm:$0xff] (%p1897_p5)  ;;  %1500 = vst [vmem:[%s1474_s17 + $0x50] sm:$0xff] (%p1897_p5), %v1499_v60 }
 0x14b   : > { %1687 = vst [vmem:[%s2156_s14 + $0x48] sm:$0x77] %v1158_v19  ;;  %1811 = vtanh.f32 %v1306_v20  ;;  %v1308_v22 = vpop.f32.mrb[25].mxu0  ;;  %v1349_v23 = vpop.f32.mrb[25].mxu1  ;;  %1502 = vst [vmem:[%s1474_s17 + $0x58] sm:$0xff] (%p1897_p5), %v1501_v61 }
 0x14c   : > { %1813 = vtanh.f32 %v1347_v21  ;;  %v1310_v24 = vpop.f32.mrb[26].mxu0  ;;  %v1351_v26 = vpop.f32.mrb[26].mxu1 }
 0x14d   : > { %v1804_v25 = vpop.eup %1803  ;;  %1815 = vtanh.f32 %v1308_v22  ;;  %v1311_v27 = vpop.f32.mrb[27].mxu0 }
 0x14e   : > { %v1806_v28 = vpop.eup %1805  ;;  %1817 = vtanh.f32 %v1349_v23  ;;  %v1352_v29 = vpop.f32.mrb[27].mxu1 }
 0x14f   : > { %v1808_v30 = vpop.eup %1807 }
 0x150   : > { %v1810_v31 = vpop.eup %1809  ;;  %v1159_v32 = vcombine.low %v1804_v25, %v1808_v30 }
 0x151   : > { %v1160_v33 = vcombine.low %v1806_v28, %v1810_v31  ;;  %v1503_v62 = vld [vmem:[%s2156_s14 + $0x40] sm:$0xff] (%p1897_p5) }
 0x152   : > { %1688 = vst [vmem:[%s2156_s14 + $0x50] sm:$0x77] %v1159_v32  ;;  %v1388_v34 = vpop.f32.mrb[28].mxu0  ;;  %v1429_v35 = vpop.f32.mrb[28].mxu1  ;;  %1504 = vst [vmem:[%s1474_s17 + $0x80] sm:$0xff] (%p1897_p5), %v1503_v62  ;;  %v1505_v63 = vld [vmem:[%s2156_s14 + $0x48] sm:$0xff] (%p1897_p5) }
 0x153   : > { %1689 = vst [vmem:[%s2156_s14 + $0x58] sm:$0x77] %v1160_v33  ;;  %1819 = vtanh.f32 %v1388_v34  ;;  %v1390_v36 = vpop.f32.mrb[29].mxu0  ;;  %v1431_v37 = vpop.f32.mrb[29].mxu1  ;;  %1506 = vst [vmem:[%s1474_s17 + $0x88] sm:$0xff] (%p1897_p5), %v1505_v63 }
 0x154   : > { %1821 = vtanh.f32 %v1429_v35  ;;  %v1392_v38 = vpop.f32.mrb[30].mxu0  ;;  %v1433_v40 = vpop.f32.mrb[30].mxu1 }
 0x155   : > { %v1812_v39 = vpop.eup %1811  ;;  %1823 = vtanh.f32 %v1390_v36  ;;  %v1393_v41 = vpop.f32.mrb[31].mxu0 }
 0x156   : > { %v1814_v42 = vpop.eup %1813  ;;  %1825 = vtanh.f32 %v1431_v37  ;;  %v1434_v43 = vpop.f32.mrb[31].mxu1 }
 0x157   : > { %v1816_v44 = vpop.eup %1815 }
 0x158   : > { %v1818_v45 = vpop.eup %1817  ;;  %v1452_v46 = vcombine.low %v1812_v39, %v1816_v44 }
 0x159   : > { %v1453_v47 = vcombine.low %v1814_v42, %v1818_v45  ;;  %v1507_v1 = vld [vmem:[%s2156_s14 + $0x50] sm:$0xff] (%p1897_p5) }
 0x15a   : > { %1727 = vst [vmem:[%s2156_s14 + $0x60] sm:$0x77] %v1452_v46  ;;  %v1509_v2 = vld [vmem:[%s2156_s14 + $0x58] sm:$0xff] (%p1897_p5)  ;;  %1508 = vst [vmem:[%s1474_s17 + $0x90] sm:$0xff] (%p1897_p5), %v1507_v1 }
 0x15b   : > { %1728 = vst [vmem:[%s2156_s14 + $0x68] sm:$0x77] %v1453_v47  ;;  %1510 = vst [vmem:[%s1474_s17 + $0x98] sm:$0xff] (%p1897_p5), %v1509_v2 }
 0x15d   : > { %v1820_v48 = vpop.eup %1819  ;;  %1471 = sbr.rel (!%p1897_p5) target bundleno = 364 (0x16c), region = 55 }
 0x15e   : > { %v1822_v49 = vpop.eup %1821 }
 0x15f   : > { %v1824_v50 = vpop.eup %1823 }
 0x160   : > { %v1826_v51 = vpop.eup %1825  ;;  %v1454_v52 = vcombine.low %v1820_v48, %v1824_v50 }
 0x161   : > { %v1455_v53 = vcombine.low %v1822_v49, %v1826_v51  ;;  %v1511_v3 = vld [vmem:[%s2156_s14 + $0x60] sm:$0xff] (%p1897_p5) }
 0x162   : > { %1729 = vst [vmem:[%s2156_s14 + $0x70] sm:$0x77] %v1454_v52  ;;  %v1513_v4 = vld [vmem:[%s2156_s14 + $0x68] sm:$0xff] (%p1897_p5)  ;;  %1512 = vst [vmem:[%s1474_s17 + $0xc0] sm:$0xff] (%p1897_p5), %v1511_v3 }
 0x163   : > { %1730 = vst [vmem:[%s2156_s14 + $0x78] sm:$0x77] %v1455_v53  ;;  %1514 = vst [vmem:[%s1474_s17 + $0xc8] sm:$0xff] (%p1897_p5), %v1513_v4 }
 0x169   : > { %v1515_v5 = vld [vmem:[%s2156_s14 + $0x70] sm:$0xff] }
 0x16a   : > { %1516 = vst [vmem:[%s1474_s17 + $0xd0] sm:$0xff] %v1515_v5  ;;  %v1517_v6 = vld [vmem:[%s2156_s14 + $0x78] sm:$0xff] }
 0x16b   : > { %1518 = vst [vmem:[%s1474_s17 + $0xd8] sm:$0xff] %v1517_v6 }
 0x16c PF: > { %p9_p10 = scmp.ge.s32.totalorder %s1884_s13, 4   ;;  %s2211_s9 = smov %s1845_s10 }
 0x16d   : > { %s2212_s10 = smov %s1895_s16  ;;  %s2213_s11 = smov %s1884_s13 }
 0x16e   :  { %11 = sbr.rel (!%p9_p10) target bundleno = 2 (0x2), region = 118 }

</bundles_post_ra>
